<compile_context>
chip_gen: v5e
topology: v5e:2x2
jax: 0.10.0
libtpu: 0.0.40
codegen_flags: <defaults>
</compile_context>

<pallas_src>
import functools

import jax
import jax.numpy as jnp
from jax import lax
from jax.experimental import pallas as pl
from jax.experimental.pallas import tpu as pltpu

NEG_INF = -1e30
_VSPEC = pl.BlockSpec(memory_space=pltpu.MemorySpace.VMEM)


# ----------------------------------------------------------------------------
# packed-parameter slab layout (shared by pack_params and the kernel)
# ----------------------------------------------------------------------------
def _slab_layout(f_dim, hid, e_dim, heads, n_route):
  """Row offsets of every parameter inside the single [rows, 128] f32 slab."""
  del n_route  # lanes only
  up8 = lambda v: (v + 7) // 8 * 8
  L = {}
  r = 0
  L["wlr1"] = (r, r + f_dim); r = up8(r + f_dim)   # lin_l1 | lin_r1   lanes 0:2HC
  L["wlr2"] = (r, r + hid); r = up8(r + hid)       # lin_l2 | lin_r2   lanes 0:2HC
  L["we"] = (r, r + e_dim); r += e_dim             # lin_edge1 | lin_edge2
  L["blr1"] = r; r += 1                            # bl1 | br1
  L["blr2"] = r; r += 1                            # bl2 | br2
  L["bias_a"] = r; r += 1                          # g1_bias | g2_bias | fc1_b | fc2_b
  L["bias_b"] = r; r += 1                          # mean_b | std_b
  r = up8(r)
  L["att"] = (r, r + heads * hid); r = up8(r + heads * hid)  # blockdiag att1 | att2
  L["fcp"] = (r, r + hid); r = up8(r + hid)        # w1a | w1b | fc2 | mean | std | p1 | p2
  L["rows"] = r
  return L


def _block_diag_att(att):
  """[H, C] attention vectors -> [H*C, H] block-diagonal matrix (one-shot kron)."""
  h, c = att.shape
  return jnp.kron(jnp.eye(h, dtype=jnp.float32), jnp.ones((c, 1), jnp.float32)) \
      * att.reshape(h * c, 1)


def pack_params(params, *, f_dim, hid, e_dim, n_route, heads):
  """Pack every Actor parameter into one 128-lane f32 slab (done ONCE at init)."""
  hc = heads * hid
  assert 2 * hc <= 128 and 4 * hid <= 128
  assert 3 * hid + 2 * n_route + 2 <= 128 and 2 * heads <= 128
  L = _slab_layout(f_dim, hid, e_dim, heads, n_route)
  s = jnp.zeros((L["rows"], 128), jnp.float32)

  s = s.at[L["wlr1"][0]:L["wlr1"][1], 0:hc].set(params["g1_wl"])
  s = s.at[L["wlr1"][0]:L["wlr1"][1], hc:2 * hc].set(params["g1_wr"])
  s = s.at[L["wlr2"][0]:L["wlr2"][1], 0:hc].set(params["g2_wl"])
  s = s.at[L["wlr2"][0]:L["wlr2"][1], hc:2 * hc].set(params["g2_wr"])
  s = s.at[L["we"][0]:L["we"][1], 0:hc].set(params["g1_we"])
  s = s.at[L["we"][0]:L["we"][1], hc:2 * hc].set(params["g2_we"])
  s = s.at[L["blr1"], 0:hc].set(params["g1_bl"][0])
  s = s.at[L["blr1"], hc:2 * hc].set(params["g1_br"][0])
  s = s.at[L["blr2"], 0:hc].set(params["g2_bl"][0])
  s = s.at[L["blr2"], hc:2 * hc].set(params["g2_br"][0])
  s = s.at[L["bias_a"], 0:hid].set(params["g1_bias"][0])
  s = s.at[L["bias_a"], hid:2 * hid].set(params["g2_bias"][0])
  s = s.at[L["bias_a"], 2 * hid:3 * hid].set(params["fc1_b"][0])
  s = s.at[L["bias_a"], 3 * hid:4 * hid].set(params["fc2_b"][0])
  s = s.at[L["bias_b"], 0:n_route].set(params["mean_b"][0])
  s = s.at[L["bias_b"], n_route:2 * n_route].set(params["std_b"][0])
  s = s.at[L["att"][0]:L["att"][1], 0:heads].set(_block_diag_att(params["g1_att"]))
  s = s.at[L["att"][0]:L["att"][1], heads:2 * heads].set(_block_diag_att(params["g2_att"]))
  f0, f1 = L["fcp"]
  s = s.at[f0:f1, 0:hid].set(params["fc1_w"][:hid])          # gmp half of fc1
  s = s.at[f0:f1, hid:2 * hid].set(params["fc1_w"][hid:])    # gap half of fc1
  s = s.at[f0:f1, 2 * hid:3 * hid].set(params["fc2_w"])
  s = s.at[f0:f1, 3 * hid:3 * hid + n_route].set(params["mean_w"])
  s = s.at[f0:f1, 3 * hid + n_route:3 * hid + 2 * n_route].set(params["std_w"])
  # TopKPooling score vectors, pre-normalized (PyG: score / ||w||_2)
  p1n = params["p1_w"] / jnp.sqrt(jnp.sum(params["p1_w"] ** 2))
  p2n = params["p2_w"] / jnp.sqrt(jnp.sum(params["p2_w"] ** 2))
  s = s.at[f0:f1, 3 * hid + 2 * n_route].set(p1n)
  s = s.at[f0:f1, 3 * hid + 2 * n_route + 1].set(p2n)
  return s


# ----------------------------------------------------------------------------
# in-kernel helpers (traced into the single fused kernel)
# ----------------------------------------------------------------------------
def _row_of(col, eye):
  """[N, 1] column -> [1, N] row without a transpose (mask with eye, sublane-sum)."""
  return jnp.sum(eye * col, axis=0, keepdims=True)


def _gat_layer(x, adj_in, flat_pos, eproj_half, eye, wlr, blr, a_blk, bias,
               neg_slope, heads, c):
  """GATv2Conv(concat=False, add_self_loops fill='mean', edge_dim=E) + ReLU."""
  n = x.shape[0]
  nn = n * n
  hc = heads * c
  num_e = eproj_half.shape[0]

  adj_ns = adj_in * (1.0 - eye)                    # remove_self_loops
  adj_ns3 = adj_ns[:, :, None]
  adj_sl3 = (adj_ns + eye)[:, :, None]             # add_self_loops

  # fused lin_l | lin_r: ONE lane-dense matmul, then the two HC-lane halves
  xlr = jnp.dot(x, wlr, preferred_element_type=jnp.float32) + blr       # [N, 2HC]
  xl = xlr[:, 0:hc]          # source role (lin_l) -- also the message payload
  xr = xlr[:, hc:2 * hc]     # target role (lin_r)

  # dense scatter of the pre-projected edge features onto (dst, src) pairs
  riota = lax.broadcasted_iota(jnp.int32, (nn, num_e), 0)
  sel = (riota == flat_pos).astype(jnp.float32)                         # [NN, E]
  ee3 = jnp.dot(sel, eproj_half,
                preferred_element_type=jnp.float32).reshape(n, n, hc)
  ee3 = ee3 * adj_ns3        # TODO(synk): duplicate multi-edges sum (PyG keeps each)

  # self-loop edge features = per-dst mean of incoming edge attrs ('mean' fill);
  # lin_edge is linear & bias-free so the mean commutes with the projection.
  # Folded into ee3 in place so at most two [N,N,HC] tensors are hot at a time.
  deg = jnp.sum(adj_ns, axis=1, keepdims=True)                          # [N, 1]
  la_e = jnp.sum(ee3, axis=1) / jnp.maximum(deg, 1.0)                   # [N, HC]
  ee3 = ee3 + eye[:, :, None] * la_e[None, :, :]

  # GATv2 scoring: leaky_relu(x_r[dst] + x_l[src] + e); logits for ALL heads via
  # one block-diagonal matmul.
  g = xr[:, None, :] + xl[None, :, :] + ee3
  g = jnp.where(g >= 0, g, neg_slope * g)                               # leaky_relu
  logits = jnp.dot(g.reshape(nn, hc), a_blk,
                   preferred_element_type=jnp.float32).reshape(n, n, heads)
  logits = jnp.where(adj_sl3 > 0, logits, NEG_INF)                      # mask non-edges

  # softmax over sources (exact division: attention rows sum to 1)
  m = jnp.max(logits, axis=1)                                           # [N, H]
  p = jnp.exp(logits - m[:, None, :]) * adj_sl3                         # [N, N, H]
  denom = jnp.maximum(jnp.sum(p, axis=1), 1e-20)                        # [N, H]
  alpha = p / denom[:, None, :]

  # per-head aggregation; mean over heads folded into the 1/H scale (no expe
  # widening, no mhead matmul, no full-width [N,N,HC] aw intermediate).
  acc = jnp.zeros((n, c), jnp.float32)
  for h in range(heads):
    acc = acc + jnp.sum(alpha[:, :, h:h + 1] * xl[None, :, h * c:(h + 1) * c],
                        axis=1)
  out = acc * (1.0 / heads) + bias
  return jnp.maximum(out, 0.0)                                          # fused F.relu


def _topk_pool(x, adj_in, same_eff, eye, tie, pvec, ratio):
  """TopKPooling(ratio, nonlinearity=tanh) as a static-shape keep mask."""
  score = jnp.tanh(jnp.dot(x, pvec, preferred_element_type=jnp.float32))  # [N, 1]
  srow = _row_of(score, eye)                                              # [1, N]
  beats = (srow > score) | ((srow == score) & (tie > 0.5))
  better = same_eff * jnp.where(beats, 1.0, 0.0)
  rank = jnp.sum(better, axis=1, keepdims=True)                           # [N, 1]
  n_in = jnp.sum(same_eff, axis=1, keepdims=True)                         # [N, 1]
  # keep iff rank < ceil(ratio*n); the -1e-4 guards against f32 rounding when
  # ratio*n is mathematically an integer (e.g. 0.8*5).
  keep = jnp.where(rank < ratio * n_in - 1e-4, 1.0, 0.0)
  keep_row = _row_of(keep, eye)
  x_new = x * (score * keep)                                              # gate by score
  adj_new = adj_in * keep * keep_row
  return x_new, adj_new, keep, keep_row


# ----------------------------------------------------------------------------
# fused Actor.forward kernel
# ----------------------------------------------------------------------------
def _actor_kernel(x_ref, eir_ref, eic_ref, ea_ref, batch_ref, z_ref, slab_ref,
                  out_ref, *, f_dim, hid, e_dim, heads, n_route, neg_slope, ratio,
                  log_std_min, log_std_max):
  n = x_ref.shape[0]
  hc = heads * hid
  num_e = ea_ref.shape[0]
  b = z_ref.shape[0]
  L = _slab_layout(f_dim, hid, e_dim, heads, n_route)

  x = x_ref[...]
  ei_r = eir_ref[...]           # [2, E] int32  (row 0 = src, row 1 = dst)
  ei_c = eic_ref[...]           # [E, 2] int32  (transposed copy)
  ea = ea_ref[...]              # [E, e_dim]
  brow = batch_ref[...]         # [1, N] int32  graph id per node
  z = z_ref[...]                # [B, R] standard-normal noise

  # ---- structural masks from iota (nothing shipped from HBM) ----
  ri = lax.broadcasted_iota(jnp.int32, (n, n), 0)
  ci = lax.broadcasted_iota(jnp.int32, (n, n), 1)
  eye = (ri == ci).astype(jnp.float32)
  tie = (ci < ri).astype(jnp.float32)                              # lower index wins ties
  brow_f = brow.astype(jnp.float32)
  bcol_f = jnp.sum(eye * brow_f, axis=1, keepdims=True)            # [N, 1]
  same = jnp.where(jnp.abs(bcol_f - brow_f) < 0.5, 1.0, 0.0)       # same-graph mask

  # ---- in-kernel densify: adj[d, s] via two one-hot matmuls (no XLA scatters) ----
  dst_row = ei_r[1:2, :]                                           # [1, E]
  src_col = ei_c[:, 0:1]                                           # [E, 1]
  m_dst = (lax.broadcasted_iota(jnp.int32, (n, num_e), 0) == dst_row).astype(jnp.float32)
  m_src = (lax.broadcasted_iota(jnp.int32, (num_e, n), 1) == src_col).astype(jnp.float32)
  adj0 = jnp.minimum(jnp.dot(m_dst, m_src, preferred_element_type=jnp.float32), 1.0)
  flat_pos = ei_r[1:2, :] * n + ei_r[0:1, :]                       # [1, E] (= dst*N+src)

  # ---- hoisted lin_edge projection for BOTH layers (one tiny matmul) ----
  we_cat = slab_ref[L["we"][0]:L["we"][1], 0:2 * hc]
  eproj = jnp.dot(ea, we_cat, preferred_element_type=jnp.float32)  # [E, 2HC]

  # ---- carve the packed parameter slab (static slices of one VMEM block) ----
  wlr1 = slab_ref[L["wlr1"][0]:L["wlr1"][1], 0:2 * hc]
  wlr2 = slab_ref[L["wlr2"][0]:L["wlr2"][1], 0:2 * hc]
  blr1 = slab_ref[L["blr1"]:L["blr1"] + 1, 0:2 * hc]
  blr2 = slab_ref[L["blr2"]:L["blr2"] + 1, 0:2 * hc]
  a1 = slab_ref[L["att"][0]:L["att"][1], 0:heads]
  a2 = slab_ref[L["att"][0]:L["att"][1], heads:2 * heads]
  b_g1 = slab_ref[L["bias_a"]:L["bias_a"] + 1, 0:hid]
  b_g2 = slab_ref[L["bias_a"]:L["bias_a"] + 1, hid:2 * hid]
  fc1_b = slab_ref[L["bias_a"]:L["bias_a"] + 1, 2 * hid:3 * hid]
  fc2_b = slab_ref[L["bias_a"]:L["bias_a"] + 1, 3 * hid:4 * hid]
  ms_b = slab_ref[L["bias_b"]:L["bias_b"] + 1, 0:2 * n_route]
  f0, f1 = L["fcp"]
  w1a = slab_ref[f0:f1, 0:hid]
  w1b = slab_ref[f0:f1, hid:2 * hid]
  fc2_w = slab_ref[f0:f1, 2 * hid:3 * hid]
  ms_w = slab_ref[f0:f1, 3 * hid:3 * hid + 2 * n_route]
  p1 = slab_ref[f0:f1, 3 * hid + 2 * n_route:3 * hid + 2 * n_route + 1]
  p2 = slab_ref[f0:f1, 3 * hid + 2 * n_route + 1:3 * hid + 2 * n_route + 2]

  # ---- GATConv1 + ReLU ----  (attention dropout & F.dropout: eval-mode no-ops)
  x1 = _gat_layer(x, adj0, flat_pos, eproj[:, 0:hc], eye, wlr1, blr1, a1, b_g1,
                  neg_slope, heads, hid)
  # ---- TopKPool1 (on the original, pre-self-loop edge set) ----
  x1p, adj1, keep1, keep1_row = _topk_pool(x1, adj0, same, eye, tie, p1, ratio)
  # ---- GATConv2 + ReLU (surviving edges keep their attrs; dropped edges masked) ----
  x2 = _gat_layer(x1p, adj1, flat_pos, eproj[:, hc:2 * hc], eye, wlr2, blr2, a2,
                  b_g2, neg_slope, heads, hid)
  # ---- TopKPool2 ----
  same2 = same * keep1 * keep1_row
  x2p, _, keep2, keep2_row = _topk_pool(x2, adj1, same2, eye, tie, p2, ratio)

  # ---- global mean pool (one matmul over the membership mask) ----
  giota = lax.broadcasted_iota(jnp.int32, (b, n), 0)
  gv = (giota == brow).astype(jnp.float32) * keep2_row             # [B, N]
  counts = jnp.maximum(jnp.sum(gv, axis=1, keepdims=True), 1.0)
  gap = jnp.dot(gv, x2p, preferred_element_type=jnp.float32) / counts

  # ---- global max pool: tiny static loop over graphs (no [B, N, C] broadcast) ----
  iota_b = lax.broadcasted_iota(jnp.int32, (b, 1), 0)
  gmp = jnp.zeros((b, hid), jnp.float32)
  for gi in range(b):
    mcol = jnp.where(jnp.abs(bcol_f - gi) < 0.5, 1.0, 0.0) * keep2  # [N, 1]
    mx = jnp.max(jnp.where(mcol > 0, x2p, NEG_INF), axis=0, keepdims=True)
    gmp = gmp + jnp.where(iota_b == gi, 1.0, 0.0) * mx

  # ---- FC head: cat([gmp, gap], 1) @ fc1 == gmp @ w1a + gap @ w1b (gmp first) ----
  h1 = jnp.maximum(jnp.dot(gmp, w1a, preferred_element_type=jnp.float32)
                   + jnp.dot(gap, w1b, preferred_element_type=jnp.float32)
                   + fc1_b, 0.0)
  h2 = jnp.maximum(jnp.dot(h1, fc2_w, preferred_element_type=jnp.float32)
                   + fc2_b, 0.0)

  # fused mean | log_std heads in ONE matmul, then split
  ms = jnp.dot(h2, ms_w, preferred_element_type=jnp.float32) + ms_b
  mean = ms[:, 0:n_route]
  log_std = jnp.clip(ms[:, n_route:2 * n_route], log_std_min, log_std_max)
  sample = mean + jnp.exp(log_std) * z                             # Normal(mean,std).sample()

  smax = jnp.max(sample, axis=1, keepdims=True)
  ex = jnp.exp(sample - smax)
  out_ref[...] = ex / jnp.sum(ex, axis=1, keepdims=True)           # exact softmax(dim=1)


# ----------------------------------------------------------------------------
# thin JAX wrapper: ONE pallas_call, only trivial dtype/layout plumbing per call
# ----------------------------------------------------------------------------
def actor_forward(slab, x, edge_index, edge_attr, batch, z, *, f_dim, hid, e_dim,
                  heads, n_route, neg_slope=0.2, ratio=0.8):
  n = x.shape[0]
  b, r = z.shape
  assert r == n_route
  kernel = functools.partial(
      _actor_kernel, f_dim=f_dim, hid=hid, e_dim=e_dim, heads=heads,
      n_route=n_route, neg_slope=neg_slope, ratio=ratio,
      log_std_min=-20.0, log_std_max=2.0)
  ei_r = edge_index.astype(jnp.int32)
  args = (x.astype(jnp.float32), ei_r, ei_r.T, edge_attr.astype(jnp.float32),
          batch.astype(jnp.int32).reshape(1, n), z.astype(jnp.float32), slab)
  return pl.pallas_call(
      kernel,
      out_shape=jax.ShapeDtypeStruct((b, r), jnp.float32),
      in_specs=[_VSPEC] * len(args),
      out_specs=_VSPEC,
  )(*args)


# ----------------------------------------------------------------------------
# Actor parameters (same pytree as before; packed once into the slab)
# ----------------------------------------------------------------------------
def init_params(key, f_dim, hid, e_dim, n_route, heads):
  ks = jax.random.split(key, 24)
  w = lambda k, s: 0.1 * jax.random.normal(k, s, jnp.float32)
  p = {}
  # GATv2Conv1 (weights stored transposed for x @ W)
  p["g1_wl"], p["g1_bl"] = w(ks[0], (f_dim, heads * hid)), w(ks[1], (1, heads * hid))
  p["g1_wr"], p["g1_br"] = w(ks[2], (f_dim, heads * hid)), w(ks[3], (1, heads * hid))
  p["g1_we"] = w(ks[4], (e_dim, heads * hid))
  p["g1_att"] = w(ks[5], (heads, hid))
  p["g1_bias"] = w(ks[6], (1, hid))
  # GATv2Conv2
  p["g2_wl"], p["g2_bl"] = w(ks[7], (hid, heads * hid)), w(ks[8], (1, heads * hid))
  p["g2_wr"], p["g2_br"] = w(ks[9], (hid, heads * hid)), w(ks[10], (1, heads * hid))
  p["g2_we"] = w(ks[11], (e_dim, heads * hid))
  p["g2_att"] = w(ks[12], (heads, hid))
  p["g2_bias"] = w(ks[13], (1, hid))
  # TopKPooling score vectors
  p["p1_w"] = w(ks[14], (hid,))
  p["p2_w"] = w(ks[15], (hid,))
  # FC head (transposed)
  p["fc1_w"], p["fc1_b"] = w(ks[16], (2 * hid, hid)), w(ks[17], (1, hid))
  p["fc2_w"], p["fc2_b"] = w(ks[18], (hid, hid)), w(ks[19], (1, hid))
  p["mean_w"], p["mean_b"] = w(ks[20], (hid, n_route)), w(ks[21], (1, n_route))
  p["std_w"], p["std_b"] = w(ks[22], (hid, n_route)), w(ks[23], (1, n_route))
  return p


# ----------------------------------------------------------------------------
if __name__ == "__main__":
  F_DIM, HID, E_DIM, ROUTES, HEADS = 8, 32, 4, 4, 2
  NUM_GRAPHS, NODES_PER_GRAPH = 2, 8
  N = NUM_GRAPHS * NODES_PER_GRAPH

  key = jax.random.PRNGKey(0)
  k_x, k_e, k_z, k_p = jax.random.split(key, 4)

  x = jax.random.normal(k_x, (N, F_DIM), jnp.float32)

  # bidirectional ring within each graph
  src, dst = [], []
  for g in range(NUM_GRAPHS):
    base = g * NODES_PER_GRAPH
    for i in range(NODES_PER_GRAPH):
      j = (i + 1) % NODES_PER_GRAPH
      src += [base + i, base + j]
      dst += [base + j, base + i]
  edge_index = jnp.array([src, dst], dtype=jnp.int32)
  edge_attr = jax.random.normal(k_e, (edge_index.shape[1], E_DIM), jnp.float32)
  batch = jnp.repeat(jnp.arange(NUM_GRAPHS, dtype=jnp.int32), NODES_PER_GRAPH)

  # standard-normal noise for Normal(mean, std).sample()
  z = jax.random.normal(k_z, (NUM_GRAPHS, ROUTES), jnp.float32)

  params = init_params(k_p, F_DIM, HID, E_DIM, ROUTES, HEADS)
  slab = jax.block_until_ready(
      pack_params(params, f_dim=F_DIM, hid=HID, e_dim=E_DIM, n_route=ROUTES,
                  heads=HEADS))

  fwd = jax.jit(functools.partial(actor_forward, f_dim=F_DIM, hid=HID, e_dim=E_DIM,
                                  heads=HEADS, n_route=ROUTES, neg_slope=0.2,
                                  ratio=0.8))
  out = fwd(slab, x, edge_index, edge_attr, batch, z)
  out = jax.block_until_ready(out)

  assert out.shape == (NUM_GRAPHS, ROUTES)
  assert bool(jnp.all(jnp.isfinite(out)))
  # rows are softmax outputs -> must sum to 1
  assert bool(jnp.all(jnp.abs(jnp.sum(out, axis=1) - 1.0) < 1e-4))
  print("KERNEL_OK")
</pallas_src>

<mosaic_0001>
module attributes {stable_mosaic.version = 11 : i64} {
  func.func @_actor_kernel(%arg0: memref<16x8xf32, #tpu.memory_space<vmem>>, %arg1: memref<2x32xi32, #tpu.memory_space<vmem>>, %arg2: memref<32x2xi32, #tpu.memory_space<vmem>>, %arg3: memref<32x4xf32, #tpu.memory_space<vmem>>, %arg4: memref<1x16xi32, #tpu.memory_space<vmem>>, %arg5: memref<2x4xf32, #tpu.memory_space<vmem>>, %arg6: memref<144x128xf32, #tpu.memory_space<vmem>>, %arg7: memref<2x4xf32, #tpu.memory_space<vmem>>) attributes {dimension_semantics = [], scalar_prefetch = 0 : i64, scratch_operands = 0 : i64, tpu.core_type = #tpu.core_type<tc>} {
    %c0 = arith.constant 0 : index
    %c0_0 = arith.constant 0 : index
    %0 = vector.load %arg0[%c0, %c0_0] : memref<16x8xf32, #tpu.memory_space<vmem>>, vector<16x8xf32>
    %c0_1 = arith.constant 0 : index
    %c0_2 = arith.constant 0 : index
    %1 = vector.load %arg1[%c0_1, %c0_2] : memref<2x32xi32, #tpu.memory_space<vmem>>, vector<2x32xi32>
    %c0_3 = arith.constant 0 : index
    %c0_4 = arith.constant 0 : index
    %2 = vector.load %arg2[%c0_3, %c0_4] : memref<32x2xi32, #tpu.memory_space<vmem>>, vector<32x2xi32>
    %c0_5 = arith.constant 0 : index
    %c0_6 = arith.constant 0 : index
    %3 = vector.load %arg3[%c0_5, %c0_6] : memref<32x4xf32, #tpu.memory_space<vmem>>, vector<32x4xf32>
    %c0_7 = arith.constant 0 : index
    %c0_8 = arith.constant 0 : index
    %4 = vector.load %arg4[%c0_7, %c0_8] : memref<1x16xi32, #tpu.memory_space<vmem>>, vector<1x16xi32>
    %c0_9 = arith.constant 0 : index
    %c0_10 = arith.constant 0 : index
    %5 = vector.load %arg5[%c0_9, %c0_10] : memref<2x4xf32, #tpu.memory_space<vmem>>, vector<2x4xf32>
    %6 = tpu.iota {dimensions = array<i32: 0>} : vector<16x16xi32>
    %7 = tpu.iota {dimensions = array<i32: 1>} : vector<16x16xi32>
    %8 = arith.cmpi eq, %6, %7 : vector<16x16xi32>
    %9 = arith.extui %8 : vector<16x16xi1> to vector<16x16xi32>
    %10 = arith.sitofp %9 : vector<16x16xi32> to vector<16x16xf32>
    %11 = arith.cmpi slt, %7, %6 : vector<16x16xi32>
    %12 = arith.extui %11 : vector<16x16xi1> to vector<16x16xi32>
    %13 = arith.sitofp %12 : vector<16x16xi32> to vector<16x16xf32>
    %14 = arith.sitofp %4 : vector<1x16xi32> to vector<1x16xf32>
    %15 = vector.broadcast %14 : vector<1x16xf32> to vector<16x16xf32>
    %16 = arith.mulf %10, %15 : vector<16x16xf32>
    %cst = arith.constant dense<0.000000e+00> : vector<16xf32>
    %17 = vector.multi_reduction <add>, %16, %cst [1] : vector<16x16xf32> to vector<16xf32>
    %18 = vector.shape_cast %17 : vector<16xf32> to vector<16x1xf32>
    %19 = vector.broadcast %18 : vector<16x1xf32> to vector<16x16xf32>
    %20 = vector.broadcast %14 : vector<1x16xf32> to vector<16x16xf32>
    %21 = arith.subf %19, %20 : vector<16x16xf32>
    %22 = math.absf %21 : vector<16x16xf32>
    %cst_11 = arith.constant 5.000000e-01 : f32
    %23 = vector.broadcast %cst_11 : f32 to vector<16x16xf32>
    %24 = arith.cmpf olt, %22, %23 : vector<16x16xf32>
    %cst_12 = arith.constant 1.000000e+00 : f32
    %cst_13 = arith.constant 0.000000e+00 : f32
    %25 = vector.broadcast %cst_12 : f32 to vector<16x16xf32>
    %26 = vector.broadcast %cst_13 : f32 to vector<16x16xf32>
    %27 = arith.select %24, %25, %26 : vector<16x16xi1>, vector<16x16xf32>
    %28 = vector.extract_strided_slice %1 {offsets = [1, 0], sizes = [1, 32], strides = [1, 1]} : vector<2x32xi32> to vector<1x32xi32>
    %29 = vector.extract_strided_slice %2 {offsets = [0, 0], sizes = [32, 1], strides = [1, 1]} : vector<32x2xi32> to vector<32x1xi32>
    %30 = tpu.iota {dimensions = array<i32: 0>} : vector<16x32xi32>
    %31 = vector.broadcast %28 : vector<1x32xi32> to vector<16x32xi32>
    %32 = arith.cmpi eq, %30, %31 : vector<16x32xi32>
    %33 = arith.extui %32 : vector<16x32xi1> to vector<16x32xi32>
    %34 = arith.sitofp %33 : vector<16x32xi32> to vector<16x32xf32>
    %35 = tpu.iota {dimensions = array<i32: 1>} : vector<32x16xi32>
    %36 = vector.broadcast %29 : vector<32x1xi32> to vector<32x16xi32>
    %37 = arith.cmpi eq, %35, %36 : vector<32x16xi32>
    %38 = arith.extui %37 : vector<32x16xi1> to vector<32x16xi32>
    %39 = arith.sitofp %38 : vector<32x16xi32> to vector<32x16xf32>
    %cst_14 = arith.constant dense<0.000000e+00> : vector<16x16xf32>
    %40 = tpu.matmul %34, %39, %cst_14 {dimension_numbers = #tpu.dot_dimension_numbers<[1], [0], [0], [1], [0, 0, 1, 1], [], []>} : vector<16x32xf32>, vector<32x16xf32>, vector<16x16xf32> -> vector<16x16xf32>
    %cst_15 = arith.constant 1.000000e+00 : f32
    %41 = vector.broadcast %cst_15 : f32 to vector<16x16xf32>
    %42 = arith.minimumf %40, %41 : vector<16x16xf32>
    %43 = vector.extract_strided_slice %1 {offsets = [1, 0], sizes = [1, 32], strides = [1, 1]} : vector<2x32xi32> to vector<1x32xi32>
    %c16_i32 = arith.constant 16 : i32
    %44 = vector.broadcast %c16_i32 : i32 to vector<1x32xi32>
    %45 = arith.muli %43, %44 : vector<1x32xi32>
    %46 = vector.extract_strided_slice %1 {offsets = [0, 0], sizes = [1, 32], strides = [1, 1]} : vector<2x32xi32> to vector<1x32xi32>
    %47 = arith.addi %45, %46 : vector<1x32xi32>
    %c40 = arith.constant 40 : index
    %c0_16 = arith.constant 0 : index
    %48 = vector.load %arg6[%c40, %c0_16] : memref<144x128xf32, #tpu.memory_space<vmem>>, vector<4x128xf32>
    %cst_17 = arith.constant dense<0.000000e+00> : vector<32x128xf32>
    %49 = tpu.matmul %3, %48, %cst_17 {dimension_numbers = #tpu.dot_dimension_numbers<[1], [0], [0], [1], [0, 0, 1, 1], [], []>} : vector<32x4xf32>, vector<4x128xf32>, vector<32x128xf32> -> vector<32x128xf32>
    %c0_18 = arith.constant 0 : index
    %c0_19 = arith.constant 0 : index
    %50 = vector.load %arg6[%c0_18, %c0_19] : memref<144x128xf32, #tpu.memory_space<vmem>>, vector<8x128xf32>
    %c8 = arith.constant 8 : index
    %c0_20 = arith.constant 0 : index
    %51 = vector.load %arg6[%c8, %c0_20] : memref<144x128xf32, #tpu.memory_space<vmem>>, vector<32x128xf32>
    %c44 = arith.constant 44 : index
    %c0_21 = arith.constant 0 : index
    %52 = vector.load %arg6[%c44, %c0_21] : memref<144x128xf32, #tpu.memory_space<vmem>>, vector<1x128xf32>
    %c45 = arith.constant 45 : index
    %c0_22 = arith.constant 0 : index
    %53 = vector.load %arg6[%c45, %c0_22] : memref<144x128xf32, #tpu.memory_space<vmem>>, vector<1x128xf32>
    %c48 = arith.constant 48 : index
    %c0_23 = arith.constant 0 : index
    %54 = vector.load %arg6[%c48, %c0_23] : memref<144x128xf32, #tpu.memory_space<vmem>>, vector<64x2xf32>
    %c48_24 = arith.constant 48 : index
    %c2 = arith.constant 2 : index
    %55 = vector.load %arg6[%c48_24, %c2] : memref<144x128xf32, #tpu.memory_space<vmem>>, vector<64x2xf32>
    %c46 = arith.constant 46 : index
    %c0_25 = arith.constant 0 : index
    %56 = vector.load %arg6[%c46, %c0_25] : memref<144x128xf32, #tpu.memory_space<vmem>>, vector<1x32xf32>
    %c46_26 = arith.constant 46 : index
    %c32 = arith.constant 32 : index
    %57 = vector.load %arg6[%c46_26, %c32] : memref<144x128xf32, #tpu.memory_space<vmem>>, vector<1x32xf32>
    %c46_27 = arith.constant 46 : index
    %c64 = arith.constant 64 : index
    %58 = vector.load %arg6[%c46_27, %c64] : memref<144x128xf32, #tpu.memory_space<vmem>>, vector<1x32xf32>
    %c46_28 = arith.constant 46 : index
    %c96 = arith.constant 96 : index
    %59 = vector.load %arg6[%c46_28, %c96] : memref<144x128xf32, #tpu.memory_space<vmem>>, vector<1x32xf32>
    %c47 = arith.constant 47 : index
    %c0_29 = arith.constant 0 : index
    %60 = vector.load %arg6[%c47, %c0_29] : memref<144x128xf32, #tpu.memory_space<vmem>>, vector<1x8xf32>
    %c112 = arith.constant 112 : index
    %c0_30 = arith.constant 0 : index
    %61 = vector.load %arg6[%c112, %c0_30] : memref<144x128xf32, #tpu.memory_space<vmem>>, vector<32x32xf32>
    %c112_31 = arith.constant 112 : index
    %c32_32 = arith.constant 32 : index
    %62 = vector.load %arg6[%c112_31, %c32_32] : memref<144x128xf32, #tpu.memory_space<vmem>>, vector<32x32xf32>
    %c112_33 = arith.constant 112 : index
    %c64_34 = arith.constant 64 : index
    %63 = vector.load %arg6[%c112_33, %c64_34] : memref<144x128xf32, #tpu.memory_space<vmem>>, vector<32x32xf32>
    %c112_35 = arith.constant 112 : index
    %c96_36 = arith.constant 96 : index
    %64 = vector.load %arg6[%c112_35, %c96_36] : memref<144x128xf32, #tpu.memory_space<vmem>>, vector<32x8xf32>
    %c112_37 = arith.constant 112 : index
    %c104 = arith.constant 104 : index
    %65 = vector.load %arg6[%c112_37, %c104] : memref<144x128xf32, #tpu.memory_space<vmem>>, vector<32x1xf32>
    %c112_38 = arith.constant 112 : index
    %c105 = arith.constant 105 : index
    %66 = vector.load %arg6[%c112_38, %c105] : memref<144x128xf32, #tpu.memory_space<vmem>>, vector<32x1xf32>
    %67 = vector.extract_strided_slice %49 {offsets = [0, 0], sizes = [32, 64], strides = [1, 1]} : vector<32x128xf32> to vector<32x64xf32>
    %cst_39 = arith.constant 1.000000e+00 : f32
    %68 = vector.broadcast %cst_39 : f32 to vector<16x16xf32>
    %69 = arith.subf %68, %10 : vector<16x16xf32>
    %70 = arith.mulf %42, %69 : vector<16x16xf32>
    %71 = vector.shape_cast %70 : vector<16x16xf32> to vector<16x16x1xf32>
    %72 = arith.addf %70, %10 : vector<16x16xf32>
    %73 = vector.shape_cast %72 : vector<16x16xf32> to vector<16x16x1xf32>
    %cst_40 = arith.constant dense<0.000000e+00> : vector<16x128xf32>
    %74 = tpu.matmul %0, %50, %cst_40 {dimension_numbers = #tpu.dot_dimension_numbers<[1], [0], [0], [1], [0, 0, 1, 1], [], []>} : vector<16x8xf32>, vector<8x128xf32>, vector<16x128xf32> -> vector<16x128xf32>
    %75 = vector.broadcast %52 : vector<1x128xf32> to vector<16x128xf32>
    %76 = arith.addf %74, %75 : vector<16x128xf32>
    %77 = vector.extract_strided_slice %76 {offsets = [0, 0], sizes = [16, 64], strides = [1, 1]} : vector<16x128xf32> to vector<16x64xf32>
    %78 = vector.extract_strided_slice %76 {offsets = [0, 64], sizes = [16, 64], strides = [1, 1]} : vector<16x128xf32> to vector<16x64xf32>
    %79 = tpu.iota {dimensions = array<i32: 0>} : vector<256x32xi32>
    %80 = vector.broadcast %47 : vector<1x32xi32> to vector<256x32xi32>
    %81 = arith.cmpi eq, %79, %80 : vector<256x32xi32>
    %82 = arith.extui %81 : vector<256x32xi1> to vector<256x32xi32>
    %83 = arith.sitofp %82 : vector<256x32xi32> to vector<256x32xf32>
    %cst_41 = arith.constant dense<0.000000e+00> : vector<256x64xf32>
    %84 = tpu.matmul %83, %67, %cst_41 {dimension_numbers = #tpu.dot_dimension_numbers<[1], [0], [0], [1], [0, 0, 1, 1], [], []>} : vector<256x32xf32>, vector<32x64xf32>, vector<256x64xf32> -> vector<256x64xf32>
    %85 = vector.shape_cast %84 : vector<256x64xf32> to vector<16x16x64xf32>
    %86 = vector.broadcast %71 : vector<16x16x1xf32> to vector<16x16x64xf32>
    %87 = arith.mulf %85, %86 : vector<16x16x64xf32>
    %cst_42 = arith.constant dense<0.000000e+00> : vector<16xf32>
    %88 = vector.multi_reduction <add>, %70, %cst_42 [1] : vector<16x16xf32> to vector<16xf32>
    %89 = vector.shape_cast %88 : vector<16xf32> to vector<16x1xf32>
    %cst_43 = arith.constant dense<0.000000e+00> : vector<16x64xf32>
    %90 = vector.multi_reduction <add>, %87, %cst_43 [1] : vector<16x16x64xf32> to vector<16x64xf32>
    %cst_44 = arith.constant 1.000000e+00 : f32
    %91 = vector.broadcast %cst_44 : f32 to vector<16x1xf32>
    %92 = arith.maximumf %89, %91 : vector<16x1xf32>
    %93 = vector.broadcast %92 : vector<16x1xf32> to vector<16x64xf32>
    %94 = arith.divf %90, %93 : vector<16x64xf32>
    %95 = vector.shape_cast %10 : vector<16x16xf32> to vector<16x16x1xf32>
    %96 = vector.shape_cast %94 : vector<16x64xf32> to vector<1x16x64xf32>
    %97 = vector.broadcast %95 : vector<16x16x1xf32> to vector<16x16x64xf32>
    %98 = vector.broadcast %96 : vector<1x16x64xf32> to vector<16x16x64xf32>
    %99 = arith.mulf %97, %98 : vector<16x16x64xf32>
    %100 = arith.addf %87, %99 : vector<16x16x64xf32>
    %101 = vector.shape_cast %78 : vector<16x64xf32> to vector<16x1x64xf32>
    %102 = vector.shape_cast %77 : vector<16x64xf32> to vector<1x16x64xf32>
    %103 = vector.broadcast %101 : vector<16x1x64xf32> to vector<16x16x64xf32>
    %104 = vector.broadcast %102 : vector<1x16x64xf32> to vector<16x16x64xf32>
    %105 = arith.addf %103, %104 : vector<16x16x64xf32>
    %106 = arith.addf %105, %100 : vector<16x16x64xf32>
    %cst_45 = arith.constant 0.000000e+00 : f32
    %107 = vector.broadcast %cst_45 : f32 to vector<16x16x64xf32>
    %108 = arith.cmpf oge, %106, %107 : vector<16x16x64xf32>
    %cst_46 = arith.constant 2.000000e-01 : f32
    %109 = vector.broadcast %cst_46 : f32 to vector<16x16x64xf32>
    %110 = arith.mulf %109, %106 : vector<16x16x64xf32>
    %111 = arith.select %108, %106, %110 : vector<16x16x64xi1>, vector<16x16x64xf32>
    %112 = vector.shape_cast %111 : vector<16x16x64xf32> to vector<256x64xf32>
    %cst_47 = arith.constant dense<0.000000e+00> : vector<256x2xf32>
    %113 = tpu.matmul %112, %54, %cst_47 {dimension_numbers = #tpu.dot_dimension_numbers<[1], [0], [0], [1], [0, 0, 1, 1], [], []>} : vector<256x64xf32>, vector<64x2xf32>, vector<256x2xf32> -> vector<256x2xf32>
    %114 = vector.shape_cast %113 : vector<256x2xf32> to vector<16x16x2xf32>
    %cst_48 = arith.constant 0.000000e+00 : f32
    %115 = vector.broadcast %cst_48 : f32 to vector<16x16x1xf32>
    %116 = arith.cmpf ogt, %73, %115 : vector<16x16x1xf32>
    %cst_49 = arith.constant -1.000000e+30 : f32
    %117 = vector.shape_cast %116 : vector<16x16x1xi1> to vector<16x16x1xi1>
    %118 = vector.broadcast %117 : vector<16x16x1xi1> to vector<16x16x2xi1>
    %119 = vector.broadcast %cst_49 : f32 to vector<16x16x2xf32>
    %120 = arith.select %118, %114, %119 : vector<16x16x2xi1>, vector<16x16x2xf32>
    %cst_50 = arith.constant dense<0xFF800000> : vector<16x2xf32>
    %121 = vector.multi_reduction <maximumf>, %120, %cst_50 [1] : vector<16x16x2xf32> to vector<16x2xf32>
    %122 = vector.shape_cast %121 : vector<16x2xf32> to vector<16x1x2xf32>
    %123 = vector.broadcast %122 : vector<16x1x2xf32> to vector<16x16x2xf32>
    %124 = arith.subf %120, %123 : vector<16x16x2xf32>
    %125 = math.exp %124 : vector<16x16x2xf32>
    %126 = vector.broadcast %73 : vector<16x16x1xf32> to vector<16x16x2xf32>
    %127 = arith.mulf %125, %126 : vector<16x16x2xf32>
    %cst_51 = arith.constant dense<0.000000e+00> : vector<16x2xf32>
    %128 = vector.multi_reduction <add>, %127, %cst_51 [1] : vector<16x16x2xf32> to vector<16x2xf32>
    %cst_52 = arith.constant 9.99999968E-21 : f32
    %129 = vector.broadcast %cst_52 : f32 to vector<16x2xf32>
    %130 = arith.maximumf %128, %129 : vector<16x2xf32>
    %131 = vector.shape_cast %130 : vector<16x2xf32> to vector<16x1x2xf32>
    %132 = vector.broadcast %131 : vector<16x1x2xf32> to vector<16x16x2xf32>
    %133 = arith.divf %127, %132 : vector<16x16x2xf32>
    %cst_53 = arith.constant 0.000000e+00 : f32
    %134 = vector.broadcast %cst_53 : f32 to vector<16x32xf32>
    %135 = vector.extract_strided_slice %133 {offsets = [0, 0, 0], sizes = [16, 16, 1], strides = [1, 1, 1]} : vector<16x16x2xf32> to vector<16x16x1xf32>
    %136 = vector.extract_strided_slice %77 {offsets = [0, 0], sizes = [16, 32], strides = [1, 1]} : vector<16x64xf32> to vector<16x32xf32>
    %137 = vector.shape_cast %136 : vector<16x32xf32> to vector<1x16x32xf32>
    %138 = vector.broadcast %135 : vector<16x16x1xf32> to vector<16x16x32xf32>
    %139 = vector.broadcast %137 : vector<1x16x32xf32> to vector<16x16x32xf32>
    %140 = arith.mulf %138, %139 : vector<16x16x32xf32>
    %cst_54 = arith.constant dense<0.000000e+00> : vector<16x32xf32>
    %141 = vector.multi_reduction <add>, %140, %cst_54 [1] : vector<16x16x32xf32> to vector<16x32xf32>
    %142 = arith.addf %134, %141 : vector<16x32xf32>
    %143 = vector.extract_strided_slice %133 {offsets = [0, 0, 1], sizes = [16, 16, 1], strides = [1, 1, 1]} : vector<16x16x2xf32> to vector<16x16x1xf32>
    %144 = vector.extract_strided_slice %77 {offsets = [0, 32], sizes = [16, 32], strides = [1, 1]} : vector<16x64xf32> to vector<16x32xf32>
    %145 = vector.shape_cast %144 : vector<16x32xf32> to vector<1x16x32xf32>
    %146 = vector.broadcast %143 : vector<16x16x1xf32> to vector<16x16x32xf32>
    %147 = vector.broadcast %145 : vector<1x16x32xf32> to vector<16x16x32xf32>
    %148 = arith.mulf %146, %147 : vector<16x16x32xf32>
    %cst_55 = arith.constant dense<0.000000e+00> : vector<16x32xf32>
    %149 = vector.multi_reduction <add>, %148, %cst_55 [1] : vector<16x16x32xf32> to vector<16x32xf32>
    %150 = arith.addf %142, %149 : vector<16x32xf32>
    %cst_56 = arith.constant 5.000000e-01 : f32
    %151 = vector.broadcast %cst_56 : f32 to vector<16x32xf32>
    %152 = arith.mulf %150, %151 : vector<16x32xf32>
    %153 = vector.broadcast %56 : vector<1x32xf32> to vector<16x32xf32>
    %154 = arith.addf %152, %153 : vector<16x32xf32>
    %cst_57 = arith.constant 0.000000e+00 : f32
    %155 = vector.broadcast %cst_57 : f32 to vector<16x32xf32>
    %156 = arith.maximumf %154, %155 : vector<16x32xf32>
    %cst_58 = arith.constant dense<0.000000e+00> : vector<16x1xf32>
    %157 = tpu.matmul %156, %65, %cst_58 {dimension_numbers = #tpu.dot_dimension_numbers<[1], [0], [0], [1], [0, 0, 1, 1], [], []>} : vector<16x32xf32>, vector<32x1xf32>, vector<16x1xf32> -> vector<16x1xf32>
    %158 = math.tanh %157 : vector<16x1xf32>
    %159 = vector.broadcast %158 : vector<16x1xf32> to vector<16x16xf32>
    %160 = arith.mulf %10, %159 : vector<16x16xf32>
    %cst_59 = arith.constant dense<0.000000e+00> : vector<16xf32>
    %161 = vector.multi_reduction <add>, %160, %cst_59 [0] : vector<16x16xf32> to vector<16xf32>
    %162 = vector.shape_cast %161 : vector<16xf32> to vector<1x16xf32>
    %163 = vector.broadcast %162 : vector<1x16xf32> to vector<16x16xf32>
    %164 = vector.broadcast %158 : vector<16x1xf32> to vector<16x16xf32>
    %165 = arith.cmpf ogt, %163, %164 : vector<16x16xf32>
    %166 = vector.broadcast %162 : vector<1x16xf32> to vector<16x16xf32>
    %167 = vector.broadcast %158 : vector<16x1xf32> to vector<16x16xf32>
    %168 = arith.cmpf oeq, %166, %167 : vector<16x16xf32>
    %cst_60 = arith.constant 5.000000e-01 : f32
    %169 = vector.broadcast %cst_60 : f32 to vector<16x16xf32>
    %170 = arith.cmpf ogt, %13, %169 : vector<16x16xf32>
    %171 = arith.andi %168, %170 : vector<16x16xi1>
    %172 = arith.ori %165, %171 : vector<16x16xi1>
    %cst_61 = arith.constant 1.000000e+00 : f32
    %cst_62 = arith.constant 0.000000e+00 : f32
    %173 = vector.broadcast %cst_61 : f32 to vector<16x16xf32>
    %174 = vector.broadcast %cst_62 : f32 to vector<16x16xf32>
    %175 = arith.select %172, %173, %174 : vector<16x16xi1>, vector<16x16xf32>
    %176 = arith.mulf %27, %175 : vector<16x16xf32>
    %cst_63 = arith.constant dense<0.000000e+00> : vector<16xf32>
    %177 = vector.multi_reduction <add>, %176, %cst_63 [1] : vector<16x16xf32> to vector<16xf32>
    %178 = vector.shape_cast %177 : vector<16xf32> to vector<16x1xf32>
    %cst_64 = arith.constant dense<0.000000e+00> : vector<16xf32>
    %179 = vector.multi_reduction <add>, %27, %cst_64 [1] : vector<16x16xf32> to vector<16xf32>
    %180 = vector.shape_cast %179 : vector<16xf32> to vector<16x1xf32>
    %cst_65 = arith.constant 8.000000e-01 : f32
    %181 = vector.broadcast %cst_65 : f32 to vector<16x1xf32>
    %182 = arith.mulf %181, %180 : vector<16x1xf32>
    %cst_66 = arith.constant 9.99999974E-5 : f32
    %183 = vector.broadcast %cst_66 : f32 to vector<16x1xf32>
    %184 = arith.subf %182, %183 : vector<16x1xf32>
    %185 = arith.cmpf olt, %178, %184 : vector<16x1xf32>
    %cst_67 = arith.constant 1.000000e+00 : f32
    %cst_68 = arith.constant 0.000000e+00 : f32
    %186 = vector.broadcast %cst_67 : f32 to vector<16x1xf32>
    %187 = vector.broadcast %cst_68 : f32 to vector<16x1xf32>
    %188 = arith.select %185, %186, %187 : vector<16x1xi1>, vector<16x1xf32>
    %189 = vector.broadcast %188 : vector<16x1xf32> to vector<16x16xf32>
    %190 = arith.mulf %10, %189 : vector<16x16xf32>
    %cst_69 = arith.constant dense<0.000000e+00> : vector<16xf32>
    %191 = vector.multi_reduction <add>, %190, %cst_69 [0] : vector<16x16xf32> to vector<16xf32>
    %192 = vector.shape_cast %191 : vector<16xf32> to vector<1x16xf32>
    %193 = arith.mulf %158, %188 : vector<16x1xf32>
    %194 = vector.broadcast %193 : vector<16x1xf32> to vector<16x32xf32>
    %195 = arith.mulf %156, %194 : vector<16x32xf32>
    %196 = vector.broadcast %188 : vector<16x1xf32> to vector<16x16xf32>
    %197 = arith.mulf %42, %196 : vector<16x16xf32>
    %198 = vector.broadcast %192 : vector<1x16xf32> to vector<16x16xf32>
    %199 = arith.mulf %197, %198 : vector<16x16xf32>
    %200 = vector.extract_strided_slice %49 {offsets = [0, 64], sizes = [32, 64], strides = [1, 1]} : vector<32x128xf32> to vector<32x64xf32>
    %cst_70 = arith.constant 1.000000e+00 : f32
    %201 = vector.broadcast %cst_70 : f32 to vector<16x16xf32>
    %202 = arith.subf %201, %10 : vector<16x16xf32>
    %203 = arith.mulf %199, %202 : vector<16x16xf32>
    %204 = vector.shape_cast %203 : vector<16x16xf32> to vector<16x16x1xf32>
    %205 = arith.addf %203, %10 : vector<16x16xf32>
    %206 = vector.shape_cast %205 : vector<16x16xf32> to vector<16x16x1xf32>
    %cst_71 = arith.constant dense<0.000000e+00> : vector<16x128xf32>
    %207 = tpu.matmul %195, %51, %cst_71 {dimension_numbers = #tpu.dot_dimension_numbers<[1], [0], [0], [1], [0, 0, 1, 1], [], []>} : vector<16x32xf32>, vector<32x128xf32>, vector<16x128xf32> -> vector<16x128xf32>
    %208 = vector.broadcast %53 : vector<1x128xf32> to vector<16x128xf32>
    %209 = arith.addf %207, %208 : vector<16x128xf32>
    %210 = vector.extract_strided_slice %209 {offsets = [0, 0], sizes = [16, 64], strides = [1, 1]} : vector<16x128xf32> to vector<16x64xf32>
    %211 = vector.extract_strided_slice %209 {offsets = [0, 64], sizes = [16, 64], strides = [1, 1]} : vector<16x128xf32> to vector<16x64xf32>
    %212 = tpu.iota {dimensions = array<i32: 0>} : vector<256x32xi32>
    %213 = vector.broadcast %47 : vector<1x32xi32> to vector<256x32xi32>
    %214 = arith.cmpi eq, %212, %213 : vector<256x32xi32>
    %215 = arith.extui %214 : vector<256x32xi1> to vector<256x32xi32>
    %216 = arith.sitofp %215 : vector<256x32xi32> to vector<256x32xf32>
    %cst_72 = arith.constant dense<0.000000e+00> : vector<256x64xf32>
    %217 = tpu.matmul %216, %200, %cst_72 {dimension_numbers = #tpu.dot_dimension_numbers<[1], [0], [0], [1], [0, 0, 1, 1], [], []>} : vector<256x32xf32>, vector<32x64xf32>, vector<256x64xf32> -> vector<256x64xf32>
    %218 = vector.shape_cast %217 : vector<256x64xf32> to vector<16x16x64xf32>
    %219 = vector.broadcast %204 : vector<16x16x1xf32> to vector<16x16x64xf32>
    %220 = arith.mulf %218, %219 : vector<16x16x64xf32>
    %cst_73 = arith.constant dense<0.000000e+00> : vector<16xf32>
    %221 = vector.multi_reduction <add>, %203, %cst_73 [1] : vector<16x16xf32> to vector<16xf32>
    %222 = vector.shape_cast %221 : vector<16xf32> to vector<16x1xf32>
    %cst_74 = arith.constant dense<0.000000e+00> : vector<16x64xf32>
    %223 = vector.multi_reduction <add>, %220, %cst_74 [1] : vector<16x16x64xf32> to vector<16x64xf32>
    %cst_75 = arith.constant 1.000000e+00 : f32
    %224 = vector.broadcast %cst_75 : f32 to vector<16x1xf32>
    %225 = arith.maximumf %222, %224 : vector<16x1xf32>
    %226 = vector.broadcast %225 : vector<16x1xf32> to vector<16x64xf32>
    %227 = arith.divf %223, %226 : vector<16x64xf32>
    %228 = vector.shape_cast %10 : vector<16x16xf32> to vector<16x16x1xf32>
    %229 = vector.shape_cast %227 : vector<16x64xf32> to vector<1x16x64xf32>
    %230 = vector.broadcast %228 : vector<16x16x1xf32> to vector<16x16x64xf32>
    %231 = vector.broadcast %229 : vector<1x16x64xf32> to vector<16x16x64xf32>
    %232 = arith.mulf %230, %231 : vector<16x16x64xf32>
    %233 = arith.addf %220, %232 : vector<16x16x64xf32>
    %234 = vector.shape_cast %211 : vector<16x64xf32> to vector<16x1x64xf32>
    %235 = vector.shape_cast %210 : vector<16x64xf32> to vector<1x16x64xf32>
    %236 = vector.broadcast %234 : vector<16x1x64xf32> to vector<16x16x64xf32>
    %237 = vector.broadcast %235 : vector<1x16x64xf32> to vector<16x16x64xf32>
    %238 = arith.addf %236, %237 : vector<16x16x64xf32>
    %239 = arith.addf %238, %233 : vector<16x16x64xf32>
    %cst_76 = arith.constant 0.000000e+00 : f32
    %240 = vector.broadcast %cst_76 : f32 to vector<16x16x64xf32>
    %241 = arith.cmpf oge, %239, %240 : vector<16x16x64xf32>
    %cst_77 = arith.constant 2.000000e-01 : f32
    %242 = vector.broadcast %cst_77 : f32 to vector<16x16x64xf32>
    %243 = arith.mulf %242, %239 : vector<16x16x64xf32>
    %244 = arith.select %241, %239, %243 : vector<16x16x64xi1>, vector<16x16x64xf32>
    %245 = vector.shape_cast %244 : vector<16x16x64xf32> to vector<256x64xf32>
    %cst_78 = arith.constant dense<0.000000e+00> : vector<256x2xf32>
    %246 = tpu.matmul %245, %55, %cst_78 {dimension_numbers = #tpu.dot_dimension_numbers<[1], [0], [0], [1], [0, 0, 1, 1], [], []>} : vector<256x64xf32>, vector<64x2xf32>, vector<256x2xf32> -> vector<256x2xf32>
    %247 = vector.shape_cast %246 : vector<256x2xf32> to vector<16x16x2xf32>
    %cst_79 = arith.constant 0.000000e+00 : f32
    %248 = vector.broadcast %cst_79 : f32 to vector<16x16x1xf32>
    %249 = arith.cmpf ogt, %206, %248 : vector<16x16x1xf32>
    %cst_80 = arith.constant -1.000000e+30 : f32
    %250 = vector.shape_cast %249 : vector<16x16x1xi1> to vector<16x16x1xi1>
    %251 = vector.broadcast %250 : vector<16x16x1xi1> to vector<16x16x2xi1>
    %252 = vector.broadcast %cst_80 : f32 to vector<16x16x2xf32>
    %253 = arith.select %251, %247, %252 : vector<16x16x2xi1>, vector<16x16x2xf32>
    %cst_81 = arith.constant dense<0xFF800000> : vector<16x2xf32>
    %254 = vector.multi_reduction <maximumf>, %253, %cst_81 [1] : vector<16x16x2xf32> to vector<16x2xf32>
    %255 = vector.shape_cast %254 : vector<16x2xf32> to vector<16x1x2xf32>
    %256 = vector.broadcast %255 : vector<16x1x2xf32> to vector<16x16x2xf32>
    %257 = arith.subf %253, %256 : vector<16x16x2xf32>
    %258 = math.exp %257 : vector<16x16x2xf32>
    %259 = vector.broadcast %206 : vector<16x16x1xf32> to vector<16x16x2xf32>
    %260 = arith.mulf %258, %259 : vector<16x16x2xf32>
    %cst_82 = arith.constant dense<0.000000e+00> : vector<16x2xf32>
    %261 = vector.multi_reduction <add>, %260, %cst_82 [1] : vector<16x16x2xf32> to vector<16x2xf32>
    %cst_83 = arith.constant 9.99999968E-21 : f32
    %262 = vector.broadcast %cst_83 : f32 to vector<16x2xf32>
    %263 = arith.maximumf %261, %262 : vector<16x2xf32>
    %264 = vector.shape_cast %263 : vector<16x2xf32> to vector<16x1x2xf32>
    %265 = vector.broadcast %264 : vector<16x1x2xf32> to vector<16x16x2xf32>
    %266 = arith.divf %260, %265 : vector<16x16x2xf32>
    %cst_84 = arith.constant 0.000000e+00 : f32
    %267 = vector.broadcast %cst_84 : f32 to vector<16x32xf32>
    %268 = vector.extract_strided_slice %266 {offsets = [0, 0, 0], sizes = [16, 16, 1], strides = [1, 1, 1]} : vector<16x16x2xf32> to vector<16x16x1xf32>
    %269 = vector.extract_strided_slice %210 {offsets = [0, 0], sizes = [16, 32], strides = [1, 1]} : vector<16x64xf32> to vector<16x32xf32>
    %270 = vector.shape_cast %269 : vector<16x32xf32> to vector<1x16x32xf32>
    %271 = vector.broadcast %268 : vector<16x16x1xf32> to vector<16x16x32xf32>
    %272 = vector.broadcast %270 : vector<1x16x32xf32> to vector<16x16x32xf32>
    %273 = arith.mulf %271, %272 : vector<16x16x32xf32>
    %cst_85 = arith.constant dense<0.000000e+00> : vector<16x32xf32>
    %274 = vector.multi_reduction <add>, %273, %cst_85 [1] : vector<16x16x32xf32> to vector<16x32xf32>
    %275 = arith.addf %267, %274 : vector<16x32xf32>
    %276 = vector.extract_strided_slice %266 {offsets = [0, 0, 1], sizes = [16, 16, 1], strides = [1, 1, 1]} : vector<16x16x2xf32> to vector<16x16x1xf32>
    %277 = vector.extract_strided_slice %210 {offsets = [0, 32], sizes = [16, 32], strides = [1, 1]} : vector<16x64xf32> to vector<16x32xf32>
    %278 = vector.shape_cast %277 : vector<16x32xf32> to vector<1x16x32xf32>
    %279 = vector.broadcast %276 : vector<16x16x1xf32> to vector<16x16x32xf32>
    %280 = vector.broadcast %278 : vector<1x16x32xf32> to vector<16x16x32xf32>
    %281 = arith.mulf %279, %280 : vector<16x16x32xf32>
    %cst_86 = arith.constant dense<0.000000e+00> : vector<16x32xf32>
    %282 = vector.multi_reduction <add>, %281, %cst_86 [1] : vector<16x16x32xf32> to vector<16x32xf32>
    %283 = arith.addf %275, %282 : vector<16x32xf32>
    %cst_87 = arith.constant 5.000000e-01 : f32
    %284 = vector.broadcast %cst_87 : f32 to vector<16x32xf32>
    %285 = arith.mulf %283, %284 : vector<16x32xf32>
    %286 = vector.broadcast %57 : vector<1x32xf32> to vector<16x32xf32>
    %287 = arith.addf %285, %286 : vector<16x32xf32>
    %cst_88 = arith.constant 0.000000e+00 : f32
    %288 = vector.broadcast %cst_88 : f32 to vector<16x32xf32>
    %289 = arith.maximumf %287, %288 : vector<16x32xf32>
    %290 = vector.broadcast %188 : vector<16x1xf32> to vector<16x16xf32>
    %291 = arith.mulf %27, %290 : vector<16x16xf32>
    %292 = vector.broadcast %192 : vector<1x16xf32> to vector<16x16xf32>
    %293 = arith.mulf %291, %292 : vector<16x16xf32>
    %cst_89 = arith.constant dense<0.000000e+00> : vector<16x1xf32>
    %294 = tpu.matmul %289, %66, %cst_89 {dimension_numbers = #tpu.dot_dimension_numbers<[1], [0], [0], [1], [0, 0, 1, 1], [], []>} : vector<16x32xf32>, vector<32x1xf32>, vector<16x1xf32> -> vector<16x1xf32>
    %295 = math.tanh %294 : vector<16x1xf32>
    %296 = vector.broadcast %295 : vector<16x1xf32> to vector<16x16xf32>
    %297 = arith.mulf %10, %296 : vector<16x16xf32>
    %cst_90 = arith.constant dense<0.000000e+00> : vector<16xf32>
    %298 = vector.multi_reduction <add>, %297, %cst_90 [0] : vector<16x16xf32> to vector<16xf32>
    %299 = vector.shape_cast %298 : vector<16xf32> to vector<1x16xf32>
    %300 = vector.broadcast %299 : vector<1x16xf32> to vector<16x16xf32>
    %301 = vector.broadcast %295 : vector<16x1xf32> to vector<16x16xf32>
    %302 = arith.cmpf ogt, %300, %301 : vector<16x16xf32>
    %303 = vector.broadcast %299 : vector<1x16xf32> to vector<16x16xf32>
    %304 = vector.broadcast %295 : vector<16x1xf32> to vector<16x16xf32>
    %305 = arith.cmpf oeq, %303, %304 : vector<16x16xf32>
    %cst_91 = arith.constant 5.000000e-01 : f32
    %306 = vector.broadcast %cst_91 : f32 to vector<16x16xf32>
    %307 = arith.cmpf ogt, %13, %306 : vector<16x16xf32>
    %308 = arith.andi %305, %307 : vector<16x16xi1>
    %309 = arith.ori %302, %308 : vector<16x16xi1>
    %cst_92 = arith.constant 1.000000e+00 : f32
    %cst_93 = arith.constant 0.000000e+00 : f32
    %310 = vector.broadcast %cst_92 : f32 to vector<16x16xf32>
    %311 = vector.broadcast %cst_93 : f32 to vector<16x16xf32>
    %312 = arith.select %309, %310, %311 : vector<16x16xi1>, vector<16x16xf32>
    %313 = arith.mulf %293, %312 : vector<16x16xf32>
    %cst_94 = arith.constant dense<0.000000e+00> : vector<16xf32>
    %314 = vector.multi_reduction <add>, %313, %cst_94 [1] : vector<16x16xf32> to vector<16xf32>
    %315 = vector.shape_cast %314 : vector<16xf32> to vector<16x1xf32>
    %cst_95 = arith.constant dense<0.000000e+00> : vector<16xf32>
    %316 = vector.multi_reduction <add>, %293, %cst_95 [1] : vector<16x16xf32> to vector<16xf32>
    %317 = vector.shape_cast %316 : vector<16xf32> to vector<16x1xf32>
    %cst_96 = arith.constant 8.000000e-01 : f32
    %318 = vector.broadcast %cst_96 : f32 to vector<16x1xf32>
    %319 = arith.mulf %318, %317 : vector<16x1xf32>
    %cst_97 = arith.constant 9.99999974E-5 : f32
    %320 = vector.broadcast %cst_97 : f32 to vector<16x1xf32>
    %321 = arith.subf %319, %320 : vector<16x1xf32>
    %322 = arith.cmpf olt, %315, %321 : vector<16x1xf32>
    %cst_98 = arith.constant 1.000000e+00 : f32
    %cst_99 = arith.constant 0.000000e+00 : f32
    %323 = vector.broadcast %cst_98 : f32 to vector<16x1xf32>
    %324 = vector.broadcast %cst_99 : f32 to vector<16x1xf32>
    %325 = arith.select %322, %323, %324 : vector<16x1xi1>, vector<16x1xf32>
    %326 = vector.broadcast %325 : vector<16x1xf32> to vector<16x16xf32>
    %327 = arith.mulf %10, %326 : vector<16x16xf32>
    %cst_100 = arith.constant dense<0.000000e+00> : vector<16xf32>
    %328 = vector.multi_reduction <add>, %327, %cst_100 [0] : vector<16x16xf32> to vector<16xf32>
    %329 = vector.shape_cast %328 : vector<16xf32> to vector<1x16xf32>
    %330 = arith.mulf %295, %325 : vector<16x1xf32>
    %331 = vector.broadcast %330 : vector<16x1xf32> to vector<16x32xf32>
    %332 = arith.mulf %289, %331 : vector<16x32xf32>
    %333 = tpu.iota {dimensions = array<i32: 0>} : vector<2x16xi32>
    %334 = vector.broadcast %4 : vector<1x16xi32> to vector<2x16xi32>
    %335 = arith.cmpi eq, %333, %334 : vector<2x16xi32>
    %336 = arith.extui %335 : vector<2x16xi1> to vector<2x16xi32>
    %337 = arith.sitofp %336 : vector<2x16xi32> to vector<2x16xf32>
    %338 = vector.broadcast %329 : vector<1x16xf32> to vector<2x16xf32>
    %339 = arith.mulf %337, %338 : vector<2x16xf32>
    %cst_101 = arith.constant dense<0.000000e+00> : vector<2xf32>
    %340 = vector.multi_reduction <add>, %339, %cst_101 [1] : vector<2x16xf32> to vector<2xf32>
    %341 = vector.shape_cast %340 : vector<2xf32> to vector<2x1xf32>
    %cst_102 = arith.constant 1.000000e+00 : f32
    %342 = vector.broadcast %cst_102 : f32 to vector<2x1xf32>
    %343 = arith.maximumf %341, %342 : vector<2x1xf32>
    %cst_103 = arith.constant dense<0.000000e+00> : vector<2x32xf32>
    %344 = tpu.matmul %339, %332, %cst_103 {dimension_numbers = #tpu.dot_dimension_numbers<[1], [0], [0], [1], [0, 0, 1, 1], [], []>} : vector<2x16xf32>, vector<16x32xf32>, vector<2x32xf32> -> vector<2x32xf32>
    %345 = vector.broadcast %343 : vector<2x1xf32> to vector<2x32xf32>
    %346 = arith.divf %344, %345 : vector<2x32xf32>
    %347 = tpu.iota {dimensions = array<i32: 0>} : vector<2x1xi32>
    %cst_104 = arith.constant 0.000000e+00 : f32
    %348 = vector.broadcast %cst_104 : f32 to vector<2x32xf32>
    %cst_105 = arith.constant 0.000000e+00 : f32
    %349 = vector.broadcast %cst_105 : f32 to vector<16x1xf32>
    %350 = arith.subf %18, %349 : vector<16x1xf32>
    %351 = math.absf %350 : vector<16x1xf32>
    %cst_106 = arith.constant 5.000000e-01 : f32
    %352 = vector.broadcast %cst_106 : f32 to vector<16x1xf32>
    %353 = arith.cmpf olt, %351, %352 : vector<16x1xf32>
    %cst_107 = arith.constant 1.000000e+00 : f32
    %cst_108 = arith.constant 0.000000e+00 : f32
    %354 = vector.broadcast %cst_107 : f32 to vector<16x1xf32>
    %355 = vector.broadcast %cst_108 : f32 to vector<16x1xf32>
    %356 = arith.select %353, %354, %355 : vector<16x1xi1>, vector<16x1xf32>
    %357 = arith.mulf %356, %325 : vector<16x1xf32>
    %cst_109 = arith.constant 0.000000e+00 : f32
    %358 = vector.broadcast %cst_109 : f32 to vector<16x1xf32>
    %359 = arith.cmpf ogt, %357, %358 : vector<16x1xf32>
    %cst_110 = arith.constant -1.000000e+30 : f32
    %360 = vector.shape_cast %359 : vector<16x1xi1> to vector<16x1xi1>
    %361 = vector.broadcast %360 : vector<16x1xi1> to vector<16x32xi1>
    %362 = vector.broadcast %cst_110 : f32 to vector<16x32xf32>
    %363 = arith.select %361, %332, %362 : vector<16x32xi1>, vector<16x32xf32>
    %cst_111 = arith.constant dense<0xFF800000> : vector<32xf32>
    %364 = vector.multi_reduction <maximumf>, %363, %cst_111 [0] : vector<16x32xf32> to vector<32xf32>
    %365 = vector.shape_cast %364 : vector<32xf32> to vector<1x32xf32>
    %c0_i32 = arith.constant 0 : i32
    %366 = vector.broadcast %c0_i32 : i32 to vector<2x1xi32>
    %367 = arith.cmpi eq, %347, %366 : vector<2x1xi32>
    %cst_112 = arith.constant 1.000000e+00 : f32
    %cst_113 = arith.constant 0.000000e+00 : f32
    %368 = vector.broadcast %cst_112 : f32 to vector<2x1xf32>
    %369 = vector.broadcast %cst_113 : f32 to vector<2x1xf32>
    %370 = arith.select %367, %368, %369 : vector<2x1xi1>, vector<2x1xf32>
    %371 = vector.broadcast %370 : vector<2x1xf32> to vector<2x32xf32>
    %372 = vector.broadcast %365 : vector<1x32xf32> to vector<2x32xf32>
    %373 = arith.mulf %371, %372 : vector<2x32xf32>
    %374 = arith.addf %348, %373 : vector<2x32xf32>
    %cst_114 = arith.constant 1.000000e+00 : f32
    %375 = vector.broadcast %cst_114 : f32 to vector<16x1xf32>
    %376 = arith.subf %18, %375 : vector<16x1xf32>
    %377 = math.absf %376 : vector<16x1xf32>
    %cst_115 = arith.constant 5.000000e-01 : f32
    %378 = vector.broadcast %cst_115 : f32 to vector<16x1xf32>
    %379 = arith.cmpf olt, %377, %378 : vector<16x1xf32>
    %cst_116 = arith.constant 1.000000e+00 : f32
    %cst_117 = arith.constant 0.000000e+00 : f32
    %380 = vector.broadcast %cst_116 : f32 to vector<16x1xf32>
    %381 = vector.broadcast %cst_117 : f32 to vector<16x1xf32>
    %382 = arith.select %379, %380, %381 : vector<16x1xi1>, vector<16x1xf32>
    %383 = arith.mulf %382, %325 : vector<16x1xf32>
    %cst_118 = arith.constant 0.000000e+00 : f32
    %384 = vector.broadcast %cst_118 : f32 to vector<16x1xf32>
    %385 = arith.cmpf ogt, %383, %384 : vector<16x1xf32>
    %cst_119 = arith.constant -1.000000e+30 : f32
    %386 = vector.shape_cast %385 : vector<16x1xi1> to vector<16x1xi1>
    %387 = vector.broadcast %386 : vector<16x1xi1> to vector<16x32xi1>
    %388 = vector.broadcast %cst_119 : f32 to vector<16x32xf32>
    %389 = arith.select %387, %332, %388 : vector<16x32xi1>, vector<16x32xf32>
    %cst_120 = arith.constant dense<0xFF800000> : vector<32xf32>
    %390 = vector.multi_reduction <maximumf>, %389, %cst_120 [0] : vector<16x32xf32> to vector<32xf32>
    %391 = vector.shape_cast %390 : vector<32xf32> to vector<1x32xf32>
    %c1_i32 = arith.constant 1 : i32
    %392 = vector.broadcast %c1_i32 : i32 to vector<2x1xi32>
    %393 = arith.cmpi eq, %347, %392 : vector<2x1xi32>
    %cst_121 = arith.constant 1.000000e+00 : f32
    %cst_122 = arith.constant 0.000000e+00 : f32
    %394 = vector.broadcast %cst_121 : f32 to vector<2x1xf32>
    %395 = vector.broadcast %cst_122 : f32 to vector<2x1xf32>
    %396 = arith.select %393, %394, %395 : vector<2x1xi1>, vector<2x1xf32>
    %397 = vector.broadcast %396 : vector<2x1xf32> to vector<2x32xf32>
    %398 = vector.broadcast %391 : vector<1x32xf32> to vector<2x32xf32>
    %399 = arith.mulf %397, %398 : vector<2x32xf32>
    %400 = arith.addf %374, %399 : vector<2x32xf32>
    %cst_123 = arith.constant dense<0.000000e+00> : vector<2x32xf32>
    %401 = tpu.matmul %400, %61, %cst_123 {dimension_numbers = #tpu.dot_dimension_numbers<[1], [0], [0], [1], [0, 0, 1, 1], [], []>} : vector<2x32xf32>, vector<32x32xf32>, vector<2x32xf32> -> vector<2x32xf32>
    %cst_124 = arith.constant dense<0.000000e+00> : vector<2x32xf32>
    %402 = tpu.matmul %346, %62, %cst_124 {dimension_numbers = #tpu.dot_dimension_numbers<[1], [0], [0], [1], [0, 0, 1, 1], [], []>} : vector<2x32xf32>, vector<32x32xf32>, vector<2x32xf32> -> vector<2x32xf32>
    %403 = arith.addf %401, %402 : vector<2x32xf32>
    %404 = vector.broadcast %58 : vector<1x32xf32> to vector<2x32xf32>
    %405 = arith.addf %403, %404 : vector<2x32xf32>
    %cst_125 = arith.constant 0.000000e+00 : f32
    %406 = vector.broadcast %cst_125 : f32 to vector<2x32xf32>
    %407 = arith.maximumf %405, %406 : vector<2x32xf32>
    %cst_126 = arith.constant dense<0.000000e+00> : vector<2x32xf32>
    %408 = tpu.matmul %407, %63, %cst_126 {dimension_numbers = #tpu.dot_dimension_numbers<[1], [0], [0], [1], [0, 0, 1, 1], [], []>} : vector<2x32xf32>, vector<32x32xf32>, vector<2x32xf32> -> vector<2x32xf32>
    %409 = vector.broadcast %59 : vector<1x32xf32> to vector<2x32xf32>
    %410 = arith.addf %408, %409 : vector<2x32xf32>
    %cst_127 = arith.constant 0.000000e+00 : f32
    %411 = vector.broadcast %cst_127 : f32 to vector<2x32xf32>
    %412 = arith.maximumf %410, %411 : vector<2x32xf32>
    %cst_128 = arith.constant dense<0.000000e+00> : vector<2x8xf32>
    %413 = tpu.matmul %412, %64, %cst_128 {dimension_numbers = #tpu.dot_dimension_numbers<[1], [0], [0], [1], [0, 0, 1, 1], [], []>} : vector<2x32xf32>, vector<32x8xf32>, vector<2x8xf32> -> vector<2x8xf32>
    %414 = vector.broadcast %60 : vector<1x8xf32> to vector<2x8xf32>
    %415 = arith.addf %413, %414 : vector<2x8xf32>
    %416 = vector.extract_strided_slice %415 {offsets = [0, 0], sizes = [2, 4], strides = [1, 1]} : vector<2x8xf32> to vector<2x4xf32>
    %417 = vector.extract_strided_slice %415 {offsets = [0, 4], sizes = [2, 4], strides = [1, 1]} : vector<2x8xf32> to vector<2x4xf32>
    %cst_129 = arith.constant -2.000000e+01 : f32
    %cst_130 = arith.constant 2.000000e+00 : f32
    %418 = vector.broadcast %cst_129 : f32 to vector<2x4xf32>
    %419 = arith.maximumf %418, %417 : vector<2x4xf32>
    %420 = vector.broadcast %cst_130 : f32 to vector<2x4xf32>
    %421 = arith.minimumf %420, %419 : vector<2x4xf32>
    %422 = math.exp %421 : vector<2x4xf32>
    %423 = arith.mulf %422, %5 : vector<2x4xf32>
    %424 = arith.addf %416, %423 : vector<2x4xf32>
    %cst_131 = arith.constant dense<0xFF800000> : vector<2xf32>
    %425 = vector.multi_reduction <maximumf>, %424, %cst_131 [1] : vector<2x4xf32> to vector<2xf32>
    %426 = vector.shape_cast %425 : vector<2xf32> to vector<2x1xf32>
    %427 = vector.broadcast %426 : vector<2x1xf32> to vector<2x4xf32>
    %428 = arith.subf %424, %427 : vector<2x4xf32>
    %429 = math.exp %428 : vector<2x4xf32>
    %cst_132 = arith.constant dense<0.000000e+00> : vector<2xf32>
    %430 = vector.multi_reduction <add>, %429, %cst_132 [1] : vector<2x4xf32> to vector<2xf32>
    %431 = vector.shape_cast %430 : vector<2xf32> to vector<2x1xf32>
    %432 = vector.broadcast %431 : vector<2x1xf32> to vector<2x4xf32>
    %433 = arith.divf %429, %432 : vector<2x4xf32>
    %c0_133 = arith.constant 0 : index
    %c0_134 = arith.constant 0 : index
    %434 = vector.load %arg7[%c0_133, %c0_134] : memref<2x4xf32, #tpu.memory_space<vmem>>, vector<2x4xf32>
    tpu.vector_store %arg7[%c0_133, %c0_134], %433 {strides = array<i32>} : memref<2x4xf32, #tpu.memory_space<vmem>>, vector<2x4xf32>,
    return
  }
}

</mosaic_0001>

<bundles_post_ra>
// kernel: actor_forward.1
= control target key start
LH: loop header
LB: loop body
LE: loop exit
PB: predicated region body
PF: predicated region fallthrough
CT: control target
= control target key end

     0   :  { %12 = vsyncpa [#allocation3], 0  ;;  %s14684_s0 = inlined_call_operand.vmem [shape: f32[16,8], index: 0, kind: input, shape index: {}]   ;;  %s14685_s1 = inlined_call_operand.vmem [shape: s32[2,32], index: 1, kind: input, shape index: {}]   ;;  %s14686_s2 = inlined_call_operand.vmem [shape: s32[32,2], index: 2, kind: input, shape index: {}]   ;;  %s14687_s3 = inlined_call_operand.vmem [shape: f32[32,4], index: 3, kind: input, shape index: {}]   ;;  %s14688_s4 = inlined_call_operand.vmem [shape: s32[1,16], index: 4, kind: input, shape index: {}]   ;;  %s14689_s5 = inlined_call_operand.vmem [shape: f32[2,4], index: 5, kind: input, shape index: {}]   ;;  %s14690_s6 = inlined_call_operand.hbm [shape: f32[144,128], index: 6, kind: input, shape index: {}]   ;;  %s14691_s7 = inlined_call_operand.hbm [shape: f32[2,4], index: 7, kind: output, shape index: {}]  }
   0x1   :  { %13 = vsyncpa [#allocation4], 0  ;;  %s30_s26 = sshll.u32 %s14690_s6, 4  ;;  %s9139_s27 = smov [#allocation2]   ;;  %s31_s26 = int_to_ptr.hbm [resolvable:$true] %s30_s26 }
   0x2   :  { %s32_s28 = sshll.u32 %s9139_s27, 4  ;;  %s9140_s29 = smov 128   ;;  %s33_s28 = int_to_ptr.vmem [resolvable:$true] %s32_s28 }
   0x3   :  { %s9141_s30 = smov 8  }
   0x4   :  { %38 = dma.hbm_to_vmem [thread:$0]  %s31_s26, 2304, %s33_s28, [#allocation3], %s9140_s29, %s9140_s29, %s9141_s30  }
   0x5   :  { %9135 = dma.done.wait [#allocation3], 2304  }
   0x6   :  { %9136 = vsyncadd [#allocation3], 4294964992  ;;  %v14696_v0 = vmov 0   ;;  %vm174_vm0 = vcmask 1043456   ;;  %vm161_vm1 = vcmask 31744   ;;  %v49_v2 = vld [vmem:[%s14686_s2 + $0x18] sm:$0xff]  ;;  %v56_v10 = vlaneseq }
   0x7   :  { %8446 = vset.pattern.permute.xlu1 %v14696_v0  ;;  %8445 = vset.pattern.permute.xlu0 %v14696_v0  ;;  %v160_v1 = vld [vmem:[#allocation2 + $0x28] sm:$0xf]  ;;  %v50_v4 = vld [vmem:[%s14687_s3] sm:$0xff]  ;;  %v48_v5 = vld [vmem:[%s14686_s2 + $0x10] sm:$0xff]  ;;  %v9143_v16 = vmov 1.0   ;;  %v14704_v22 = vmov 0.0  }
   0x8   :  { %v47_v3 = vld [vmem:[%s14686_s2 + $0x8] sm:$0xff]  ;;  %8244 = vmatpush.msk.msra.mxu1 %vm174_vm0, %v160_v1  ;;  %111 = vperm.xlu0 %8445, %v49_v2   ;;  %v46_v6 = vld [vmem:[%s14686_s2] sm:$0xff]  ;;  %v52_v8 = vld [vmem:[%s14687_s3 + $0x10] sm:$0xff]  ;;  %v9228_v11 = vshrl.u32 %v56_v10, 7  ;;  %v9236_v13 = vand.u32 127, %v56_v10  ;;  %vm14759_vm6 = vcmask 261120  }
   0x9   :  { %105 = vperm.xlu1 %8446, %v47_v3   ;;  %8245 = vmatmul.msk.f32.vlgmr.msra.gmra.mxu1 %vm161_vm1, %v50_v4  ;;  %v51_v7 = vld [vmem:[%s14687_s3 + $0x8] sm:$0xff]  ;;  %v53_v9 = vld [vmem:[%s14687_s3 + $0x18] sm:$0xff]  ;;  %v45_v17 = vld [vmem:[%s14685_s1] sm:$0x3]  ;;  %vm651_vm0 = vcmask 64512   ;;  %s9147_s26 = smov 96  }
   0xa   :  { %14910 = vst [vmem:[#allocation8_spill] sm:$0xff] %v9228_v11  ;;  %v9231_v12 = vadd.s32 8, %v9228_v11  ;;  %8447 = vset.pattern.permute.xlu2 %v9228_v11  ;;  %v94_v18 = vperm.slane %v45_v17, 1  ;;  %v157_v25 = vmul.u32 16, %v45_v17  ;;  %v158_v26 = vrot.slane %v45_v17, 7  ;;  %v207_v43 = vld [vmem:[#allocation2] sm:$0xff] }
   0xb   :  { %14912 = vst [vmem:[#allocation10_spill] sm:$0xff] %v9236_v13  ;;  %v681_v33 = vadd.s32 16, %v9228_v11  ;;  %v682_v36 = vadd.s32 24, %v9228_v11  ;;  %v683_v38 = vadd.s32 32, %v9228_v11  ;;  %v684_v40 = vadd.s32 40, %v9228_v11  ;;  %673 = vmatpush.msra.mxu2 %v207_v43  ;;  %v43_v46 = vld [vmem:[%s14684_s0] sm:$0xff] }
   0xc   :  { %14911 = vst [vmem:[#allocation9_spill] sm:$0xff] %v9231_v12  ;;  %vm95_vm4 = vcmp.eq.s32.totalorder %v9228_v11, %v94_v18  ;;  %v159_v28 = vadd.s32 %v158_v26, %v157_v25  ;;  %vm96_vm10 = vcmp.eq.s32.totalorder %v9231_v12, %v94_v18  ;;  %v685_v42 = vadd.s32 48, %v9228_v11  ;;  %8249 = vmatmul.msk.f32.vlgmr.msra.gmra.mxu2 %vm651_vm0, %v43_v46  ;;  %s9148_s27 = smov 24   ;;  %s9149_s30 = smov 126  }
   0xd   :  { %v8232_v23 = vsel %vm95_vm4, 1.0, %v14704_v22  ;;  %v8233_v34 = vsel %vm96_vm10, 1.0, %v14704_v22  ;;  %v686_v45 = vadd.s32 56, %v9228_v11  ;;  %v687_v48 = vadd.s32 64, %v9228_v11  ;;  %s9150_s8 = smov 23   ;;  %s9152_s12 = smov 4  }
   0xe   :  { %v9254_v29 = vperm.slane %v159_v28, 1  ;;  %v688_v50 = vadd.s32 72, %v9228_v11  ;;  %v689_v52 = vadd.s32 80, %v9228_v11  ;;  %v690_v54 = vadd.s32 88, %v9228_v11  ;;  %s9153_s13 = smov 124   ;;  %s8218_s17 = sshll.u32 %s14691_s7, 4  ;;  %s8219_s17 = int_to_ptr.hbm [resolvable:$true] %s8218_s17 }
   0xf   :  { %v691_v56 = vadd.s32 96, %v9228_v11  ;;  %v692_v59 = vadd.s32 104, %v9228_v11  ;;  %v698_v28 = vadd.s32 152, %v9228_v11 }
  0x10   :  { %108 = vperm.xlu0 %8445, %v48_v5   ;;  %vm712_vm8 = vcmp.eq.s32.totalorder %v9228_v11, %v9254_v29  ;;  %vm713_vm9 = vcmp.eq.s32.totalorder %v9231_v12, %v9254_v29  ;;  %vm714_vm11 = vcmp.eq.s32.totalorder %v681_v33, %v9254_v29  ;;  %vm715_vm12 = vcmp.eq.s32.totalorder %v682_v36, %v9254_v29 }
  0x11   :  { %102 = vperm.xlu1 %8446, %v46_v6   ;;  %8246 = vmatmul.msk.f32.gmra.mxu1 %vm161_vm1, %v51_v7  ;;  %v9264_v31 = vsel %vm712_vm8, 1.0, %v14704_v22  ;;  %v9272_v32 = vsel %vm713_vm9, 1.0, %v14704_v22  ;;  %v9282_v35 = vsel %vm714_vm11, 1.0, %v14704_v22  ;;  %v9289_v37 = vsel %vm715_vm12, 1.0, %v14704_v22  ;;  %v44_v6 = vld [vmem:[%s14684_s0 + $0x8] sm:$0xff]  ;;  %s9145_s0 = smov 64  }
  0x12   :  { %14917 = vst [vmem:[#allocation15_spill] sm:$0xff] %v9264_v31  ;;  %vm716_vm13 = vcmp.eq.s32.totalorder %v683_v38, %v9254_v29  ;;  %vm717_vm14 = vcmp.eq.s32.totalorder %v684_v40, %v9254_v29  ;;  %vm718_vm15 = vcmp.eq.s32.totalorder %v685_v42, %v9254_v29  ;;  %vm722_vm4 = vcmp.eq.s32.totalorder %v689_v52, %v9254_v29 }
  0x13   :  { %14918 = vst [vmem:[#allocation16_spill] sm:$0xff] %v9272_v32  ;;  %v9296_v39 = vsel %vm716_vm13, 1.0, %v14704_v22  ;;  %v9303_v41 = vsel %vm717_vm14, 1.0, %v14704_v22  ;;  %v9310_v44 = vsel %vm718_vm15, 1.0, %v14704_v22  ;;  %v9342_v53 = vsel %vm722_vm4, 1.0, %v14704_v22 }
  0x14   :  { %14919 = vst [vmem:[#allocation17_spill] sm:$0xff] %v9282_v35  ;;  %vm724_vm8 = vcmp.eq.s32.totalorder %v691_v56, %v9254_v29  ;;  %vm14758_vm9 = vcmask 130048   ;;  %vm725_vm10 = vcmp.eq.s32.totalorder %v692_v59, %v9254_v29  ;;  %v693_v5 = vadd.s32 112, %v9228_v11  ;;  %8250 = vmatmul.msk.f32.gmra.mxu2 %vm651_vm0, %v44_v6 }
  0x15   :  { %14920 = vst [vmem:[#allocation18_spill] sm:$0xff] %v9289_v37  ;;  %v9361_v58 = vsel %vm724_vm8, 1.0, %v14704_v22  ;;  %v9382_v4 = vsel %vm725_vm10, 1.0, %v14704_v22  ;;  %vm731_vm0 = vcmp.eq.s32.totalorder %v698_v28, %v9254_v29  ;;  %v699_v40 = vadd.s32 160, %v9228_v11 }
  0x16   :  { %14921 = vst [vmem:[#allocation19_spill] sm:$0xff] %v9296_v39  ;;  %vm726_vm11 = vcmp.eq.s32.totalorder %v693_v5, %v9254_v29  ;;  %v9444_v38 = vsel %vm731_vm0, 1.0, %v14704_v22 }
  0x17   :  { %14922 = vst [vmem:[#allocation20_spill] sm:$0xff] %v9303_v41  ;;  %v9393_v7 = vsel %vm726_vm11, 1.0, %v14704_v22 }
  0x18   :  { %8448 = vset.pattern.permute.xlu0 %v9231_v12  ;;  %14923 = vst [vmem:[#allocation21_spill] sm:$0xff] %v9310_v44 }
  0x19   :  { %8247 = vmatmul.msk.f32.gmra.mxu1 %vm161_vm1, %v52_v8  ;;  %8449 = vset.pattern.permute.xlu1 %v9228_v11  ;;  %14927 = vst [vmem:[#allocation25_spill] sm:$0xff] %v9342_v53  ;;  %v694_v8 = vadd.s32 120, %v9228_v11 }
  0x1a   :  { %14930 = vst [vmem:[#allocation28_spill] sm:$0xff] %v9361_v58 }
  0x1b   :  { %14933 = vst [vmem:[#allocation31_spill] sm:$0xff] %v9382_v4  ;;  %vm727_vm12 = vcmp.eq.s32.totalorder %v694_v8, %v9254_v29 }
  0x1c   :  { %14934 = vst [vmem:[#allocation32_spill] sm:$0xff] %v9393_v7  ;;  %v9403_v10 = vsel %vm727_vm12, 1.0, %v14704_v22 }
  0x1d   :  { %14935 = vst [vmem:[#allocation33_spill] sm:$0xff] %v9403_v10 }
  0x1e   :  { %14939 = vst [vmem:[#allocation37_spill] sm:$0xff] %v9444_v38 }
  0x21   :  { %8248 = vmatmul.msk.f32.gmra.mxu1 %vm161_vm1, %v53_v9  ;;  %vm719_vm1 = vcmp.eq.s32.totalorder %v686_v45, %v9254_v29  ;;  %v700_v45 = vadd.s32 168, %v9228_v11 }
  0x22   :  { %v9321_v47 = vsel %vm719_vm1, 1.0, %v14704_v22  ;;  %vm732_vm1 = vcmp.eq.s32.totalorder %v699_v40, %v9254_v29 }
  0x23   :  { %14924 = vst [vmem:[#allocation22_spill] sm:$0xff] %v9321_v47  ;;  %v9455_v43 = vsel %vm732_vm1, 1.0, %v14704_v22 }
  0x24   :  { %14940 = vst [vmem:[#allocation38_spill] sm:$0xff] %v9455_v43 }
  0x7a   :  { %v112_v14 = vpop.permute.xlu0 %111 }
  0x7b   :  { %v106_v15 = vpop.permute.xlu1 %105  ;;  %vm116_vm2 = vcmp.eq.s32.totalorder %v9236_v13, %v112_v14  ;;  %v695_v14 = vadd.s32 128, %v9228_v11 }
  0x7c   :  { %8238 = vmatpush.msk.msra.mxu0 %vm116_vm2, %v9143_v16  ;;  %vm114_vm5 = vcmp.eq.s32.totalorder %v9236_v13, %v106_v15  ;;  %vm720_vm2 = vcmp.eq.s32.totalorder %v687_v48, %v9254_v29 }
  0x7d   :  { %v9328_v49 = vsel %vm720_vm2, 1.0, %v14704_v22  ;;  %vm728_vm13 = vcmp.eq.s32.totalorder %v695_v14, %v9254_v29  ;;  %vm62_vm2 = vcmp.eq.s32.totalorder %v9231_v12, %v9236_v13 }
  0x7e   :  { %14925 = vst [vmem:[#allocation23_spill] sm:$0xff] %v9328_v49  ;;  %v9410_v15 = vsel %vm728_vm13, 1.0, %v14704_v22  ;;  %v9461_v46 = vsel %vm62_vm2, 1.0, %v14704_v22 }
  0x7f   :  { %14936 = vst [vmem:[#allocation34_spill] sm:$0xff] %v9410_v15 }
  0x80   :  { %14941 = vst [vmem:[#allocation39_spill] sm:$0xff] %v9461_v46 }
  0x82   :  { %v109_v19 = vpop.permute.xlu0 %108 }
  0x83   :  { %vm115_vm3 = vcmp.eq.s32.totalorder %v9236_v13, %v109_v19  ;;  %v103_v20 = vpop.permute.xlu1 %102 }
  0x84   :  { %8239 = vmatpush.msk.msra.mxu0 %vm115_vm3, %v9143_v16  ;;  %vm113_vm7 = vcmp.eq.s32.totalorder %v9236_v13, %v103_v20  ;;  %vm721_vm3 = vcmp.eq.s32.totalorder %v688_v50, %v9254_v29 }
  0x85   :  { %v9335_v51 = vsel %vm721_vm3, 1.0, %v14704_v22  ;;  %vm733_vm3 = vcmp.eq.s32.totalorder %v700_v45, %v9254_v29 }
  0x86   :  { %8240 = vmatpush.msk.msra.mxu0 %vm114_vm5, %v9143_v16  ;;  %v9245_v21 = vpop.f32.mrf.mxu1  ;;  %14926 = vst [vmem:[#allocation24_spill] sm:$0xff] %v9335_v51  ;;  %vm723_vm5 = vcmp.eq.s32.totalorder %v690_v54, %v9254_v29  ;;  %v14692_v54 = vsub.f32 1.0, %v9461_v46  ;;  %v9474_v59 = vsel %vm733_vm3, 1.0, %v14704_v22 }
  0x87   :  { %14913 = vst [vmem:[#allocation11_spill] sm:$0xff] %v9245_v21  ;;  %v9349_v55 = vsel %vm723_vm5, 1.0, %v14704_v22 }
  0x88   :  { %8241 = vmatpush.msk.msra.mxu0 %vm113_vm7, %v9143_v16  ;;  %14928 = vst [vmem:[#allocation26_spill] sm:$0xff] %v9349_v55  ;;  %vm61_vm7 = vcmp.eq.s32.totalorder %v9228_v11, %v9236_v13  ;;  %v696_v16 = vadd.s32 136, %v9228_v11 }
  0x89   :  { %8242 = vmatmul.msk.f32.vlgmr.msra.gmra.mxu0 %vm14759_vm6, %v8232_v23  ;;  %v9358_v57 = vsel %vm61_vm7, 1.0, %v14704_v22  ;;  %v697_v23 = vadd.s32 144, %v9228_v11  ;;  %14943 = vst [vmem:[#allocation41_spill] sm:$0xff] %v9474_v59 }
  0x8a   :  { %14929 = vst [vmem:[#allocation27_spill] sm:$0xff] %v9358_v57  ;;  %v14693_v60 = vsub.f32 1.0, %v9358_v57  ;;  %vm729_vm14 = vcmp.eq.s32.totalorder %v696_v16, %v9254_v29 }
  0x8b   :  { %v9422_v20 = vsel %vm729_vm14, 1.0, %v14704_v22  ;;  %vm730_vm15 = vcmp.eq.s32.totalorder %v697_v23, %v9254_v29  ;;  %vm14857_vm14 = vcmask 523264  }
  0x8c   :  { %14937 = vst [vmem:[#allocation35_spill] sm:$0xff] %v9422_v20  ;;  %v9431_v26 = vsel %vm730_vm15, 1.0, %v14704_v22 }
  0x8d   :  { %14938 = vst [vmem:[#allocation36_spill] sm:$0xff] %v9431_v26 }
  0x8e   :  { %v9250_v24 = vpop.f32.mrf.mxu1 }
  0x8f   :  { %14914 = vst [vmem:[#allocation12_spill] sm:$0xff] %v9250_v24 }
  0x91   :  { %8243 = vmatmul.msk.f32.gmra.mxu0 %vm14759_vm6, %v8233_v34 }
  0x96   :  { %v9252_v27 = vpop.f32.mrf.mxu1 }
  0x97   :  { %14915 = vst [vmem:[#allocation13_spill] sm:$0xff] %v9252_v27 }
  0x9e   :  { %v9256_v30 = vpop.f32.mrf.mxu1 }
  0x9f   :  { %14916 = vst [vmem:[#allocation14_spill] sm:$0xff] %v9256_v30  ;;  %916 = vmatpush.msra.mxu3 %v9256_v30 }
  0xa1   :  { %917 = vmatpush.msra.mxu3 %v9252_v27 }
  0xa3   :  { %918 = vmatpush.msra.mxu3 %v9250_v24 }
  0xa5   :  { %919 = vmatpush.msra.mxu3 %v9245_v21 }
  0xa6   :  { %8283 = vmatmul.msk.f32.vlgmr.msra.gmra.mxu3 %vm14759_vm6, %v9264_v31 }
  0xae   :  { %8284 = vmatmul.msk.f32.gmra.mxu3 %vm14759_vm6, %v9272_v32 }
  0xb6   :  { %8285 = vmatmul.msk.f32.gmra.mxu3 %vm14759_vm6, %v9282_v35 }
  0xbe   :  { %8286 = vmatmul.msk.f32.gmra.mxu3 %vm14759_vm6, %v9289_v37 }
  0xc6   :  { %8287 = vmatmul.msk.f32.gmra.mxu3 %vm14759_vm6, %v9296_v39 }
  0xce   :  { %8288 = vmatmul.msk.f32.gmra.mxu3 %vm14759_vm6, %v9303_v41 }
  0xd6   :  { %8289 = vmatmul.msk.f32.gmra.mxu3 %vm14759_vm6, %v9310_v44 }
  0xde   :  { %8290 = vmatmul.msk.f32.gmra.mxu3 %vm14759_vm6, %v9321_v47 }
  0xe6   :  { %8291 = vmatmul.msk.f32.gmra.mxu3 %vm14759_vm6, %v9328_v49 }
  0xee   :  { %8292 = vmatmul.msk.f32.gmra.mxu3 %vm14759_vm6, %v9335_v51 }
  0xf6   :  { %8293 = vmatmul.msk.f32.gmra.mxu3 %vm14759_vm6, %v9342_v53 }
  0xfe   :  { %8294 = vmatmul.msk.f32.gmra.mxu3 %vm14759_vm6, %v9349_v55 }
 0x106   :  { %v9365_v61 = vpop.f32.mrf.mxu0  ;;  %8295 = vmatmul.msk.f32.gmra.mxu3 %vm14759_vm6, %v9361_v58 }
 0x107   :  { %14931 = vst [vmem:[#allocation29_spill] sm:$0xff] %v9365_v61  ;;  %v14695_v62 = vmin.f32 %v9365_v61, 1.0 }
 0x109   :  { %v9375_v63 = vmul.f32 %v14693_v60, %v14695_v62  ;;  %v707_v62 = vadd.s32 224, %v9228_v11 }
 0x10b   :  { %14932 = vst [vmem:[#allocation30_spill] sm:$0xff] %v9375_v63  ;;  %v1049_v1 = vsel %vm14758_vm9, %v9375_v63, 0.0  ;;  %v258_v2 = vperm.slane %v9375_v63, 2  ;;  %v245_v3 = vperm.slane %v9375_v63, 1  ;;  %v232_v9 = vperm.slane %v9375_v63, 0 }
 0x10c   :  { %1050 = vadd.xlane.f32.xlu2 %v1049_v1  ;;  %v271_v18 = vperm.slane %v9375_v63, 3  ;;  %v284_v19 = vperm.slane %v9375_v63, 4  ;;  %v297_v34 = vperm.slane %v9375_v63, 5  ;;  %v310_v36 = vperm.slane %v9375_v63, 6 }
 0x10d   :  { %263 = vperm.xlu1 %8449, %v258_v2   ;;  %256 = vperm.xlu0 %8448, %v245_v3   ;;  %v323_v56 = vperm.slane %v9375_v63, 7  ;;  %v701_v1 = vadd.s32 176, %v9228_v11  ;;  %vm740_vm12 = vcmp.eq.s32.totalorder %v707_v62, %v9254_v29 }
 0x10e   :  { %8296 = vmatmul.msk.f32.gmra.mxu3 %vm14759_vm6, %v9382_v4  ;;  %v9465_v48 = vpop.f32.mrf.mxu0 }
 0x10f   :  { %14942 = vst [vmem:[#allocation40_spill] sm:$0xff] %v9465_v48  ;;  %v14694_v52 = vmin.f32 %v9465_v48, 1.0  ;;  %vm734_vm4 = vcmp.eq.s32.totalorder %v701_v1, %v9254_v29 }
 0x110   :  { %v9490_v6 = vsel %vm734_vm4, 1.0, %v14704_v22 }
 0x111   :  { %14945 = vst [vmem:[#allocation43_spill] sm:$0xff] %v9490_v6 }
 0x115   :  { %8450 = vset.pattern.permute.xlu1 %v9231_v12  ;;  %8451 = vset.pattern.permute.xlu0 %v9228_v11 }
 0x116   :  { %8297 = vmatmul.msk.f32.gmra.mxu3 %vm14759_vm6, %v9393_v7 }
 0x11d   :  { %269 = vperm.xlu1 %8450, %v258_v2   ;;  %237 = vperm.xlu0 %8451, %v232_v9   ;;  %v9481_v2 = vmul.f32 %v14692_v54, %v14694_v52 }
 0x11e   :  { %8298 = vmatmul.msk.f32.gmra.mxu3 %vm14759_vm6, %v9403_v10 }
 0x11f   :  { %14944 = vst [vmem:[#allocation42_spill] sm:$0xff] %v9481_v2  ;;  %v362_v5 = vperm.slane %v9481_v2, 2  ;;  %v1052_v8 = vsel %vm14758_vm9, %v9481_v2, 0.0  ;;  %v14700_v16 = vperm.slane %v9481_v2, 0  ;;  %v14699_v28 = vperm.slane %v9481_v2, 3 }
 0x120   :  { %v349_v40 = vperm.slane %v9481_v2, 1  ;;  %v14969_v32 = vperm.slane %v9481_v2, 5 }
 0x124   :  { %250 = vperm.xlu2 %8447, %v245_v3  }
 0x125   :  { %243 = vperm.xlu1 %8450, %v232_v9   ;;  %8452 = vset.pattern.permute.xlu0 %v9231_v12  ;;  %v702_v9 = vadd.s32 184, %v9228_v11 }
 0x126   :  { %8299 = vmatmul.msk.f32.gmra.mxu3 %vm14759_vm6, %v9410_v15 }
 0x127   :  { %vm735_vm5 = vcmp.eq.s32.totalorder %v702_v9, %v9254_v29  ;;  %v14698_v9 = vperm.slane %v9481_v2, 5 }
 0x129   :  { %v9417_v17 = vpop.f32.mrf.mxu3 }
 0x12c   :  { %276 = vperm.xlu2 %8447, %v271_v18  }
 0x12d   :  { %282 = vperm.xlu1 %8450, %v271_v18   ;;  %295 = vperm.xlu0 %8452, %v284_v19   ;;  %v9502_v18 = vsel %vm735_vm5, 1.0, %v14704_v22 }
 0x12e   :  { %8300 = vmatmul.msk.f32.gmra.mxu3 %vm14759_vm6, %v9422_v20  ;;  %14946 = vst [vmem:[#allocation44_spill] sm:$0xff] %v9502_v18 }
 0x131   :  { %v9428_v25 = vpop.f32.mrf.mxu3 }
 0x134   :  { %289 = vperm.xlu2 %8447, %v284_v19   ;;  %v703_v19 = vadd.s32 192, %v9228_v11 }
 0x135   :  { %8454 = vset.pattern.permute.xlu0 %v9228_v11  ;;  %8458 = vset.pattern.permute.xlu1 %v9228_v11 }
 0x136   :  { %8301 = vmatmul.msk.f32.gmra.mxu3 %vm14759_vm6, %v9431_v26  ;;  %vm736_vm7 = vcmp.eq.s32.totalorder %v703_v19, %v9254_v29 }
 0x139   :  { %v9439_v33 = vpop.f32.mrf.mxu3 }
 0x13c   :  { %302 = vperm.xlu2 %8447, %v297_v34  }
 0x13d   :  { %315 = vperm.xlu0 %8454, %v310_v36  }
 0x13e   :  { %8302 = vmatmul.msk.f32.gmra.mxu3 %vm14759_vm6, %v9444_v38 }
 0x141   :  { %v9450_v42 = vpop.f32.mrf.mxu3 }
 0x144   :  { %8453 = vset.pattern.permute.xlu2 %v9231_v12 }
 0x145   :  { %8456 = vset.pattern.permute.xlu0 %v9231_v12 }
 0x146   :  { %8303 = vmatmul.msk.f32.gmra.mxu3 %vm14759_vm6, %v9455_v43 }
 0x149   :  { %v9468_v50 = vpop.f32.mrf.mxu3 }
 0x14c   :  { %308 = vperm.xlu2 %8453, %v297_v34   ;;  %v9515_v34 = vsel %vm736_vm7, 1.0, %v14704_v22 }
 0x14d   :  { %334 = vperm.xlu0 %8456, %v323_v56   ;;  %14947 = vst [vmem:[#allocation45_spill] sm:$0xff] %v9515_v34 }
 0x14e   :  { %8304 = vmatmul.msk.f32.gmra.mxu3 %vm14759_vm6, %v9474_v59  ;;  %v710_v59 = vadd.s32 248, %v9228_v11 }
 0x150   :  { %vm743_vm0 = vcmp.eq.s32.totalorder %v710_v59, %v9254_v29 }
 0x151   :  { %v9486_v3 = vpop.f32.mrf.mxu3 }
 0x154   :  { %321 = vperm.xlu2 %8453, %v310_v36   ;;  %v704_v36 = vadd.s32 200, %v9228_v11 }
 0x155   :  { %373 = vperm.xlu0 %8456, %v362_v5  }
 0x156   :  { %8305 = vmatmul.msk.f32.gmra.mxu3 %vm14759_vm6, %v9490_v6  ;;  %vm737_vm8 = vcmp.eq.s32.totalorder %v704_v36, %v9254_v29  ;;  %v706_v36 = vadd.s32 216, %v9228_v11  ;;  %v14956_v6 = vperm.slane %v9481_v2, 3 }
 0x157   :  { %1053 = vadd.xlane.f32.xlu1 %v1052_v8  ;;  %v9527_v1 = vsel %vm737_vm8, 1.0, %v14704_v22 }
 0x158   :  { %14948 = vst [vmem:[#allocation46_spill] sm:$0xff] %v9527_v1  ;;  %vm739_vm11 = vcmp.eq.s32.totalorder %v706_v36, %v9254_v29  ;;  %v14702_v36 = vperm.slane %v9481_v2, 4 }
 0x159   :  { %v9498_v14 = vpop.f32.mrf.mxu3  ;;  %v9556_v52 = vsel %vm739_vm11, 1.0, %v14704_v22 }
 0x15a   :  { %14950 = vst [vmem:[#allocation48_spill] sm:$0xff] %v9556_v52 }
 0x15c   :  { %8455 = vset.pattern.permute.xlu2 %v9228_v11 }
 0x15d   :  { %347 = vperm.xlu0 %8456, %v14700_v16  }
 0x15e   :  { %8306 = vmatmul.msk.f32.gmra.mxu3 %vm14759_vm6, %v9502_v18 }
 0x161   :  { %v9511_v23 = vpop.f32.mrf.mxu3 }
 0x164   :  { %328 = vperm.xlu2 %8455, %v323_v56   ;;  %v705_v56 = vadd.s32 208, %v9228_v11 }
 0x165   :  { %386 = vperm.xlu0 %8456, %v14699_v28   ;;  %v708_v28 = vadd.s32 232, %v9228_v11 }
 0x166   :  { %8307 = vmatmul.msk.f32.gmra.mxu3 %vm14759_vm6, %v9515_v34  ;;  %vm738_vm10 = vcmp.eq.s32.totalorder %v705_v56, %v9254_v29  ;;  %v675_v56 = vpop.f32.mrf.mxu2  ;;  %v14715_v34 = vperm.slane %v9481_v2, 6 }
 0x167   :  { %v9538_v19 = vsel %vm738_vm10, 1.0, %v14704_v22  ;;  %vm741_vm13 = vcmp.eq.s32.totalorder %v708_v28, %v9254_v29  ;;  %v709_v28 = vadd.s32 240, %v9228_v11 }
 0x168   :  { %14949 = vst [vmem:[#allocation47_spill] sm:$0xff] %v9538_v19 }
 0x169   :  { %v9524_v45 = vpop.f32.mrf.mxu3  ;;  %vm742_vm15 = vcmp.eq.s32.totalorder %v709_v28, %v9254_v29 }
 0x16c   :  { %354 = vperm.xlu2 %8455, %v349_v40  }
 0x16d   :  { %8461 = vset.pattern.permute.xlu0 %v9228_v11 }
 0x16e   :  { %8308 = vmatmul.msk.f32.gmra.mxu3 %vm14759_vm6, %v9527_v1 }
 0x170   :  { %367 = vperm.xlu1 %8458, %v362_v5   ;;  %v9546_v5 = vld [vmem:[#allocation2 + $0x2c] ss:$0 sm:$0xff] }
 0x171   :  { %v9534_v8 = vpop.f32.mrf.mxu3  ;;  %v9553_v60 = vadd.f32 %v9546_v5, %v675_v56  ;;  %v9571_v56 = vsel %vm740_vm12, 1.0, %v14704_v22 }
 0x172   :  { %14951 = vst [vmem:[#allocation49_spill] sm:$0xff] %v9571_v56 }
 0x174   :  { %8457 = vset.pattern.permute.xlu2 %v9231_v12 }
 0x175   :  { %406 = vperm.xlu0 %8461, %v14698_v9   ;;  %v427_v9 = vperm.slane %v9481_v2, 7 }
 0x176   :  { %8309 = vmatmul.msk.f32.gmra.mxu3 %vm14759_vm6, %v9538_v19  ;;  %v14952_v19 = vmov 0.0  }
 0x177   :  { %v9668_v29 = vsel %vm743_vm0, 1.0, %v14952_v19 }
 0x178   :  { %8460 = vset.pattern.permute.xlu1 %v9231_v12  ;;  %14957 = vst [vmem:[#allocation52_spill] sm:$0xff] %v9668_v29 }
 0x179   :  { %v9550_v54 = vpop.f32.mrf.mxu3 }
 0x17c   :  { %360 = vperm.xlu2 %8457, %v349_v40  }
 0x17d   :  { %8486 = vset.pattern.permute.xlu0 %v9231_v12 }
 0x17e   :  { %1847 = vrot.lane.b32.xlu0 %v9553_v60, %s9145_s0  ;;  %8310 = vmatmul.msk.f32.gmra.mxu3 %vm14759_vm6, %v9556_v52 }
 0x17f   :  { %v1051_v0 = vpop.xlane.xlu2 %1050  ;;  %v264_v48 = vpop.permute.xlu1 %263 }
 0x180   :  { %399 = vperm.xlu1 %8460, %v14702_v36   ;;  %v9576_v16 = vmax.f32 %v1051_v0, 1.0  ;;  %v257_v36 = vpop.permute.xlu0 %256 }
 0x181   :  { %v9568_v40 = vpop.f32.mrf.mxu3  ;;  %v9588_v52 = vmul.f32 %v9450_v42, %v257_v36  ;;  %v9605_v42 = vmul.f32 %v9468_v50, %v264_v48 }
 0x182   :  { %v9591_v0 = vrot.slane %v9576_v16, 1  ;;  %v9602_v1 = vrot.slane %v9576_v16, 2  ;;  %v9622_v48 = vrot.slane %v9576_v16, 3  ;;  %v1243_v58 = vand.u32 2147483647, %v9576_v16 }
 0x183   :  { %v1066_v36 = vsel %vm14857_vm14, %v9588_v52, 0.0  ;;  %v1245_v55 = vand.u32 2147483648, %v9576_v16  ;;  %vm1239_vm2 = vweird.f32 %v9576_v16 }
 0x184   :  { %8459 = vset.pattern.permute.xlu2 %v9228_v11  ;;  %8807 = vrcp.f32 %v9591_v0  ;;  %vm1254_vm1 = vweird.f32 %v9591_v0  ;;  %v1273_v49 = vand.u32 2147483647, %v9602_v1  ;;  %vm1269_vm3 = vweird.f32 %v9602_v1 }
 0x185   :  { %8809 = vrcp.f32 %v9576_v16  ;;  %vm9725_vm11 = vcmp.eq.f32.partialorder %v1243_v58, 8.507059e+37  ;;  %vm1284_vm0 = vweird.f32 %v9622_v48 }
 0x186   :  { %438 = vperm.xlu0 %8486, %v427_v9   ;;  %8311 = vmatmul.msk.f32.gmra.mxu3 %vm14759_vm6, %v9571_v56  ;;  %v9594_v56 = vsel %vm741_vm13, 1.0, %v14952_v19  ;;  %8811 = vrcp.f32 %v9602_v1 }
 0x187   :  { %v251_v62 = vpop.permute.xlu2 %250  ;;  %14953 = vst [vmem:[#allocation50_spill] sm:$0xff] %v9594_v56  ;;  %8813 = vrcp.f32 %v9622_v48 }
 0x188   :  { %v9581_v61 = vmul.f32 %v9439_v33, %v251_v62  ;;  %8463 = vset.pattern.permute.xlu1 %v9228_v11  ;;  %v14954_v62 = vperm.slane %v9481_v2, 0 }
 0x189   :  { %v9585_v22 = vpop.f32.mrf.mxu3 }
 0x18a   :  { %v1065_v33 = vsel %vm14857_vm14, %v9581_v61, 0.0  ;;  %v9634_v28 = vpop.eup %8807 }
 0x18b   :  { %v9640_v43 = vpop.eup %8809  ;;  %vm1255_vm4 = vweird.f32 %v9634_v28 }
 0x18c   :  { %341 = vperm.xlu2 %8459, %v14954_v62   ;;  %v1067_v62 = vadd.f32 %v1066_v36, %v1065_v33  ;;  %v1074_v33 = vsel %vm14857_vm14, %v9605_v42, 0.0  ;;  %v1235_v15 = vmul.f32 %v9640_v43, %v9576_v16  ;;  %vm1240_vm7 = vweird.f32 %v9640_v43  ;;  %vm9719_vm8 = vmor %vm1254_vm1, %vm1255_vm4 }
 0x18d   :  { %vm9734_vm12 = vmor %vm1239_vm2, %vm1240_vm7  ;;  %vm1274_vm1 = vcmp.eq.f32.partialorder %v1273_v49, 8.507059e+37  ;;  %vm1705_vm7 = vcmask 1043459  }
 0x18e   :  { %8312 = vmatmul.msk.f32.gmra.mxu3 %vm14759_vm6, %v9594_v56  ;;  %8522 = vset.pattern.permute.xlu0 %v9228_v11  ;;  %v1236_v59 = vsub.f32 1.0, %v1235_v15 }
 0x18f   :  { %v270_v13 = vpop.permute.xlu1 %269  ;;  %v238_v56 = vpop.permute.xlu0 %237 }
 0x190   :  { %v9616_v18 = vmul.f32 %v9486_v3, %v270_v13  ;;  %419 = vperm.xlu1 %8463, %v14715_v34   ;;  %v1068_v13 = vrot.slane %v1067_v62, 4  ;;  %v9632_v34 = vsel %vm742_vm15, 1.0, %v14952_v19  ;;  %v9643_v26 = vmul.f32 %v9417_v17, %v238_v56 }
 0x191   :  { %v9625_v50 = vpop.f32.mrf.mxu3  ;;  %14955 = vst [vmem:[#allocation51_spill] sm:$0xff] %v9632_v34 }
 0x192   :  { %v1075_v36 = vsel %vm14857_vm14, %v9616_v18, 0.0  ;;  %v1069_v20 = vadd.f32 %v1068_v13, %v1067_v62  ;;  %v1056_v62 = vsel %vm14857_vm14, %v9643_v26, 0.0 }
 0x193   :  { %v1076_v3 = vadd.f32 %v1075_v36, %v1074_v33  ;;  %v9647_v33 = vpop.eup %8811  ;;  %v1250_v36 = vmul.f32 %v9634_v28, %v9591_v0 }
 0x194   :  { %380 = vperm.xlu2 %8459, %v14956_v6   ;;  %v9659_v56 = vpop.eup %8813  ;;  %vm1270_vm10 = vweird.f32 %v9647_v33 }
 0x195   :  { %v1077_v38 = vrot.slane %v1076_v3, 4  ;;  %v1251_v4 = vsub.f32 1.0, %v1250_v36  ;;  %v1280_v36 = vmul.f32 %v9659_v56, %v9622_v48  ;;  %vm9746_vm13 = vmor %vm1269_vm3, %vm1270_vm10  ;;  %vm1285_vm15 = vweird.f32 %v9659_v56 }
 0x196   :  { %8313 = vmatmul.msk.f32.gmra.mxu3 %vm14759_vm6, %v9632_v34  ;;  %v1265_v34 = vmul.f32 %v9647_v33, %v9602_v1  ;;  %vm1286_vm2 = vmor %vm1284_vm0, %vm1285_vm15  ;;  %vm1699_vm3 = vcmask 1041409  }
 0x197   :  { %v244_v6 = vpop.permute.xlu1 %243  ;;  %v1078_v7 = vadd.f32 %v1077_v38, %v1076_v3  ;;  %v14958_v38 = vperm.slane %v9481_v2, 4  ;;  %v1258_v3 = vand.u32 2147483647, %v9591_v0 }
 0x198   :  { %v9654_v10 = vmul.f32 %v9428_v25, %v244_v6  ;;  %432 = vperm.xlu1 %8463, %v427_v9   ;;  %v1070_v25 = vrot.slane %v1069_v20, 2  ;;  %v277_v6 = vpop.permute.xlu2 %276 }
 0x199   :  { %v9657_v17 = vpop.f32.mrf.mxu3  ;;  %v1079_v19 = vrot.slane %v1078_v7, 2  ;;  %v9680_v15 = vmul.f32 %v9498_v14, %v277_v6  ;;  %v1474_v14 = vperm.slane %v9358_v57, 0  ;;  %v1487_v6 = vperm.slane %v9358_v57, 1 }
 0x19a   :  { %v1057_v13 = vsel %vm14857_vm14, %v9654_v10, 0.0  ;;  %v1071_v51 = vadd.f32 %v1070_v25, %v1069_v20  ;;  %vm9705_vm5 = vcmp.eq.f32.partialorder %v1258_v3, 8.507059e+37 }
 0x19b   :  { %v1058_v9 = vadd.f32 %v1057_v13, %v1056_v62  ;;  %v1260_v62 = vand.u32 2147483648, %v9591_v0  ;;  %v1266_v13 = vsub.f32 1.0, %v1265_v34  ;;  %v1237_v34 = vmul.f32 %v9640_v43, %v1236_v59 }
 0x19c   :  { %393 = vperm.xlu2 %8459, %v14958_v38   ;;  %v1252_v38 = vmul.f32 %v9634_v28, %v1251_v4  ;;  %v1275_v4 = vand.u32 2147483648, %v9602_v1  ;;  %v1080_v59 = vadd.f32 %v1079_v19, %v1078_v7  ;;  %v1072_v39 = vrot.slane %v1071_v51, 1 }
 0x19d   :  { %v1059_v53 = vrot.slane %v1058_v9, 4  ;;  %v9712_v7 = vpack.i.bf16 %v1487_v6, %v1474_v14  ;;  %v1261_v19 = vor.u32 1.1754944e-38, %v1260_v62 }
 0x19e   :  { %8314 = vmatmul.msk.f32.gmra.mxu3 %vm14759_vm6, %v9668_v29  ;;  %v1253_v29 = vadd.f32 %v9634_v28, %v1252_v38  ;;  %v1073_v6 = vadd.f32 %v1072_v39, %v1071_v51 }
 0x19f   :  { %v1060_v47 = vadd.f32 %v1059_v53, %v1058_v9  ;;  %v283_v44 = vpop.permute.xlu1 %282  ;;  %v1281_v53 = vsub.f32 1.0, %v1280_v36  ;;  %v1267_v9 = vmul.f32 %v9647_v33, %v1266_v13  ;;  %v1238_v36 = vadd.f32 %v9640_v43, %v1237_v34 }
 0x1a0   :  { %v9690_v41 = vmul.f32 %v9511_v23, %v283_v44  ;;  %8470 = vset.pattern.permute.xlu1 %v9231_v12  ;;  %v1083_v44 = vsel %vm14857_vm14, %v9680_v15, 0.0  ;;  %v1081_v34 = vrot.slane %v1080_v59, 1  ;;  %v1257_v62 = vsel %vm9719_vm8, %v9634_v28, %v1253_v29 }
 0x1a1   :  { %v1061_v20 = vrot.slane %v1060_v47, 2  ;;  %v9697_v25 = vpop.f32.mrf.mxu3  ;;  %v1282_v31 = vmul.f32 %v9659_v56, %v1281_v53  ;;  %v1268_v3 = vadd.f32 %v9647_v33, %v1267_v9  ;;  %v1276_v9 = vor.u32 1.1754944e-38, %v1275_v4 }
 0x1a2   :  { %v1084_v23 = vsel %vm14857_vm14, %v9690_v41, 0.0  ;;  %v1242_v58 = vsel %vm9734_vm12, %v9640_v43, %v1238_v36  ;;  %v1513_v28 = vperm.slane %v9358_v57, 3  ;;  %v1262_v43 = vsel %vm9705_vm5, %v1261_v19, %v1257_v62 }
 0x1a3   :  { %v1062_v37 = vadd.f32 %v1061_v20, %v1060_v47  ;;  %v1085_v35 = vadd.f32 %v1084_v23, %v1083_v44  ;;  %v1246_v20 = vor.u32 1.1754944e-38, %v1245_v55  ;;  %v1500_v44 = vperm.slane %v9358_v57, 2 }
 0x1a4   :  { %8462 = vset.pattern.permute.xlu2 %v9231_v12  ;;  %v1272_v4 = vsel %vm9746_vm13, %v9647_v33, %v1268_v3  ;;  %v1082_v1 = vadd.f32 %v1081_v34, %v1080_v59  ;;  %v1290_v23 = vand.u32 2147483648, %v9622_v48  ;;  %v1263_v36 = vmul.f32 %v1262_v43, %v1073_v6 }
 0x1a5   :  { %v1063_v13 = vrot.slane %v1062_v37, 1  ;;  %v1086_v38 = vrot.slane %v1085_v35, 4  ;;  %v8481_v19 = vpack.i.bf16 %v1513_v28, %v1500_v44  ;;  %v1277_v33 = vsel %vm1274_vm1, %v1276_v9, %v1272_v4  ;;  %v678_v9 = vpop.f32.mrf.mxu2 }
 0x1a6   :  { %v1278_v34 = vmul.f32 %v1277_v33, %v1082_v1  ;;  %v1291_v62 = vor.u32 1.1754944e-38, %v1290_v23  ;;  %v1698_v6 = vrot.slane %v1263_v36, 7  ;;  %vm1702_vm5 = vcmask 1042434   ;;  %v296_v23 = vpop.permute.xlu0 %295 }
 0x1a7   :  { %v1087_v53 = vadd.f32 %v1086_v38, %v1085_v35  ;;  %v1064_v51 = vadd.f32 %v1063_v13, %v1062_v37  ;;  %v1283_v35 = vadd.f32 %v9659_v56, %v1282_v31  ;;  %v290_v38 = vpop.permute.xlu2 %289  ;;  %v1288_v31 = vand.u32 2147483647, %v9622_v48 }
 0x1a8   :  { %8472 = vperm.xlu1 %8470, %v9712_v7   ;;  %v1247_v13 = vsel %vm9725_vm11, %v1246_v20, %v1242_v58  ;;  %v14970_v44 = vperm.slane %v9481_v2, 6  ;;  %v1539_v43 = vperm.slane %v9358_v57, 5 }
 0x1a9   :  { %v1088_v55 = vrot.slane %v1087_v53, 2  ;;  %v9752_v29 = vpop.f32.mrf.mxu3  ;;  %v1248_v59 = vmul.f32 %v1247_v13, %v1064_v51  ;;  %v1287_v47 = vsel %vm1286_vm2, %v9659_v56, %v1283_v35  ;;  %vm1289_vm4 = vcmp.eq.f32.partialorder %v1288_v31, 8.507059e+37 }
 0x1aa   :  { %v1292_v49 = vsel %vm1289_vm4, %v1291_v62, %v1287_v47  ;;  %v9777_v51 = vadd.f32 %v9546_v5, %v678_v9  ;;  %v9796_v13 = vmul.f32 %v9534_v8, %v296_v23 }
 0x1ab   :  { %v1089_v37 = vadd.f32 %v1088_v55, %v1087_v53  ;;  %v1700_v14 = vsel %vm1699_vm3, %v1698_v6, %v1248_v59  ;;  %v1701_v53 = vrot.slane %v1278_v34, 6  ;;  %v1526_v55 = vperm.slane %v9358_v57, 4 }
 0x1ac   :  { %412 = vperm.xlu2 %8462, %v14969_v32   ;;  %14971 = vst [vmem:[#allocation53_spill] sm:$0xff] %v9777_v51  ;;  %v9799_v32 = vrot.slane %v9576_v16, 4  ;;  %v1093_v62 = vsel %vm14857_vm14, %v9796_v13, 0.0 }
 0x1ad   :  { %v1090_v3 = vrot.slane %v1089_v37, 1  ;;  %v1703_v56 = vsel %vm1702_vm5, %v1701_v53, %v1700_v14  ;;  %v9787_v4 = vpack.i.bf16 %v1539_v43, %v1526_v55 }
 0x1ae   :  { %8815 = vrcp.f32 %v9799_v32  ;;  %vm1299_vm8 = vweird.f32 %v9799_v32  ;;  %v1305_v63 = vand.u32 2147483648, %v9799_v32 }
 0x1af   :  { %v1091_v48 = vadd.f32 %v1090_v3, %v1089_v37  ;;  %v303_v28 = vpop.permute.xlu2 %302  ;;  %v316_v37 = vpop.permute.xlu0 %315  ;;  %v9810_v3 = vrot.slane %v9576_v16, 5 }
 0x1b0   :  { %8482 = vperm.xlu1 %8470, %v8481_v19   ;;  %v9816_v8 = vmul.f32 %v9585_v22, %v316_v37  ;;  %v9819_v34 = vmul.f32 %v9550_v54, %v303_v28 }
 0x1b1   :  { %v1293_v0 = vmul.f32 %v1292_v49, %v1091_v48  ;;  %v9768_v20 = vpop.f32.mrf.mxu3  ;;  %8817 = vrcp.f32 %v9810_v3  ;;  %vm1314_vm11 = vweird.f32 %v9810_v3 }
 0x1b2   :  { %14974 = vst [vmem:[#allocation56_spill] sm:$0xff] %v9816_v8  ;;  %v1101_v6 = vsel %vm14857_vm14, %v9819_v34, 0.0 }
 0x1b3   :  { %v1704_v58 = vrot.slane %v1293_v0, 5  ;;  %14975 = vst [vmem:[#allocation57_spill] sm:$0xff] %v9819_v34 }
 0x1b4   :  { %425 = vperm.xlu2 %8462, %v14970_v44   ;;  %v9851_v44 = vrot.slane %v9576_v16, 7 }
 0x1b5   :  { %v9774_v39 = vsel %vm1705_vm7, %v1704_v58, %v1703_v56  ;;  %v9848_v58 = vpop.eup %8815 }
 0x1b6   :  { %vm1300_vm10 = vweird.f32 %v9848_v58 }
 0x1b7   :  { %v309_v1 = vpop.permute.xlu2 %308  ;;  %v9855_v55 = vpop.eup %8817  ;;  %vm9902_vm15 = vmor %vm1299_vm8, %vm1300_vm10 }
 0x1b8   :  { %8487 = vset.pattern.permute.xlu1 %v9228_v11  ;;  %v9802_v33 = vmul.f32 %v9568_v40, %v309_v1  ;;  %v9822_v40 = vrot.slane %v9576_v16, 6  ;;  %v1310_v16 = vmul.f32 %v9855_v55, %v9810_v3  ;;  %vm1315_vm12 = vweird.f32 %v9855_v55 }
 0x1b9   :  { %1849 = vrot.lane.b32.xlu1 %v9777_v51, %s9145_s0  ;;  %v9782_v35 = vpop.f32.mrf.mxu3  ;;  %vm9913_vm0 = vmor %vm1314_vm11, %vm1315_vm12  ;;  %vm1344_vm12 = vweird.f32 %v9851_v44 }
 0x1ba   :  { %14972 = vst [vmem:[#allocation54_spill] sm:$0xff] %v9802_v33  ;;  %8819 = vrcp.f32 %v9822_v40  ;;  %vm1329_vm1 = vweird.f32 %v9822_v40 }
 0x1bb   :  { %8821 = vrcp.f32 %v9851_v44 }
 0x1bc   :  { %8464 = vset.pattern.permute.xlu2 %v9228_v11 }
 0x1bf   :  { %v322_v36 = vpop.permute.xlu2 %321 }
 0x1c0   :  { %v9857_v1 = vpop.eup %8819 }
 0x1c1   :  { %8489 = vperm.xlu1 %8487, %v9787_v4   ;;  %v9790_v5 = vpop.f32.mrf.mxu3  ;;  %v9874_v30 = vpop.eup %8821  ;;  %vm1330_vm13 = vweird.f32 %v9857_v1 }
 0x1c2   :  { %vm9931_vm2 = vmor %vm1329_vm1, %vm1330_vm13  ;;  %vm1345_vm11 = vweird.f32 %v9874_v30  ;;  %vm14901_vm1 = vcmask 1046534  }
 0x1c3   :  { %vm9959_vm13 = vmor %vm1344_vm12, %vm1345_vm11 }
 0x1c4   :  { %8466 = vperm.xlu2 %8464, %v9712_v7   ;;  %v9807_v7 = vmul.f32 %v9524_v45, %v290_v38  ;;  %v1102_v45 = vsel %vm14857_vm14, %v9802_v33, 0.0  ;;  %v335_v38 = vpop.permute.xlu0 %334 }
 0x1c5   :  { %v1103_v49 = vadd.f32 %v1102_v45, %v1101_v6  ;;  %v9844_v53 = vmul.f32 %v9697_v25, %v335_v38  ;;  %v1311_v6 = vsub.f32 1.0, %v1310_v16 }
 0x1c6   :  { %v1092_v22 = vsel %vm14857_vm14, %v9807_v7, 0.0 }
 0x1c7   :  { %v329_v59 = vpop.permute.xlu2 %328  ;;  %v1094_v48 = vadd.f32 %v1093_v62, %v1092_v22  ;;  %14977 = vst [vmem:[#allocation59_spill] sm:$0xff] %v9844_v53  ;;  %v1104_v43 = vrot.slane %v1103_v49, 4  ;;  %v1120_v23 = vsel %vm14857_vm14, %v9844_v53, 0.0  ;;  %v1325_v62 = vmul.f32 %v9857_v1, %v9822_v40 }
 0x1c8   :  { %v9841_v0 = vmul.f32 %v9657_v17, %v329_v59 }
 0x1c9   :  { %v9793_v31 = vpop.f32.mrf.mxu3  ;;  %v1095_v56 = vrot.slane %v1094_v48, 4  ;;  %v1105_v59 = vadd.f32 %v1104_v43, %v1103_v49 }
 0x1ca   :  { %14976 = vst [vmem:[#allocation58_spill] sm:$0xff] %v9841_v0  ;;  %v1119_v25 = vsel %vm14857_vm14, %v9841_v0, 0.0  ;;  %v1054_v21 = vpop.xlane.xlu1 %1053 }
 0x1cb   :  { %v1096_v37 = vadd.f32 %v1095_v56, %v1094_v48  ;;  %v1121_v45 = vadd.f32 %v1120_v23, %v1119_v25  ;;  %v1106_v48 = vrot.slane %v1105_v59, 2  ;;  %v1326_v56 = vsub.f32 1.0, %v1325_v62 }
 0x1cc   :  { %8477 = vperm.xlu2 %8464, %v8481_v19   ;;  %v9813_v19 = vmul.f32 %v9625_v50, %v322_v36  ;;  %v1110_v50 = vsel %vm14857_vm14, %v9816_v8, 0.0  ;;  %v1295_v36 = vmul.f32 %v9848_v58, %v9799_v32  ;;  %v9877_v43 = vmax.f32 %v1054_v21, 1.0  ;;  %v9909_v0 = vpop.permute.xlu0 %373 }
 0x1cd   :  { %v1097_v38 = vrot.slane %v1096_v37, 2  ;;  %v1122_v27 = vrot.slane %v1121_v45, 4  ;;  %v1327_v23 = vmul.f32 %v9857_v1, %v1326_v56  ;;  %v1303_v62 = vand.u32 2147483647, %v9799_v32 }
 0x1ce   :  { %14973 = vst [vmem:[#allocation55_spill] sm:$0xff] %v9813_v19  ;;  %v1111_v54 = vsel %vm14857_vm14, %v9813_v19, 0.0  ;;  %v1318_v56 = vand.u32 2147483647, %v9810_v3  ;;  %v1333_v32 = vand.u32 2147483647, %v9822_v40  ;;  %vm1359_vm9 = vweird.f32 %v9877_v43 }
 0x1cf   :  { %v1112_v14 = vadd.f32 %v1111_v54, %v1110_v50  ;;  %v9853_v28 = vpop.permute.xlu2 %354  ;;  %v1296_v50 = vsub.f32 1.0, %v1295_v36  ;;  %v1098_v25 = vadd.f32 %v1097_v38, %v1096_v37  ;;  %v1340_v36 = vmul.f32 %v9874_v30, %v9851_v44 }
 0x1d0   :  { %v1123_v16 = vadd.f32 %v1122_v27, %v1121_v45  ;;  %v9892_v37 = vrot.slane %v9877_v43, 1  ;;  %v1306_v19 = vor.u32 1.1754944e-38, %v1305_v63  ;;  %vm1304_vm4 = vcmp.eq.f32.partialorder %v1303_v62, 8.507059e+37 }
 0x1d1   :  { %v9804_v47 = vpop.f32.mrf.mxu3  ;;  %v1113_v17 = vrot.slane %v1112_v14, 4  ;;  %v1297_v49 = vmul.f32 %v9848_v58, %v1296_v50  ;;  %v1341_v38 = vsub.f32 1.0, %v1340_v36  ;;  %v9921_v36 = vrot.slane %v9877_v43, 2 }
 0x1d2   :  { %8823 = vrcp.f32 %v9892_v37  ;;  %vm1319_vm8 = vcmp.eq.f32.partialorder %v1318_v56, 8.507059e+37  ;;  %vm1334_vm10 = vcmp.eq.f32.partialorder %v1333_v32, 8.507059e+37 }
 0x1d3   :  { %v1114_v22 = vadd.f32 %v1113_v17, %v1112_v14  ;;  %v1312_v14 = vmul.f32 %v9855_v55, %v1311_v6  ;;  %v1107_v17 = vadd.f32 %v1106_v48, %v1105_v59  ;;  %v1298_v21 = vadd.f32 %v9848_v58, %v1297_v49 }
 0x1d4   :  { %8493 = vset.pattern.permute.xlu2 %v9231_v12  ;;  %v1099_v59 = vrot.slane %v1098_v25, 1  ;;  %v1124_v6 = vrot.slane %v1123_v16, 2  ;;  %v1320_v49 = vand.u32 2147483648, %v9810_v3  ;;  %v1342_v48 = vmul.f32 %v9874_v30, %v1341_v38 }
 0x1d5   :  { %v1115_v2 = vrot.slane %v1114_v22, 2  ;;  %v1313_v27 = vadd.f32 %v9855_v55, %v1312_v14  ;;  %v1335_v14 = vand.u32 2147483648, %v9822_v40  ;;  %v1302_v8 = vsel %vm9902_vm15, %v9848_v58, %v1298_v21 }
 0x1d6   :  { %v1100_v33 = vadd.f32 %v1099_v59, %v1098_v25  ;;  %v1125_v58 = vadd.f32 %v1124_v6, %v1123_v16  ;;  %v1321_v63 = vor.u32 1.1754944e-38, %v1320_v49  ;;  %8825 = vrcp.f32 %v9921_v36  ;;  %v348_v6 = vpop.permute.xlu0 %347 }
 0x1d7   :  { %v9872_v24 = vpop.permute.xlu2 %360  ;;  %v1116_v51 = vadd.f32 %v1115_v2, %v1114_v22  ;;  %v1108_v2 = vrot.slane %v1107_v17, 1  ;;  %v1328_v22 = vadd.f32 %v9857_v1, %v1327_v23  ;;  %v1317_v3 = vsel %vm9913_vm0, %v9855_v55, %v1313_v27 }
 0x1d8   :  { %v1336_v25 = vor.u32 1.1754944e-38, %v1335_v14  ;;  %v1307_v55 = vsel %vm1304_vm4, %v1306_v19, %v1302_v8  ;;  %v9944_v34 = vmul.f32 %v9790_v5, %v9872_v24  ;;  %v1343_v62 = vadd.f32 %v9874_v30, %v1342_v48 }
 0x1d9   :  { %v9846_v9 = vpop.f32.mrf.mxu3  ;;  %v1117_v53 = vrot.slane %v1116_v51, 1  ;;  %v1109_v40 = vadd.f32 %v1108_v2, %v1107_v17  ;;  %v1332_v46 = vsel %vm9931_vm2, %v9857_v1, %v1328_v22  ;;  %v1308_v27 = vmul.f32 %v1307_v55, %v1100_v33  ;;  %v9946_v1 = vpop.eup %8823 }
 0x1da   :  { %v1322_v17 = vsel %vm1319_vm8, %v1321_v63, %v1317_v3  ;;  %v1337_v2 = vsel %vm1334_vm10, %v1336_v25, %v1332_v46  ;;  %14984 = vst [vmem:[#allocation60_spill] sm:$0xff] %v9944_v34  ;;  %v1350_v8 = vand.u32 2147483648, %v9851_v44  ;;  %v9953_v33 = vmul.f32 %v9782_v35, %v9853_v28 }
 0x1db   :  { %v1118_v21 = vadd.f32 %v1117_v53, %v1116_v51  ;;  %v1323_v16 = vmul.f32 %v1322_v17, %v1109_v40  ;;  %v1126_v51 = vrot.slane %v1125_v58, 1  ;;  %v1348_v24 = vand.u32 2147483647, %v9851_v44 }
 0x1dc   :  { %v1707_v5 = vrot.slane %v1308_v27, 4  ;;  %v1370_v22 = vmul.f32 %v9946_v1, %v9892_v37  ;;  %v1138_v38 = vsel %vm14857_vm14, %v9944_v34, 0.0  ;;  %8827 = vrcp.f32 %v9877_v43  ;;  %v9968_v35 = vpop.eup %8825 }
 0x1dd   :  { %v1338_v19 = vmul.f32 %v1337_v2, %v1118_v21  ;;  %vm1708_vm15 = vcmask 1044484   ;;  %v1710_v28 = vrot.slane %v1323_v16, 3  ;;  %v1347_v44 = vsel %vm9959_vm13, %v9874_v30, %v1343_v62 }
 0x1de   :  { %v1127_v56 = vadd.f32 %v1126_v51, %v1125_v58  ;;  %vm14902_vm0 = vcmask 1045509   ;;  %v1351_v23 = vor.u32 1.1754944e-38, %v1350_v8  ;;  %v1137_v32 = vsel %vm14857_vm14, %v9953_v33, 0.0 }
 0x1df   :  { %v1713_v14 = vrot.slane %v1338_v19, 2  ;;  %vm1349_vm2 = vcmp.eq.f32.partialorder %v1348_v24, 8.507059e+37  ;;  %v1139_v40 = vadd.f32 %v1138_v38, %v1137_v32  ;;  %v9978_v48 = vrot.slane %v9877_v43, 3 }
 0x1e0   :  { %v1709_v63 = vsel %vm1708_vm15, %v1707_v5, %v9774_v39  ;;  %v1352_v30 = vsel %vm1349_vm2, %v1351_v23, %v1347_v44  ;;  %v1371_v58 = vsub.f32 1.0, %v1370_v22  ;;  %v1385_v25 = vmul.f32 %v9968_v35, %v9921_v36  ;;  %v387_v44 = vpop.permute.xlu0 %386 }
 0x1e1   :  { %v9870_v54 = vpop.f32.mrf.mxu3  ;;  %v1712_v21 = vsel %vm14902_vm0, %v1710_v28, %v1709_v63  ;;  %v1353_v55 = vmul.f32 %v1352_v30, %v1127_v56  ;;  %vm14900_vm4 = vcmask 1047559   ;;  %v1378_v2 = vand.u32 2147483647, %v9892_v37 }
 0x1e2   :  { %v368_v49 = vpop.permute.xlu1 %367  ;;  %v9985_v27 = vpop.eup %8827  ;;  %v1715_v17 = vsel %vm14901_vm1, %v1713_v14, %v1712_v21  ;;  %v1380_v16 = vand.u32 2147483648, %v9892_v37  ;;  %vm1374_vm8 = vweird.f32 %v9892_v37  ;;  %v1140_v39 = vrot.slane %v1139_v40, 4 }
 0x1e3   :  { %v9992_v62 = vmul.f32 %v9768_v20, %v348_v6  ;;  %8829 = vrcp.f32 %v9978_v48  ;;  %v1372_v51 = vmul.f32 %v9946_v1, %v1371_v58  ;;  %v1386_v19 = vsub.f32 1.0, %v1385_v25 }
 0x1e4   :  { %v1393_v8 = vand.u32 2147483647, %v9921_v36  ;;  %v1395_v24 = vand.u32 2147483648, %v9921_v36  ;;  %v1716_v53 = vrot.slane %v1353_v55, 1  ;;  %v10000_v22 = vmul.f32 %v9804_v47, %v9909_v0 }
 0x1e5   :  { %14987 = vst [vmem:[#allocation61_spill] sm:$0xff] %v9992_v62  ;;  %vm1389_vm10 = vweird.f32 %v9921_v36  ;;  %v1355_v20 = vmul.f32 %v9985_v27, %v9877_v43  ;;  %vm1375_vm11 = vweird.f32 %v9946_v1  ;;  %vm10006_vm12 = vcmp.eq.f32.partialorder %v1378_v2, 8.507059e+37 }
 0x1e6   :  { %v9897_v45 = vpop.permute.xlu2 %341  ;;  %14988 = vst [vmem:[#allocation62_spill] sm:$0xff] %v10000_v22  ;;  %v1381_v28 = vor.u32 1.1754944e-38, %v1380_v16  ;;  %v1365_v56 = vand.u32 2147483648, %v9877_v43  ;;  %v1141_v23 = vadd.f32 %v1140_v39, %v1139_v40  ;;  %v1129_v47 = vsel %vm14857_vm14, %v9992_v62, 0.0  ;;  %vm10036_vm2 = vmor %vm1374_vm8, %vm1375_vm11 }
 0x1e7   :  { %v10014_v0 = vmul.f32 %v9793_v31, %v368_v49  ;;  %v10017_v32 = vrot.slane %v9877_v43, 4  ;;  %v1373_v63 = vadd.f32 %v9946_v1, %v1372_v51  ;;  %v1387_v30 = vmul.f32 %v9968_v35, %v1386_v19 }
 0x1e8   :  { %vm10021_vm13 = vcmp.eq.f32.partialorder %v1393_v8, 8.507059e+37  ;;  %v1396_v25 = vor.u32 1.1754944e-38, %v1395_v24  ;;  %v10028_v40 = vsel %vm14900_vm4, %v1716_v53, %v1715_v17  ;;  %v1147_v31 = vsel %vm14857_vm14, %v10000_v22, 0.0 }
 0x1e9   :  { %v9886_v50 = vpop.f32.mrf.mxu3  ;;  %14991 = vst [vmem:[#allocation63_spill] sm:$0xff] %v10014_v0  ;;  %v10025_v21 = vpop.eup %8829  ;;  %v1356_v55 = vsub.f32 1.0, %v1355_v20  ;;  %vm1390_vm6 = vweird.f32 %v9968_v35  ;;  %v1363_v2 = vand.u32 2147483647, %v9877_v43  ;;  %v10043_v17 = vor.u32 1.1754944e-38, %v1365_v56 }
 0x1ea   :  { %v10047_v16 = vmul.f32 %v9752_v29, %v9897_v45  ;;  %v1142_v39 = vrot.slane %v1141_v23, 2  ;;  %v1146_v37 = vsel %vm14857_vm14, %v10014_v0, 0.0  ;;  %8831 = vrcp.f32 %v10017_v32  ;;  %vm10067_vm8 = vmor %vm1389_vm10, %vm1390_vm6 }
 0x1eb   :  { %v10053_v51 = vrot.slane %v9877_v43, 5  ;;  %v1377_v19 = vsel %vm10036_vm2, %v9946_v1, %v1373_v63  ;;  %v1388_v8 = vadd.f32 %v9968_v35, %v1387_v30  ;;  %v1400_v24 = vmul.f32 %v10025_v21, %v9978_v48 }
 0x1ec   :  { %v1357_v20 = vmul.f32 %v9985_v27, %v1356_v55  ;;  %vm1360_vm11 = vweird.f32 %v9985_v27  ;;  %v1408_v1 = vand.u32 2147483647, %v9978_v48  ;;  %v10075_v63 = vrot.slane %v9877_v43, 6 }
 0x1ed   :  { %v1128_v36 = vsel %vm14857_vm14, %v10047_v16, 0.0  ;;  %v10087_v55 = vsel %vm10006_vm12, %v1381_v28, %v1377_v19  ;;  %v1143_v22 = vadd.f32 %v1142_v39, %v1141_v23  ;;  %8833 = vrcp.f32 %v10053_v51  ;;  %vm10125_vm12 = vmor %vm1359_vm9, %vm1360_vm11 }
 0x1ee   :  { %v9955_v46 = vpop.permute.xlu2 %380  ;;  %vm1404_vm6 = vweird.f32 %v9978_v48  ;;  %vm10103_vm10 = vcmp.eq.f32.partialorder %v1363_v2, 8.507059e+37  ;;  %v1410_v23 = vand.u32 2147483648, %v9978_v48  ;;  %8835 = vrcp.f32 %v10075_v63 }
 0x1ef   :  { %v10063_v29 = vmul.f32 %v9846_v9, %v9955_v46  ;;  %v10078_v9 = vmul.f32 %v9870_v54, %v387_v44  ;;  %v1148_v46 = vadd.f32 %v1147_v31, %v1146_v37  ;;  %v1392_v54 = vsel %vm10067_vm8, %v9968_v35, %v1388_v8  ;;  %v407_v44 = vpop.permute.xlu0 %406 }
 0x1f0   :  { %v1401_v31 = vsub.f32 1.0, %v1400_v24  ;;  %v10101_v6 = vpop.eup %8831  ;;  %v1144_v2 = vrot.slane %v1143_v22, 1  ;;  %vm1405_vm9 = vweird.f32 %v10025_v21  ;;  %vm1419_vm8 = vweird.f32 %v10017_v32 }
 0x1f1   :  { %v9939_v59 = vpop.f32.mrf.mxu3  ;;  %14996 = vst [vmem:[#allocation64_spill] sm:$0xff] %v10063_v29  ;;  %v1156_v39 = vsel %vm14857_vm14, %v10078_v9, 0.0  ;;  %v1149_v37 = vrot.slane %v1148_v46, 4  ;;  %v1415_v58 = vmul.f32 %v10101_v6, %v10017_v32  ;;  %vm10174_vm2 = vmor %vm1404_vm6, %vm1405_vm9  ;;  %vm1420_vm11 = vweird.f32 %v10101_v6 }
 0x1f2   :  { %v400_v38 = vpop.permute.xlu1 %399  ;;  %14999 = vst [vmem:[#allocation65_spill] sm:$0xff] %v10078_v9  ;;  %v1402_v24 = vmul.f32 %v10025_v21, %v1401_v31 }
 0x1f3   :  { %v10139_v53 = vpop.eup %8833 }
 0x1f4   :  { %vm1435_vm9 = vweird.f32 %v10139_v53 }
 0x1f6   :  { %v394_v5 = vpop.permute.xlu2 %393 }
 0x1f7   :  { %v10083_v30 = vmul.f32 %v9886_v50, %v394_v5  ;;  %v1155_v50 = vsel %vm14857_vm14, %v10063_v29, 0.0  ;;  %v10099_v5 = vmul.f32 %v9939_v59, %v400_v38  ;;  %v1358_v59 = vadd.f32 %v9985_v27, %v1357_v20 }
 0x1f8   :  { %v1157_v19 = vadd.f32 %v1156_v39, %v1155_v50  ;;  %v1150_v50 = vadd.f32 %v1149_v37, %v1148_v46  ;;  %v1416_v37 = vsub.f32 1.0, %v1415_v58  ;;  %v1440_v29 = vand.u32 2147483648, %v10053_v51 }
 0x1f9   :  { %v9975_v3 = vpop.f32.mrf.mxu3  ;;  %15000 = vst [vmem:[#allocation66_spill] sm:$0xff] %v10083_v30  ;;  %v1164_v38 = vsel %vm14857_vm14, %v10083_v30, 0.0  ;;  %v1362_v31 = vsel %vm10125_vm12, %v9985_v27, %v1358_v59  ;;  %v1403_v27 = vadd.f32 %v10025_v21, %v1402_v24  ;;  %vm10216_vm12 = vmor %vm1419_vm8, %vm1420_vm11 }
 0x1fa   :  { %15002 = vst [vmem:[#allocation68_spill] sm:$0xff] %v10099_v5  ;;  %v10109_v35 = vmul.f32 %v9975_v3, %v407_v44 }
 0x1fc   :  { %15005 = vst [vmem:[#allocation69_spill] sm:$0xff] %v10109_v35 }
 0x201   :  { %v1002_v14 = vpop.f32.mrf.mxu3 }
 0x202   :  { %v420_v56 = vpop.permute.xlu1 %419 }
 0x206   :  { %v413_v45 = vpop.permute.xlu2 %412 }
 0x207   :  { %v10090_v0 = vmul.f32 %v1002_v14, %v413_v45  ;;  %v1130_v14 = vadd.f32 %v1129_v47, %v1128_v36  ;;  %v10119_v47 = vsel %vm10021_vm13, %v1396_v25, %v1392_v54  ;;  %v1165_v45 = vsel %vm14857_vm14, %v10099_v5, 0.0 }
 0x208   :  { %v10137_v25 = vrot.slane %v9877_v43, 7  ;;  %v1166_v36 = vadd.f32 %v1165_v45, %v1164_v38  ;;  %v1173_v54 = vsel %vm14857_vm14, %v10109_v35, 0.0  ;;  %vm10149_vm13 = vcmp.eq.f32.partialorder %v1408_v1, 8.507059e+37  ;;  %v10153_v38 = vpop.eup %8835 }
 0x209   :  { %v1005_v49 = vpop.f32.mrf.mxu3  ;;  %15001 = vst [vmem:[#allocation67_spill] sm:$0xff] %v10090_v0  ;;  %v1174_v8 = vsel %vm14857_vm14, %v10090_v0, 0.0  ;;  %v1131_v20 = vrot.slane %v1130_v14, 4  ;;  %v1145_v45 = vadd.f32 %v1144_v2, %v1143_v22  ;;  %v1158_v35 = vrot.slane %v1157_v19, 4 }
 0x20a   :  { %v10143_v44 = vmul.f32 %v1005_v49, %v420_v56  ;;  %v1175_v43 = vadd.f32 %v1174_v8, %v1173_v54  ;;  %v1423_v56 = vand.u32 2147483647, %v10017_v32  ;;  %v10156_v46 = vpop.permute.xlu1 %432  ;;  %v1430_v1 = vmul.f32 %v10139_v53, %v10053_v51 }
 0x20b   :  { %8837 = vrcp.f32 %v10137_v25  ;;  %v1132_v59 = vadd.f32 %v1131_v20, %v1130_v14  ;;  %v1167_v3 = vrot.slane %v1166_v36, 4  ;;  %v1151_v8 = vrot.slane %v1150_v50, 2 }
 0x20c   :  { %15008 = vst [vmem:[#allocation70_spill] sm:$0xff] %v10143_v44  ;;  %v1182_v22 = vsel %vm14857_vm14, %v10143_v44, 0.0  ;;  %v1176_v54 = vrot.slane %v1175_v43, 4  ;;  %v1411_v14 = vor.u32 1.1754944e-38, %v1410_v23  ;;  %v1159_v58 = vadd.f32 %v1158_v35, %v1157_v19 }
 0x20d   :  { %v1425_v20 = vand.u32 2147483648, %v10017_v32  ;;  %v1417_v44 = vmul.f32 %v10101_v6, %v1416_v37  ;;  %v1431_v48 = vsub.f32 1.0, %v1430_v1  ;;  %v10189_v30 = vmul.f32 %v10087_v55, %v1145_v45 }
 0x20e   :  { %v426_v0 = vpop.permute.xlu2 %425  ;;  %v1133_v23 = vrot.slane %v1132_v59, 2  ;;  %vm10192_vm6 = vcmp.eq.f32.partialorder %v1423_v56, 8.507059e+37  ;;  %v1168_v19 = vadd.f32 %v1167_v3, %v1166_v36  ;;  %v1177_v37 = vadd.f32 %v1176_v54, %v1175_v43 }
 0x20f   :  { %v1160_v55 = vrot.slane %v1159_v58, 2  ;;  %v1426_v45 = vor.u32 1.1754944e-38, %v1425_v20  ;;  %v1418_v34 = vadd.f32 %v10101_v6, %v1417_v44  ;;  %v1432_v36 = vmul.f32 %v10139_v53, %v1431_v48 }
 0x210   :  { %v1134_v3 = vadd.f32 %v1133_v23, %v1132_v59  ;;  %v1169_v44 = vrot.slane %v1168_v19, 2  ;;  %v10223_v54 = vor.u32 1.1754944e-38, %v1440_v29 }
 0x211   :  { %v1008_v5 = vpop.f32.mrf.mxu3  ;;  %v10196_v28 = vpop.eup %8837  ;;  %v1161_v39 = vadd.f32 %v1160_v55, %v1159_v58  ;;  %v1422_v24 = vsel %vm10216_vm12, %v10101_v6, %v1418_v34 }
 0x212   :  { %v10158_v49 = vmul.f32 %v1008_v5, %v426_v0  ;;  %v1445_v5 = vmul.f32 %v10153_v38, %v10075_v63  ;;  %v1460_v32 = vmul.f32 %v10196_v28, %v10137_v25  ;;  %v1135_v58 = vrot.slane %v1134_v3, 1 }
 0x213   :  { %v1170_v29 = vadd.f32 %v1169_v44, %v1168_v19  ;;  %v1162_v19 = vrot.slane %v1161_v39, 1  ;;  %v1427_v43 = vsel %vm10192_vm6, %v1426_v45, %v1422_v24 }
 0x214   :  { %15011 = vst [vmem:[#allocation71_spill] sm:$0xff] %v10158_v49  ;;  %v1183_v2 = vsel %vm14857_vm14, %v10158_v49, 0.0  ;;  %v1446_v1 = vsub.f32 1.0, %v1445_v5 }
 0x215   :  { %v1184_v0 = vadd.f32 %v1183_v2, %v1182_v22  ;;  %v10183_v22 = vsel %vm10103_vm10, %v10043_v17, %v1362_v31  ;;  %v10185_v2 = vpop.permute.xlu0 %1847  ;;  %v1152_v17 = vadd.f32 %v1151_v8, %v1150_v50  ;;  %v1407_v31 = vsel %vm10174_vm2, %v10025_v21, %v1403_v27 }
 0x216   :  { %vm1434_vm10 = vweird.f32 %v10053_v51  ;;  %v1455_v50 = vand.u32 2147483648, %v10075_v63  ;;  %v10210_v21 = vsel %vm10149_vm13, %v1411_v14, %v1407_v31  ;;  %v1438_v27 = vand.u32 2147483647, %v10053_v51 }
 0x217   :  { %v1185_v49 = vrot.slane %v1184_v0, 4  ;;  %v1178_v8 = vrot.slane %v1177_v37, 2  ;;  %v1447_v59 = vmul.f32 %v10153_v38, %v1446_v1  ;;  %v10233_v14 = vadd.f32 %v10139_v53, %v1432_v36  ;;  %vm10253_vm11 = vmor %vm1434_vm10, %vm1435_vm9 }
 0x218   :  { %vm1449_vm13 = vweird.f32 %v10075_v63  ;;  %vm1450_vm2 = vweird.f32 %v10153_v38  ;;  %vm10241_vm8 = vcmp.eq.f32.partialorder %v1438_v27, 8.507059e+37  ;;  %v1453_v51 = vand.u32 2147483647, %v10075_v63 }
 0x219   :  { %v1011_v9 = vpop.f32.mrf.mxu3  ;;  %v1186_v62 = vadd.f32 %v1185_v49, %v1184_v0  ;;  %v1153_v49 = vrot.slane %v1152_v17, 1  ;;  %v1179_v34 = vadd.f32 %v1178_v8, %v1177_v37  ;;  %v1448_v6 = vadd.f32 %v10153_v38, %v1447_v59  ;;  %vm10265_vm12 = vmor %vm1449_vm13, %vm1450_vm2 }
 0x21a   :  { %v10202_v56 = vpop.permute.xlu1 %8472  ;;  %v10239_v48 = vmul.f32 %v1011_v9, %v10156_v46  ;;  %v1461_v37 = vsub.f32 1.0, %v1460_v32  ;;  %v1136_v27 = vadd.f32 %v1135_v58, %v1134_v3  ;;  %v1171_v8 = vrot.slane %v1170_v29, 1 }
 0x21b   :  { %15016 = vst [vmem:[#allocation72_spill] sm:$0xff] %v10202_v56  ;;  %v1187_v0 = vrot.slane %v1186_v62, 2  ;;  %v1154_v23 = vadd.f32 %v1153_v49, %v1152_v17  ;;  %v1180_v63 = vrot.slane %v1179_v34, 1  ;;  %v1456_v32 = vor.u32 1.1754944e-38, %v1455_v50 }
 0x21c   :  { %v1191_v35 = vsel %vm14857_vm14, %v10239_v48, 0.0  ;;  %v1452_v58 = vsel %vm10265_vm12, %v10153_v38, %v1448_v6  ;;  %vm10289_vm6 = vcmp.eq.f32.partialorder %v1453_v51, 8.507059e+37  ;;  %vm1464_vm10 = vweird.f32 %v10137_v25 }
 0x21d   :  { %v439_v31 = vpop.permute.xlu0 %438  ;;  %v1188_v46 = vadd.f32 %v1187_v0, %v1186_v62  ;;  %v1437_v0 = vsel %vm10253_vm11, %v10139_v53, %v10233_v14  ;;  %v1368_v14 = vmul.f32 %v10183_v22, %v1136_v27  ;;  %vm1465_vm9 = vweird.f32 %v10196_v28 }
 0x21e   :  { %v10225_v5 = vpop.permute.xlu2 %8466  ;;  %v1181_v38 = vadd.f32 %v1180_v63, %v1179_v34  ;;  %v1468_v9 = vand.u32 2147483647, %v10137_v25  ;;  %v1470_v22 = vand.u32 2147483648, %v10137_v25  ;;  %vm10319_vm13 = vmor %vm1464_vm10, %vm1465_vm9 }
 0x21f   :  { %15019 = vst [vmem:[#allocation73_spill] sm:$0xff] %v10225_v5  ;;  %v14802_v20 = vunpack.i.l.bf16 %v10225_v5  ;;  %v14803_v49 = vunpack.i.h.bf16 %v10225_v5  ;;  %v1189_v3 = vrot.slane %v1188_v46, 1 }
 0x220   :  { %vm1469_vm2 = vcmp.eq.f32.partialorder %v1468_v9, 8.507059e+37 }
 0x221   :  { %v1735_v55 = vmul.f32 %v14802_v20, %v10028_v40  ;;  %v1014_v36 = vpop.f32.mrf.mxu3  ;;  %v1737_v53 = vmul.f32 %v14803_v49, %v10028_v40  ;;  %v1190_v51 = vadd.f32 %v1189_v3, %v1188_v46 }
 0x222   :  { %v10257_v17 = vmul.f32 %v1014_v36, %v439_v31  ;;  %v10276_v59 = vpop.permute.xlu1 %8482  ;;  %v1462_v31 = vmul.f32 %v10196_v28, %v1461_v37 }
 0x223   :  { %v1767_v62 = vadd.f32 %v1735_v55, %v9643_v26  ;;  %15026 = vst [vmem:[#allocation74_spill] sm:$0xff] %v10276_v59  ;;  %v1163_v26 = vadd.f32 %v1162_v19, %v1161_v39  ;;  %v1172_v19 = vadd.f32 %v1171_v8, %v1170_v29  ;;  %v1769_v8 = vadd.f32 %v1737_v53, %v9581_v61 }
 0x224   :  { %v1192_v45 = vsel %vm14857_vm14, %v10257_v17, 0.0 }
 0x225   :  { %v1193_v24 = vadd.f32 %v1192_v45, %v1191_v35  ;;  %1917 = vrot.lane.b32.xlu2 %v1767_v62, %s9145_s0  ;;  %v1413_v44 = vmul.f32 %v10210_v21, %v1163_v26  ;;  %v1463_v62 = vadd.f32 %v10196_v28, %v1462_v31  ;;  %v1719_v35 = vrot.slane %v10189_v30, 7 }
 0x226   :  { %v10287_v55 = vpop.permute.xlu2 %8477  ;;  %v1398_v45 = vmul.f32 %v10119_v47, %v1154_v23  ;;  %v1428_v63 = vmul.f32 %v1427_v43, %v1172_v19  ;;  %v1442_v21 = vsel %vm10241_vm8, %v10223_v54, %v1437_v0  ;;  %v1471_v23 = vor.u32 1.1754944e-38, %v1470_v22 }
 0x227   :  { %15027 = vst [vmem:[#allocation75_spill] sm:$0xff] %v10287_v55  ;;  %v1194_v50 = vrot.slane %v1193_v24, 4  ;;  %v14801_v39 = vunpack.i.l.bf16 %v10287_v55  ;;  %v14797_v27 = vunpack.i.h.bf16 %v10287_v55  ;;  %v1443_v61 = vmul.f32 %v1442_v21, %v1181_v38 }
 0x228   :  { %v1720_v47 = vsel %vm1699_vm3, %v1719_v35, %v1368_v14  ;;  %v1723_v25 = vrot.slane %v1413_v44, 5  ;;  %v1467_v0 = vsel %vm10319_vm13, %v10196_v28, %v1463_v62  ;;  %v1725_v26 = vrot.slane %v1428_v63, 4 }
 0x229   :  { %v1195_v6 = vadd.f32 %v1194_v50, %v1193_v24  ;;  %v1739_v37 = vmul.f32 %v14801_v39, %v10028_v40  ;;  %v1721_v24 = vrot.slane %v1398_v45, 6  ;;  %v1727_v3 = vrot.slane %v1443_v61, 3 }
 0x22a   :  { %v1472_v53 = vsel %vm1469_vm2, %v1471_v23, %v1467_v0  ;;  %v14778_v28 = vunpack.i.h.bf16 %v10276_v59  ;;  %v1565_v61 = vperm.slane %v9358_v57, 7 }
 0x22b   :  { %v1196_v29 = vrot.slane %v1195_v6, 2  ;;  %v1771_v34 = vadd.f32 %v1739_v37, %v9605_v42  ;;  %v1457_v42 = vsel %vm10289_vm6, %v1456_v32, %v1452_v58  ;;  %v10328_v1 = vpop.permute.xlu1 %1849  ;;  %v1741_v32 = vmul.f32 %v14797_v27, %v10028_v40 }
 0x22c   :  { %v1458_v54 = vmul.f32 %v1457_v42, %v1190_v51  ;;  %v1722_v31 = vsel %vm1702_vm5, %v1721_v24, %v1720_v47 }
 0x22d   :  { %v1197_v30 = vadd.f32 %v1196_v29, %v1195_v6  ;;  %1921 = vrot.lane.b32.xlu2 %v1769_v8, %s9145_s0  ;;  %1925 = vrot.lane.b32.xlu1 %v1771_v34, %s9145_s0  ;;  %v1724_v50 = vsel %vm1705_vm7, %v1723_v25, %v1722_v31  ;;  %v1773_v19 = vadd.f32 %v1741_v32, %v9680_v15  ;;  %v1815_v8 = vperm.slane %v9553_v60, 0 }
 0x22e   :  { %v1729_v36 = vrot.slane %v1458_v54, 2  ;;  %v1726_v38 = vsel %vm1708_vm15, %v1725_v26, %v1724_v50  ;;  %v1801_v34 = vrot.slane %v9553_v60, 1  ;;  %v14798_v25 = vunpack.i.l.bf16 %v10202_v56  ;;  %v10395_v50 = vld [vmem:[#allocation2 + $0x68] sm:$0xff] }
 0x22f   :  { %v1198_v43 = vrot.slane %v1197_v30, 1  ;;  %v1728_v6 = vsel %vm14902_vm0, %v1727_v3, %v1726_v38  ;;  %v14799_v32 = vunpack.i.h.bf16 %v10202_v56  ;;  %v1802_v26 = vrot.slane %v9553_v60, 2  ;;  %15034 = vst [vmem:[#allocation78_spill] sm:$0xff] %v10395_v50  ;;  %2309 = vmatpush.msrb.mxu2 %v10395_v50 }
 0x230   :  { %v1730_v37 = vsel %vm14901_vm1, %v1729_v36, %v1728_v6  ;;  %v10367_v21 = vperm.slane %v1801_v34, 0  ;;  %v10421_v34 = vld [vmem:[#allocation2 + $0x30] sm:$0xff] }
 0x231   :  { %v1199_v58 = vadd.f32 %v1198_v43, %v1197_v30  ;;  %v10389_v31 = vperm.slane %v1802_v26, 0  ;;  %15041 = vst [vmem:[#allocation85_spill] sm:$0xff] %v10421_v34 }
 0x232   :  { %v1855_v42 = vadd.f32 %v10185_v2, %v10367_v21 }
 0x233   :  { %v1473_v14 = vmul.f32 %v1472_v53, %v1199_v58  ;;  %v10351_v51 = vpop.permute.xlu1 %8489  ;;  %v1857_v38 = vadd.f32 %v10185_v2, %v10389_v31 }
 0x234   :  { %15032 = vst [vmem:[#allocation76_spill] sm:$0xff] %v10351_v51  ;;  %v14775_v22 = vunpack.i.l.bf16 %v10351_v51 }
 0x235   :  { %v1731_v9 = vrot.slane %v1473_v14, 1  ;;  %8495 = vperm.xlu2 %8493, %v9787_v4   ;;  %1929 = vrot.lane.b32.xlu1 %v1773_v19, %s9145_s0  ;;  %v10397_v14 = vld [vmem:[#allocation2 + $0x60] sm:$0xff]  ;;  %v10399_v19 = vld [vmem:[#allocation2 + $0x58] sm:$0xff] }
 0x236   :  { %v1743_v4 = vmul.f32 %v14775_v22, %v10028_v40  ;;  %15035 = vst [vmem:[#allocation79_spill] sm:$0xff] %v10397_v14  ;;  %2310 = vmatpush.msrb.mxu2 %v10397_v14 }
 0x237   :  { %v10346_v44 = vsel %vm14900_vm4, %v1731_v9, %v1730_v37  ;;  %15036 = vst [vmem:[#allocation80_spill] sm:$0xff] %v10399_v19  ;;  %v10408_v9 = vld [vmem:[#allocation2 + $0x48] sm:$0xff]  ;;  %v10410_v37 = vld [vmem:[#allocation2 + $0x40] sm:$0xff] }
 0x238   :  { %v1742_v15 = vmul.f32 %v14778_v28, %v10346_v44  ;;  %v1775_v29 = vadd.f32 %v1743_v4, %v9807_v7  ;;  %v1552_v7 = vperm.slane %v9358_v57, 6  ;;  %v1736_v0 = vmul.f32 %v14798_v25, %v10346_v44  ;;  %15038 = vst [vmem:[#allocation82_spill] sm:$0xff] %v10408_v9  ;;  %2311 = vmatpush.msrb.mxu2 %v10399_v19 }
 0x239   :  { %v1738_v3 = vmul.f32 %v14799_v32, %v10346_v44  ;;  %15039 = vst [vmem:[#allocation83_spill] sm:$0xff] %v10410_v37 }
 0x23a   :  { %v1774_v62 = vadd.f32 %v1742_v15, %v9690_v41  ;;  %v1853_v41 = vadd.f32 %v10185_v2, %v1815_v8  ;;  %v8500_v54 = vpack.i.bf16 %v1565_v61, %v1552_v7  ;;  %v1768_v24 = vadd.f32 %v1736_v0, %v9654_v10  ;;  %v15043_v0 = vld [vmem:[#allocation57_spill] sm:$0xff] }
 0x23b   :  { %v1770_v53 = vadd.f32 %v1738_v3, %v9588_v52  ;;  %v14800_v10 = vunpack.i.l.bf16 %v10276_v59  ;;  %v10406_v52 = vld [vmem:[#allocation2 + $0x50] sm:$0xff]  ;;  %v14773_v61 = vunpack.i.h.bf16 %v10351_v51  ;;  %v15044_v3 = vld [vmem:[#allocation54_spill] sm:$0xff] }
 0x23c   :  { %15037 = vst [vmem:[#allocation81_spill] sm:$0xff] %v10406_v52  ;;  %2312 = vmatpush.msrb.mxu2 %v10406_v52 }
 0x23d   :  { %1931 = vrot.lane.b32.xlu1 %v1774_v62, %s9145_s0  ;;  %8499 = vset.pattern.permute.xlu2 %v9228_v11 }
 0x23e   :  { %2313 = vmatpush.msrb.mxu2 %v10408_v9 }
 0x240   :  { %2314 = vmatpush.msrb.mxu2 %v10410_v37 }
 0x245   :  { %1933 = vrot.lane.b32.xlu1 %v1775_v29, %s9145_s0 }
 0x27f   :  { %v1918_v35 = vpop.permute.xlu2 %1917 }
 0x280   :  { %v2013_v45 = vadd.f32 %v1918_v35, %v1853_v41  ;;  %v10419_v41 = vld [vmem:[#allocation2 + $0x38] sm:$0xff]  ;;  %v1740_v35 = vmul.f32 %v14800_v10, %v10346_v44 }
 0x281   :  { %15040 = vst [vmem:[#allocation84_spill] sm:$0xff] %v10419_v41  ;;  %2315 = vmatpush.msrb.mxu2 %v10419_v41 }
 0x282   :  { %vm2045_vm8 = vcmp.ge.f32.partialorder %v2013_v45, 0.0  ;;  %v2077_v63 = vmul.f32 0.2, %v2013_v45 }
 0x283   :  { %2316 = vmatpush.msrb.mxu2 %v10421_v34 }
 0x284   :  { %v2109_v46 = vsel %vm2045_vm8, %v2013_v45, %v2077_v63 }
 0x285   :  { %2173 = vrot.lane.b32.xlu2 %v2109_v46, %s9145_s0 }
 0x287   :  { %v1922_v30 = vpop.permute.xlu2 %1921 }
 0x288   :  { %v2015_v47 = vadd.f32 %v1922_v30, %v1855_v42  ;;  %v1772_v30 = vadd.f32 %v1740_v35, %v9616_v18  ;;  %v1804_v35 = vrot.slane %v9553_v60, 4 }
 0x28a   :  { %vm2047_vm11 = vcmp.ge.f32.partialorder %v2015_v47, 0.0  ;;  %v2079_v23 = vmul.f32 0.2, %v2015_v47 }
 0x28c   :  { %v2111_v43 = vsel %vm2047_vm11, %v2015_v47, %v2079_v23  ;;  %v15042_v47 = vld [vmem:[#allocation39_spill] sm:$0xff] }
 0x28d   :  { %8501 = vperm.xlu2 %8499, %v8500_v54   ;;  %2177 = vrot.lane.b32.xlu0 %v2111_v43, %s9145_s0  ;;  %v1591_v23 = vperm.slane %v15042_v47, 1 }
 0x28f   :  { %v10387_v58 = vpop.permute.xlu2 %8495 }
 0x290   :  { %15033 = vst [vmem:[#allocation77_spill] sm:$0xff] %v10387_v58  ;;  %v14777_v36 = vunpack.i.l.bf16 %v10387_v58  ;;  %v14774_v43 = vunpack.i.h.bf16 %v10387_v58 }
 0x292   :  { %v1744_v15 = vmul.f32 %v14777_v36, %v10346_v44  ;;  %v1746_v26 = vmul.f32 %v14774_v43, %v10346_v44 }
 0x294   :  { %v1776_v7 = vadd.f32 %v1744_v15, %v9796_v13  ;;  %v1745_v13 = vmul.f32 %v14773_v61, %v10028_v40 }
 0x295   :  { %8505 = vset.pattern.permute.xlu2 %v9231_v12  ;;  %1919 = vrot.lane.b32.xlu0 %v1768_v24, %s9145_s0 }
 0x296   :  { %v1777_v24 = vadd.f32 %v1745_v13, %v15043_v0 }
 0x29d   :  { %8507 = vperm.xlu2 %8505, %v8500_v54   ;;  %1923 = vrot.lane.b32.xlu0 %v1770_v53, %s9145_s0  ;;  %v1578_v54 = vperm.slane %v15042_v47, 0  ;;  %v1778_v53 = vadd.f32 %v1746_v26, %v15044_v3 }
 0x29f   :  { %v1926_v62 = vpop.permute.xlu1 %1925  ;;  %v8511_v18 = vpack.i.bf16 %v1591_v23, %v1578_v54 }
 0x2a0   :  { %v2017_v45 = vadd.f32 %v1926_v62, %v1857_v38 }
 0x2a2   :  { %vm2049_vm12 = vcmp.ge.f32.partialorder %v2017_v45, 0.0  ;;  %v2081_v46 = vmul.f32 0.2, %v2017_v45 }
 0x2a4   :  { %v2113_v42 = vsel %vm2049_vm12, %v2017_v45, %v2081_v46 }
 0x2a5   :  { %1935 = vrot.lane.b32.xlu2 %v1776_v7, %s9145_s0  ;;  %2181 = vrot.lane.b32.xlu1 %v2113_v42, %s9145_s0  ;;  %v1819_v42 = vperm.slane %v1804_v35, 0 }
 0x2a6   :  { %1927 = vrot.lane.b32.xlu0 %v1772_v30, %s9145_s0  ;;  %v15047_v30 = vld [vmem:[#allocation55_spill] sm:$0xff] }
 0x2a7   :  { %v1930_v7 = vpop.permute.xlu1 %1929  ;;  %v1862_v23 = vadd.f32 %v10328_v1, %v1819_v42 }
 0x2ad   :  { %8512 = vperm.xlu1 %8487, %v8511_v18  }
 0x2ae   :  { %1937 = vrot.lane.b32.xlu0 %v1777_v24, %s9145_s0 }
 0x2af   :  { %v1932_v3 = vpop.permute.xlu1 %1931 }
 0x2b5   :  { %8516 = vset.pattern.permute.xlu1 %v9231_v12 }
 0x2b6   :  { %1939 = vrot.lane.b32.xlu0 %v1778_v53, %s9145_s0  ;;  %v1854_v53 = vadd.f32 %v10328_v1, %v1815_v8 }
 0x2bd   :  { %8518 = vperm.xlu1 %8516, %v8511_v18  }
 0x2c5   :  { %8533 = vset.pattern.permute.xlu1 %v9228_v11 }
 0x2df   :  { %v2174_v38 = vpop.permute.xlu2 %2173 }
 0x2e0   :  { %8315 = vmatmul.msk.f32.vlgmr.msrb.gmra.mxu2 %vm14857_vm14, %v2174_v38 }
 0x2e7   :  { %v10457_v15 = vpop.permute.xlu2 %8501 }
 0x2e8   :  { %15045 = vst [vmem:[#allocation57_spill] sm:$0xff] %v10457_v15 }
 0x2f7   :  { %v10459_v62 = vpop.permute.xlu2 %8507 }
 0x2f8   :  { %15046 = vst [vmem:[#allocation54_spill] sm:$0xff] %v10459_v62  ;;  %v14772_v45 = vunpack.i.l.bf16 %v10459_v62 }
 0x2fa   :  { %v1748_v46 = vmul.f32 %v14772_v45, %v10346_v44  ;;  %v14776_v45 = vunpack.i.l.bf16 %v10457_v15 }
 0x2fc   :  { %v1780_v54 = vadd.f32 %v1748_v46, %v15047_v30 }
 0x2fe   :  { %1943 = vrot.lane.b32.xlu1 %v1780_v54, %s9145_s0  ;;  %v1856_v54 = vadd.f32 %v10328_v1, %v10367_v21  ;;  %v1858_v21 = vadd.f32 %v10328_v1, %v10389_v31 }
 0x2ff   :  { %v1936_v13 = vpop.permute.xlu2 %1935  ;;  %v10469_v18 = vpop.permute.xlu0 %2177 }
 0x300   :  { %v2022_v0 = vadd.f32 %v1936_v13, %v1862_v23  ;;  %v1934_v23 = vpop.permute.xlu1 %1933 }
 0x302   :  { %vm2054_vm6 = vcmp.ge.f32.partialorder %v2022_v0, 0.0  ;;  %v2086_v24 = vmul.f32 0.2, %v2022_v0 }
 0x304   :  { %v2118_v26 = vsel %vm2054_vm6, %v2022_v0, %v2086_v24  ;;  %v1803_v24 = vrot.slane %v9553_v60, 3 }
 0x306   :  { %2191 = vrot.lane.b32.xlu1 %v2118_v26, %s9145_s0 }
 0x307   :  { %v1920_v38 = vpop.permute.xlu0 %1919 }
 0x308   :  { %v2014_v35 = vadd.f32 %v1920_v38, %v1854_v53  ;;  %v1818_v53 = vperm.slane %v1803_v24, 0  ;;  %v1747_v38 = vmul.f32 %v14776_v45, %v10028_v40 }
 0x30a   :  { %vm2046_vm10 = vcmp.ge.f32.partialorder %v2014_v35, 0.0  ;;  %v2078_v46 = vmul.f32 0.2, %v2014_v35 }
 0x30c   :  { %v2110_v30 = vsel %vm2046_vm10, %v2014_v35, %v2078_v46  ;;  %v1805_v46 = vrot.slane %v9553_v60, 5 }
 0x30d   :  { %2175 = vrot.lane.b32.xlu0 %v2110_v30, %s9145_s0 }
 0x30e   :  { %v1820_v61 = vperm.slane %v1805_v46, 0 }
 0x30f   :  { %v1924_v13 = vpop.permute.xlu0 %1923 }
 0x310   :  { %v2016_v0 = vadd.f32 %v1924_v13, %v1856_v54  ;;  %v1859_v13 = vadd.f32 %v10185_v2, %v1818_v53  ;;  %v1863_v31 = vadd.f32 %v10185_v2, %v1820_v61 }
 0x312   :  { %vm2048_vm9 = vcmp.ge.f32.partialorder %v2016_v0, 0.0  ;;  %v2080_v26 = vmul.f32 0.2, %v2016_v0  ;;  %v2019_v22 = vadd.f32 %v1930_v7, %v1859_v13 }
 0x314   :  { %v2112_v8 = vsel %vm2048_vm9, %v2016_v0, %v2080_v26  ;;  %v1861_v0 = vadd.f32 %v10185_v2, %v1819_v42  ;;  %v15048_v26 = vld [vmem:[#allocation56_spill] sm:$0xff]  ;;  %v2083_v42 = vmul.f32 0.2, %v2019_v22  ;;  %vm2051_vm8 = vcmp.ge.f32.partialorder %v2019_v22, 0.0 }
 0x315   :  { %2179 = vrot.lane.b32.xlu0 %v2112_v8, %s9145_s0  ;;  %v1779_v8 = vadd.f32 %v1747_v38, %v15048_v26  ;;  %v1860_v38 = vadd.f32 %v10328_v1, %v1818_v53  ;;  %v1617_v26 = vperm.slane %v15042_v47, 3 }
 0x316   :  { %v2021_v43 = vadd.f32 %v1934_v23, %v1861_v0  ;;  %v1604_v0 = vperm.slane %v15042_v47, 2 }
 0x317   :  { %v10484_v35 = vpop.permute.xlu1 %2181  ;;  %v2020_v7 = vadd.f32 %v1932_v3, %v1860_v38  ;;  %v14780_v38 = vunpack.i.h.bf16 %v10459_v62 }
 0x318   :  { %v1928_v30 = vpop.permute.xlu0 %1927  ;;  %vm2053_vm2 = vcmp.ge.f32.partialorder %v2021_v43, 0.0  ;;  %v8523_v3 = vpack.i.bf16 %v1617_v26, %v1604_v0  ;;  %v15052_v0 = vld [vmem:[#allocation60_spill] sm:$0xff] }
 0x319   :  { %v2018_v54 = vadd.f32 %v1928_v30, %v1858_v21  ;;  %v2085_v21 = vmul.f32 0.2, %v2021_v43  ;;  %v2084_v53 = vmul.f32 0.2, %v2020_v7  ;;  %vm2052_vm12 = vcmp.ge.f32.partialorder %v2020_v7, 0.0 }
 0x31b   :  { %vm2050_vm13 = vcmp.ge.f32.partialorder %v2018_v54, 0.0  ;;  %v2082_v24 = vmul.f32 0.2, %v2018_v54 }
 0x31d   :  { %1941 = vrot.lane.b32.xlu0 %v1779_v8, %s9145_s0  ;;  %v2114_v45 = vsel %vm2050_vm13, %v2018_v54, %v2082_v24  ;;  %v2117_v54 = vsel %vm2053_vm2, %v2021_v43, %v2085_v21  ;;  %v2116_v8 = vsel %vm2052_vm12, %v2020_v7, %v2084_v53  ;;  %v15053_v53 = vld [vmem:[#allocation59_spill] sm:$0xff] }
 0x31e   :  { %2183 = vrot.lane.b32.xlu2 %v2114_v45, %s9145_s0  ;;  %v2115_v45 = vsel %vm2051_vm8, %v2019_v22, %v2083_v42  ;;  %v14790_v22 = vunpack.i.h.bf16 %v10457_v15 }
 0x31f   :  { %v10495_v30 = vpop.permute.xlu1 %8512 }
 0x320   :  { %v1938_v36 = vpop.permute.xlu0 %1937  ;;  %15049 = vst [vmem:[#allocation55_spill] sm:$0xff] %v10495_v30  ;;  %v14785_v46 = vunpack.i.l.bf16 %v10495_v30  ;;  %v14779_v43 = vunpack.i.h.bf16 %v10495_v30 }
 0x321   :  { %v2023_v28 = vadd.f32 %v1938_v36, %v1863_v31  ;;  %v1749_v31 = vmul.f32 %v14790_v22, %v10028_v40 }
 0x322   :  { %v1751_v36 = vmul.f32 %v14785_v46, %v10028_v40  ;;  %v1753_v24 = vmul.f32 %v14779_v43, %v10028_v40 }
 0x323   :  { %vm2055_vm11 = vcmp.ge.f32.partialorder %v2023_v28, 0.0  ;;  %v2087_v23 = vmul.f32 0.2, %v2023_v28 }
 0x325   :  { %2189 = vrot.lane.b32.xlu0 %v2117_v54, %s9145_s0  ;;  %v2119_v13 = vsel %vm2055_vm11, %v2023_v28, %v2087_v23  ;;  %v1783_v28 = vadd.f32 %v1751_v36, %v10047_v16  ;;  %v1785_v16 = vadd.f32 %v1753_v24, %v9953_v33  ;;  %v15051_v23 = vld [vmem:[#allocation58_spill] sm:$0xff]  ;;  %v1864_v33 = vadd.f32 %v10328_v1, %v1820_v61 }
 0x326   :  { %2185 = vrot.lane.b32.xlu2 %v2115_v45, %s9145_s0  ;;  %2193 = vrot.lane.b32.xlu1 %v2119_v13, %s9145_s0  ;;  %v1781_v7 = vadd.f32 %v1749_v31, %v15051_v23  ;;  %v1750_v45 = vmul.f32 %v14780_v38, %v10346_v44 }
 0x328   :  { %v1940_v13 = vpop.permute.xlu0 %1939 }
 0x329   :  { %v2024_v36 = vadd.f32 %v1940_v13, %v1864_v33 }
 0x32b   :  { %vm2056_vm6 = vcmp.ge.f32.partialorder %v2024_v36, 0.0 }
 0x32d   :  { %8524 = vperm.xlu0 %8522, %v8523_v3  }
 0x32e   :  { %2187 = vrot.lane.b32.xlu2 %v2116_v8, %s9145_s0  ;;  %1949 = vrot.lane.b32.xlu1 %v1783_v28, %s9145_s0  ;;  %v1782_v28 = vadd.f32 %v1750_v45, %v15053_v53  ;;  %v2088_v8 = vmul.f32 0.2, %v2024_v36 }
 0x32f   :  { %v10518_v21 = vpop.permute.xlu1 %8518 }
 0x330   :  { %15050 = vst [vmem:[#allocation56_spill] sm:$0xff] %v10518_v21  ;;  %v14782_v42 = vunpack.i.h.bf16 %v10518_v21  ;;  %v14781_v24 = vunpack.i.l.bf16 %v10518_v21  ;;  %v2120_v31 = vsel %vm2056_vm6, %v2024_v36, %v2088_v8  ;;  %v1807_v8 = vrot.slane %v9553_v60, 7 }
 0x332   :  { %v1754_v54 = vmul.f32 %v14782_v42, %v10346_v44  ;;  %v1752_v61 = vmul.f32 %v14781_v24, %v10346_v44 }
 0x334   :  { %v1786_v26 = vadd.f32 %v1754_v54, %v15052_v0 }
 0x335   :  { %1953 = vrot.lane.b32.xlu0 %v1785_v16, %s9145_s0  ;;  %v15054_v16 = vld [vmem:[#allocation61_spill] sm:$0xff] }
 0x336   :  { %1945 = vrot.lane.b32.xlu2 %v1781_v7, %s9145_s0  ;;  %8545 = vset.pattern.permute.xlu0 %v9231_v12  ;;  %v1784_v23 = vadd.f32 %v1752_v61, %v15054_v16  ;;  %v1806_v7 = vrot.slane %v9553_v60, 6  ;;  %v1822_v61 = vperm.slane %v1807_v8, 0 }
 0x338   :  { %v1821_v54 = vperm.slane %v1806_v7, 0  ;;  %v1868_v8 = vadd.f32 %v10328_v1, %v1822_v61 }
 0x33a   :  { %v1866_v45 = vadd.f32 %v10328_v1, %v1821_v54  ;;  %v1865_v16 = vadd.f32 %v10185_v2, %v1821_v54  ;;  %v1643_v54 = vperm.slane %v15042_v47, 5 }
 0x33d   :  { %1955 = vrot.lane.b32.xlu0 %v1786_v26, %s9145_s0 }
 0x33e   :  { %1947 = vrot.lane.b32.xlu2 %v1782_v28, %s9145_s0 }
 0x345   :  { %2195 = vrot.lane.b32.xlu0 %v2120_v31, %s9145_s0 }
 0x346   :  { %8529 = vperm.xlu2 %8505, %v8523_v3  }
 0x34e   :  { %1951 = vrot.lane.b32.xlu2 %v1784_v23, %s9145_s0  ;;  %v1867_v23 = vadd.f32 %v10185_v2, %v1822_v61 }
 0x34f   :  { %8558 = vset.pattern.permute.xlu2 %v9228_v11 }
 0x370   :  { %v1944_v13 = vpop.permute.xlu1 %1943 }
 0x371   :  { %v2026_v33 = vadd.f32 %v1944_v13, %v1866_v45 }
 0x373   :  { %vm2058_vm10 = vcmp.ge.f32.partialorder %v2026_v33, 0.0  ;;  %v2090_v0 = vmul.f32 0.2, %v2026_v33 }
 0x375   :  { %v2122_v3 = vsel %vm2058_vm10, %v2026_v33, %v2090_v0 }
 0x376   :  { %2199 = vrot.lane.b32.xlu2 %v2122_v3, %s9145_s0 }
 0x378   :  { %v2184_v26 = vpop.permute.xlu2 %2183  ;;  %v10557_v45 = vpop.permute.xlu1 %2191 }
 0x37f   :  { %v2176_v36 = vpop.permute.xlu0 %2175 }
 0x380   :  { %v2186_v53 = vpop.permute.xlu2 %2185  ;;  %8316 = vmatmul.msk.f32.gmra.mxu2 %vm14857_vm14, %v2176_v36 }
 0x387   :  { %v2180_v28 = vpop.permute.xlu0 %2179 }
 0x388   :  { %v10551_v31 = vpop.permute.xlu2 %2187  ;;  %8317 = vmatmul.msk.f32.gmra.mxu2 %vm14857_vm14, %v10469_v18  ;;  %v1630_v18 = vperm.slane %v15042_v47, 4 }
 0x38f   :  { %v1942_v7 = vpop.permute.xlu0 %1941 }
 0x390   :  { %v1946_v13 = vpop.permute.xlu2 %1945  ;;  %v2025_v33 = vadd.f32 %v1942_v7, %v1865_v16  ;;  %8318 = vmatmul.msk.f32.gmra.mxu2 %vm14857_vm14, %v2180_v28 }
 0x391   :  { %v2027_v0 = vadd.f32 %v1946_v13, %v1867_v23  ;;  %v8534_v13 = vpack.i.bf16 %v1643_v54, %v1630_v18 }
 0x392   :  { %vm2057_vm9 = vcmp.ge.f32.partialorder %v2025_v33, 0.0  ;;  %v2089_v3 = vmul.f32 0.2, %v2025_v33 }
 0x393   :  { %vm2059_vm13 = vcmp.ge.f32.partialorder %v2027_v0, 0.0  ;;  %v2091_v36 = vmul.f32 0.2, %v2027_v0 }
 0x394   :  { %v2121_v43 = vsel %vm2057_vm9, %v2025_v33, %v2089_v3 }
 0x395   :  { %v2123_v38 = vsel %vm2059_vm13, %v2027_v0, %v2091_v36  ;;  %2197 = vrot.lane.b32.xlu1 %v2121_v43, %s9145_s0  ;;  %v15055_v0 = vld [vmem:[#allocation53_spill] sm:$0xff] }
 0x396   :  { %2201 = vrot.lane.b32.xlu2 %v2123_v38, %s9145_s0  ;;  %v1823_v3 = vperm.slane %v15055_v0, 0 }
 0x397   :  { %v2190_v16 = vpop.permute.xlu0 %2189 }
 0x398   :  { %v1948_v7 = vpop.permute.xlu2 %1947  ;;  %v10565_v28 = vpop.permute.xlu1 %2193  ;;  %8319 = vmatmul.msk.f32.gmra.mxu2 %vm14857_vm14, %v10484_v35 }
 0x399   :  { %v2028_v23 = vadd.f32 %v1948_v7, %v1868_v8  ;;  %v1869_v8 = vadd.f32 %v10185_v2, %v1823_v3 }
 0x39b   :  { %vm2060_vm2 = vcmp.ge.f32.partialorder %v2028_v23, 0.0  ;;  %v2092_v33 = vmul.f32 0.2, %v2028_v23 }
 0x39d   :  { %v2124_v43 = vsel %vm2060_vm2, %v2028_v23, %v2092_v33  ;;  %8535 = vperm.xlu1 %8533, %v8534_v13   ;;  %v15058_v23 = vld [vmem:[#allocation64_spill] sm:$0xff] }
 0x39e   :  { %2203 = vrot.lane.b32.xlu2 %v2124_v43, %s9145_s0  ;;  %v15059_v43 = vld [vmem:[#allocation63_spill] sm:$0xff] }
 0x39f   :  { %v10571_v38 = vpop.permute.xlu0 %8524 }
 0x3a0   :  { %15056 = vst [vmem:[#allocation58_spill] sm:$0xff] %v10571_v38  ;;  %v14783_v61 = vunpack.i.h.bf16 %v10571_v38  ;;  %v14784_v36 = vunpack.i.l.bf16 %v10571_v38  ;;  %8320 = vmatmul.msk.f32.gmra.mxu2 %vm14857_vm14, %v2184_v26  ;;  %v10576_v24 = vpop.permute.xlu2 %8529  ;;  %v1950_v35 = vpop.permute.xlu1 %1949 }
 0x3a1   :  { %15057 = vst [vmem:[#allocation60_spill] sm:$0xff] %v10576_v24  ;;  %v14786_v7 = vunpack.i.h.bf16 %v10576_v24  ;;  %v2029_v26 = vadd.f32 %v1950_v35, %v1869_v8  ;;  %v14788_v46 = vunpack.i.l.bf16 %v10576_v24 }
 0x3a2   :  { %v1757_v18 = vmul.f32 %v14783_v61, %v10028_v40  ;;  %v1755_v54 = vmul.f32 %v14784_v36, %v10028_v40 }
 0x3a3   :  { %v1758_v61 = vmul.f32 %v14786_v7, %v10346_v44  ;;  %v2093_v36 = vmul.f32 0.2, %v2029_v26  ;;  %vm2061_vm8 = vcmp.ge.f32.partialorder %v2029_v26, 0.0 }
 0x3a4   :  { %v1789_v33 = vadd.f32 %v1757_v18, %v15058_v23  ;;  %v1787_v42 = vadd.f32 %v1755_v54, %v15059_v43  ;;  %v15060_v18 = vld [vmem:[#allocation65_spill] sm:$0xff]  ;;  %v1669_v54 = vperm.slane %v15042_v47, 7 }
 0x3a5   :  { %8539 = vset.pattern.permute.xlu1 %v9231_v12  ;;  %v1790_v23 = vadd.f32 %v1758_v61, %v15060_v18  ;;  %v2125_v35 = vsel %vm2061_vm8, %v2029_v26, %v2093_v36  ;;  %v1870_v61 = vadd.f32 %v10328_v1, %v1823_v3 }
 0x3a6   :  { %1961 = vrot.lane.b32.xlu2 %v1789_v33, %s9145_s0  ;;  %1957 = vrot.lane.b32.xlu0 %v1787_v42, %s9145_s0  ;;  %v1656_v42 = vperm.slane %v15042_v47, 6  ;;  %v15061_v33 = vld [vmem:[#allocation62_spill] sm:$0xff] }
 0x3a8   :  { %8321 = vmatmul.msk.f32.gmra.mxu2 %vm14857_vm14, %v2186_v53  ;;  %v1756_v53 = vmul.f32 %v14788_v46, %v10346_v44  ;;  %v1952_v8 = vpop.permute.xlu2 %1951  ;;  %v8546_v36 = vpack.i.bf16 %v1669_v54, %v1656_v42 }
 0x3a9   :  { %v2030_v26 = vadd.f32 %v1952_v8, %v1870_v61 }
 0x3aa   :  { %v1788_v43 = vadd.f32 %v1756_v53, %v15061_v33 }
 0x3ab   :  { %vm2062_vm11 = vcmp.ge.f32.partialorder %v2030_v26, 0.0 }
 0x3ad   :  { %8541 = vperm.xlu1 %8539, %v8534_v13   ;;  %v1808_v13 = vrot.slane %v15055_v0, 1 }
 0x3ae   :  { %1963 = vrot.lane.b32.xlu2 %v1790_v23, %s9145_s0  ;;  %2205 = vrot.lane.b32.xlu0 %v2125_v35, %s9145_s0  ;;  %v1954_v23 = vpop.permute.xlu0 %1953  ;;  %v2094_v35 = vmul.f32 0.2, %v2030_v26 }
 0x3af   :  { %v1824_v18 = vperm.slane %v1808_v13, 0 }
 0x3b0   :  { %8322 = vmatmul.msk.f32.gmra.mxu2 %vm14857_vm14, %v10551_v31  ;;  %v2126_v7 = vsel %vm2062_vm11, %v2030_v26, %v2094_v35 }
 0x3b1   :  { %v1871_v31 = vadd.f32 %v10185_v2, %v1824_v18  ;;  %v1872_v53 = vadd.f32 %v10328_v1, %v1824_v18  ;;  %v1810_v18 = vrot.slane %v15055_v0, 3 }
 0x3b3   :  { %v2031_v3 = vadd.f32 %v1954_v23, %v1871_v31 }
 0x3b5   :  { %1959 = vrot.lane.b32.xlu1 %v1788_v43, %s9145_s0  ;;  %v2095_v42 = vmul.f32 0.2, %v2031_v3  ;;  %vm2063_vm12 = vcmp.ge.f32.partialorder %v2031_v3, 0.0 }
 0x3b6   :  { %8547 = vperm.xlu0 %8545, %v8546_v36   ;;  %8557 = vset.pattern.permute.xlu1 %v9228_v11  ;;  %v1956_v54 = vpop.permute.xlu0 %1955 }
 0x3b7   :  { %v2032_v8 = vadd.f32 %v1956_v54, %v1872_v53 }
 0x3b8   :  { %8323 = vmatmul.msk.f32.gmra.mxu2 %vm14857_vm14, %v2190_v16  ;;  %v2127_v16 = vsel %vm2063_vm12, %v2031_v3, %v2095_v42 }
 0x3b9   :  { %v2096_v61 = vmul.f32 0.2, %v2032_v8  ;;  %vm2064_vm6 = vcmp.ge.f32.partialorder %v2032_v8, 0.0 }
 0x3bd   :  { %2207 = vrot.lane.b32.xlu1 %v2126_v7, %s9145_s0  ;;  %v2128_v7 = vsel %vm2064_vm6, %v2032_v8, %v2096_v61 }
 0x3be   :  { %8551 = vset.pattern.permute.xlu0 %v9228_v11  ;;  %v2196_v13 = vpop.permute.xlu0 %2195 }
 0x3c0   :  { %8324 = vmatmul.msk.f32.gmra.mxu2 %vm14857_vm14, %v10557_v45 }
 0x3c5   :  { %2209 = vrot.lane.b32.xlu1 %v2127_v16, %s9145_s0  ;;  %v15063_v16 = vld [vmem:[#allocation66_spill] sm:$0xff] }
 0x3c6   :  { %8553 = vperm.xlu0 %8551, %v8546_v36   ;;  %v1826_v36 = vperm.slane %v1810_v18, 0 }
 0x3c8   :  { %8325 = vmatmul.msk.f32.gmra.mxu2 %vm14857_vm14, %v10565_v28  ;;  %v1809_v28 = vrot.slane %v15055_v0, 2  ;;  %v1875_v53 = vadd.f32 %v10185_v2, %v1826_v36 }
 0x3ca   :  { %v1825_v8 = vperm.slane %v1809_v28, 0 }
 0x3cd   :  { %2211 = vrot.lane.b32.xlu1 %v2128_v7, %s9145_s0  ;;  %v15064_v7 = vld [vmem:[#allocation69_spill] sm:$0xff] }
 0x3d0   :  { %8326 = vmatmul.msk.f32.gmra.mxu2 %vm14857_vm14, %v2196_v13  ;;  %v2200_v45 = vpop.permute.xlu2 %2199 }
 0x3f0   :  { %v2202_v33 = vpop.permute.xlu2 %2201 }
 0x3f8   :  { %v2204_v26 = vpop.permute.xlu2 %2203 }
 0x400   :  { %v1962_v3 = vpop.permute.xlu2 %1961 }
 0x407   :  { %v2198_v43 = vpop.permute.xlu1 %2197 }
 0x408   :  { %8327 = vmatmul.msk.f32.gmra.mxu2 %vm14857_vm14, %v2198_v43  ;;  %v2035_v43 = vadd.f32 %v1962_v3, %v1875_v53  ;;  %v1964_v53 = vpop.permute.xlu2 %1963 }
 0x40a   :  { %v2099_v46 = vmul.f32 0.2, %v2035_v43  ;;  %vm2067_vm10 = vcmp.ge.f32.partialorder %v2035_v43, 0.0 }
 0x40c   :  { %v2131_v28 = vsel %vm2067_vm10, %v2035_v43, %v2099_v46 }
 0x40f   :  { %v10625_v23 = vpop.permute.xlu1 %8535 }
 0x410   :  { %15062 = vst [vmem:[#allocation59_spill] sm:$0xff] %v10625_v23  ;;  %v14787_v35 = vunpack.i.h.bf16 %v10625_v23  ;;  %v14789_v31 = vunpack.i.l.bf16 %v10625_v23  ;;  %8328 = vmatmul.msk.f32.gmra.mxu2 %vm14857_vm14, %v2200_v45  ;;  %v1873_v45 = vadd.f32 %v10185_v2, %v1825_v8 }
 0x412   :  { %v1761_v42 = vmul.f32 %v14787_v35, %v10028_v40  ;;  %v1759_v54 = vmul.f32 %v14789_v31, %v10028_v40 }
 0x414   :  { %v1791_v61 = vadd.f32 %v1759_v54, %v15063_v16  ;;  %v1793_v13 = vadd.f32 %v1761_v42, %v15064_v7 }
 0x416   :  { %1965 = vrot.lane.b32.xlu2 %v1791_v61, %s9145_s0  ;;  %1969 = vrot.lane.b32.xlu0 %v1793_v13, %s9145_s0  ;;  %v15067_v61 = vld [vmem:[#allocation67_spill] sm:$0xff] }
 0x418   :  { %8329 = vmatmul.msk.f32.gmra.mxu2 %vm14857_vm14, %v2202_v33  ;;  %v1958_v18 = vpop.permute.xlu0 %1957 }
 0x419   :  { %v2033_v35 = vadd.f32 %v1958_v18, %v1873_v45 }
 0x41b   :  { %vm2065_vm9 = vcmp.ge.f32.partialorder %v2033_v35, 0.0  ;;  %v2097_v31 = vmul.f32 0.2, %v2033_v35 }
 0x41d   :  { %v2129_v22 = vsel %vm2065_vm9, %v2033_v35, %v2097_v31  ;;  %v15066_v35 = vld [vmem:[#allocation68_spill] sm:$0xff] }
 0x41e   :  { %2217 = vrot.lane.b32.xlu0 %v2131_v28, %s9145_s0  ;;  %2213 = vrot.lane.b32.xlu1 %v2129_v22, %s9145_s0  ;;  %v1876_v22 = vadd.f32 %v10328_v1, %v1826_v36 }
 0x41f   :  { %v10646_v3 = vpop.permute.xlu1 %8541 }
 0x420   :  { %15065 = vst [vmem:[#allocation61_spill] sm:$0xff] %v10646_v3  ;;  %v14796_v42 = vunpack.i.h.bf16 %v10646_v3  ;;  %v14795_v54 = vunpack.i.l.bf16 %v10646_v3  ;;  %8330 = vmatmul.msk.f32.gmra.mxu2 %vm14857_vm14, %v2204_v26  ;;  %v2206_v33 = vpop.permute.xlu0 %2205  ;;  %v2036_v13 = vadd.f32 %v1964_v53, %v1876_v22  ;;  %v1874_v26 = vadd.f32 %v10328_v1, %v1825_v8 }
 0x422   :  { %v1762_v16 = vmul.f32 %v14796_v42, %v10346_v44  ;;  %v1760_v46 = vmul.f32 %v14795_v54, %v10346_v44  ;;  %v2100_v36 = vmul.f32 0.2, %v2036_v13  ;;  %vm2068_vm2 = vcmp.ge.f32.partialorder %v2036_v13, 0.0 }
 0x424   :  { %v1792_v31 = vadd.f32 %v1760_v46, %v15066_v35  ;;  %v1794_v7 = vadd.f32 %v1762_v16, %v15067_v61  ;;  %v2132_v22 = vsel %vm2068_vm2, %v2036_v13, %v2100_v36  ;;  %v15069_v35 = vld [vmem:[#allocation71_spill] sm:$0xff]  ;;  %v15071_v36 = vld [vmem:[#allocation70_spill] sm:$0xff] }
 0x426   :  { %1967 = vrot.lane.b32.xlu2 %v1792_v31, %s9145_s0  ;;  %1971 = vrot.lane.b32.xlu1 %v1794_v7, %s9145_s0 }
 0x427   :  { %v1960_v43 = vpop.permute.xlu1 %1959 }
 0x428   :  { %v2034_v45 = vadd.f32 %v1960_v43, %v1874_v26  ;;  %8331 = vmatmul.msk.f32.gmra.mxu2 %vm14857_vm14, %v2206_v33  ;;  %v10664_v18 = vpop.permute.xlu0 %8547 }
 0x429   :  { %15068 = vst [vmem:[#allocation64_spill] sm:$0xff] %v10664_v18  ;;  %v14791_v28 = vunpack.i.l.bf16 %v10664_v18 }
 0x42a   :  { %vm2066_vm13 = vcmp.ge.f32.partialorder %v2034_v45, 0.0  ;;  %v2098_v46 = vmul.f32 0.2, %v2034_v45 }
 0x42b   :  { %v1764_v53 = vmul.f32 %v14791_v28, %v10346_v44 }
 0x42c   :  { %v2130_v16 = vsel %vm2066_vm13, %v2034_v45, %v2098_v46 }
 0x42d   :  { %v1796_v8 = vadd.f32 %v1764_v53, %v15069_v35 }
 0x42e   :  { %2215 = vrot.lane.b32.xlu2 %v2130_v16, %s9145_s0  ;;  %2219 = vrot.lane.b32.xlu1 %v2132_v22, %s9145_s0  ;;  %v1811_v16 = vrot.slane %v15055_v0, 4 }
 0x42f   :  { %v2208_v33 = vpop.permute.xlu1 %2207  ;;  %1975 = vrot.lane.b32.xlu0 %v1796_v8, %s9145_s0 }
 0x430   :  { %8332 = vmatmul.msk.f32.gmra.mxu2 %vm14857_vm14, %v2208_v33  ;;  %v10692_v22 = vperm.slane %v1811_v16, 0  ;;  %v14792_v33 = vunpack.i.h.bf16 %v10664_v18 }
 0x432   :  { %v1877_v35 = vadd.f32 %v10185_v2, %v10692_v22 }
 0x437   :  { %v2210_v31 = vpop.permute.xlu1 %2209 }
 0x438   :  { %8333 = vmatmul.msk.f32.gmra.mxu2 %vm14857_vm14, %v2210_v31  ;;  %v10676_v61 = vpop.permute.xlu0 %8553 }
 0x439   :  { %15070 = vst [vmem:[#allocation63_spill] sm:$0xff] %v10676_v61  ;;  %v14794_v7 = vunpack.i.h.bf16 %v10676_v61  ;;  %v14793_v13 = vunpack.i.l.bf16 %v10676_v61 }
 0x43b   :  { %v1765_v26 = vmul.f32 %v14794_v7, %v10028_v40  ;;  %v1763_v43 = vmul.f32 %v14793_v13, %v10028_v40  ;;  %v15073_v7 = vld [vmem:[#allocation42_spill] sm:$0xff] }
 0x43c   :  { %v10758_v54 = vadd.f32 %v15042_v47, %v15073_v7 }
 0x43d   :  { %v1797_v45 = vadd.f32 %v1765_v26, %v10239_v48  ;;  %v1795_v46 = vadd.f32 %v1763_v43, %v15071_v36  ;;  %v1766_v26 = vmul.f32 %v14792_v33, %v10346_v44 }
 0x43e   :  { %v637_v3 = vperm.slane %v10758_v54, 7 }
 0x43f   :  { %v2212_v53 = vpop.permute.xlu1 %2211  ;;  %1977 = vrot.lane.b32.xlu1 %v1797_v45, %s9145_s0  ;;  %1973 = vrot.lane.b32.xlu2 %v1795_v46, %s9145_s0  ;;  %v1798_v43 = vadd.f32 %v1766_v26, %v10257_v17  ;;  %v1812_v45 = vrot.slane %v15055_v0, 5 }
 0x440   :  { %8334 = vmatmul.msk.f32.gmra.mxu2 %vm14857_vm14, %v2212_v53 }
 0x441   :  { %v10704_v36 = vperm.slane %v1812_v45, 0 }
 0x443   :  { %v1879_v53 = vadd.f32 %v10185_v2, %v10704_v36 }
 0x470   :  { %v1966_v8 = vpop.permute.xlu2 %1965 }
 0x471   :  { %v2037_v40 = vadd.f32 %v1966_v8, %v1877_v35 }
 0x473   :  { %vm2069_vm8 = vcmp.ge.f32.partialorder %v2037_v40, 0.0  ;;  %v2101_v48 = vmul.f32 0.2, %v2037_v40 }
 0x475   :  { %v2133_v31 = vsel %vm2069_vm8, %v2037_v40, %v2101_v48  ;;  %v15072_v48 = vld [vmem:[#allocation30_spill] sm:$0xff] }
 0x476   :  { %2221 = vrot.lane.b32.xlu2 %v2133_v31, %s9145_s0  ;;  %v10711_v17 = vadd.f32 %v9358_v57, %v15072_v48  ;;  %v1813_v31 = vrot.slane %v15055_v0, 6 }
 0x478   :  { %v1829_v45 = vperm.slane %v1813_v31, 0  ;;  %v468_v33 = vperm.slane %v10711_v17, 2 }
 0x47a   :  { %v1882_v31 = vadd.f32 %v10328_v1, %v1829_v45 }
 0x47e   :  { %1979 = vrot.lane.b32.xlu2 %v1798_v43, %s9145_s0  ;;  %v455_v43 = vperm.slane %v10711_v17, 1 }
 0x480   :  { %v1968_v46 = vpop.permute.xlu2 %1967 }
 0x488   :  { %v1970_v16 = vpop.permute.xlu0 %1969  ;;  %v2216_v26 = vpop.permute.xlu2 %2215 }
 0x489   :  { %v2039_v35 = vadd.f32 %v1970_v16, %v1879_v53  ;;  %v1881_v53 = vadd.f32 %v10185_v2, %v1829_v45  ;;  %v10730_v45 = vpop.f32.mrf.mxu2 }
 0x48b   :  { %vm2071_vm11 = vcmp.ge.f32.partialorder %v2039_v35, 0.0  ;;  %v2103_v8 = vmul.f32 0.2, %v2039_v35 }
 0x48d   :  { %v2135_v40 = vsel %vm2071_vm11, %v2039_v35, %v2103_v8  ;;  %vm14856_vm11 = vcmask 15360  }
 0x48e   :  { %2225 = vrot.lane.b32.xlu1 %v2135_v40, %s9145_s0 }
 0x490   :  { %v2214_v44 = vpop.permute.xlu1 %2213  ;;  %v2218_v8 = vpop.permute.xlu0 %2217 }
 0x491   :  { %8335 = vmatmul.msk.f32.gmra.mxu2 %vm14857_vm14, %v2214_v44 }
 0x496   :  { %460 = vperm.xlu1 %8557, %v455_v43  }
 0x498   :  { %v1972_v48 = vpop.permute.xlu1 %1971 }
 0x499   :  { %8336 = vmatmul.msk.f32.gmra.mxu2 %vm14857_vm14, %v2216_v26  ;;  %v1974_v16 = vpop.permute.xlu2 %1973 }
 0x49a   :  { %v2041_v35 = vadd.f32 %v1974_v16, %v1881_v53  ;;  %v1814_v53 = vrot.slane %v15055_v0, 7 }
 0x49c   :  { %vm2073_vm12 = vcmp.ge.f32.partialorder %v2041_v35, 0.0  ;;  %v2105_v40 = vmul.f32 0.2, %v2041_v35 }
 0x49e   :  { %8559 = vset.pattern.permute.xlu1 %v9231_v12  ;;  %v2137_v28 = vsel %vm2073_vm12, %v2041_v35, %v2105_v40  ;;  %v1830_v35 = vperm.slane %v1814_v53, 0 }
 0x49f   :  { %2229 = vrot.lane.b32.xlu2 %v2137_v28, %s9145_s0 }
 0x4a0   :  { %v2220_v26 = vpop.permute.xlu1 %2219 }
 0x4a1   :  { %8337 = vmatmul.msk.f32.gmra.mxu2 %vm14857_vm14, %v2218_v8  ;;  %v1976_v44 = vpop.permute.xlu0 %1975  ;;  %v1883_v8 = vadd.f32 %v10185_v2, %v1830_v35  ;;  %v494_v2 = vperm.slane %v10711_v17, 4 }
 0x4a2   :  { %v2042_v13 = vadd.f32 %v1976_v44, %v1882_v31  ;;  %v481_v31 = vperm.slane %v10711_v17, 3 }
 0x4a4   :  { %v2106_v16 = vmul.f32 0.2, %v2042_v13  ;;  %vm2074_vm6 = vcmp.ge.f32.partialorder %v2042_v13, 0.0 }
 0x4a6   :  { %479 = vperm.xlu1 %8559, %v468_v33   ;;  %v2138_v28 = vsel %vm2074_vm6, %v2042_v13, %v2106_v16  ;;  %v10735_v13 = vpop.f32.mrf.mxu2  ;;  %v1878_v16 = vadd.f32 %v10328_v1, %v10692_v22 }
 0x4a7   :  { %473 = vperm.xlu2 %8558, %v468_v33  }
 0x4a9   :  { %8338 = vmatmul.msk.f32.gmra.mxu2 %vm14857_vm14, %v2220_v26  ;;  %v442_v26 = vperm.slane %v10711_v17, 0 }
 0x4ae   :  { %8561 = vset.pattern.permute.xlu1 %v9228_v11 }
 0x4af   :  { %2231 = vrot.lane.b32.xlu1 %v2138_v28, %s9145_s0  ;;  %8560 = vset.pattern.permute.xlu2 %v9231_v12  ;;  %v2038_v28 = vadd.f32 %v1968_v46, %v1878_v16 }
 0x4b1   :  { %v1978_v33 = vpop.permute.xlu1 %1977  ;;  %vm2070_vm9 = vcmp.ge.f32.partialorder %v2038_v28, 0.0 }
 0x4b2   :  { %v2043_v40 = vadd.f32 %v1978_v33, %v1883_v8  ;;  %v10741_v8 = vpop.f32.mrf.mxu2  ;;  %v2102_v33 = vmul.f32 0.2, %v2038_v28 }
 0x4b4   :  { %vm2075_vm10 = vcmp.ge.f32.partialorder %v2043_v40, 0.0  ;;  %v2107_v44 = vmul.f32 0.2, %v2043_v40 }
 0x4b6   :  { %v2139_v53 = vsel %vm2075_vm10, %v2043_v40, %v2107_v44  ;;  %v1880_v40 = vadd.f32 %v10328_v1, %v10704_v36  ;;  %v520_v36 = vperm.slane %v10711_v17, 6 }
 0x4b7   :  { %486 = vperm.xlu1 %8561, %v481_v31   ;;  %453 = vperm.xlu2 %8560, %v442_v26  }
 0x4b8   :  { %2233 = vrot.lane.b32.xlu0 %v2139_v53, %s9145_s0  ;;  %v2040_v44 = vadd.f32 %v1972_v48, %v1880_v40  ;;  %v2134_v53 = vsel %vm2070_vm9, %v2038_v28, %v2102_v33  ;;  %v533_v28 = vperm.slane %v10711_v17, 7  ;;  %v1884_v33 = vadd.f32 %v10328_v1, %v1830_v35 }
 0x4b9   :  { %v559_v1 = vperm.slane %v10758_v54, 1  ;;  %v572_v35 = vperm.slane %v10758_v54, 2 }
 0x4ba   :  { %v2104_v22 = vmul.f32 0.2, %v2040_v44  ;;  %v10748_v46 = vpop.f32.mrf.mxu2  ;;  %vm2072_vm13 = vcmp.ge.f32.partialorder %v2040_v44, 0.0 }
 0x4bf   :  { %499 = vperm.xlu1 %8561, %v494_v2   ;;  %492 = vperm.xlu2 %8560, %v481_v31   ;;  %v507_v31 = vperm.slane %v10711_v17, 5  ;;  %v624_v17 = vperm.slane %v10758_v54, 6 }
 0x4c0   :  { %447 = vperm.xlu0 %8551, %v442_v26   ;;  %v2136_v26 = vsel %vm2072_vm13, %v2040_v44, %v2104_v22 }
 0x4c2   :  { %v2330_v48 = vpop.f32.mrf.mxu2 }
 0x4c7   :  { %8563 = vset.pattern.permute.xlu1 %v9231_v12  ;;  %8562 = vset.pattern.permute.xlu2 %v9228_v11 }
 0x4c8   :  { %2223 = vrot.lane.b32.xlu0 %v2134_v53, %s9145_s0 }
 0x4cf   :  { %518 = vperm.xlu1 %8563, %v507_v31  }
 0x4d0   :  { %2227 = vrot.lane.b32.xlu0 %v2136_v26, %s9145_s0  ;;  %v2222_v16 = vpop.permute.xlu2 %2221  ;;  %v14804_v26 = vperm.slane %v10758_v54, 4 }
 0x4d1   :  { %8339 = vmatmul.msk.f32.gmra.mxu2 %vm14857_vm14, %v2222_v16  ;;  %v2333_v16 = vpop.f32.mrf.mxu2 }
 0x4d7   :  { %531 = vperm.xlu1 %8563, %v520_v36  }
 0x4d8   :  { %538 = vperm.xlu0 %8551, %v533_v28   ;;  %v1980_v40 = vpop.permute.xlu2 %1979 }
 0x4d9   :  { %v2044_v53 = vadd.f32 %v1980_v40, %v1884_v33  ;;  %v2336_v7 = vpop.f32.mrf.mxu2  ;;  %v546_v40 = vperm.slane %v10758_v54, 0 }
 0x4db   :  { %vm2076_vm2 = vcmp.ge.f32.partialorder %v2044_v53, 0.0  ;;  %v2108_v44 = vmul.f32 0.2, %v2044_v53 }
 0x4dd   :  { %v2140_v22 = vsel %vm2076_vm2, %v2044_v53, %v2108_v44  ;;  %v585_v53 = vperm.slane %v10758_v54, 3 }
 0x4de   :  { %2235 = vrot.lane.b32.xlu2 %v2140_v22, %s9145_s0 }
 0x4df   :  { %8565 = vset.pattern.permute.xlu1 %v9228_v11 }
 0x4e0   :  { %603 = vperm.xlu0 %8551, %v14804_v26  }
 0x4e1   :  { %v2339_v33 = vpop.f32.mrf.mxu2 }
 0x4e6   :  { %512 = vperm.xlu2 %8562, %v507_v31  }
 0x4e7   :  { %564 = vperm.xlu1 %8565, %v559_v1  }
 0x4e8   :  { %8568 = vset.pattern.permute.xlu0 %v9231_v12 }
 0x4e9   :  { %v10773_v31 = vpop.f32.mrf.mxu2 }
 0x4ee   :  { %525 = vperm.xlu2 %8562, %v520_v36  }
 0x4ef   :  { %577 = vperm.xlu1 %8565, %v572_v35  }
 0x4f0   :  { %466 = vperm.xlu0 %8568, %v455_v43  }
 0x4f1   :  { %v10781_v44 = vpop.f32.mrf.mxu2 }
 0x4f6   :  { %8564 = vset.pattern.permute.xlu2 %v9231_v12 }
 0x4f7   :  { %8567 = vset.pattern.permute.xlu1 %v9231_v12 }
 0x4f8   :  { %505 = vperm.xlu0 %8568, %v494_v2  }
 0x4f9   :  { %v10779_v43 = vpop.permute.xlu2 %2229  ;;  %v10789_v22 = vpop.f32.mrf.mxu2 }
 0x4fe   :  { %544 = vperm.xlu2 %8564, %v533_v28  }
 0x4ff   :  { %557 = vperm.xlu1 %8567, %v546_v40  }
 0x500   :  { %583 = vperm.xlu0 %8568, %v572_v35   ;;  %v10776_v36 = vpop.permute.xlu1 %2225 }
 0x501   :  { %v10787_v28 = vpop.permute.xlu2 %473  ;;  %v10797_v27 = vpop.f32.mrf.mxu2 }
 0x502   :  { %vm2418_vm8 = vcmp.gt.f32.partialorder %v10787_v28, 0.0 }
 0x503   :  { %v2514_v35 = vsel %vm2418_vm8, %v2330_v48, -1e+30 }
 0x504   :  { %v2561_v6 = vsel %vm14856_vm11, %v2514_v35, -inf }
 0x506   :  { %570 = vperm.xlu2 %8564, %v559_v1   ;;  %v611_v1 = vperm.slane %v10758_v54, 5 }
 0x507   :  { %596 = vperm.xlu1 %8567, %v585_v53  }
 0x508   :  { %635 = vperm.xlu0 %8568, %v624_v17   ;;  %v10785_v2 = vpop.permute.xlu1 %460 }
 0x509   :  { %v10803_v20 = vpop.f32.mrf.mxu2 }
 0x50e   :  { %8566 = vset.pattern.permute.xlu2 %v9228_v11 }
 0x50f   :  { %8570 = vset.pattern.permute.xlu1 %v9228_v11 }
 0x511   :  { %v10793_v29 = vpop.permute.xlu2 %453  ;;  %v10816_v23 = vpop.f32.mrf.mxu2 }
 0x512   :  { %vm2415_vm9 = vcmp.gt.f32.partialorder %v10793_v29, 0.0 }
 0x516   :  { %551 = vperm.xlu2 %8566, %v546_v40  }
 0x517   :  { %616 = vperm.xlu1 %8570, %v611_v1  }
 0x518   :  { %v480_v42 = vpop.permute.xlu1 %479 }
 0x519   :  { %vm2419_vm12 = vcmp.gt.f32.partialorder %v480_v42, 0.0  ;;  %v10801_v48 = vpop.permute.xlu2 %492 }
 0x51a   :  { %v2515_v63 = vsel %vm2419_vm12, %v2333_v16, -1e+30  ;;  %vm2421_vm6 = vcmp.gt.f32.partialorder %v10801_v48, 0.0 }
 0x51b   :  { %v2562_v4 = vsel %vm14856_vm11, %v2515_v63, -inf }
 0x51c   :  { %v2563_v25 = vmax.f32 %v2561_v6, %v2562_v4  ;;  %v2517_v4 = vsel %vm2421_vm6, %v2339_v33, -1e+30 }
 0x51d   :  { %v2571_v26 = vsel %vm14856_vm11, %v2517_v4, -inf }
 0x51e   :  { %v2564_v32 = vrot.slane %v2563_v25, 4  ;;  %590 = vperm.xlu2 %8566, %v585_v53  }
 0x51f   :  { %629 = vperm.xlu1 %8570, %v624_v17  }
 0x520   :  { %v2565_v10 = vmax.f32 %v2563_v25, %v2564_v32 }
 0x521   :  { %v10799_v40 = vpop.permute.xlu1 %2231 }
 0x522   :  { %v2566_v39 = vrot.slane %v2565_v10, 2 }
 0x524   :  { %v2567_v49 = vmax.f32 %v2565_v10, %v2566_v39 }
 0x526   :  { %v2568_v16 = vrot.slane %v2567_v49, 1  ;;  %8569 = vset.pattern.permute.xlu2 %v9231_v12 }
 0x527   :  { %8572 = vset.pattern.permute.xlu1 %v9231_v12 }
 0x528   :  { %v2569_v6 = vmax.f32 %v2567_v49, %v2568_v16  ;;  %v15074_v49 = vperm.slane %v10758_v54, 4  ;;  %v2511_v16 = vsel %vm2415_vm9, %v10735_v13, -1e+30 }
 0x529   :  { %v10808_v53 = vpop.permute.xlu1 %486 }
 0x52a   :  { %v2692_v25 = vsub.f32 %v2515_v63, %v2569_v6  ;;  %vm2420_vm10 = vcmp.gt.f32.partialorder %v10808_v53, 0.0  ;;  %v10811_v32 = vpop.permute.xlu0 %2233  ;;  %v2691_v10 = vsub.f32 %v2514_v35, %v2569_v6  ;;  %v2544_v6 = vsel %vm14856_vm11, %v2511_v16, -inf }
 0x52b   :  { %v2516_v17 = vsel %vm2420_vm10, %v2336_v7, -1e+30 }
 0x52c   :  { %v2570_v39 = vsel %vm14856_vm11, %v2516_v17, -inf  ;;  %v2729_v18 = vmul.f32 1.442695, %v2692_v25  ;;  %v2727_v33 = vmul.f32 1.442695, %v2691_v10  ;;  %v10825_v10 = vpop.f32.mrf.mxu2 }
 0x52d   :  { %v2572_v61 = vmax.f32 %v2570_v39, %v2571_v26 }
 0x52e   :  { %609 = vperm.xlu2 %8569, %v15074_v49   ;;  %8839 = vpow2.f32 %v2729_v18 }
 0x52f   :  { %v2573_v63 = vrot.slane %v2572_v61, 4  ;;  %648 = vperm.xlu1 %8572, %v637_v3   ;;  %8841 = vpow2.f32 %v2727_v33 }
 0x531   :  { %v2574_v7 = vmax.f32 %v2572_v61, %v2573_v63 }
 0x532   :  { %v448_v24 = vpop.permute.xlu0 %447 }
 0x533   :  { %v2575_v35 = vrot.slane %v2574_v7, 2  ;;  %vm2414_vm13 = vcmp.gt.f32.partialorder %v448_v24, 0.0 }
 0x534   :  { %v2510_v26 = vsel %vm2414_vm13, %v10730_v45, -1e+30  ;;  %v8840_v49 = vpop.eup %8839 }
 0x535   :  { %v2576_v25 = vmax.f32 %v2574_v7, %v2575_v35  ;;  %v2543_v54 = vsel %vm14856_vm11, %v2510_v26, -inf  ;;  %v10827_v13 = vmul.f32 %v8840_v49, %v480_v42  ;;  %v8842_v21 = vpop.eup %8841 }
 0x536   :  { %v2545_v39 = vmax.f32 %v2543_v54, %v2544_v6  ;;  %622 = vperm.xlu2 %8569, %v611_v1   ;;  %v10833_v1 = vmul.f32 %v8842_v21, %v10787_v28 }
 0x537   :  { %v2577_v38 = vrot.slane %v2576_v25, 1  ;;  %v2834_v33 = vsel %vm14856_vm11, %v10827_v13, 0.0 }
 0x538   :  { %v2546_v18 = vrot.slane %v2545_v39, 4  ;;  %v10839_v54 = vpop.permute.xlu2 %2235 }
 0x539   :  { %v2578_v61 = vmax.f32 %v2576_v25, %v2577_v38  ;;  %v2833_v38 = vsel %vm14856_vm11, %v10833_v1, 0.0  ;;  %v10837_v25 = vpop.permute.xlu1 %499 }
 0x53a   :  { %v2547_v63 = vmax.f32 %v2545_v39, %v2546_v18  ;;  %v10841_v39 = vpop.f32.mrf.mxu2 }
 0x53b   :  { %v2693_v45 = vsub.f32 %v2516_v17, %v2578_v61  ;;  %v2694_v7 = vsub.f32 %v2517_v4, %v2578_v61  ;;  %v2835_v17 = vadd.f32 %v2834_v33, %v2833_v38 }
 0x53c   :  { %v2548_v30 = vrot.slane %v2547_v63, 2 }
 0x53d   :  { %v2731_v42 = vmul.f32 1.442695, %v2693_v45  ;;  %v2733_v49 = vmul.f32 1.442695, %v2694_v7  ;;  %v2836_v18 = vrot.slane %v2835_v17, 4 }
 0x53e   :  { %v2549_v35 = vmax.f32 %v2547_v63, %v2548_v30  ;;  %8571 = vset.pattern.permute.xlu2 %v9228_v11  ;;  %v2224_v30 = vpop.permute.xlu0 %2223 }
 0x53f   :  { %8340 = vmatmul.msk.f32.gmra.mxu2 %vm14857_vm14, %v2224_v30  ;;  %8843 = vpow2.f32 %v2731_v42  ;;  %v2837_v61 = vadd.f32 %v2836_v18, %v2835_v17 }
 0x540   :  { %v2550_v6 = vrot.slane %v2549_v35, 1  ;;  %8845 = vpow2.f32 %v2733_v49  ;;  %v10844_v33 = vpop.permute.xlu2 %512 }
 0x541   :  { %v2838_v62 = vrot.slane %v2837_v61, 2  ;;  %v10846_v38 = vpop.permute.xlu1 %518  ;;  %vm2424_vm2 = vcmp.gt.f32.partialorder %v10844_v33, 0.0 }
 0x542   :  { %v2551_v4 = vmax.f32 %v2549_v35, %v2550_v6  ;;  %v10850_v6 = vpop.f32.mrf.mxu2  ;;  %vm2425_vm8 = vcmp.gt.f32.partialorder %v10846_v38, 0.0 }
 0x543   :  { %v2839_v7 = vadd.f32 %v2838_v62, %v2837_v61 }
 0x544   :  { %v2687_v21 = vsub.f32 %v2510_v26, %v2551_v4  ;;  %v2688_v28 = vsub.f32 %v2511_v16, %v2551_v4 }
 0x545   :  { %v8844_v35 = vpop.eup %8843  ;;  %v2840_v26 = vrot.slane %v2839_v7, 1 }
 0x546   :  { %v2719_v63 = vmul.f32 1.442695, %v2687_v21  ;;  %v2721_v45 = vmul.f32 1.442695, %v2688_v28  ;;  %642 = vperm.xlu2 %8571, %v637_v3   ;;  %v8846_v16 = vpop.eup %8845  ;;  %v2228_v49 = vpop.permute.xlu0 %2227  ;;  %v10853_v4 = vmul.f32 %v8844_v35, %v10808_v53 }
 0x547   :  { %8341 = vmatmul.msk.f32.gmra.mxu2 %vm14857_vm14, %v10776_v36  ;;  %v2841_v42 = vadd.f32 %v2840_v26, %v2839_v7  ;;  %v10858_v62 = vmul.f32 %v8846_v16, %v10801_v48  ;;  %v10884_v7 = vsel %vm2425_vm8, %v10797_v27, -1e+30  ;;  %vm2416_vm8 = vcmp.gt.f32.partialorder %v10785_v2, 0.0 }
 0x548   :  { %8847 = vpow2.f32 %v2719_v63  ;;  %v10865_v28 = vpop.permute.xlu2 %525 }
 0x549   :  { %8849 = vpow2.f32 %v2721_v45  ;;  %v2961_v18 = vmax.f32 %v2841_v42, 1e-20  ;;  %v10867_v61 = vpop.permute.xlu1 %531  ;;  %v2843_v48 = vsel %vm14856_vm11, %v10858_v62, 0.0  ;;  %vm2426_vm12 = vcmp.gt.f32.partialorder %v10865_v28, 0.0 }
 0x54a   :  { %vm2427_vm6 = vcmp.gt.f32.partialorder %v10867_v61, 0.0  ;;  %v10881_v45 = vsel %vm2424_vm2, %v10789_v22, -1e+30  ;;  %v10886_v35 = vpop.f32.mrf.mxu2  ;;  %v2589_v22 = vsel %vm14856_vm11, %v10884_v7, -inf }
 0x54b   :  { %8851 = vrcp.f32 %v2961_v18  ;;  %v3018_v15 = vand.u32 2147483648, %v2961_v18  ;;  %v3016_v9 = vand.u32 2147483647, %v2961_v18  ;;  %vm3012_vm9 = vweird.f32 %v2961_v18 }
 0x54d   :  { %v3019_v19 = vor.u32 1.1754944e-38, %v3018_v15  ;;  %vm3017_vm2 = vcmp.eq.f32.partialorder %v3016_v9, 8.507059e+37 }
 0x54e   :  { %v8848_v17 = vpop.eup %8847 }
 0x54f   :  { %v8850_v3 = vpop.eup %8849  ;;  %v10855_v30 = vmul.f32 %v8848_v17, %v448_v24  ;;  %v2842_v24 = vsel %vm14856_vm11, %v10853_v4, 0.0  ;;  %8342 = vmatmul.msk.f32.gmra.mxu2 %vm14857_vm14, %v2228_v49  ;;  %v10889_v17 = vsel %vm2426_vm12, %v10803_v20, -1e+30  ;;  %v10892_v49 = vsel %vm2427_vm6, %v10816_v23, -1e+30 }
 0x550   :  { %v10861_v21 = vmul.f32 %v8850_v3, %v10793_v29  ;;  %v2844_v26 = vadd.f32 %v2843_v48, %v2842_v24  ;;  %v2588_v3 = vsel %vm14856_vm11, %v10881_v45, -inf  ;;  %v2597_v24 = vsel %vm14856_vm11, %v10889_v17, -inf }
 0x551   :  { %v2815_v36 = vsel %vm14856_vm11, %v10855_v30, 0.0  ;;  %v8852_v16 = vpop.eup %8851  ;;  %v2598_v20 = vsel %vm14856_vm11, %v10892_v49, -inf }
 0x552   :  { %v2816_v53 = vsel %vm14856_vm11, %v10861_v21, 0.0  ;;  %v3008_v27 = vmul.f32 %v8852_v16, %v2961_v18  ;;  %vm3013_vm10 = vweird.f32 %v8852_v16  ;;  %v2599_v34 = vmax.f32 %v2597_v24, %v2598_v20 }
 0x553   :  { %v2817_v29 = vadd.f32 %v2816_v53, %v2815_v36  ;;  %v10898_v36 = vpop.permute.xlu0 %538  ;;  %v2845_v53 = vrot.slane %v2844_v26, 4  ;;  %vm3014_vm13 = vmor %vm3012_vm9, %vm3013_vm10  ;;  %vm2422_vm10 = vcmp.gt.f32.partialorder %v10837_v25, 0.0 }
 0x555   :  { %v2818_v63 = vrot.slane %v2817_v29, 4  ;;  %v2846_v23 = vadd.f32 %v2845_v53, %v2844_v26 }
 0x557   :  { %v2819_v42 = vadd.f32 %v2818_v63, %v2817_v29  ;;  %v3009_v29 = vsub.f32 1.0, %v3008_v27  ;;  %v2590_v63 = vmax.f32 %v2588_v3, %v2589_v22  ;;  %8343 = vmatmul.msk.f32.gmra.mxu2 %vm14857_vm14, %v10779_v43  ;;  %v2847_v37 = vrot.slane %v2846_v23, 2  ;;  %v2372_v27 = vpop.f32.mrf.mxu2 }
 0x558   :  { %v2600_v43 = vrot.slane %v2599_v34, 4  ;;  %v10908_v3 = vpop.permute.xlu2 %544 }
 0x559   :  { %v2820_v51 = vrot.slane %v2819_v42, 2  ;;  %v3010_v58 = vmul.f32 %v8852_v16, %v3009_v29  ;;  %v2848_v52 = vadd.f32 %v2847_v37, %v2846_v23  ;;  %v2591_v26 = vrot.slane %v2590_v63, 4 }
 0x55a   :  { %v10927_v37 = vsel %vm2416_vm8, %v10741_v8, -1e+30 }
 0x55b   :  { %v2821_v48 = vadd.f32 %v2820_v51, %v2819_v42  ;;  %v3011_v50 = vadd.f32 %v8852_v16, %v3010_v58  ;;  %v10910_v53 = vpop.permute.xlu0 %603  ;;  %v10914_v58 = vpop.permute.xlu1 %564  ;;  %v2552_v23 = vsel %vm14856_vm11, %v10927_v37, -inf }
 0x55c   :  { %vm2432_vm12 = vcmp.gt.f32.partialorder %v10914_v58, 0.0 }
 0x55d   :  { %v2822_v41 = vrot.slane %v2821_v48, 1  ;;  %v3015_v51 = vsel %vm3014_vm13, %v8852_v16, %v3011_v50  ;;  %v2849_v50 = vrot.slane %v2848_v52, 1  ;;  %v10929_v16 = vsel %vm2432_vm12, %v2372_v27, -1e+30 }
 0x55e   :  { %v3020_v22 = vsel %vm3017_vm2, %v3019_v19, %v3015_v51  ;;  %v2601_v19 = vmax.f32 %v2599_v34, %v2600_v43  ;;  %v2624_v27 = vsel %vm14856_vm11, %v10929_v16, -inf  ;;  %v15075_v51 = vmov 0  }
 0x55f   :  { %v2823_v14 = vadd.f32 %v2822_v41, %v2821_v48  ;;  %v3021_v24 = vmul.f32 %v3020_v22, %v10833_v1  ;;  %v14837_v41 = vmov 1   ;;  %8344 = vmatmul.msk.f32.gmra.mxu2 %vm14857_vm14, %v10799_v40  ;;  %v10924_v9 = vmul.f32 %v3020_v22, %v10827_v13  ;;  %v2375_v34 = vpop.f32.mrf.mxu2 }
 0x560   :  { %8581 = vset.pattern.permute.xlu0 %v14837_v41  ;;  %8574 = vset.pattern.permute.xlu2 %v14837_v41  ;;  %v2850_v15 = vadd.f32 %v2849_v50, %v2848_v52  ;;  %v2602_v18 = vrot.slane %v2601_v19, 2  ;;  %v10931_v20 = vpop.permute.xlu2 %570  ;;  %vm2428_vm12 = vcmp.gt.f32.partialorder %v10898_v36, 0.0 }
 0x561   :  { %v10906_v42 = vmax.f32 %v2823_v14, 1e-20  ;;  %v2592_v14 = vmax.f32 %v2590_v63, %v2591_v26  ;;  %3600 = vperm.xlu0 %8581, %v3021_v24   ;;  %8573 = vset.pattern.permute.xlu1 %v14837_v41  ;;  %vm2433_vm6 = vcmp.gt.f32.partialorder %v10931_v20, 0.0  ;;  %v10963_v41 = vsel %vm2422_vm10, %v10773_v31, -1e+30 }
 0x562   :  { %v10933_v29 = vmax.f32 %v2850_v15, 1e-20  ;;  %v10942_v52 = vsel %vm2433_vm6, %v2375_v34, -1e+30  ;;  %v2603_v22 = vmax.f32 %v2601_v19, %v2602_v18  ;;  %vm2429_vm10 = vcmp.gt.f32.partialorder %v10908_v3, 0.0 }
 0x563   :  { %8853 = vrcp.f32 %v10906_v42  ;;  %v2593_v40 = vrot.slane %v2592_v14, 2  ;;  %v10939_v8 = vpop.permute.xlu0 %466  ;;  %v2625_v26 = vsel %vm14856_vm11, %v10942_v52, -inf  ;;  %v2986_v43 = vand.u32 2147483648, %v10906_v42 }
 0x564   :  { %vm2417_vm9 = vcmp.gt.f32.partialorder %v10939_v8, 0.0  ;;  %8855 = vrcp.f32 %v10933_v29  ;;  %v2626_v50 = vmax.f32 %v2624_v27, %v2625_v26  ;;  %vm2980_vm2 = vweird.f32 %v10906_v42 }
 0x565   :  { %v2594_v63 = vmax.f32 %v2592_v14, %v2593_v40  ;;  %v10955_v15 = vsel %vm2417_vm9, %v10748_v46, -1e+30  ;;  %v2984_v14 = vand.u32 2147483647, %v10906_v42  ;;  %v3032_v5 = vand.u32 2147483647, %v10933_v29 }
 0x566   :  { %v2553_v40 = vsel %vm14856_vm11, %v10955_v15, -inf  ;;  %v2627_v34 = vrot.slane %v2626_v50, 4 }
 0x567   :  { %8345 = vmatmul.msk.f32.gmra.mxu2 %vm14857_vm14, %v10811_v32  ;;  %v2595_v46 = vrot.slane %v2594_v63, 1  ;;  %vm2985_vm6 = vcmp.eq.f32.partialorder %v2984_v14, 8.507059e+37  ;;  %v2579_v14 = vsel %vm14856_vm11, %v10963_v41, -inf }
 0x569   :  { %v8854_v1 = vpop.eup %8853  ;;  %8583 = vset.pattern.permute.xlu0 %v15075_v51 }
 0x56a   :  { %v2976_v13 = vmul.f32 %v8854_v1, %v10906_v42  ;;  %3253 = vperm.xlu0 %8583, %v3021_v24   ;;  %vm2981_vm13 = vweird.f32 %v8854_v1  ;;  %v10966_v18 = vpop.eup %8855  ;;  %v2987_v24 = vor.u32 1.1754944e-38, %v2986_v43 }
 0x56b   :  { %vm2982_vm8 = vmor %vm2980_vm2, %vm2981_vm13  ;;  %v3024_v31 = vmul.f32 %v10966_v18, %v10933_v29  ;;  %vm3029_vm13 = vweird.f32 %v10966_v18  ;;  %vm3028_vm2 = vweird.f32 %v10933_v29 }
 0x56c   :  { %v2977_v48 = vsub.f32 1.0, %v2976_v13  ;;  %v2554_v13 = vmax.f32 %v2552_v23, %v2553_v40  ;;  %v2604_v23 = vrot.slane %v2603_v22, 1  ;;  %v10969_v40 = vpop.permute.xlu0 %505 }
 0x56d   :  { %vm2423_vm9 = vcmp.gt.f32.partialorder %v10969_v40, 0.0 }
 0x56e   :  { %v2978_v32 = vmul.f32 %v8854_v1, %v2977_v48  ;;  %v2628_v48 = vmax.f32 %v2626_v50, %v2627_v34  ;;  %v2555_v27 = vrot.slane %v2554_v13, 4  ;;  %v10983_v50 = vsel %vm2428_vm12, %v10825_v10, -1e+30 }
 0x56f   :  { %8346 = vmatmul.msk.f32.gmra.mxu2 %vm14857_vm14, %v10839_v54  ;;  %v2605_v54 = vmax.f32 %v2603_v22, %v2604_v23  ;;  %v11003_v22 = vpop.permute.xlu1 %577  ;;  %v3034_v23 = vand.u32 2147483648, %v10933_v29  ;;  %vm3033_vm12 = vcmp.eq.f32.partialorder %v3032_v5, 8.507059e+37 }
 0x570   :  { %v2979_v19 = vadd.f32 %v8854_v1, %v2978_v32  ;;  %v2629_v42 = vrot.slane %v2628_v48, 2  ;;  %v2556_v56 = vmax.f32 %v2554_v13, %v2555_v27  ;;  %v10989_v13 = vsel %vm2423_vm9, %v10781_v44, -1e+30 }
 0x571   :  { %v2580_v10 = vsel %vm14856_vm11, %v10989_v13, -inf  ;;  %v3035_v11 = vor.u32 1.1754944e-38, %v3034_v23  ;;  %vm2434_vm9 = vcmp.gt.f32.partialorder %v11003_v22, 0.0 }
 0x572   :  { %v2983_v26 = vsel %vm2982_vm8, %v8854_v1, %v2979_v19  ;;  %v10980_v1 = vmax.f32 %v2594_v63, %v2595_v46  ;;  %v2630_v34 = vmax.f32 %v2628_v48, %v2629_v42  ;;  %v2557_v19 = vrot.slane %v2556_v56, 2  ;;  %v10997_v46 = vpop.f32.mrf.mxu2  ;;  %vm3030_vm8 = vmor %vm3028_vm2, %vm3029_vm13 }
 0x573   :  { %v10973_v32 = vsel %vm2985_vm6, %v2987_v24, %v2983_v26  ;;  %v15076_v24 = vmov 1   ;;  %v3025_v63 = vsub.f32 1.0, %v3024_v31  ;;  %v2606_v48 = vsel %vm14856_vm11, %v10983_v50, -inf }
 0x574   :  { %v2989_v43 = vmul.f32 %v10973_v32, %v10855_v30  ;;  %8586 = vset.pattern.permute.xlu0 %v15076_v24  ;;  %v10993_v30 = vsel %vm2429_vm10, %v10841_v39, -1e+30  ;;  %v2631_v27 = vrot.slane %v2630_v34, 1  ;;  %v2558_v26 = vmax.f32 %v2556_v56, %v2557_v19 }
 0x575   :  { %v2581_v44 = vmax.f32 %v2579_v14, %v2580_v10  ;;  %v2698_v42 = vsub.f32 %v10884_v7, %v10980_v1  ;;  %v3026_v39 = vmul.f32 %v10966_v18, %v3025_v63  ;;  %v2607_v31 = vsel %vm14856_vm11, %v10993_v30, -inf }
 0x576   :  { %3584 = vperm.xlu1 %8573, %v2989_v43   ;;  %v2632_v59 = vmax.f32 %v2630_v34, %v2631_v27  ;;  %v2559_v55 = vrot.slane %v2558_v26, 1  ;;  %v2699_v56 = vsub.f32 %v10889_v17, %v2605_v54  ;;  %v2700_v19 = vsub.f32 %v10892_v49, %v2605_v54 }
 0x577   :  { %v2582_v14 = vrot.slane %v2581_v44, 4  ;;  %v3027_v7 = vadd.f32 %v10966_v18, %v3026_v39  ;;  %v2608_v47 = vmax.f32 %v2606_v48, %v2607_v31  ;;  %v11025_v5 = vpop.permute.xlu1 %557 }
 0x578   :  { %v2705_v10 = vsub.f32 %v10929_v16, %v2632_v59  ;;  %v2706_v63 = vsub.f32 %v10942_v52, %v2632_v59  ;;  %v2560_v12 = vmax.f32 %v2558_v26, %v2559_v55  ;;  %v2697_v59 = vsub.f32 %v10881_v45, %v10980_v1  ;;  %v11023_v52 = vpop.permute.xlu2 %551  ;;  %v11028_v26 = vpop.permute.xlu0 %583 }
 0x579   :  { %v2583_v34 = vmax.f32 %v2581_v44, %v2582_v14  ;;  %v3031_v27 = vsel %vm3030_vm8, %v10966_v18, %v3027_v7  ;;  %v2743_v55 = vmul.f32 1.442695, %v2699_v56  ;;  %v2745_v18 = vmul.f32 1.442695, %v2700_v19 }
 0x57a   :  { %v2755_v57 = vmul.f32 1.442695, %v2705_v10  ;;  %v2757_v17 = vmul.f32 1.442695, %v2706_v63  ;;  %v2689_v0 = vsub.f32 %v10927_v37, %v2560_v12  ;;  %v2690_v29 = vsub.f32 %v10955_v15, %v2560_v12  ;;  %v2381_v12 = vpop.f32.mrf.mxu2 }
 0x57b   :  { %v2584_v39 = vrot.slane %v2583_v34, 2  ;;  %v3036_v49 = vsel %vm3033_vm12, %v3035_v11, %v3031_v27  ;;  %v2741_v15 = vmul.f32 1.442695, %v2698_v42  ;;  %v2609_v11 = vrot.slane %v2608_v47, 4 }
 0x57c   :  { %8857 = vpow2.f32 %v2755_v57  ;;  %v2723_v16 = vmul.f32 1.442695, %v2689_v0  ;;  %v2725_v54 = vmul.f32 1.442695, %v2690_v29  ;;  %v3038_v48 = vmul.f32 %v3036_v49, %v10858_v62 }
 0x57d   :  { %8859 = vpow2.f32 %v2757_v17  ;;  %v2585_v37 = vmax.f32 %v2583_v34, %v2584_v39  ;;  %v11031_v0 = vmul.f32 %v3036_v49, %v10853_v4  ;;  %vm2430_vm6 = vcmp.gt.f32.partialorder %v11023_v52, 0.0 }
 0x57e   :  { %8575 = vset.pattern.permute.xlu1 %v15075_v51  ;;  %8861 = vpow2.f32 %v2723_v16  ;;  %3612 = vperm.xlu0 %8586, %v3038_v48   ;;  %vm2431_vm10 = vcmp.gt.f32.partialorder %v11025_v5, 0.0  ;;  %vm2435_vm13 = vcmp.gt.f32.partialorder %v11028_v26, 0.0  ;;  %v2610_v1 = vmax.f32 %v2608_v47, %v2609_v11 }
 0x57f   :  { %3233 = vperm.xlu1 %8575, %v2989_v43   ;;  %8863 = vpow2.f32 %v2725_v54  ;;  %v2586_v57 = vrot.slane %v2585_v37, 1  ;;  %v2739_v43 = vmul.f32 1.442695, %v2697_v59  ;;  %v11038_v44 = vsel %vm2430_vm6, %v10850_v6, -1e+30 }
 0x580   :  { %8865 = vpow2.f32 %v2743_v55  ;;  %v11046_v56 = vsel %vm2431_vm10, %v10886_v35, -1e+30  ;;  %v11052_v47 = vsel %vm2434_vm9, %v10997_v46, -1e+30  ;;  %v11054_v6 = vsel %vm2435_vm13, %v2381_v12, -1e+30 }
 0x581   :  { %8867 = vpow2.f32 %v2745_v18  ;;  %v2587_v45 = vmax.f32 %v2585_v37, %v2586_v57  ;;  %v2634_v17 = vsel %vm14856_vm11, %v11054_v6, -inf  ;;  %v2633_v55 = vsel %vm14856_vm11, %v11052_v47, -inf }
 0x582   :  { %v8858_v62 = vpop.eup %8857  ;;  %8869 = vpow2.f32 %v2741_v15  ;;  %v2384_v39 = vpop.f32.mrf.mxu2  ;;  %v2635_v12 = vmax.f32 %v2633_v55, %v2634_v17 }
 0x583   :  { %v8860_v4 = vpop.eup %8859  ;;  %v11041_v42 = vmul.f32 %v8858_v62, %v10914_v58  ;;  %v2695_v23 = vsub.f32 %v10963_v41, %v2587_v45  ;;  %v2696_v31 = vsub.f32 %v10989_v13, %v2587_v45  ;;  %v2990_v58 = vmul.f32 %v10973_v32, %v10861_v21 }
 0x584   :  { %v8862_v14 = vpop.eup %8861  ;;  %v11049_v7 = vmul.f32 %v8860_v4, %v10931_v20  ;;  %v2615_v20 = vsel %vm14856_vm11, %v11038_v44, -inf  ;;  %v2616_v32 = vsel %vm14856_vm11, %v11046_v56, -inf  ;;  %8871 = vpow2.f32 %v2739_v43 }
 0x585   :  { %v8864_v41 = vpop.eup %8863  ;;  %v2896_v13 = vsel %vm14856_vm11, %v11041_v42, 0.0  ;;  %v11062_v35 = vmul.f32 %v8862_v14, %v10785_v2  ;;  %v2735_v19 = vmul.f32 1.442695, %v2695_v23  ;;  %v2737_v21 = vmul.f32 1.442695, %v2696_v31  ;;  %3588 = vperm.xlu2 %8574, %v2990_v58   ;;  %v11088_v31 = vpop.permute.xlu2 %590 }
 0x586   :  { %v8866_v46 = vpop.eup %8865  ;;  %v2897_v10 = vsel %vm14856_vm11, %v11049_v7, 0.0  ;;  %v11069_v63 = vmul.f32 %v8864_v41, %v10939_v8  ;;  %v2611_v2 = vrot.slane %v2610_v1, 2  ;;  %8588 = vset.pattern.permute.xlu0 %v15075_v51  ;;  %v2617_v18 = vmax.f32 %v2615_v20, %v2616_v32  ;;  %v11090_v14 = vpop.permute.xlu1 %596 }
 0x587   :  { %8578 = vset.pattern.permute.xlu1 %v15076_v24  ;;  %v8868_v34 = vpop.eup %8867  ;;  %v2898_v27 = vadd.f32 %v2897_v10, %v2896_v13  ;;  %v2824_v49 = vsel %vm14856_vm11, %v11062_v35, 0.0  ;;  %8873 = vpow2.f32 %v2735_v19  ;;  %3268 = vperm.xlu0 %8588, %v3038_v48   ;;  %v11083_v54 = vmul.f32 %v8866_v46, %v10865_v28 }
 0x588   :  { %v8870_v29 = vpop.eup %8869  ;;  %v2825_v8 = vsel %vm14856_vm11, %v11069_v63, 0.0  ;;  %v11086_v37 = vmul.f32 %v8868_v34, %v10867_v61  ;;  %8875 = vpow2.f32 %v2737_v21  ;;  %v2612_v15 = vmax.f32 %v2610_v1, %v2611_v2 }
 0x589   :  { %v2899_v59 = vrot.slane %v2898_v27, 4  ;;  %v2826_v16 = vadd.f32 %v2825_v8, %v2824_v49  ;;  %v2618_v4 = vrot.slane %v2617_v18, 4  ;;  %v2636_v23 = vrot.slane %v2635_v12, 4 }
 0x58a   :  { %v8872_v45 = vpop.eup %8871  ;;  %v11093_v28 = vmul.f32 %v8870_v29, %v10846_v38  ;;  %v2869_v61 = vsel %vm14856_vm11, %v11083_v54, 0.0  ;;  %v2870_v1 = vsel %vm14856_vm11, %v11086_v37, 0.0  ;;  %v2613_v41 = vrot.slane %v2612_v15, 1  ;;  %v2387_v34 = vpop.f32.mrf.mxu2 }
 0x58b   :  { %v2900_v11 = vadd.f32 %v2899_v59, %v2898_v27  ;;  %v2827_v57 = vrot.slane %v2826_v16, 4  ;;  %vm2436_vm2 = vcmp.gt.f32.partialorder %v11088_v31, 0.0  ;;  %vm2437_vm8 = vcmp.gt.f32.partialorder %v11090_v14, 0.0 }
 0x58c   :  { %v11106_v38 = vmul.f32 %v8872_v45, %v10844_v33  ;;  %v2871_v10 = vadd.f32 %v2870_v1, %v2869_v61  ;;  %v2619_v21 = vmax.f32 %v2617_v18, %v2618_v4  ;;  %v2637_v32 = vmax.f32 %v2635_v12, %v2636_v23 }
 0x58d   :  { %v2901_v62 = vrot.slane %v2900_v11, 2  ;;  %v2828_v43 = vadd.f32 %v2827_v57, %v2826_v16  ;;  %v8874_v48 = vpop.eup %8873  ;;  %8576 = vset.pattern.permute.xlu2 %v15075_v51  ;;  %v2614_v17 = vmax.f32 %v2612_v15, %v2613_v41  ;;  %v11116_v33 = vsel %vm2436_vm2, %v2384_v39, -1e+30 }
 0x58e   :  { %3238 = vperm.xlu2 %8576, %v2990_v58   ;;  %v8876_v20 = vpop.eup %8875  ;;  %v11101_v46 = vmul.f32 %v8874_v48, %v10837_v25  ;;  %v2861_v58 = vsel %vm14856_vm11, %v11093_v28, 0.0  ;;  %v11118_v49 = vsel %vm2437_vm8, %v2387_v34, -1e+30  ;;  %v2860_v16 = vsel %vm14856_vm11, %v11106_v38, 0.0 }
 0x58f   :  { %v2902_v13 = vadd.f32 %v2901_v62, %v2900_v11  ;;  %v2829_v19 = vrot.slane %v2828_v43, 2  ;;  %8593 = vset.pattern.permute.xlu0 %v15076_v24  ;;  %v11112_v25 = vmul.f32 %v8876_v20, %v10969_v40  ;;  %v2872_v18 = vrot.slane %v2871_v10, 4 }
 0x590   :  { %v2851_v29 = vsel %vm14856_vm11, %v11101_v46, 0.0  ;;  %v2620_v40 = vrot.slane %v2619_v21, 2  ;;  %v2638_v11 = vrot.slane %v2637_v32, 2  ;;  %v2642_v39 = vsel %vm14856_vm11, %v11116_v33, -inf }
 0x591   :  { %v2903_v2 = vrot.slane %v2902_v13, 1  ;;  %v2830_v27 = vadd.f32 %v2829_v19, %v2828_v43  ;;  %v2852_v55 = vsel %vm14856_vm11, %v11112_v25, 0.0  ;;  %v2643_v45 = vsel %vm14856_vm11, %v11118_v49, -inf }
 0x592   :  { %v2853_v12 = vadd.f32 %v2852_v55, %v2851_v29  ;;  %v2701_v62 = vsub.f32 %v10983_v50, %v2614_v17  ;;  %v2639_v4 = vmax.f32 %v2637_v32, %v2638_v11  ;;  %v2702_v23 = vsub.f32 %v10993_v30, %v2614_v17 }
 0x593   :  { %v2904_v8 = vadd.f32 %v2903_v2, %v2902_v13  ;;  %v2831_v59 = vrot.slane %v2830_v27, 1  ;;  %v2644_v1 = vmax.f32 %v2642_v39, %v2643_v45  ;;  %v2862_v41 = vadd.f32 %v2861_v58, %v2860_v16 }
 0x594   :  { %v2854_v43 = vrot.slane %v2853_v12, 4  ;;  %v2873_v13 = vadd.f32 %v2872_v18, %v2871_v10  ;;  %v2621_v19 = vmax.f32 %v2619_v21, %v2620_v40  ;;  %v2747_v20 = vmul.f32 1.442695, %v2701_v62 }
 0x595   :  { %v2968_v15 = vmax.f32 %v2904_v8, 1e-20  ;;  %v2832_v57 = vadd.f32 %v2831_v59, %v2830_v27  ;;  %v2640_v34 = vrot.slane %v2639_v4, 1  ;;  %v2749_v2 = vmul.f32 1.442695, %v2702_v23 }
 0x596   :  { %8577 = vset.pattern.permute.xlu2 %v15076_v24  ;;  %v2855_v61 = vadd.f32 %v2854_v43, %v2853_v12  ;;  %v2645_v27 = vrot.slane %v2644_v1, 4  ;;  %v2863_v32 = vrot.slane %v2862_v41, 4  ;;  %v2874_v8 = vrot.slane %v2873_v13, 2 }
 0x597   :  { %8877 = vrcp.f32 %v2968_v15  ;;  %v11131_v48 = vmax.f32 %v2832_v57, 1e-20  ;;  %v2622_v59 = vrot.slane %v2621_v19, 1  ;;  %v2641_v17 = vmax.f32 %v2639_v4, %v2640_v34 }
 0x598   :  { %v2856_v50 = vrot.slane %v2855_v61, 2  ;;  %v2646_v10 = vmax.f32 %v2644_v1, %v2645_v27  ;;  %v2864_v21 = vadd.f32 %v2863_v32, %v2862_v41  ;;  %v2875_v16 = vadd.f32 %v2874_v8, %v2873_v13 }
 0x599   :  { %8879 = vrcp.f32 %v11131_v48  ;;  %v3130_v18 = vand.u32 2147483648, %v2968_v15  ;;  %v2623_v11 = vmax.f32 %v2621_v19, %v2622_v59  ;;  %v3128_v39 = vand.u32 2147483647, %v2968_v15 }
 0x59a   :  { %8881 = vpow2.f32 %v2747_v20  ;;  %v2857_v58 = vadd.f32 %v2856_v50, %v2855_v61  ;;  %v2707_v45 = vsub.f32 %v11052_v47, %v2641_v17  ;;  %vm3124_vm6 = vweird.f32 %v2968_v15 }
 0x59b   :  { %8883 = vpow2.f32 %v2749_v2  ;;  %v3002_v43 = vand.u32 2147483648, %v11131_v48  ;;  %v2708_v4 = vsub.f32 %v11054_v6, %v2641_v17  ;;  %v2647_v41 = vrot.slane %v2646_v10, 2 }
 0x59c   :  { %v2858_v1 = vrot.slane %v2857_v58, 1  ;;  %v2865_v13 = vrot.slane %v2864_v21, 2  ;;  %v3131_v34 = vor.u32 1.1754944e-38, %v3130_v18  ;;  %v3000_v2 = vand.u32 2147483647, %v11131_v48 }
 0x59d   :  { %v8878_v29 = vpop.eup %8877  ;;  %vm3129_vm13 = vcmp.eq.f32.partialorder %v3128_v39, 8.507059e+37  ;;  %vm2996_vm2 = vweird.f32 %v11131_v48  ;;  %v2759_v47 = vmul.f32 1.442695, %v2707_v45  ;;  %v3003_v27 = vor.u32 1.1754944e-38, %v3002_v43 }
 0x59e   :  { %v3120_v30 = vmul.f32 %v8878_v29, %v2968_v15  ;;  %vm3125_vm12 = vweird.f32 %v8878_v29  ;;  %v2761_v32 = vmul.f32 1.442695, %v2708_v4  ;;  %v2859_v59 = vadd.f32 %v2858_v1, %v2857_v58 }
 0x59f   :  { %v8880_v55 = vpop.eup %8879  ;;  %vm3126_vm10 = vmor %vm3124_vm6, %vm3125_vm12  ;;  %v2866_v17 = vadd.f32 %v2865_v13, %v2864_v21  ;;  %vm3001_vm12 = vcmp.eq.f32.partialorder %v3000_v2, 8.507059e+37  ;;  %8885 = vpow2.f32 %v2759_v47  ;;  %v2704_v58 = vsub.f32 %v11046_v56, %v2623_v11 }
 0x5a0   :  { %v3121_v12 = vsub.f32 1.0, %v3120_v30  ;;  %v2992_v40 = vmul.f32 %v8880_v55, %v11131_v48  ;;  %v8882_v23 = vpop.eup %8881  ;;  %vm2997_vm9 = vweird.f32 %v8880_v55  ;;  %v2648_v30 = vmax.f32 %v2646_v10, %v2647_v41 }
 0x5a1   :  { %v8884_v20 = vpop.eup %8883  ;;  %vm2998_vm8 = vmor %vm2996_vm2, %vm2997_vm9  ;;  %v11148_v48 = vmul.f32 %v8882_v23, %v10898_v36  ;;  %8887 = vpow2.f32 %v2761_v32  ;;  %v2753_v43 = vmul.f32 1.442695, %v2704_v58 }
 0x5a2   :  { %v3122_v57 = vmul.f32 %v8878_v29, %v3121_v12  ;;  %v2993_v62 = vsub.f32 1.0, %v2992_v40  ;;  %v2876_v12 = vrot.slane %v2875_v16, 1  ;;  %v11153_v39 = vmul.f32 %v8884_v20, %v10908_v3 }
 0x5a3   :  { %v2649_v10 = vrot.slane %v2648_v30, 1 }
 0x5a4   :  { %v3123_v61 = vadd.f32 %v8878_v29, %v3122_v57  ;;  %v2994_v19 = vmul.f32 %v8880_v55, %v2993_v62  ;;  %v2867_v57 = vrot.slane %v2866_v17, 1  ;;  %v2877_v45 = vadd.f32 %v2876_v12, %v2875_v16 }
 0x5a5   :  { %v2878_v62 = vsel %vm14856_vm11, %v11148_v48, 0.0  ;;  %v2879_v3 = vsel %vm14856_vm11, %v11153_v39, 0.0  ;;  %v8886_v4 = vpop.eup %8885  ;;  %v2650_v56 = vmax.f32 %v2648_v30, %v2649_v10 }
 0x5a6   :  { %v3127_v50 = vsel %vm3126_vm10, %v8878_v29, %v3123_v61  ;;  %v2995_v6 = vadd.f32 %v8880_v55, %v2994_v19  ;;  %v2703_v29 = vsub.f32 %v11038_v44, %v2623_v11  ;;  %v2868_v44 = vadd.f32 %v2867_v57, %v2866_v17 }
 0x5a7   :  { %v11140_v15 = vsel %vm3129_vm13, %v3131_v34, %v3127_v50  ;;  %v2880_v11 = vadd.f32 %v2879_v3, %v2878_v62  ;;  %v11165_v23 = vmax.f32 %v2877_v45, 1e-20  ;;  %v11168_v16 = vmul.f32 %v8886_v4, %v11003_v22 }
 0x5a8   :  { %v11144_v8 = vmul.f32 %v11140_v15, %v11049_v7  ;;  %v2999_v18 = vsel %vm2998_vm8, %v8880_v55, %v2995_v6  ;;  %v11158_v55 = vmax.f32 %v2859_v59, 1e-20  ;;  %v2751_v21 = vmul.f32 1.442695, %v2703_v29 }
 0x5a9   :  { %v11150_v40 = vsel %vm3001_vm12, %v3003_v27, %v2999_v18  ;;  %v2964_v36 = vmax.f32 %v2868_v44, 1e-20  ;;  %v2709_v1 = vsub.f32 %v11116_v33, %v2650_v56  ;;  %v2710_v41 = vsub.f32 %v11118_v49, %v2650_v56 }
 0x5aa   :  { %v3006_v7 = vmul.f32 %v11150_v40, %v11069_v63  ;;  %8889 = vrcp.f32 %v11158_v55  ;;  %v8888_v63 = vpop.eup %8887  ;;  %v2881_v20 = vrot.slane %v2880_v11, 4  ;;  %v2905_v22 = vsel %vm14856_vm11, %v11168_v16, 0.0 }
 0x5ab   :  { %8891 = vpow2.f32 %v2751_v21  ;;  %v11171_v61 = vmul.f32 %v8888_v63, %v11028_v26  ;;  %v2763_v2 = vmul.f32 1.442695, %v2709_v1  ;;  %v2765_v50 = vmul.f32 1.442695, %v2710_v41 }
 0x5ac   :  { %3596 = vperm.xlu1 %8578, %v3006_v7   ;;  %8893 = vrcp.f32 %v2964_v36  ;;  %v2882_v6 = vadd.f32 %v2881_v20, %v2880_v11  ;;  %v3066_v29 = vand.u32 2147483648, %v2964_v36  ;;  %vm3060_vm10 = vweird.f32 %v2964_v36 }
 0x5ad   :  { %8895 = vpow2.f32 %v2753_v43  ;;  %v2906_v26 = vsel %vm14856_vm11, %v11171_v61, 0.0  ;;  %v3005_v4 = vmul.f32 %v11150_v40, %v11062_v35  ;;  %vm3044_vm8 = vweird.f32 %v11158_v55 }
 0x5ae   :  { %8897 = vrcp.f32 %v11165_v23  ;;  %v2907_v27 = vadd.f32 %v2906_v26, %v2905_v22  ;;  %v2883_v57 = vrot.slane %v2882_v6, 2  ;;  %v3067_v45 = vor.u32 1.1754944e-38, %v3066_v29 }
 0x5af   :  { %8899 = vpow2.f32 %v2763_v2  ;;  %3592 = vperm.xlu2 %8577, %v3005_v4   ;;  %v3048_v40 = vand.u32 2147483647, %v11158_v55 }
 0x5b0   :  { %v11176_v13 = vpop.eup %8889  ;;  %8901 = vpow2.f32 %v2765_v50  ;;  %v2908_v58 = vrot.slane %v2907_v27, 4  ;;  %v2884_v3 = vadd.f32 %v2883_v57, %v2882_v6 }
 0x5b1   :  { %v8892_v34 = vpop.eup %8891  ;;  %v3040_v49 = vmul.f32 %v11176_v13, %v11158_v55  ;;  %vm3045_vm2 = vweird.f32 %v11176_v13 }
 0x5b2   :  { %v8894_v19 = vpop.eup %8893  ;;  %v11186_v59 = vmul.f32 %v8892_v34, %v11023_v52  ;;  %v2909_v11 = vadd.f32 %v2908_v58, %v2907_v27  ;;  %v2885_v34 = vrot.slane %v2884_v3, 1  ;;  %vm3046_vm12 = vmor %vm3044_vm8, %vm3045_vm2  ;;  %vm2438_vm8 = vcmp.gt.f32.partialorder %v10910_v53, 0.0 }
 0x5b3   :  { %v8896_v33 = vpop.eup %8895  ;;  %v3056_v47 = vmul.f32 %v8894_v19, %v2964_v36  ;;  %v3041_v12 = vsub.f32 1.0, %v3040_v49  ;;  %vm3061_vm6 = vweird.f32 %v8894_v19 }
 0x5b4   :  { %8580 = vset.pattern.permute.xlu1 %v15075_v51  ;;  %v11189_v30 = vmul.f32 %v8896_v33, %v11025_v5  ;;  %v11191_v17 = vpop.eup %8897  ;;  %v2887_v5 = vsel %vm14856_vm11, %v11186_v59, 0.0  ;;  %vm3062_vm9 = vmor %vm3060_vm10, %vm3061_vm6  ;;  %v2910_v26 = vrot.slane %v2909_v11, 2  ;;  %v2886_v50 = vadd.f32 %v2885_v34, %v2884_v3 }
 0x5b5   :  { %3248 = vperm.xlu1 %8580, %v3006_v7   ;;  %v3057_v32 = vsub.f32 1.0, %v3056_v47  ;;  %v3064_v7 = vand.u32 2147483647, %v2964_v36  ;;  %v3072_v52 = vmul.f32 %v11191_v17, %v11165_v23  ;;  %v3042_v21 = vmul.f32 %v11176_v13, %v3041_v12  ;;  %v8900_v62 = vpop.eup %8899 }
 0x5b6   :  { %v2888_v44 = vsel %vm14856_vm11, %v11189_v30, 0.0  ;;  %v8902_v56 = vpop.eup %8901  ;;  %v11212_v22 = vmul.f32 %v8900_v62, %v11088_v31  ;;  %vm3049_vm6 = vcmp.eq.f32.partialorder %v3048_v40, 8.507059e+37  ;;  %v2911_v47 = vadd.f32 %v2910_v26, %v2909_v11 }
 0x5b7   :  { %v3058_v18 = vmul.f32 %v8894_v19, %v3057_v32  ;;  %vm3065_vm13 = vcmp.eq.f32.partialorder %v3064_v7, 8.507059e+37  ;;  %v2889_v63 = vadd.f32 %v2888_v44, %v2887_v5  ;;  %v3073_v41 = vsub.f32 1.0, %v3072_v52  ;;  %8579 = vset.pattern.permute.xlu2 %v15075_v51  ;;  %v2390_v44 = vpop.f32.mrf.mxu2 }
 0x5b8   :  { %v3043_v20 = vadd.f32 %v11176_v13, %v3042_v21  ;;  %v11215_v35 = vmul.f32 %v8902_v56, %v11090_v14  ;;  %v2914_v14 = vsel %vm14856_vm11, %v11212_v22, 0.0  ;;  %vm3077_vm10 = vweird.f32 %v11191_v17  ;;  %3243 = vperm.xlu2 %8579, %v3005_v4  }
 0x5b9   :  { %v3059_v10 = vadd.f32 %v8894_v19, %v3058_v18  ;;  %v3074_v2 = vmul.f32 %v11191_v17, %v3073_v41  ;;  %v3080_v32 = vand.u32 2147483647, %v11165_v23  ;;  %v11236_v12 = vmax.f32 %v2886_v50, 1e-20 }
 0x5ba   :  { %v3047_v31 = vsel %vm3046_vm12, %v11176_v13, %v3043_v20  ;;  %v2915_v49 = vsel %vm14856_vm11, %v11215_v35, 0.0  ;;  %v2912_v57 = vrot.slane %v2911_v47, 1  ;;  %v11255_v4 = vsel %vm2438_vm8, %v2390_v44, -1e+30 }
 0x5bb   :  { %v3063_v43 = vsel %vm3062_vm9, %v8894_v19, %v3059_v10  ;;  %v3050_v19 = vand.u32 2147483648, %v11158_v55  ;;  %v3075_v6 = vadd.f32 %v11191_v17, %v3074_v2  ;;  %v2916_v13 = vadd.f32 %v2915_v49, %v2914_v14 }
 0x5bc   :  { %v11204_v1 = vsel %vm3065_vm13, %v3067_v45, %v3063_v43  ;;  %vm3076_vm9 = vweird.f32 %v11165_v23  ;;  %vm3081_vm2 = vcmp.eq.f32.partialorder %v3080_v32, 8.507059e+37  ;;  %8903 = vrcp.f32 %v11236_v12  ;;  %v11251_v43 = vpop.permute.xlu2 %609 }
 0x5bd   :  { %8585 = vset.pattern.permute.xlu1 %v15076_v24  ;;  %v3069_v36 = vmul.f32 %v11204_v1, %v11106_v38  ;;  %v2890_v38 = vrot.slane %v2889_v63, 4  ;;  %v3051_v33 = vor.u32 1.1754944e-38, %v3050_v19  ;;  %vm3078_vm13 = vmor %vm3076_vm9, %vm3077_vm10  ;;  %v2917_v10 = vrot.slane %v2916_v13, 4 }
 0x5be   :  { %3608 = vperm.xlu1 %8585, %v11031_v0   ;;  %v3079_v7 = vsel %vm3078_vm13, %v11191_v17, %v3075_v6  ;;  %v2913_v5 = vadd.f32 %v2912_v57, %v2911_v47  ;;  %vm2439_vm12 = vcmp.gt.f32.partialorder %v11251_v43, 0.0  ;;  %v3098_v6 = vand.u32 2147483648, %v11236_v12  ;;  %v11289_v57 = vpop.permute.xlu1 %616 }
 0x5bf   :  { %3624 = vperm.xlu0 %8593, %v3069_v36   ;;  %v2891_v55 = vadd.f32 %v2890_v38, %v2889_v63  ;;  %v11229_v27 = vsel %vm3049_vm6, %v3051_v33, %v3047_v31  ;;  %v2918_v21 = vadd.f32 %v2917_v10, %v2916_v13  ;;  %v3133_v32 = vmul.f32 %v11140_v15, %v11041_v42 }
 0x5c0   :  { %v3054_v18 = vmul.f32 %v11229_v27, %v11112_v25  ;;  %8582 = vset.pattern.permute.xlu2 %v15076_v24  ;;  %v11246_v45 = vmax.f32 %v2913_v5, 1e-20  ;;  %v3053_v47 = vmul.f32 %v11229_v27, %v11101_v46  ;;  %vm3092_vm10 = vweird.f32 %v11236_v12 }
 0x5c1   :  { %v2892_v29 = vrot.slane %v2891_v55, 2  ;;  %3604 = vperm.xlu2 %8582, %v10924_v9   ;;  %v2919_v3 = vrot.slane %v2918_v21, 2  ;;  %v3096_v27 = vand.u32 2147483647, %v11236_v12  ;;  %v3099_v42 = vor.u32 1.1754944e-38, %v3098_v6  ;;  %v11344_v6 = vpop.permute.xlu0 %635 }
 0x5c2   :  { %v11249_v62 = vpop.eup %8903  ;;  %8905 = vrcp.f32 %v11246_v45  ;;  %v2393_v63 = vpop.f32.mrf.mxu2  ;;  %vm2440_vm13 = vcmp.gt.f32.partialorder %v11289_v57, 0.0 }
 0x5c3   :  { %v2893_v52 = vadd.f32 %v2892_v29, %v2891_v55  ;;  %v3088_v56 = vmul.f32 %v11249_v62, %v11236_v12  ;;  %v2920_v11 = vadd.f32 %v2919_v3, %v2918_v21  ;;  %v2535_v41 = vsel %vm2439_vm12, %v2393_v63, -1e+30 }
 0x5c4   :  { %v2652_v20 = vsel %vm14856_vm11, %v2535_v41, -inf  ;;  %vm3093_vm6 = vweird.f32 %v11249_v62  ;;  %v11298_v15 = vpop.permute.xlu2 %622 }
 0x5c5   :  { %v2894_v17 = vrot.slane %v2893_v52, 1  ;;  %v3089_v40 = vsub.f32 1.0, %v3088_v56  ;;  %v2921_v26 = vrot.slane %v2920_v11, 1  ;;  %vm11294_vm9 = vmor %vm3092_vm10, %vm3093_vm6  ;;  %vm2441_vm8 = vcmp.gt.f32.partialorder %v11298_v15, 0.0 }
 0x5c6   :  { %8587 = vset.pattern.permute.xlu1 %v15075_v51  ;;  %vm3140_vm6 = vweird.f32 %v11246_v45 }
 0x5c7   :  { %3263 = vperm.xlu1 %8587, %v11031_v0   ;;  %v3082_v0 = vand.u32 2147483648, %v11165_v23  ;;  %8595 = vset.pattern.permute.xlu0 %v15075_v51  ;;  %v3090_v14 = vmul.f32 %v11249_v62, %v3089_v40  ;;  %v2922_v49 = vadd.f32 %v2921_v26, %v2920_v11  ;;  %v3146_v11 = vand.u32 2147483648, %v11246_v45 }
 0x5c8   :  { %3283 = vperm.xlu0 %8595, %v3069_v36   ;;  %v2651_v36 = vsel %vm14856_vm11, %v11255_v4, -inf  ;;  %v11269_v38 = vpop.eup %8905 }
 0x5c9   :  { %v3083_v58 = vor.u32 1.1754944e-38, %v3082_v0  ;;  %8584 = vset.pattern.permute.xlu2 %v15075_v51  ;;  %v2653_v19 = vmax.f32 %v2651_v36, %v2652_v20  ;;  %v3091_v0 = vadd.f32 %v11249_v62, %v3090_v14  ;;  %v11287_v29 = vmax.f32 %v2922_v49, 1e-20 }
 0x5ca   :  { %3258 = vperm.xlu2 %8584, %v10924_v9   ;;  %v3136_v9 = vmul.f32 %v11269_v38, %v11246_v45  ;;  %v2396_v55 = vpop.f32.mrf.mxu2  ;;  %vm3141_vm12 = vweird.f32 %v11269_v38  ;;  %v3144_v36 = vand.u32 2147483647, %v11246_v45 }
 0x5cb   :  { %v3084_v23 = vsel %vm3081_vm2, %v3083_v58, %v3079_v7  ;;  %v2654_v2 = vrot.slane %v2653_v19, 4  ;;  %v3095_v10 = vsel %vm11294_vm9, %v11249_v62, %v3091_v0  ;;  %v11310_v44 = vsel %vm2440_vm13, %v2396_v55, -1e+30  ;;  %vm3142_vm10 = vmor %vm3140_vm6, %vm3141_vm12 }
 0x5cc   :  { %v3086_v25 = vmul.f32 %v3084_v23, %v11086_v37  ;;  %v2895_v37 = vadd.f32 %v2894_v17, %v2893_v52  ;;  %v3085_v31 = vmul.f32 %v3084_v23, %v11083_v54  ;;  %v3137_v13 = vsub.f32 1.0, %v3136_v9 }
 0x5cd   :  { %v2655_v33 = vmax.f32 %v2653_v19, %v2654_v2  ;;  %vm3097_vm2 = vcmp.eq.f32.partialorder %v3096_v27, 8.507059e+37  ;;  %vm3145_vm9 = vcmp.eq.f32.partialorder %v3144_v36, 8.507059e+37  ;;  %vm2443_vm12 = vcmp.gt.f32.partialorder %v11344_v6, 0.0 }
 0x5ce   :  { %v11265_v34 = vmax.f32 %v2895_v37, 1e-20  ;;  %v3138_v12 = vmul.f32 %v11269_v38, %v3137_v13 }
 0x5cf   :  { %8590 = vset.pattern.permute.xlu1 %v15076_v24  ;;  %v2656_v50 = vrot.slane %v2655_v33, 2 }
 0x5d0   :  { %3620 = vperm.xlu1 %8590, %v3054_v18   ;;  %8598 = vset.pattern.permute.xlu0 %v15076_v24  ;;  %8907 = vrcp.f32 %v11265_v34  ;;  %v3139_v37 = vadd.f32 %v11269_v38, %v3138_v12 }
 0x5d1   :  { %3636 = vperm.xlu0 %8598, %v3086_v25   ;;  %v2657_v54 = vmax.f32 %v2655_v33, %v2656_v50  ;;  %8909 = vrcp.f32 %v11287_v29  ;;  %v3070_v50 = vmul.f32 %v11204_v1, %v11093_v28  ;;  %v3112_v1 = vand.u32 2147483647, %v11265_v34 }
 0x5d2   :  { %8589 = vset.pattern.permute.xlu2 %v15076_v24  ;;  %v2399_v21 = vpop.f32.mrf.mxu2  ;;  %v3143_v26 = vsel %vm3142_vm10, %v11269_v38, %v3139_v37 }
 0x5d3   :  { %3616 = vperm.xlu2 %8589, %v3053_v47   ;;  %v2658_v46 = vrot.slane %v2657_v54, 1  ;;  %v11315_v3 = vsel %vm2441_vm8, %v2399_v21, -1e+30  ;;  %vm3113_vm10 = vcmp.eq.f32.partialorder %v3112_v1, 8.507059e+37 }
 0x5d4   :  { %v2661_v56 = vsel %vm14856_vm11, %v11315_v3, -inf }
 0x5d5   :  { %v2659_v58 = vmax.f32 %v2657_v54, %v2658_v46 }
 0x5d7   :  { %v2711_v52 = vsub.f32 %v11255_v4, %v2659_v58  ;;  %v2712_v5 = vsub.f32 %v2535_v41, %v2659_v58  ;;  %v2660_v4 = vsel %vm14856_vm11, %v11310_v44, -inf }
 0x5d8   :  { %8592 = vset.pattern.permute.xlu1 %v15075_v51  ;;  %v2662_v41 = vmax.f32 %v2660_v4, %v2661_v56 }
 0x5d9   :  { %3278 = vperm.xlu1 %8592, %v3054_v18   ;;  %8600 = vset.pattern.permute.xlu0 %v15075_v51  ;;  %v11285_v18 = vpop.eup %8907  ;;  %v2767_v17 = vmul.f32 1.442695, %v2711_v52  ;;  %v2769_v62 = vmul.f32 1.442695, %v2712_v5 }
 0x5da   :  { %3298 = vperm.xlu0 %8600, %v3086_v25   ;;  %v3104_v23 = vmul.f32 %v11285_v18, %v11265_v34  ;;  %v11313_v25 = vsel %vm3097_vm2, %v3099_v42, %v3095_v10  ;;  %v11328_v20 = vpop.eup %8909  ;;  %v2663_v40 = vrot.slane %v2662_v41, 4  ;;  %v2402_v49 = vpop.f32.mrf.mxu2  ;;  %vm3109_vm13 = vweird.f32 %v11285_v18 }
 0x5db   :  { %8591 = vset.pattern.permute.xlu2 %v15075_v51  ;;  %8911 = vpow2.f32 %v2767_v17  ;;  %v3102_v19 = vmul.f32 %v11313_v25, %v11153_v39  ;;  %v3152_v45 = vmul.f32 %v11328_v20, %v11287_v29  ;;  %vm3108_vm2 = vweird.f32 %v11265_v34 }
 0x5dc   :  { %v3105_v63 = vsub.f32 1.0, %v3104_v23  ;;  %3273 = vperm.xlu2 %8591, %v3053_v47   ;;  %8913 = vpow2.f32 %v2769_v62  ;;  %v2664_v33 = vmax.f32 %v2662_v41, %v2663_v40  ;;  %v3114_v47 = vand.u32 2147483648, %v11265_v34  ;;  %vm11357_vm8 = vmor %vm3108_vm2, %vm3109_vm13  ;;  %v11395_v41 = vpop.permute.xlu2 %642 }
 0x5dd   :  { %v3153_v13 = vsub.f32 1.0, %v3152_v45  ;;  %vm3156_vm13 = vweird.f32 %v11287_v29 }
 0x5de   :  { %v3106_v2 = vmul.f32 %v11285_v18, %v3105_v63  ;;  %v2665_v39 = vrot.slane %v2664_v33, 2  ;;  %v3115_v7 = vor.u32 1.1754944e-38, %v3114_v47  ;;  %v3162_v63 = vand.u32 2147483648, %v11287_v29 }
 0x5df   :  { %v3154_v34 = vmul.f32 %v11328_v20, %v3153_v13 }
 0x5e0   :  { %v3107_v55 = vadd.f32 %v11285_v18, %v3106_v2  ;;  %v2666_v54 = vmax.f32 %v2664_v33, %v2665_v39 }
 0x5e1   :  { %8597 = vset.pattern.permute.xlu1 %v15076_v24  ;;  %v8912_v14 = vpop.eup %8911 }
 0x5e2   :  { %3632 = vperm.xlu1 %8597, %v3085_v31   ;;  %8609 = vset.pattern.permute.xlu0 %v15076_v24  ;;  %v8914_v38 = vpop.eup %8913  ;;  %v11352_v28 = vmul.f32 %v8912_v14, %v10910_v53  ;;  %v2667_v46 = vrot.slane %v2666_v54, 1  ;;  %v3111_v53 = vsel %vm11357_vm8, %v11285_v18, %v3107_v55  ;;  %v2405_v12 = vpop.f32.mrf.mxu2 }
 0x5e3   :  { %3656 = vperm.xlu0 %8609, %v3133_v32   ;;  %v11379_v5 = vsel %vm3113_vm10, %v3115_v7, %v3111_v53  ;;  %v11383_v21 = vsel %vm2443_vm12, %v2405_v12, -1e+30  ;;  %vm2444_vm12 = vcmp.gt.f32.partialorder %v11395_v41, 0.0 }
 0x5e4   :  { %8594 = vset.pattern.permute.xlu2 %v15076_v24  ;;  %v2668_v42 = vmax.f32 %v2666_v54, %v2667_v46  ;;  %v2923_v10 = vsel %vm14856_vm11, %v11352_v28, 0.0  ;;  %v2670_v4 = vsel %vm14856_vm11, %v11383_v21, -inf  ;;  %v3118_v40 = vmul.f32 %v11379_v5, %v11189_v30 }
 0x5e5   :  { %3628 = vperm.xlu2 %8594, %v3070_v50  }
 0x5e6   :  { %v2713_v18 = vsub.f32 %v11310_v44, %v2668_v42  ;;  %v2714_v23 = vsub.f32 %v11315_v3, %v2668_v42  ;;  %v3155_v44 = vadd.f32 %v11328_v20, %v3154_v34 }
 0x5e8   :  { %v2771_v17 = vmul.f32 1.442695, %v2713_v18  ;;  %v2773_v62 = vmul.f32 1.442695, %v2714_v23 }
 0x5ea   :  { %8599 = vset.pattern.permute.xlu1 %v15075_v51  ;;  %8915 = vpow2.f32 %v2771_v17  ;;  %v2408_v33 = vpop.f32.mrf.mxu2 }
 0x5eb   :  { %3293 = vperm.xlu1 %8599, %v3085_v31   ;;  %8611 = vset.pattern.permute.xlu0 %v15075_v51  ;;  %v3147_v31 = vor.u32 1.1754944e-38, %v3146_v11  ;;  %v3160_v11 = vand.u32 2147483647, %v11287_v29  ;;  %8917 = vpow2.f32 %v2773_v62  ;;  %v11425_v46 = vsel %vm2444_vm12, %v2408_v33, -1e+30 }
 0x5ec   :  { %3323 = vperm.xlu0 %8611, %v3133_v32   ;;  %v11349_v32 = vpop.permute.xlu1 %629 }
 0x5ed   :  { %v11337_v9 = vsel %vm3145_vm9, %v3147_v31, %v3143_v26  ;;  %vm2442_vm6 = vcmp.gt.f32.partialorder %v11349_v32, 0.0  ;;  %vm3157_vm9 = vweird.f32 %v11328_v20  ;;  %8596 = vset.pattern.permute.xlu2 %v15075_v51  ;;  %v3163_v31 = vor.u32 1.1754944e-38, %v3162_v63 }
 0x5ee   :  { %v3150_v0 = vmul.f32 %v11337_v9, %v11171_v61  ;;  %v11363_v61 = vmul.f32 %v8914_v38, %v11251_v43  ;;  %v11371_v58 = vsel %vm2442_vm6, %v2402_v49, -1e+30  ;;  %3288 = vperm.xlu2 %8596, %v3070_v50   ;;  %vm3158_vm2 = vmor %vm3156_vm13, %vm3157_vm9  ;;  %vm3161_vm8 = vcmp.eq.f32.partialorder %v3160_v11, 8.507059e+37 }
 0x5ef   :  { %v2669_v37 = vsel %vm14856_vm11, %v11371_v58, -inf  ;;  %v3159_v26 = vsel %vm3158_vm2, %v11328_v20, %v3155_v44  ;;  %v3101_v38 = vmul.f32 %v11313_v25, %v11148_v48 }
 0x5f0   :  { %v2924_v43 = vsel %vm14856_vm11, %v11363_v61, 0.0  ;;  %v2671_v3 = vmax.f32 %v2669_v37, %v2670_v4  ;;  %v8916_v14 = vpop.eup %8915  ;;  %v11404_v39 = vsel %vm3161_vm8, %v3163_v31, %v3159_v26  ;;  %v3149_v4 = vmul.f32 %v11337_v9, %v11168_v16 }
 0x5f1   :  { %v2925_v52 = vadd.f32 %v2924_v43, %v2923_v10  ;;  %v8918_v30 = vpop.eup %8917  ;;  %v3165_v54 = vmul.f32 %v11404_v39, %v11212_v22  ;;  %v11419_v1 = vmul.f32 %v8916_v14, %v11289_v57  ;;  %v2678_v10 = vsel %vm14856_vm11, %v11425_v46, -inf }
 0x5f2   :  { %v2672_v36 = vrot.slane %v2671_v3, 4  ;;  %v11409_v20 = vmul.f32 %v8918_v30, %v11298_v15  ;;  %v2411_v27 = vpop.f32.mrf.mxu2 }
 0x5f3   :  { %8602 = vset.pattern.permute.xlu1 %v15076_v24  ;;  %v2926_v56 = vrot.slane %v2925_v52, 4  ;;  %v2932_v22 = vsel %vm14856_vm11, %v11419_v1, 0.0 }
 0x5f4   :  { %3644 = vperm.xlu1 %8602, %v3102_v19   ;;  %8614 = vset.pattern.permute.xlu0 %v15076_v24  ;;  %v2673_v2 = vmax.f32 %v2671_v3, %v2672_v36  ;;  %v11412_v47 = vpop.permute.xlu1 %648  ;;  %v2933_v48 = vsel %vm14856_vm11, %v11409_v20, 0.0  ;;  %v11450_v36 = vpop.permute.xlu0 %3600 }
 0x5f5   :  { %3668 = vperm.xlu0 %8614, %v3150_v0   ;;  %vm2445_vm6 = vcmp.gt.f32.partialorder %v11412_v47, 0.0  ;;  %v2934_v53 = vadd.f32 %v2933_v48, %v2932_v22 }
 0x5f6   :  { %v2674_v45 = vrot.slane %v2673_v2, 2  ;;  %8601 = vset.pattern.permute.xlu2 %v15076_v24  ;;  %v11435_v34 = vsel %vm2445_vm6, %v2411_v27, -1e+30 }
 0x5f7   :  { %3640 = vperm.xlu2 %8601, %v3101_v38   ;;  %v2679_v43 = vsel %vm14856_vm11, %v11435_v34, -inf }
 0x5f8   :  { %v2675_v50 = vmax.f32 %v2673_v2, %v2674_v45  ;;  %v2680_v12 = vmax.f32 %v2678_v10, %v2679_v43 }
 0x5fa   :  { %v2676_v13 = vrot.slane %v2675_v50, 1  ;;  %v2681_v17 = vrot.slane %v2680_v12, 4 }
 0x5fc   :  { %8604 = vset.pattern.permute.xlu1 %v15075_v51  ;;  %v2677_v25 = vmax.f32 %v2675_v50, %v2676_v13  ;;  %v2682_v62 = vmax.f32 %v2680_v12, %v2681_v17 }
 0x5fd   :  { %3308 = vperm.xlu1 %8604, %v3102_v19   ;;  %8616 = vset.pattern.permute.xlu0 %v15075_v51  ;;  %v2927_v19 = vadd.f32 %v2926_v56, %v2925_v52  ;;  %v2935_v52 = vrot.slane %v2934_v53, 4 }
 0x5fe   :  { %3338 = vperm.xlu0 %8616, %v3150_v0   ;;  %v11416_v0 = vpop.permute.xlu2 %3588  ;;  %v2715_v7 = vsub.f32 %v11371_v58, %v2677_v25  ;;  %v2716_v42 = vsub.f32 %v11383_v21, %v2677_v25  ;;  %v2683_v3 = vrot.slane %v2682_v62, 2 }
 0x5ff   :  { %v2928_v29 = vrot.slane %v2927_v19, 2  ;;  %8603 = vset.pattern.permute.xlu2 %v15075_v51  ;;  %v2936_v58 = vadd.f32 %v2935_v52, %v2934_v53 }
 0x600   :  { %v2775_v18 = vmul.f32 1.442695, %v2715_v7  ;;  %v2777_v23 = vmul.f32 1.442695, %v2716_v42  ;;  %3303 = vperm.xlu2 %8603, %v3101_v38   ;;  %v11479_v7 = vpop.permute.xlu0 %3253  ;;  %v3585_v42 = vpop.permute.xlu1 %3584 }
 0x601   :  { %v2929_v49 = vadd.f32 %v2928_v29, %v2927_v19  ;;  %v2937_v44 = vrot.slane %v2936_v58, 2  ;;  %v2684_v19 = vmax.f32 %v2682_v62, %v2683_v3 }
 0x603   :  { %v2930_v55 = vrot.slane %v2929_v49, 1  ;;  %v2938_v63 = vadd.f32 %v2937_v44, %v2936_v58  ;;  %v2685_v33 = vrot.slane %v2684_v19, 1 }
 0x605   :  { %8606 = vset.pattern.permute.xlu1 %v15076_v24  ;;  %v2931_v15 = vadd.f32 %v2930_v55, %v2929_v49  ;;  %v2939_v29 = vrot.slane %v2938_v63, 1  ;;  %v2686_v49 = vmax.f32 %v2684_v19, %v2685_v33  ;;  %v3711_v19 = vmul.f32 %v3585_v42, %v9553_v60 }
 0x606   :  { %3652 = vperm.xlu1 %8606, %v3118_v40   ;;  %8617 = vset.pattern.permute.xlu0 %v15076_v24  ;;  %v11444_v21 = vpop.permute.xlu2 %3238 }
 0x607   :  { %3672 = vperm.xlu0 %8617, %v3165_v54   ;;  %v11430_v57 = vmax.f32 %v2931_v15, 1e-20  ;;  %v2718_v13 = vsub.f32 %v11435_v34, %v2686_v49 }
 0x608   :  { %8605 = vset.pattern.permute.xlu2 %v15076_v24  ;;  %v11494_v3 = vpop.permute.xlu0 %3612 }
 0x609   :  { %8919 = vrcp.f32 %v11430_v57  ;;  %v3176_v16 = vand.u32 2147483647, %v11430_v57  ;;  %v3178_v9 = vand.u32 2147483648, %v11430_v57  ;;  %vm3172_vm9 = vweird.f32 %v11430_v57 }
 0x60a   :  { %8921 = vpow2.f32 %v2775_v18  ;;  %v2781_v27 = vmul.f32 1.442695, %v2718_v13 }
 0x60b   :  { %8923 = vpow2.f32 %v2777_v23  ;;  %vm3177_vm2 = vcmp.eq.f32.partialorder %v3176_v16, 8.507059e+37  ;;  %v15081_v16 = vld [vmem:[#allocation53_spill] sm:$0xff] }
 0x60e   :  { %8608 = vset.pattern.permute.xlu1 %v15075_v51  ;;  %v11466_v30 = vpop.permute.xlu2 %3592 }
 0x60f   :  { %3318 = vperm.xlu1 %8608, %v3118_v40   ;;  %8619 = vset.pattern.permute.xlu0 %v15075_v51  ;;  %v8920_v37 = vpop.eup %8919  ;;  %v3117_v40 = vmul.f32 %v11379_v5, %v11186_v59  ;;  %v2940_v59 = vadd.f32 %v2939_v29, %v2938_v63 }
 0x610   :  { %3343 = vperm.xlu0 %8619, %v3165_v54   ;;  %v3168_v56 = vmul.f32 %v8920_v37, %v11430_v57  ;;  %v8922_v11 = vpop.eup %8921  ;;  %vm3173_vm10 = vweird.f32 %v8920_v37  ;;  %v2717_v54 = vsub.f32 %v11425_v46, %v2686_v49 }
 0x611   :  { %v8924_v2 = vpop.eup %8923  ;;  %v11460_v14 = vmul.f32 %v8922_v11, %v11349_v32  ;;  %3648 = vperm.xlu2 %8605, %v3117_v40   ;;  %vm3174_vm13 = vmor %vm3172_vm9, %vm3173_vm10  ;;  %v3179_v32 = vor.u32 1.1754944e-38, %v3178_v9  ;;  %v11472_v55 = vmax.f32 %v2940_v59, 1e-20  ;;  %v3712_v9 = vmul.f32 %v11416_v0, %v15081_v16 }
 0x612   :  { %v3169_v26 = vsub.f32 1.0, %v3168_v56  ;;  %v11457_v31 = vmul.f32 %v8924_v2, %v11344_v6  ;;  %v2779_v22 = vmul.f32 1.442695, %v2717_v54  ;;  %vm14855_vm10 = vcmask 523520  }
 0x613   :  { %v2941_v6 = vsel %vm14856_vm11, %v11460_v14, 0.0  ;;  %8925 = vrcp.f32 %v11472_v55  ;;  %vm3188_vm12 = vweird.f32 %v11472_v55  ;;  %v3192_v2 = vand.u32 2147483647, %v11472_v55 }
 0x614   :  { %v3170_v45 = vmul.f32 %v8920_v37, %v3169_v26  ;;  %v2942_v5 = vsel %vm14856_vm11, %v11457_v31, 0.0  ;;  %8927 = vpow2.f32 %v2779_v22 }
 0x615   :  { %v2943_v38 = vadd.f32 %v2942_v5, %v2941_v6  ;;  %8929 = vpow2.f32 %v2781_v27  ;;  %v3744_v5 = vsel %vm14855_vm10, %v3711_v19, 0.0  ;;  %vm3193_vm9 = vcmp.eq.f32.partialorder %v3192_v2, 8.507059e+37 }
 0x616   :  { %v3171_v50 = vadd.f32 %v8920_v37, %v3170_v45  ;;  %v11482_v10 = vpop.permute.xlu2 %3243 }
 0x617   :  { %8613 = vset.pattern.permute.xlu1 %v15076_v24  ;;  %v2944_v25 = vrot.slane %v2943_v38, 4 }
 0x618   :  { %3664 = vperm.xlu1 %8613, %v3149_v4   ;;  %8622 = vset.pattern.permute.xlu0 %v15076_v24  ;;  %v3175_v48 = vsel %vm3174_vm13, %v8920_v37, %v3171_v50 }
 0x619   :  { %v3180_v15 = vsel %vm3177_vm2, %v3179_v32, %v3175_v48  ;;  %v2945_v53 = vadd.f32 %v2944_v25, %v2943_v38  ;;  %8607 = vset.pattern.permute.xlu2 %v15075_v51  ;;  %v8926_v34 = vpop.eup %8925  ;;  %v3745_v32 = vsel %vm14855_vm10, %v3712_v9, 0.0  ;;  %v11522_v38 = vpop.permute.xlu0 %3268 }
 0x61a   :  { %v3182_v57 = vmul.f32 %v3180_v15, %v11363_v61  ;;  %3313 = vperm.xlu2 %8607, %v3117_v40   ;;  %v3184_v18 = vmul.f32 %v8926_v34, %v11472_v55  ;;  %v3181_v61 = vmul.f32 %v3180_v15, %v11352_v28  ;;  %v8928_v12 = vpop.eup %8927  ;;  %v11496_v28 = vpop.permute.xlu1 %3233  ;;  %vm3189_vm8 = vweird.f32 %v8926_v34 }
 0x61b   :  { %v2946_v46 = vrot.slane %v2945_v53, 2  ;;  %v8930_v17 = vpop.eup %8929  ;;  %v11488_v58 = vmul.f32 %v8928_v12, %v11395_v41  ;;  %v3194_v40 = vand.u32 2147483648, %v11472_v55  ;;  %vm11511_vm6 = vmor %vm3188_vm12, %vm3189_vm8  ;;  %v3746_v48 = vadd.f32 %v3745_v32, %v3744_v5 }
 0x61c   :  { %3684 = vperm.xlu0 %8622, %v3182_v57   ;;  %v3185_v52 = vsub.f32 1.0, %v3184_v18  ;;  %v11492_v37 = vmul.f32 %v8930_v17, %v11412_v47 }
 0x61d   :  { %v2947_v43 = vadd.f32 %v2946_v46, %v2945_v53  ;;  %v2950_v56 = vsel %vm14856_vm11, %v11488_v58, 0.0  ;;  %v3195_v6 = vor.u32 1.1754944e-38, %v3194_v40 }
 0x61e   :  { %v3186_v44 = vmul.f32 %v8926_v34, %v3185_v52  ;;  %v2951_v41 = vsel %vm14856_vm11, %v11492_v37, 0.0  ;;  %v3605_v63 = vpop.permute.xlu2 %3604  ;;  %v3166_v52 = vmul.f32 %v11404_v39, %v11215_v35 }
 0x61f   :  { %v2948_v23 = vrot.slane %v2947_v43, 1  ;;  %v2952_v47 = vadd.f32 %v2951_v41, %v2950_v56  ;;  %v3716_v42 = vmul.f32 %v3605_v63, %v15081_v16 }
 0x620   :  { %8615 = vset.pattern.permute.xlu1 %v15075_v51  ;;  %v3187_v11 = vadd.f32 %v8926_v34, %v3186_v44 }
 0x621   :  { %3333 = vperm.xlu1 %8615, %v3149_v4   ;;  %v2949_v62 = vadd.f32 %v2948_v23, %v2947_v43  ;;  %v2953_v26 = vrot.slane %v2952_v47, 4 }
 0x622   :  { %8610 = vset.pattern.permute.xlu2 %v15076_v24  ;;  %v3191_v59 = vsel %vm11511_vm6, %v8926_v34, %v3187_v11  ;;  %v11519_v49 = vpop.permute.xlu1 %3596  ;;  %v3747_v34 = vrot.slane %v3746_v48, 4 }
 0x623   :  { %v2973_v4 = vmax.f32 %v2949_v62, 1e-20  ;;  %3660 = vperm.xlu2 %8610, %v11144_v8   ;;  %v2954_v33 = vadd.f32 %v2953_v26, %v2952_v47  ;;  %v11525_v54 = vsel %vm3193_vm9, %v3195_v6, %v3191_v59  ;;  %v3763_v62 = vsel %vm14855_vm10, %v3716_v42, 0.0 }
 0x624   :  { %8624 = vset.pattern.permute.xlu0 %v15075_v51  ;;  %v3748_v44 = vadd.f32 %v3747_v34, %v3746_v48 }
 0x625   :  { %3358 = vperm.xlu0 %8624, %v3182_v57   ;;  %8931 = vrcp.f32 %v2973_v4  ;;  %v2955_v0 = vrot.slane %v2954_v33, 2  ;;  %v3210_v25 = vand.u32 2147483648, %v2973_v4  ;;  %v3208_v27 = vand.u32 2147483647, %v2973_v4 }
 0x626   :  { %v11527_v15 = vpop.permute.xlu2 %3258  ;;  %v3198_v57 = vmul.f32 %v11525_v54, %v11409_v20  ;;  %vm3204_vm2 = vweird.f32 %v2973_v4  ;;  %v3749_v63 = vrot.slane %v3748_v44, 2 }
 0x627   :  { %v2956_v13 = vadd.f32 %v2955_v0, %v2954_v33  ;;  %v3211_v43 = vor.u32 1.1754944e-38, %v3210_v25  ;;  %vm3209_vm12 = vcmp.eq.f32.partialorder %v3208_v27, 8.507059e+37 }
 0x628   :  { %v3750_v19 = vadd.f32 %v3749_v63, %v3748_v44 }
 0x629   :  { %8621 = vset.pattern.permute.xlu1 %v15076_v24  ;;  %v2957_v53 = vrot.slane %v2956_v13, 1 }
 0x62a   :  { %3680 = vperm.xlu1 %8621, %v3181_v61   ;;  %v3751_v59 = vrot.slane %v3750_v19, 1 }
 0x62b   :  { %v8932_v45 = vpop.eup %8931  ;;  %8612 = vset.pattern.permute.xlu2 %v15075_v51  ;;  %v2958_v18 = vadd.f32 %v2957_v53, %v2956_v13 }
 0x62c   :  { %v3200_v50 = vmul.f32 %v8932_v45, %v2973_v4  ;;  %3328 = vperm.xlu2 %8612, %v11144_v8   ;;  %vm3205_vm13 = vweird.f32 %v8932_v45  ;;  %v3715_v8 = vmul.f32 %v11450_v36, %v9553_v60  ;;  %v3752_v13 = vadd.f32 %v3751_v59, %v3750_v19 }
 0x62d   :  { %8629 = vset.pattern.permute.xlu0 %v15076_v24  ;;  %vm3206_vm8 = vmor %vm3204_vm2, %vm3205_vm13  ;;  %v2974_v12 = vmax.f32 %v2958_v18, 1e-20 }
 0x62e   :  { %v3201_v55 = vsub.f32 1.0, %v3200_v50  ;;  %v3762_v36 = vsel %vm14855_vm10, %v3715_v8, 0.0  ;;  %v3617_v56 = vpop.permute.xlu2 %3616  ;;  %v3713_v50 = vmul.f32 %v11466_v30, %v9553_v60 }
 0x62f   :  { %8933 = vrcp.f32 %v2974_v12  ;;  %v3764_v41 = vadd.f32 %v3763_v62, %v3762_v36  ;;  %v3226_v9 = vand.u32 2147483648, %v2974_v12  ;;  %v3224_v33 = vand.u32 2147483647, %v2974_v12 }
 0x630   :  { %v3202_v22 = vmul.f32 %v8932_v45, %v3201_v55  ;;  %vm3220_vm9 = vweird.f32 %v2974_v12  ;;  %v3753_v27 = vsel %vm14855_vm10, %v3713_v50, 0.0 }
 0x631   :  { %v3625_v17 = vpop.permute.xlu0 %3624  ;;  %v3765_v39 = vrot.slane %v3764_v41, 4  ;;  %v3227_v0 = vor.u32 1.1754944e-38, %v3226_v9  ;;  %vm3225_vm2 = vcmp.eq.f32.partialorder %v3224_v33, 8.507059e+37 }
 0x632   :  { %8623 = vset.pattern.permute.xlu1 %v15075_v51  ;;  %v3203_v46 = vadd.f32 %v8932_v45, %v3202_v22  ;;  %v3721_v22 = vmul.f32 %v3625_v17, %v9553_v60 }
 0x633   :  { %3353 = vperm.xlu1 %8623, %v3181_v61   ;;  %v11536_v61 = vpop.permute.xlu1 %3248  ;;  %v3766_v26 = vadd.f32 %v3765_v39, %v3764_v41 }
 0x634   :  { %v3207_v23 = vsel %vm3206_vm8, %v8932_v45, %v3203_v46  ;;  %8618 = vset.pattern.permute.xlu2 %v15076_v24  ;;  %v3714_v45 = vmul.f32 %v11519_v49, %v15081_v16  ;;  %v3197_v49 = vmul.f32 %v11525_v54, %v11419_v1  ;;  %v3789_v54 = vsel %vm14855_vm10, %v3721_v22, 0.0 }
 0x635   :  { %v11538_v20 = vsel %vm3209_vm12, %v3211_v43, %v3207_v23  ;;  %3676 = vperm.xlu2 %8618, %v3166_v52   ;;  %v8934_v35 = vpop.eup %8933  ;;  %v3767_v6 = vrot.slane %v3766_v26, 2  ;;  %vm15088_vm8 = vcmask 261120  }
 0x636   :  { %v3213_v4 = vmul.f32 %v11538_v20, %v11460_v14  ;;  %v3216_v11 = vmul.f32 %v8934_v35, %v2974_v12  ;;  %v11552_v2 = vpop.permute.xlu2 %3273  ;;  %vm3221_vm6 = vweird.f32 %v8934_v35  ;;  %v3754_v55 = vsel %vm14855_vm10, %v3714_v45, 0.0  ;;  %vm15089_vm12 = vmmov %vm15088_vm8 }
 0x637   :  { %vm3222_vm13 = vmor %vm3220_vm9, %vm3221_vm6  ;;  %v3755_v42 = vadd.f32 %v3754_v55, %v3753_v27 }
 0x638   :  { %3696 = vperm.xlu0 %8629, %v3213_v4   ;;  %v3217_v40 = vsub.f32 1.0, %v3216_v11  ;;  %v3718_v11 = vmul.f32 %v11494_v3, %v15081_v16  ;;  %vm15090_vm6 = vmmov %vm15088_vm8 }
 0x639   :  { %v3756_v18 = vrot.slane %v3755_v42, 4  ;;  %vm15091_vm9 = vmmov %vm15090_vm6 }
 0x63a   :  { %v11548_v14 = vpop.permute.xlu0 %3283  ;;  %v3218_v29 = vmul.f32 %v8934_v35, %v3217_v40 }
 0x63b   :  { %8626 = vset.pattern.permute.xlu1 %v15076_v24  ;;  %v3609_v47 = vpop.permute.xlu1 %3608 }
 0x63c   :  { %3692 = vperm.xlu1 %8626, %v3198_v57   ;;  %v3219_v5 = vadd.f32 %v8934_v35, %v3218_v29  ;;  %v3717_v41 = vmul.f32 %v3609_v47, %v9553_v60  ;;  %v3772_v29 = vsel %vm14855_vm10, %v3718_v11, 0.0 }
 0x63d   :  { %8620 = vset.pattern.permute.xlu2 %v15075_v51 }
 0x63e   :  { %3348 = vperm.xlu2 %8620, %v3166_v52   ;;  %v3223_v32 = vsel %vm3222_vm13, %v8934_v35, %v3219_v5  ;;  %v3771_v47 = vsel %vm14855_vm10, %v3717_v41, 0.0  ;;  %vm15092_vm13 = vmmov %vm15090_vm6 }
 0x63f   :  { %v3228_v25 = vsel %vm3225_vm2, %v3227_v0, %v3223_v32  ;;  %v3629_v46 = vpop.permute.xlu2 %3628  ;;  %v3773_v5 = vadd.f32 %v3772_v29, %v3771_v47  ;;  %vm15093_vm2 = vmmov %vm15090_vm6 }
 0x640   :  { %8631 = vset.pattern.permute.xlu0 %v15075_v51  ;;  %v11569_v30 = vmul.f32 %v3228_v25, %v11488_v58  ;;  %v3722_v1 = vmul.f32 %v3629_v46, %v15081_v16  ;;  %v3719_v58 = vmul.f32 %v3617_v56, %v9553_v60  ;;  %v3230_v23 = vmul.f32 %v3228_v25, %v11492_v37 }
 0x641   :  { %3373 = vperm.xlu0 %8631, %v3213_v4   ;;  %v3757_v4 = vadd.f32 %v3756_v18, %v3755_v42 }
 0x642   :  { %v3790_v34 = vsel %vm14855_vm10, %v3722_v1, 0.0  ;;  %v3780_v36 = vsel %vm14855_vm10, %v3719_v58, 0.0 }
 0x643   :  { %v11560_v48 = vpop.permute.xlu1 %3263  ;;  %v3637_v53 = vpop.permute.xlu0 %3636  ;;  %v3791_v8 = vadd.f32 %v3790_v34, %v3789_v54  ;;  %v3758_v19 = vrot.slane %v3757_v4, 2 }
 0x644   :  { %8628 = vset.pattern.permute.xlu1 %v15075_v51 }
 0x645   :  { %3368 = vperm.xlu1 %8628, %v3198_v57   ;;  %v3768_v57 = vadd.f32 %v3767_v6, %v3766_v26  ;;  %v3792_v12 = vrot.slane %v3791_v8, 4  ;;  %v3759_v59 = vadd.f32 %v3758_v19, %v3757_v4  ;;  %v3214_v6 = vmul.f32 %v11538_v20, %v11457_v31 }
 0x646   :  { %8625 = vset.pattern.permute.xlu2 %v15076_v24 }
 0x647   :  { %3688 = vperm.xlu2 %8625, %v3197_v49   ;;  %v3769_v43 = vrot.slane %v3768_v57, 1  ;;  %v3793_v44 = vadd.f32 %v3792_v12, %v3791_v8  ;;  %v3760_v25 = vrot.slane %v3759_v59, 1 }
 0x648   :  { %v11583_v56 = vpop.permute.xlu2 %3288 }
 0x649   :  { %3904 = vrot.lane.b32.xlu0 %v3752_v13, %s9147_s26  ;;  %v3770_v62 = vadd.f32 %v3769_v43, %v3768_v57  ;;  %v3794_v35 = vrot.slane %v3793_v44, 2  ;;  %v3774_v13 = vrot.slane %v3773_v5, 4  ;;  %v3761_v42 = vadd.f32 %v3760_v25, %v3759_v59 }
 0x64a   :  { %8634 = vset.pattern.permute.xlu0 %v15076_v24 }
 0x64b   :  { %v3621_v52 = vpop.permute.xlu1 %3620  ;;  %v3795_v40 = vadd.f32 %v3794_v35, %v3793_v44  ;;  %v3775_v27 = vadd.f32 %v3774_v13, %v3773_v5 }
 0x64c   :  { %v3720_v17 = vmul.f32 %v3621_v52, %v15081_v16  ;;  %v11586_v37 = vpop.permute.xlu0 %3298 }
 0x64d   :  { %8633 = vset.pattern.permute.xlu1 %v15076_v24  ;;  %v3796_v45 = vrot.slane %v3795_v40, 1  ;;  %v3776_v34 = vrot.slane %v3775_v27, 2 }
 0x64e   :  { %3704 = vperm.xlu1 %8633, %v11569_v30   ;;  %v3781_v63 = vsel %vm14855_vm10, %v3720_v17, 0.0 }
 0x64f   :  { %8627 = vset.pattern.permute.xlu2 %v15075_v51  ;;  %v3782_v39 = vadd.f32 %v3781_v63, %v3780_v36  ;;  %v3797_v3 = vadd.f32 %v3796_v45, %v3795_v40  ;;  %v3777_v8 = vadd.f32 %v3776_v34, %v3775_v27  ;;  %v226_v27 = vld [vmem:[#allocation2 + $0x80] sm:$0xff] }
 0x650   :  { %3363 = vperm.xlu2 %8627, %v3197_v49   ;;  %v3724_v49 = vmul.f32 %v3637_v53, %v15081_v16 }
 0x651   :  { %3708 = vperm.xlu0 %8634, %v3230_v23   ;;  %v3783_v26 = vrot.slane %v3782_v39, 4  ;;  %v3641_v0 = vpop.permute.xlu2 %3640 }
 0x652   :  { %v3799_v20 = vsel %vm14855_vm10, %v3724_v49, 0.0 }
 0x653   :  { %v3784_v9 = vadd.f32 %v3783_v26, %v3782_v39  ;;  %v11593_v33 = vpop.permute.xlu1 %3278 }
 0x655   :  { %v3785_v50 = vrot.slane %v3784_v9, 2  ;;  %v3657_v55 = vpop.permute.xlu0 %3656 }
 0x656   :  { %3908 = vrot.lane.b32.xlu1 %v3770_v62, %s9147_s26  ;;  %v3725_v62 = vmul.f32 %v3641_v0, %v9553_v60  ;;  %v3729_v5 = vmul.f32 %v3657_v55, %v9553_v60 }
 0x657   :  { %8640 = vset.pattern.permute.xlu1 %v15075_v51  ;;  %v3786_v32 = vadd.f32 %v3785_v50, %v3784_v9 }
 0x658   :  { %8630 = vset.pattern.permute.xlu2 %v15076_v24  ;;  %v3807_v35 = vsel %vm14855_vm10, %v3725_v62, 0.0  ;;  %v3825_v25 = vsel %vm14855_vm10, %v3729_v5, 0.0 }
 0x659   :  { %8641 = vset.pattern.permute.xlu0 %v15075_v51  ;;  %3700 = vperm.xlu2 %8630, %v3214_v6   ;;  %v3787_v22 = vrot.slane %v3786_v32, 1 }
 0x65a   :  { %3914 = vrot.lane.b32.xlu0 %v3797_v3, %s9147_s26  ;;  %v11605_v54 = vpop.permute.xlu2 %3303 }
 0x65b   :  { %v3633_v57 = vpop.permute.xlu1 %3632  ;;  %v3788_v31 = vadd.f32 %v3787_v22, %v3786_v32 }
 0x65c   :  { %v3723_v46 = vmul.f32 %v3633_v57, %v9553_v60  ;;  %v227_v57 = vld [vmem:[#allocation2 + $0x88] sm:$0xff] }
 0x65d   :  { %v8635_v55 = vpack.i.bf16 %v226_v27, %v227_v57 }
 0x65e   :  { %v3798_v1 = vsel %vm14855_vm10, %v3723_v46, 0.0  ;;  %3912 = vrot.lane.b32.xlu1 %v3788_v31, %s9147_s26  ;;  %v11609_v43 = vpop.permute.xlu0 %3323 }
 0x65f   :  { %v3800_v53 = vadd.f32 %v3799_v20, %v3798_v1 }
 0x661   :  { %3906 = vrot.lane.b32.xlu2 %v3761_v42, %s9147_s26  ;;  %v3801_v18 = vrot.slane %v3800_v53, 4 }
 0x662   :  { %3388 = vperm.xlu0 %8641, %v3230_v23   ;;  %8632 = vset.pattern.permute.xlu2 %v15075_v51  ;;  %v3778_v23 = vrot.slane %v3777_v8, 1 }
 0x663   :  { %v3802_v58 = vadd.f32 %v3801_v18, %v3800_v53  ;;  %v11611_v12 = vpop.permute.xlu1 %3293 }
 0x664   :  { %v3779_v41 = vadd.f32 %v3778_v23, %v3777_v8 }
 0x665   :  { %v3803_v52 = vrot.slane %v3802_v58, 2 }
 0x666   :  { %3383 = vperm.xlu1 %8640, %v11569_v30  }
 0x667   :  { %v3669_v4 = vpop.permute.xlu0 %3668  ;;  %v3804_v44 = vadd.f32 %v3803_v52, %v3802_v58 }
 0x669   :  { %3378 = vperm.xlu2 %8632, %v3214_v6   ;;  %v3805_v19 = vrot.slane %v3804_v44, 1 }
 0x66b   :  { %v3649_v17 = vpop.permute.xlu2 %3648  ;;  %v3645_v36 = vpop.permute.xlu1 %3644  ;;  %v3806_v47 = vadd.f32 %v3805_v19, %v3804_v44 }
 0x66c   :  { %v3726_v63 = vmul.f32 %v3645_v36, %v15081_v16  ;;  %v3727_v3 = vmul.f32 %v3649_v17, %v9553_v60 }
 0x66e   :  { %v3808_v39 = vsel %vm14855_vm10, %v3726_v63, 0.0  ;;  %v3816_v46 = vsel %vm14855_vm10, %v3727_v3, 0.0 }
 0x66f   :  { %v3809_v11 = vadd.f32 %v3808_v39, %v3807_v35  ;;  %v3732_v39 = vmul.f32 %v3669_v4, %v15081_v16 }
 0x670   :  { %v11623_v29 = vpop.permute.xlu0 %3338 }
 0x671   :  { %3910 = vrot.lane.b32.xlu2 %v3779_v41, %s9147_s26  ;;  %v3810_v30 = vrot.slane %v3809_v11, 4 }
 0x673   :  { %v3811_v26 = vadd.f32 %v3810_v30, %v3809_v11  ;;  %v11621_v9 = vpop.permute.xlu1 %3308 }
 0x674   :  { %v11619_v40 = vpop.permute.xlu2 %3313 }
 0x675   :  { %v3812_v45 = vrot.slane %v3811_v26, 2 }
 0x677   :  { %v3813_v59 = vadd.f32 %v3812_v45, %v3811_v26 }
 0x679   :  { %3916 = vrot.lane.b32.xlu2 %v3806_v47, %s9147_s26  ;;  %v3814_v6 = vrot.slane %v3813_v59, 1  ;;  %v3673_v20 = vpop.permute.xlu0 %3672 }
 0x67a   :  { %v3733_v11 = vmul.f32 %v3673_v20, %v9553_v60 }
 0x67b   :  { %v3653_v32 = vpop.permute.xlu1 %3652  ;;  %v3815_v13 = vadd.f32 %v3814_v6, %v3813_v59  ;;  %v3835_v59 = vsel %vm14855_vm10, %v3732_v39, 0.0 }
 0x67c   :  { %v3728_v22 = vmul.f32 %v3653_v32, %v15081_v16  ;;  %v3843_v5 = vsel %vm14855_vm10, %v3733_v11, 0.0 }
 0x67d   :  { %v3661_v50 = vpop.permute.xlu2 %3660  ;;  %3918 = vrot.lane.b32.xlu1 %v3815_v13, %s9147_s26 }
 0x67e   :  { %v3730_v0 = vmul.f32 %v3661_v50, %v15081_v16  ;;  %v3817_v31 = vsel %vm14855_vm10, %v3728_v22, 0.0 }
 0x67f   :  { %v3818_v34 = vadd.f32 %v3817_v31, %v3816_v46 }
 0x680   :  { %v3826_v49 = vsel %vm14855_vm10, %v3730_v0, 0.0 }
 0x681   :  { %v3827_v42 = vadd.f32 %v3826_v49, %v3825_v25  ;;  %8636 = vrot.lane.b32.xlu2 %v8635_v55, %s9148_s27  ;;  %v3819_v18 = vrot.slane %v3818_v34, 4 }
 0x682   :  { %v11640_v41 = vpop.permute.xlu0 %3343 }
 0x683   :  { %v3828_v1 = vrot.slane %v3827_v42, 4  ;;  %v3820_v52 = vadd.f32 %v3819_v18, %v3818_v34  ;;  %v11638_v17 = vpop.permute.xlu1 %3318 }
 0x685   :  { %v3829_v53 = vadd.f32 %v3828_v1, %v3827_v42  ;;  %v3821_v62 = vrot.slane %v3820_v52, 2 }
 0x686   :  { %v11636_v8 = vpop.permute.xlu2 %3328 }
 0x687   :  { %v3830_v58 = vrot.slane %v3829_v53, 2  ;;  %v3822_v44 = vadd.f32 %v3821_v62, %v3820_v52 }
 0x689   :  { %v3831_v23 = vadd.f32 %v3830_v58, %v3829_v53  ;;  %v3823_v35 = vrot.slane %v3822_v44, 1 }
 0x68b   :  { %v3832_v36 = vrot.slane %v3831_v23, 1  ;;  %v3665_v30 = vpop.permute.xlu1 %3664  ;;  %v3824_v26 = vadd.f32 %v3823_v35, %v3822_v44 }
 0x68c   :  { %v3731_v45 = vmul.f32 %v3665_v30, %v9553_v60 }
 0x68d   :  { %v3833_v63 = vadd.f32 %v3832_v36, %v3831_v23  ;;  %3920 = vrot.lane.b32.xlu1 %v3824_v26, %s9147_s26 }
 0x68e   :  { %v3834_v4 = vsel %vm14855_vm10, %v3731_v45, 0.0  ;;  %v3685_v0 = vpop.permute.xlu0 %3684 }
 0x68f   :  { %v3677_v19 = vpop.permute.xlu2 %3676  ;;  %3922 = vrot.lane.b32.xlu0 %v3833_v63, %s9147_s26  ;;  %v3836_v3 = vadd.f32 %v3835_v59, %v3834_v4  ;;  %v3736_v1 = vmul.f32 %v3685_v0, %v15081_v16 }
 0x690   :  { %v3734_v47 = vmul.f32 %v3677_v19, %v15081_v16 }
 0x691   :  { %v3837_v13 = vrot.slane %v3836_v3, 4  ;;  %v3853_v62 = vsel %vm14855_vm10, %v3736_v1, 0.0 }
 0x692   :  { %v3844_v50 = vsel %vm14855_vm10, %v3734_v47, 0.0 }
 0x693   :  { %v3845_v6 = vadd.f32 %v3844_v50, %v3843_v5  ;;  %v3838_v49 = vadd.f32 %v3837_v13, %v3836_v3  ;;  %v11652_v22 = vpop.permute.xlu1 %3333 }
 0x695   :  { %v3846_v32 = vrot.slane %v3845_v6, 4  ;;  %v3839_v42 = vrot.slane %v3838_v49, 2 }
 0x697   :  { %v3847_v25 = vadd.f32 %v3846_v32, %v3845_v6  ;;  %v3840_v46 = vadd.f32 %v3839_v42, %v3838_v49  ;;  %v11657_v34 = vpop.permute.xlu0 %3358 }
 0x698   :  { %v11654_v27 = vpop.permute.xlu2 %3348 }
 0x699   :  { %v3848_v57 = vrot.slane %v3847_v25, 2  ;;  %v3841_v20 = vrot.slane %v3840_v46, 1 }
 0x69b   :  { %v3849_v55 = vadd.f32 %v3848_v57, %v3847_v25  ;;  %v3842_v58 = vadd.f32 %v3841_v20, %v3840_v46 }
 0x69c   :  { %v3681_v18 = vpop.permute.xlu1 %3680 }
 0x69d   :  { %v3850_v31 = vrot.slane %v3849_v55, 1  ;;  %v3735_v52 = vmul.f32 %v3681_v18, %v9553_v60  ;;  %3924 = vrot.lane.b32.xlu2 %v3842_v58, %s9147_s26 }
 0x69f   :  { %v3851_v53 = vadd.f32 %v3850_v31, %v3849_v55  ;;  %v3852_v44 = vsel %vm14855_vm10, %v3735_v52, 0.0 }
 0x6a0   :  { %v3854_v36 = vadd.f32 %v3853_v62, %v3852_v44 }
 0x6a1   :  { %v3689_v23 = vpop.permute.xlu2 %3688  ;;  %3926 = vrot.lane.b32.xlu0 %v3851_v53, %s9147_s26 }
 0x6a2   :  { %v3855_v63 = vrot.slane %v3854_v36, 4  ;;  %v3737_v45 = vmul.f32 %v3689_v23, %v9553_v60 }
 0x6a4   :  { %v3856_v39 = vadd.f32 %v3855_v63, %v3854_v36  ;;  %v3861_v6 = vsel %vm14855_vm10, %v3737_v45, 0.0  ;;  %v225_v45 = vld [vmem:[#allocation2 + $0x78] sm:$0xff] }
 0x6a5   :  { %v11664_v11 = vpop.permute.xlu1 %3353 }
 0x6a6   :  { %v3857_v19 = vrot.slane %v3856_v39, 2 }
 0x6a8   :  { %v3858_v26 = vadd.f32 %v3857_v19, %v3856_v39 }
 0x6aa   :  { %v3697_v35 = vpop.permute.xlu0 %3696  ;;  %v11666_v30 = vpop.permute.xlu2 %3363  ;;  %v3859_v47 = vrot.slane %v3858_v26, 1 }
 0x6ab   :  { %v3739_v3 = vmul.f32 %v3697_v35, %v9553_v60 }
 0x6ac   :  { %v3860_v5 = vadd.f32 %v3859_v47, %v3858_v26  ;;  %v224_v47 = vld [vmem:[#allocation2 + $0x70] sm:$0xff] }
 0x6ad   :  { %v3870_v57 = vsel %vm14855_vm10, %v3739_v3, 0.0 }
 0x6ae   :  { %v3693_v59 = vpop.permute.xlu1 %3692  ;;  %3928 = vrot.lane.b32.xlu1 %v3860_v5, %s9147_s26 }
 0x6af   :  { %v3738_v4 = vmul.f32 %v3693_v59, %v15081_v16 }
 0x6b1   :  { %v3862_v0 = vsel %vm14855_vm10, %v3738_v4, 0.0 }
 0x6b2   :  { %v3863_v13 = vadd.f32 %v3862_v0, %v3861_v6  ;;  %v8642_v6 = vpack.i.bf16 %v224_v47, %v225_v45  ;;  %v3398_v45 = vmul.f32 %v11522_v38, %v15081_v16 }
 0x6b3   :  { %v11669_v50 = vpop.permute.xlu0 %3373  ;;  %v3701_v32 = vpop.permute.xlu2 %3700 }
 0x6b4   :  { %v3740_v25 = vmul.f32 %v3701_v32, %v15081_v16  ;;  %v3864_v49 = vrot.slane %v3863_v13, 4 }
 0x6b6   :  { %v3871_v42 = vsel %vm14855_vm10, %v3740_v25, 0.0  ;;  %v3865_v46 = vadd.f32 %v3864_v49, %v3863_v13  ;;  %v15084_v13 = vld [vmem:[#allocation14_spill] sm:$0xff]  ;;  %v15085_v25 = vld [vmem:[#allocation13_spill] sm:$0xff] }
 0x6b7   :  { %v3872_v55 = vadd.f32 %v3871_v42, %v3870_v57  ;;  %v11679_v31 = vpop.permute.xlu1 %3368  ;;  %v8647_v49 = vpack.i.bf16 %v15085_v25, %v15084_v13  ;;  %v3400_v13 = vmul.f32 %v11593_v33, %v15081_v16  ;;  %v3399_v25 = vmul.f32 %v11552_v2, %v9553_v60 }
 0x6b8   :  { %v3866_v53 = vrot.slane %v3865_v46, 2  ;;  %v3406_v2 = vmul.f32 %v11621_v9, %v15081_v16 }
 0x6b9   :  { %v3873_v1 = vrot.slane %v3872_v55, 4 }
 0x6ba   :  { %v3867_v58 = vadd.f32 %v3866_v53, %v3865_v46  ;;  %v15086_v46 = vld [vmem:[#allocation12_spill] sm:$0xff] }
 0x6bb   :  { %v11681_v20 = vpop.permute.xlu0 %3904  ;;  %v3874_v18 = vadd.f32 %v3873_v1, %v3872_v55  ;;  %v15087_v1 = vld [vmem:[#allocation11_spill] sm:$0xff] }
 0x6bc   :  { %v3868_v23 = vrot.slane %v3867_v58, 1  ;;  %v8652_v53 = vpack.i.bf16 %v15087_v1, %v15086_v46 }
 0x6bd   :  { %v3875_v52 = vrot.slane %v3874_v18, 2 }
 0x6be   :  { %v3869_v36 = vadd.f32 %v3868_v23, %v3867_v58  ;;  %v3394_v58 = vmul.f32 %v11536_v61, %v15081_v16  ;;  %v3393_v23 = vmul.f32 %v11482_v10, %v9553_v60  ;;  %v3392_v61 = vmul.f32 %v11444_v21, %v15081_v16 }
 0x6bf   :  { %v3876_v62 = vadd.f32 %v3875_v52, %v3874_v18  ;;  %v3396_v18 = vmul.f32 %v11527_v15, %v15081_v16  ;;  %v3395_v52 = vmul.f32 %v11479_v7, %v9553_v60 }
 0x6c0   :  { %v3705_v44 = vpop.permute.xlu1 %3704  ;;  %3930 = vrot.lane.b32.xlu0 %v3869_v36, %s9147_s26 }
 0x6c1   :  { %v3741_v35 = vmul.f32 %v3705_v44, %v9553_v60  ;;  %v3877_v19 = vrot.slane %v3876_v62, 1  ;;  %v3391_v44 = vmul.f32 %v11496_v28, %v9553_v60  ;;  %v3442_v36 = vsel %vm15088_vm8, %v3396_v18, 0.0  ;;  %vm15094_vm8 = vmmov %vm15093_vm2 }
 0x6c2   :  { %v3441_v15 = vsel %vm15090_vm6, %v3395_v52, 0.0  ;;  %v3397_v28 = vmul.f32 %v11560_v48, %v9553_v60  ;;  %v3401_v48 = vmul.f32 %v11548_v14, %v9553_v60  ;;  %vm15096_vm6 = vmmov %vm15093_vm2  ;;  %v3404_v14 = vmul.f32 %v11586_v37, %v15081_v16 }
 0x6c3   :  { %v3709_v63 = vpop.permute.xlu0 %3708  ;;  %v3879_v26 = vsel %vm14855_vm10, %v3741_v35, 0.0  ;;  %v3878_v5 = vadd.f32 %v3877_v19, %v3876_v62  ;;  %v11705_v62 = vpop.permute.xlu2 %3906  ;;  %v3432_v35 = vsel %vm15091_vm9, %v3393_v23, 0.0  ;;  %v3443_v7 = vadd.f32 %v3442_v36, %v3441_v15  ;;  %vm15097_vm9 = vmmov %vm15093_vm2 }
 0x6c4   :  { %v3742_v39 = vmul.f32 %v3709_v63, %v15081_v16  ;;  %v3433_v63 = vsel %vm15089_vm12, %v3394_v58, 0.0  ;;  %v3424_v19 = vsel %vm15093_vm2, %v3392_v61, 0.0  ;;  %v3450_v21 = vsel %vm15094_vm8, %v3397_v28, 0.0  ;;  %vm15095_vm12 = vmmov %vm15093_vm2 }
 0x6c5   :  { %3932 = vrot.lane.b32.xlu2 %v3878_v5, %s9147_s26  ;;  %v3434_v10 = vadd.f32 %v3433_v63, %v3432_v35  ;;  %v3444_v47 = vrot.slane %v3443_v7, 4  ;;  %v3459_v58 = vsel %vm15093_vm2, %v3399_v25, 0.0  ;;  %vm15099_vm8 = vmmov %vm15093_vm2  ;;  %v3405_v23 = vmul.f32 %v11605_v54, %v9553_v60 }
 0x6c6   :  { %v3880_v59 = vsel %vm14855_vm10, %v3742_v39, 0.0  ;;  %v3423_v39 = vsel %vm15092_vm13, %v3391_v44, 0.0  ;;  %vm15098_vm13 = vmmov %vm15093_vm2  ;;  %v3414_v25 = vmul.f32 %v11654_v27, %v15081_v16  ;;  %v3415_v27 = vmul.f32 %v11664_v11, %v9553_v60 }
 0x6c7   :  { %v3881_v4 = vadd.f32 %v3880_v59, %v3879_v26  ;;  %v3425_v26 = vadd.f32 %v3424_v19, %v3423_v39  ;;  %v3435_v59 = vrot.slane %v3434_v10, 4  ;;  %v3460_v46 = vsel %vm15098_vm13, %v3400_v13, 0.0  ;;  %vm15103_vm13 = vmmov %vm15093_vm2 }
 0x6c8   :  { %8643 = vrot.lane.b32.xlu0 %v8642_v6, %s9148_s27  ;;  %v11742_v18 = vpop.permute.xlu1 %3908  ;;  %v3461_v52 = vadd.f32 %v3460_v46, %v3459_v58  ;;  %vm15110_vm10 = vmmov %vm15093_vm2 }
 0x6c9   :  { %v3882_v3 = vrot.slane %v3881_v4, 4  ;;  %v3426_v6 = vrot.slane %v3425_v26, 4 }
 0x6ca   :  { %v3462_v39 = vrot.slane %v3461_v52, 4 }
 0x6cb   :  { %v3883_v0 = vadd.f32 %v3882_v3, %v3881_v4  ;;  %v11721_v5 = vpop.permute.xlu2 %3378  ;;  %v3402_v4 = vmul.f32 %v11583_v56, %v15081_v16  ;;  %v3445_v3 = vadd.f32 %v3444_v47, %v3443_v7  ;;  %v3403_v56 = vmul.f32 %v11611_v12, %v9553_v60 }
 0x6cd   :  { %v3884_v32 = vrot.slane %v3883_v0, 2  ;;  %8648 = vrot.lane.b32.xlu2 %v8647_v49, %s9145_s0  ;;  %v3469_v49 = vsel %vm15096_vm6, %v3402_v4, 0.0  ;;  %v3477_v12 = vsel %vm15099_vm8, %v3403_v56, 0.0  ;;  %vm15101_vm6 = vmmov %vm15093_vm2  ;;  %v11757_v4 = vpop.permute.xlu0 %3914  ;;  %v3411_v56 = vmul.f32 %v11652_v22, %v9553_v60 }
 0x6ce   :  { %v3487_v7 = vsel %vm15101_vm6, %v3406_v2, 0.0  ;;  %v3412_v22 = vmul.f32 %v11623_v29, %v15081_v16  ;;  %vm15104_vm8 = vmmov %vm15093_vm2 }
 0x6cf   :  { %v3885_v57 = vadd.f32 %v3884_v32, %v3883_v0  ;;  %v3451_v0 = vsel %vm15095_vm12, %v3398_v45, 0.0  ;;  %v3436_v32 = vadd.f32 %v3435_v59, %v3434_v10  ;;  %vm15100_vm12 = vmmov %vm15093_vm2 }
 0x6d0   :  { %v3452_v38 = vadd.f32 %v3451_v0, %v3450_v21  ;;  %v3478_v63 = vsel %vm15100_vm12, %v3404_v14, 0.0  ;;  %v3410_v21 = vmul.f32 %v11636_v8, %v15081_v16  ;;  %v3407_v14 = vmul.f32 %v11619_v40, %v9553_v60  ;;  %vm15105_vm12 = vmmov %vm15093_vm2 }
 0x6d1   :  { %v3886_v42 = vrot.slane %v3885_v57, 1  ;;  %v3437_v1 = vrot.slane %v3436_v32, 2  ;;  %v3479_v9 = vadd.f32 %v3478_v63, %v3477_v12  ;;  %v3416_v40 = vmul.f32 %v11657_v34, %v15081_v16  ;;  %vm15106_vm6 = vmmov %vm15093_vm2 }
 0x6d2   :  { %v3453_v33 = vrot.slane %v3452_v38, 4  ;;  %v3523_v2 = vsel %vm15105_vm12, %v3414_v25, 0.0  ;;  %v3513_v11 = vsel %vm15106_vm6, %v3411_v56, 0.0  ;;  %v3417_v12 = vmul.f32 %v11666_v30, %v9553_v60  ;;  %vm15111_vm12 = vmmov %vm15093_vm2 }
 0x6d3   :  { %v3887_v55 = vadd.f32 %v3886_v42, %v3885_v57  ;;  %v3427_v57 = vadd.f32 %v3426_v6, %v3425_v26  ;;  %v3446_v42 = vrot.slane %v3445_v3, 2  ;;  %v11748_v37 = vpop.permute.xlu2 %3910  ;;  %v3438_v15 = vadd.f32 %v3437_v1, %v3436_v32  ;;  %v11764_v32 = vpop.permute.xlu1 %3912  ;;  %vm15112_vm6 = vmmov %vm15093_vm2 }
 0x6d4   :  { %v3454_v61 = vadd.f32 %v3453_v33, %v3452_v38  ;;  %v3480_v45 = vrot.slane %v3479_v9, 4  ;;  %v3409_v6 = vmul.f32 %v11609_v43, %v9553_v60  ;;  %v3408_v38 = vmul.f32 %v11638_v17, %v15081_v16 }
 0x6d5   :  { %3934 = vrot.lane.b32.xlu1 %v3887_v55, %s9147_s26  ;;  %v3468_v55 = vsel %vm15097_vm9, %v3401_v48, 0.0  ;;  %v3428_v44 = vrot.slane %v3427_v57, 2  ;;  %v3447_v36 = vadd.f32 %v3446_v42, %v3445_v3  ;;  %vm15102_vm9 = vmmov %vm15093_vm2  ;;  %v3439_v54 = vrot.slane %v3438_v15, 1 }
 0x6d6   :  { %v3486_v10 = vsel %vm15102_vm9, %v3405_v23, 0.0  ;;  %v3455_v59 = vrot.slane %v3454_v61, 2  ;;  %v3463_v3 = vadd.f32 %v3462_v39, %v3461_v52  ;;  %v3505_v17 = vsel %vm15103_vm13, %v3410_v21, 0.0  ;;  %vm15107_vm9 = vmmov %vm15093_vm2 }
 0x6d7   :  { %v11753_v19 = vadd.f32 %v3428_v44, %v3427_v57  ;;  %v3448_v28 = vrot.slane %v3447_v36, 1  ;;  %v3488_v26 = vadd.f32 %v3487_v7, %v3486_v10  ;;  %v3440_v8 = vadd.f32 %v3439_v54, %v3438_v15  ;;  %vm15108_vm13 = vmmov %vm15093_vm2 }
 0x6d8   :  { %v11772_v43 = vadd.f32 %v3455_v59, %v3454_v61  ;;  %v3504_v46 = vsel %vm15093_vm2, %v3409_v6, 0.0  ;;  %v3418_v1 = vmul.f32 %v11679_v31, %v15081_v16  ;;  %v3464_v33 = vrot.slane %v3463_v3, 2 }
 0x6d9   :  { %v3430_v0 = vrot.slane %v11753_v19, 1  ;;  %v11762_v48 = vadd.f32 %v3448_v28, %v3447_v36  ;;  %v3489_v13 = vrot.slane %v3488_v26, 4  ;;  %v3506_v58 = vadd.f32 %v3505_v17, %v3504_v46 }
 0x6da   :  { %v3495_v31 = vsel %vm15108_vm13, %v3407_v14, 0.0  ;;  %v3531_v23 = vsel %vm15093_vm2, %v3415_v27, 0.0  ;;  %v3541_v15 = vsel %vm15110_vm10, %v3418_v1, 0.0  ;;  %v3532_v61 = vsel %vm15111_vm12, %v3416_v40, 0.0  ;;  %vm15113_vm10 = vmmov %vm15093_vm2 }
 0x6db   :  { %v11774_v42 = vpop.permute.xlu2 %3916  ;;  %v3465_v7 = vadd.f32 %v3464_v33, %v3463_v3  ;;  %v3507_v39 = vrot.slane %v3506_v58, 4  ;;  %v3540_v10 = vsel %vm15112_vm6, %v3417_v12, 0.0  ;;  %v3533_v28 = vadd.f32 %v3532_v61, %v3531_v23  ;;  %v3384_v54 = vpop.permute.xlu1 %3383  ;;  %vm15115_vm13 = vmmov %vm15093_vm2 }
 0x6dc   :  { %v3419_v25 = vmul.f32 %v11669_v50, %v9553_v60  ;;  %v3457_v3 = vrot.slane %v11772_v43, 1  ;;  %v3953_v27 = vadd.f32 %v11705_v62, %v3440_v8  ;;  %v3431_v46 = vadd.f32 %v3430_v0, %v11753_v19  ;;  %vm15117_vm12 = vmmov %vm15093_vm2 }
 0x6dd   :  { %8653 = vrot.lane.b32.xlu1 %v8652_v53, %s9145_s0  ;;  %v3470_v53 = vadd.f32 %v3469_v49, %v3468_v55  ;;  %v3481_v49 = vadd.f32 %v3480_v45, %v3479_v9  ;;  %v3413_v55 = vmul.f32 %v11640_v41, %v9553_v60  ;;  %v3496_v41 = vsel %vm15104_vm8, %v3408_v38, 0.0  ;;  %vm15109_vm8 = vmmov %vm15093_vm2  ;;  %v3389_v9 = vpop.permute.xlu0 %3388 }
 0x6de   :  { %v3514_v36 = vsel %vm15109_vm8, %v3412_v22, 0.0  ;;  %v3497_v63 = vadd.f32 %v3496_v41, %v3495_v31  ;;  %v3542_v45 = vadd.f32 %v3541_v15, %v3540_v10  ;;  %v3508_v17 = vadd.f32 %v3507_v39, %v3506_v58  ;;  %vm15116_vm8 = vmmov %vm15093_vm2 }
 0x6df   :  { %v3471_v35 = vrot.slane %v3470_v53, 4  ;;  %v3522_v29 = vsel %vm15107_vm9, %v3413_v55, 0.0  ;;  %v3482_v44 = vrot.slane %v3481_v49, 2  ;;  %v3466_v55 = vrot.slane %v3465_v7, 1  ;;  %vm15114_vm9 = vmmov %vm15093_vm2 }
 0x6e0   :  { %v3524_v34 = vadd.f32 %v3523_v2, %v3522_v29  ;;  %v3543_v22 = vrot.slane %v3542_v45, 4  ;;  %v3954_v50 = vadd.f32 %v11742_v18, %v11762_v48  ;;  %v3458_v40 = vadd.f32 %v3457_v3, %v11772_v43  ;;  %vm15119_vm6 = vmmov %vm15093_vm2 }
 0x6e1   :  { %v3472_v47 = vadd.f32 %v3471_v35, %v3470_v53  ;;  %v3490_v53 = vadd.f32 %v3489_v13, %v3488_v26  ;;  %v3515_v35 = vadd.f32 %v3514_v36, %v3513_v11  ;;  %v3420_v26 = vmul.f32 %v11721_v5, %v15081_v16  ;;  %v11819_v36 = vld [vmem:[#allocation2 + $0x2e] ss:$0 sm:$0xff] }
 0x6e2   :  { %v3483_v59 = vadd.f32 %v3482_v44, %v3481_v49  ;;  %v3498_v13 = vrot.slane %v3497_v63, 4  ;;  %v3525_v38 = vrot.slane %v3524_v34, 4  ;;  %v3534_v5 = vrot.slane %v3533_v28, 4 }
 0x6e3   :  { %v3473_v57 = vrot.slane %v3472_v47, 2  ;;  %v3491_v30 = vrot.slane %v3490_v53, 2  ;;  %v3516_v56 = vrot.slane %v3515_v35, 4  ;;  %v3550_v49 = vsel %vm15113_vm10, %v3420_v26, 0.0  ;;  %vm15121_vm10 = vmmov %vm15093_vm2 }
 0x6e4   :  { %v3484_v1 = vrot.slane %v3483_v59, 1  ;;  %v3499_v33 = vadd.f32 %v3498_v13, %v3497_v63  ;;  %v3526_v41 = vadd.f32 %v3525_v38, %v3524_v34  ;;  %v3467_v58 = vadd.f32 %v3466_v55, %v3465_v7 }
 0x6e5   :  { %v3474_v52 = vadd.f32 %v3473_v57, %v3472_v47  ;;  %v8637_v47 = vpop.permute.xlu2 %8636  ;;  %v3492_v14 = vadd.f32 %v3491_v30, %v3490_v53  ;;  %v3549_v53 = vsel %vm15114_vm9, %v3419_v25, 0.0  ;;  %v3517_v2 = vadd.f32 %v3516_v56, %v3515_v35  ;;  %vm15123_vm9 = vmmov %vm15093_vm2 }
 0x6e6   :  { %v8638_v21 = vunpack.i.l.bf16 %v8637_v47  ;;  %v8639_v6 = vunpack.i.h.bf16 %v8637_v47  ;;  %v3551_v62 = vadd.f32 %v3550_v49, %v3549_v53  ;;  %v3535_v11 = vadd.f32 %v3534_v5, %v3533_v28 }
 0x6e7   :  { %v3475_v57 = vrot.slane %v3474_v52, 1  ;;  %v3969_v12 = vmul.f32 0.5, %v3953_v27  ;;  %v3493_v29 = vrot.slane %v3492_v14, 1  ;;  %v3509_v0 = vrot.slane %v3508_v17, 2 }
 0x6e8   :  { %4093 = vmatpush.msrb.mxu0 %v8638_v21  ;;  %v3544_v18 = vadd.f32 %v3543_v22, %v3542_v45  ;;  %v3970_v48 = vmul.f32 0.5, %v3954_v50  ;;  %v3485_v23 = vadd.f32 %v3484_v1, %v3483_v59  ;;  %v3421_v44 = vmul.f32 %v3384_v54, %v9553_v60 }
 0x6e9   :  { %v3476_v8 = vadd.f32 %v3475_v57, %v3474_v52  ;;  %v3952_v43 = vadd.f32 %v11681_v20, %v3431_v46  ;;  %v3956_v63 = vadd.f32 %v11764_v32, %v3467_v58  ;;  %v3500_v52 = vrot.slane %v3499_v33, 2 }
 0x6ea   :  { %4094 = vmatpush.msrb.mxu0 %v8639_v6  ;;  %v3527_v34 = vrot.slane %v3526_v41, 2  ;;  %v3552_v15 = vrot.slane %v3551_v62, 4  ;;  %v3955_v61 = vadd.f32 %v11748_v37, %v3458_v40  ;;  %v3422_v35 = vmul.f32 %v3389_v9, %v15081_v16 }
 0x6eb   :  { %v3518_v7 = vrot.slane %v3517_v2, 2  ;;  %v11826_v30 = vadd.f32 %v11819_v36, %v3969_v12  ;;  %v3494_v39 = vadd.f32 %v3493_v29, %v3492_v14  ;;  %v3510_v10 = vadd.f32 %v3509_v0, %v3508_v17 }
 0x6ec   :  { %v3536_v60 = vrot.slane %v3535_v11, 2  ;;  %v3957_v28 = vadd.f32 %v11757_v4, %v3476_v8  ;;  %v11830_v20 = vadd.f32 %v11819_v36, %v3970_v48  ;;  %v3558_v32 = vsel %vm15115_vm13, %v3421_v44, 0.0  ;;  %vm15125_vm13 = vmmov %vm15093_vm2 }
 0x6ed   :  { %v3545_v26 = vrot.slane %v3544_v18, 2  ;;  %v3968_v54 = vmul.f32 0.5, %v3952_v43  ;;  %v3972_v47 = vmul.f32 0.5, %v3956_v63  ;;  %v3501_v37 = vadd.f32 %v3500_v52, %v3499_v33 }
 0x6ee   :  { %v3528_v45 = vadd.f32 %v3527_v34, %v3526_v41  ;;  %v3553_v16 = vadd.f32 %v3552_v15, %v3551_v62  ;;  %v3971_v9 = vmul.f32 0.5, %v3955_v61  ;;  %v3559_v59 = vsel %vm15093_vm2, %v3422_v35, 0.0 }
 0x6ef   :  { %v3919_v19 = vpop.permute.xlu1 %3918  ;;  %v3519_v6 = vadd.f32 %v3518_v7, %v3517_v2  ;;  %v4002_v13 = vmax.f32 %v11826_v30, 0.0  ;;  %v3560_v38 = vadd.f32 %v3559_v59, %v3558_v32  ;;  %v3511_v4 = vrot.slane %v3510_v10, 1 }
 0x6f0   :  { %v3537_v56 = vadd.f32 %v3536_v60, %v3535_v11  ;;  %v3973_v57 = vmul.f32 0.5, %v3957_v28  ;;  %v4003_v55 = vmax.f32 %v11830_v20, 0.0  ;;  %v3959_v14 = vadd.f32 %v3919_v19, %v3494_v39 }
 0x6f1   :  { %v3546_v17 = vadd.f32 %v3545_v26, %v3544_v18  ;;  %v11837_v5 = vadd.f32 %v11819_v36, %v3968_v54  ;;  %v3958_v27 = vadd.f32 %v11774_v42, %v3485_v23  ;;  %v11841_v49 = vadd.f32 %v11819_v36, %v3972_v47 }
 0x6f2   :  { %v3502_v46 = vrot.slane %v3501_v37, 1  ;;  %v11844_v22 = vadd.f32 %v11819_v36, %v3971_v9  ;;  %v3520_v50 = vrot.slane %v3519_v6, 1  ;;  %v3529_v1 = vrot.slane %v3528_v45, 1 }
 0x6f3   :  { %v3554_v33 = vrot.slane %v3553_v16, 2  ;;  %v4033_v41 = vrot.slane %v4002_v13, 7  ;;  %v3561_v53 = vrot.slane %v3560_v38, 4  ;;  %v3512_v40 = vadd.f32 %v3511_v4, %v3510_v10 }
 0x6f4   :  { %v3538_v2 = vrot.slane %v3537_v56, 1  ;;  %v11849_v62 = vadd.f32 %v11819_v36, %v3973_v57  ;;  %v4035_v42 = vrot.slane %v4003_v55, 6  ;;  %v3975_v8 = vmul.f32 0.5, %v3959_v14 }
 0x6f5   :  { %v3547_v58 = vrot.slane %v3546_v17, 1  ;;  %v14869_v11 = vmax.f32 %v11837_v5, 0.0  ;;  %v3974_v12 = vmul.f32 0.5, %v3958_v27  ;;  %v4005_v29 = vmax.f32 %v11841_v49, 0.0 }
 0x6f6   :  { %v3503_v19 = vadd.f32 %v3502_v46, %v3501_v37  ;;  %v4004_v0 = vmax.f32 %v11844_v22, 0.0  ;;  %v3521_v18 = vadd.f32 %v3520_v50, %v3519_v6  ;;  %v3530_v48 = vadd.f32 %v3529_v1, %v3528_v45 }
 0x6f7   :  { %v3925_v21 = vpop.permute.xlu2 %3924  ;;  %v3555_v44 = vadd.f32 %v3554_v33, %v3553_v16  ;;  %v4034_v43 = vsel %vm1699_vm3, %v4033_v41, %v14869_v11  ;;  %v3562_v63 = vadd.f32 %v3561_v53, %v3560_v38  ;;  %v3539_v15 = vadd.f32 %v3538_v2, %v3537_v56 }
 0x6f8   :  { %v14870_v35 = vmax.f32 %v11849_v62, 0.0  ;;  %v4036_v7 = vsel %vm1702_vm5, %v4035_v42, %v4034_v43  ;;  %v11863_v39 = vadd.f32 %v11819_v36, %v3975_v8  ;;  %v3548_v10 = vadd.f32 %v3547_v58, %v3546_v17 }
 0x6f9   :  { %v11866_v60 = vadd.f32 %v11819_v36, %v3974_v12  ;;  %v4039_v28 = vrot.slane %v4005_v29, 4  ;;  %v3962_v54 = vadd.f32 %v3925_v21, %v3521_v18  ;;  %v3556_v47 = vrot.slane %v3555_v44, 1 }
 0x6fa   :  { %v3563_v9 = vrot.slane %v3562_v63, 2  ;;  %v14866_v59 = vmax.f32 %v11863_v39, 0.0 }
 0x6fb   :  { %v14867_v38 = vmax.f32 %v11866_v60, 0.0  ;;  %v3978_v57 = vmul.f32 0.5, %v3962_v54  ;;  %v3557_v21 = vadd.f32 %v3556_v47, %v3555_v44  ;;  %v15212_v30 = vmax.f32 %v11866_v60, 0.0 }
 0x6fc   :  { %v3564_v50 = vadd.f32 %v3563_v9, %v3562_v63  ;;  %v4045_v1 = vrot.slane %v14866_v59, 1 }
 0x6fd   :  { %v11893_v58 = vadd.f32 %v11819_v36, %v3978_v57 }
 0x6fe   :  { %v3565_v44 = vrot.slane %v3564_v50, 1 }
 0x6ff   :  { %v3921_v25 = vpop.permute.xlu1 %3920 }
 0x700   :  { %v3960_v32 = vadd.f32 %v3921_v25, %v3503_v19 }
 0x701   :  { %v11816_v31 = vpop.permute.xlu0 %3922 }
 0x702   :  { %v3961_v52 = vadd.f32 %v11816_v31, %v3512_v40  ;;  %v4037_v31 = vrot.slane %v4004_v0, 5  ;;  %v3976_v4 = vmul.f32 0.5, %v3960_v32  ;;  %v4043_v40 = vrot.slane %v14867_v38, 2 }
 0x704   :  { %v3977_v45 = vmul.f32 0.5, %v3961_v52  ;;  %v4038_v6 = vsel %vm1705_vm7, %v4037_v31, %v4036_v7  ;;  %v11887_v2 = vadd.f32 %v11819_v36, %v3976_v4 }
 0x705   :  { %v4040_v25 = vsel %vm1708_vm15, %v4039_v28, %v4038_v6 }
 0x706   :  { %v11879_v17 = vadd.f32 %v11819_v36, %v3977_v45 }
 0x708   :  { %v14865_v18 = vmax.f32 %v11879_v17, 0.0 }
 0x70a   :  { %v4047_v28 = vrot.slane %v14865_v18, 7 }
 0x713   :  { %v3927_v3 = vpop.permute.xlu0 %3926 }
 0x714   :  { %v3963_v26 = vadd.f32 %v3927_v3, %v3530_v48  ;;  %v4041_v3 = vrot.slane %v14870_v35, 3 }
 0x716   :  { %v3979_v56 = vmul.f32 0.5, %v3963_v26  ;;  %v4042_v53 = vsel %vm14902_vm0, %v4041_v3, %v4040_v25  ;;  %v3566_v26 = vadd.f32 %v3565_v44, %v3564_v50  ;;  %v15126_v44 = vld [vmem:[#allocation19_spill] sm:$0xff] }
 0x718   :  { %v11890_v42 = vadd.f32 %v11819_v36, %v3979_v56 }
 0x71f   :  { %v3933_v23 = vpop.permute.xlu2 %3932 }
 0x720   :  { %v3929_v34 = vpop.permute.xlu1 %3928  ;;  %v3966_v33 = vadd.f32 %v3933_v23, %v3557_v21  ;;  %v4044_v23 = vsel %vm14901_vm1, %v4043_v40, %v4042_v53  ;;  %v15118_v40 = vld [vmem:[#allocation15_spill] sm:$0xff] }
 0x721   :  { %v3964_v37 = vadd.f32 %v3929_v34, %v3539_v15  ;;  %v4046_v52 = vsel %vm14900_vm4, %v4045_v1, %v4044_v23  ;;  %v14862_v34 = vmax.f32 %v11887_v2, 0.0  ;;  %v14863_v15 = vmax.f32 %v11890_v42, 0.0  ;;  %v15124_v23 = vld [vmem:[#allocation18_spill] sm:$0xff] }
 0x722   :  { %v3982_v43 = vmul.f32 0.5, %v3966_v33 }
 0x723   :  { %v3980_v14 = vmul.f32 0.5, %v3964_v37  ;;  %v4048_v47 = vsel %vm1699_vm3, %v4047_v28, %v14862_v34  ;;  %v4051_v37 = vrot.slane %v14863_v15, 5  ;;  %v15135_v28 = vld [vmem:[#allocation24_spill] sm:$0xff] }
 0x724   :  { %v11913_v31 = vadd.f32 %v11819_v36, %v3982_v43  ;;  %v15127_v43 = vld [vmem:[#allocation20_spill] sm:$0xff] }
 0x725   :  { %v11896_v12 = vadd.f32 %v11819_v36, %v3980_v14  ;;  %v210_v34 = vld [vmem:[#allocation2 + $0x18] sm:$0xff] }
 0x726   :  { %v14859_v25 = vmax.f32 %v11913_v31, 0.0 }
 0x727   :  { %v8649_v8 = vpop.permute.xlu2 %8648 }
 0x728   :  { %v8650_v63 = vunpack.i.l.bf16 %v8649_v8  ;;  %v8651_v7 = vunpack.i.h.bf16 %v8649_v8  ;;  %v15120_v8 = vld [vmem:[#allocation16_spill] sm:$0xff] }
 0x732   :  { %v3931_v61 = vpop.permute.xlu0 %3930 }
 0x733   :  { %v3965_v16 = vadd.f32 %v3931_v61, %v3548_v10  ;;  %v14864_v61 = vmax.f32 %v11893_v58, 0.0  ;;  %v14861_v10 = vmax.f32 %v11896_v12, 0.0 }
 0x735   :  { %v3981_v27 = vmul.f32 0.5, %v3965_v16  ;;  %v4049_v16 = vrot.slane %v14864_v61, 6  ;;  %v4053_v9 = vrot.slane %v14861_v10, 4  ;;  %v211_v10 = vld [vmem:[#allocation2 + $0x20] sm:$0xff] }
 0x736   :  { %4713 = vmatpush.msrb.mxu1 %v211_v10 }
 0x737   :  { %v11900_v48 = vadd.f32 %v11819_v36, %v3981_v27  ;;  %v4050_v56 = vsel %vm1702_vm5, %v4049_v16, %v4048_v47  ;;  %v15140_v16 = vld [vmem:[#allocation27_spill] sm:$0xff] }
 0x738   :  { %v4052_v57 = vsel %vm1705_vm7, %v4051_v37, %v4050_v56  ;;  %v15139_v37 = vld [vmem:[#allocation26_spill] sm:$0xff]  ;;  %4714 = vmatpush.msrb.mxu1 %v210_v34 }
 0x739   :  { %v14860_v32 = vmax.f32 %v11900_v48, 0.0  ;;  %v4054_v21 = vsel %vm1708_vm15, %v4053_v9, %v4052_v57  ;;  %v15144_v57 = vld [vmem:[#allocation31_spill] sm:$0xff] }
 0x73a   :  { %v8644_v46 = vpop.permute.xlu0 %8643 }
 0x73b   :  { %v8645_v41 = vunpack.i.l.bf16 %v8644_v46  ;;  %v8646_v19 = vunpack.i.h.bf16 %v8644_v46  ;;  %v4055_v6 = vrot.slane %v14860_v32, 3  ;;  %v4057_v46 = vrot.slane %v14859_v25, 2 }
 0x73d   :  { %4095 = vmatpush.msrb.mxu0 %v8645_v41  ;;  %v4056_v27 = vsel %vm14902_vm0, %v4055_v6, %v4054_v21 }
 0x73e   :  { %v4058_v41 = vsel %vm14901_vm1, %v4057_v46, %v4056_v27  ;;  %v15146_v27 = vld [vmem:[#allocation32_spill] sm:$0xff] }
 0x73f   :  { %4096 = vmatpush.msrb.mxu0 %v8646_v19  ;;  %v15122_v19 = vld [vmem:[#allocation17_spill] sm:$0xff] }
 0x740   :  { %8347 = vmatmul.msk.f32.vlgmr.msrb.gmra.mxu0 %vm15116_vm8, %v4046_v52  ;;  %vm15128_vm8 = vmmov %vm15093_vm2  ;;  %v15131_v52 = vld [vmem:[#allocation22_spill] sm:$0xff] }
 0x741   :  { %4752 = vmatpush.msra.mxu0 %v8650_v63  ;;  %v15129_v63 = vld [vmem:[#allocation21_spill] sm:$0xff] }
 0x743   :  { %4753 = vmatpush.msra.mxu0 %v8651_v7  ;;  %v15133_v7 = vld [vmem:[#allocation23_spill] sm:$0xff] }
 0x747   :  { %v3935_v54 = vpop.permute.xlu1 %3934 }
 0x748   :  { %v3967_v45 = vadd.f32 %v3935_v54, %v3566_v26  ;;  %v15137_v26 = vld [vmem:[#allocation25_spill] sm:$0xff] }
 0x749   :  { %v54_v54 = vld [vmem:[%s14688_s4] sm:$0x1] }
 0x74a   :  { %v3983_v4 = vmul.f32 0.5, %v3967_v45  ;;  %v73_v47 = vcvt.s32.f32 %v54_v54  ;;  %v15168_v54 = vmov 0.0  }
 0x74c   :  { %v11929_v3 = vadd.f32 %v11819_v36, %v3983_v4  ;;  %v11969_v45 = vperm.slane %v73_v47, 0  ;;  %v15142_v4 = vld [vmem:[#allocation28_spill] sm:$0xff] }
 0x74e   :  { %v14858_v14 = vmax.f32 %v11929_v3, 0.0  ;;  %v77_v9 = vmul.f32 %v15140_v16, %v11969_v45 }
 0x74f   :  { %v8654_v50 = vpop.permute.xlu1 %8653 }
 0x750   :  { %v8655_v1 = vunpack.i.l.bf16 %v8654_v50  ;;  %v4059_v33 = vrot.slane %v14858_v14, 1  ;;  %v8656_v36 = vunpack.i.h.bf16 %v8654_v50  ;;  %v15148_v50 = vld [vmem:[#allocation8_spill] sm:$0xff] }
 0x752   :  { %4754 = vmatpush.msra.mxu0 %v8655_v1  ;;  %v4060_v53 = vsel %vm14900_vm4, %v4059_v33, %v4058_v41  ;;  %v15149_v1 = vld [vmem:[#allocation33_spill] sm:$0xff]  ;;  %v15151_v41 = vld [vmem:[#allocation34_spill] sm:$0xff] }
 0x753   :  { %8348 = vmatmul.msk.f32.gmra.mxu0 %vm15117_vm12, %v4060_v53  ;;  %vm15130_vm12 = vmmov %vm15093_vm2  ;;  %v15154_v53 = vld [vmem:[#allocation36_spill] sm:$0xff] }
 0x754   :  { %4755 = vmatpush.msra.mxu0 %v8656_v36  ;;  %v15153_v36 = vld [vmem:[#allocation35_spill] sm:$0xff] }
 0x75b   :  { %8353 = vmatmul.msk.f32.vlgmr.msra.gmra.mxu0 %vm15119_vm6, %v15118_v40  ;;  %vm15132_vm6 = vmmov %vm15093_vm2  ;;  %v15156_v40 = vld [vmem:[#allocation39_spill] sm:$0xff] }
 0x763   :  { %8354 = vmatmul.msk.f32.gmra.mxu0 %vm15121_vm10, %v15120_v8  ;;  %vm15134_vm10 = vmmov %vm15093_vm2  ;;  %v78_v8 = vmul.f32 %v15156_v40, %v11969_v45 }
 0x76b   :  { %8355 = vmatmul.msk.f32.gmra.mxu0 %vm15123_vm9, %v15122_v19  ;;  %vm15136_vm9 = vmmov %vm15093_vm2 }
 0x773   :  { %8356 = vmatmul.msk.f32.gmra.mxu0 %vm15125_vm13, %v15124_v23  ;;  %vm15138_vm13 = vmmov %vm15093_vm2  ;;  %v15158_v23 = vld [vmem:[#allocation37_spill] sm:$0xff] }
 0x77b   :  { %8357 = vmatmul.msk.f32.gmra.mxu0 %vm15093_vm2, %v15126_v44  ;;  %v15160_v44 = vld [vmem:[#allocation38_spill] sm:$0xff] }
 0x783   :  { %8358 = vmatmul.msk.f32.gmra.mxu0 %vm15128_vm8, %v15127_v43  ;;  %vm15141_vm8 = vcmask 130048   ;;  %v15162_v43 = vld [vmem:[#allocation41_spill] sm:$0xff] }
 0x784   :  { %v80_v6 = vsel %vm15141_vm8, %v77_v9, 0.0  ;;  %vm15155_vm8 = vmmov %vm15093_vm2 }
 0x785   :  { %81 = vadd.xlane.f32.xlu1 %v80_v6 }
 0x78b   :  { %8359 = vmatmul.msk.f32.gmra.mxu0 %vm15130_vm12, %v15129_v63  ;;  %vm15143_vm12 = vmmov %vm15093_vm2  ;;  %v15164_v63 = vld [vmem:[#allocation43_spill] sm:$0xff] }
 0x793   :  { %8360 = vmatmul.msk.f32.gmra.mxu0 %vm15132_vm6, %v15131_v52  ;;  %vm15145_vm6 = vmmov %vm15093_vm2  ;;  %v15166_v52 = vld [vmem:[#allocation44_spill] sm:$0xff] }
 0x79b   :  { %8361 = vmatmul.msk.f32.gmra.mxu0 %vm15134_vm10, %v15133_v7  ;;  %vm15147_vm10 = vmmov %vm15093_vm2 }
 0x7a3   :  { %8362 = vmatmul.msk.f32.gmra.mxu0 %vm15136_vm9, %v15135_v28  ;;  %vm15150_vm9 = vmmov %vm15093_vm2 }
 0x7ab   :  { %8363 = vmatmul.msk.f32.gmra.mxu0 %vm15138_vm13, %v15137_v26  ;;  %vm15152_vm13 = vmmov %vm15093_vm2 }
 0x7b3   :  { %8364 = vmatmul.msk.f32.gmra.mxu0 %vm15093_vm2, %v15139_v37 }
 0x7bb   :  { %8365 = vmatmul.msk.f32.gmra.mxu0 %vm15143_vm12, %v15142_v4  ;;  %vm15157_vm12 = vcmask 130048  }
 0x7bc   :  { %v83_v19 = vsel %vm15157_vm12, %v78_v8, 0.0 }
 0x7bd   :  { %v4098_v56 = vpop.f32.mrf.mxu0 }
 0x7be   :  { %8935 = vtanh.f32 %v4098_v56 }
 0x7c3   :  { %8366 = vmatmul.msk.f32.gmra.mxu0 %vm15145_vm6, %v15144_v57  ;;  %vm15159_vm6 = vmmov %vm15093_vm2 }
 0x7c4   :  { %v11978_v21 = vpop.eup %8935 }
 0x7c5   :  { %4108 = vperm.xlu0 %8641, %v11978_v21  }
 0x7cb   :  { %8367 = vmatmul.msk.f32.gmra.mxu0 %vm15147_vm10, %v15146_v27  ;;  %vm15161_vm10 = vmmov %vm15093_vm2 }
 0x7cd   :  { %8657 = vset.pattern.permute.xlu0 %v15148_v50 }
 0x7d0   :  { %v4101_v46 = vpop.f32.mrf.mxu0 }
 0x7d1   :  { %8937 = vtanh.f32 %v4101_v46 }
 0x7d3   :  { %8368 = vmatmul.msk.f32.gmra.mxu0 %vm15150_vm9, %v15149_v1  ;;  %vm15163_vm9 = vmmov %vm15093_vm2 }
 0x7d7   :  { %v11986_v33 = vpop.eup %8937 }
 0x7d8   :  { %4113 = vperm.xlu2 %8632, %v11986_v33  }
 0x7db   :  { %8369 = vmatmul.msk.f32.gmra.mxu0 %vm15152_vm13, %v15151_v41  ;;  %vm15165_vm13 = vmmov %vm15093_vm2 }
 0x7e3   :  { %8370 = vmatmul.msk.f32.gmra.mxu0 %vm15093_vm2, %v15153_v36 }
 0x7eb   :  { %8371 = vmatmul.msk.f32.gmra.mxu0 %vm15155_vm8, %v15154_v53  ;;  %v15172_v53 = vld [vmem:[#allocation10_spill] sm:$0xff] }
 0x7ef   :  { %84 = vadd.xlane.f32.xlu0 %v83_v19 }
 0x7f3   :  { %8372 = vmatmul.msk.f32.gmra.mxu0 %vm15159_vm6, %v15158_v23  ;;  %vm15170_vm6 = vmmov %vm15157_vm12 }
 0x7f8   :  { %v12008_v7 = vpop.xlane.xlu1 %81 }
 0x7f9   :  { %15167 = vst [vmem:[#allocation65_spill] sm:$0xff] %v12008_v7  ;;  %v86_v28 = vsub.f32 %v12008_v7, %v11969_v45 }
 0x7fb   :  { %8373 = vmatmul.msk.f32.gmra.mxu0 %vm15161_vm10, %v15160_v44  ;;  %v88_v26 = vand.u32 2147483647, %v86_v28  ;;  %vm15171_vm10 = vmmov %vm15170_vm6  ;;  %v15174_v28 = vld [vmem:[#allocation9_spill] sm:$0xff] }
 0x7fd   :  { %vm90_vm8 = vcmp.lt.f32.partialorder %v88_v26, 0.5 }
 0x7fe   :  { %v12013_v47 = vsel %vm90_vm8, 1.0, %v15168_v54 }
 0x7ff   :  { %15169 = vst [vmem:[#allocation62_spill] sm:$0xff] %v12013_v47  ;;  %v4147_v37 = vsel %vm15157_vm12, %v12013_v47, 0.0 }
 0x801   :  { %4148 = vadd.xlane.f32.xlu2 %v4147_v37 }
 0x803   :  { %8374 = vmatmul.msk.f32.gmra.mxu0 %vm15163_vm9, %v15162_v43  ;;  %vm67_vm9 = vcmp.lt.s32.totalorder %v15172_v53, %v15148_v50 }
 0x804   :  { %v12024_v19 = vsel %vm67_vm9, 1.0, %v15168_v54  ;;  %vm68_vm9 = vcmp.lt.s32.totalorder %v15172_v53, %v15174_v28 }
 0x805   :  { %15173 = vst [vmem:[#allocation66_spill] sm:$0xff] %v12024_v19  ;;  %v12035_v26 = vsel %vm68_vm9, 1.0, %v15168_v54  ;;  %vm15178_vm9 = vmmov %vm15171_vm10 }
 0x806   :  { %15175 = vst [vmem:[#allocation69_spill] sm:$0xff] %v12035_v26  ;;  %vm14898_vm14 = vcmp.gt.f32.partialorder %v12035_v26, 0.5  ;;  %v15211_v26 = vmax.f32 %v11837_v5, 0.0 }
 0x80b   :  { %8375 = vmatmul.msk.f32.gmra.mxu0 %vm15165_vm13, %v15164_v63  ;;  %vm14899_vm13 = vcmp.gt.f32.partialorder %v12024_v19, 0.5 }
 0x813   :  { %8376 = vmatmul.msk.f32.gmra.mxu0 %vm15093_vm2, %v15166_v52 }
 0x832   :  { %v4114_v9 = vpop.permute.xlu2 %4113 }
 0x833   :  { %v4117_v6 = vmul.f32 %v15156_v40, %v4114_v9 }
 0x835   :  { %v4119_v57 = vsel %vm15170_vm6, %v4117_v6, 0.0 }
 0x837   :  { %v4109_v4 = vpop.permute.xlu0 %4108 }
 0x838   :  { %v4116_v56 = vmul.f32 %v15140_v16, %v4109_v4 }
 0x83a   :  { %v4118_v27 = vsel %vm15171_vm10, %v4116_v56, 0.0 }
 0x83b   :  { %v4120_v46 = vadd.f32 %v4119_v57, %v4118_v27 }
 0x83d   :  { %v4121_v1 = vrot.slane %v4120_v46, 4 }
 0x83f   :  { %v4122_v41 = vadd.f32 %v4121_v1, %v4120_v46 }
 0x841   :  { %v4123_v36 = vrot.slane %v4122_v41, 2 }
 0x843   :  { %v4124_v8 = vadd.f32 %v4123_v36, %v4122_v41 }
 0x845   :  { %v4125_v23 = vrot.slane %v4124_v8, 1 }
 0x847   :  { %v4126_v44 = vadd.f32 %v4125_v23, %v4124_v8  ;;  %v12058_v23 = vpop.f32.mrf.mxu0 }
 0x849   :  { %vm4127_vm2 = vcmp.gt.f32.partialorder %v4126_v44, %v4109_v4  ;;  %vm4129_vm8 = vcmp.eq.f32.partialorder %v4126_v44, %v4109_v4  ;;  %vm4130_vm11 = vcmp.eq.f32.partialorder %v4126_v44, %v4114_v9 }
 0x84a   :  { %vm4133_vm12 = vmand %vm4129_vm8, %vm14899_vm13  ;;  %vm4128_vm8 = vcmp.gt.f32.partialorder %v4126_v44, %v4114_v9  ;;  %v15180_v44 = vld [vmem:[#allocation45_spill] sm:$0xff] }
 0x84b   :  { %vm4135_vm6 = vmor %vm4127_vm2, %vm4133_vm12 }
 0x84c   :  { %v4137_v43 = vsel %vm4135_vm6, 1.0, %v15168_v54  ;;  %vm4134_vm2 = vmand %vm4130_vm11, %vm14898_vm14 }
 0x84d   :  { %v4139_v63 = vmul.f32 %v4137_v43, %v12013_v47  ;;  %vm4136_vm12 = vmor %vm4128_vm8, %vm4134_vm2  ;;  %vm15181_vm8 = vcmask 261120  }
 0x84e   :  { %v4138_v57 = vsel %vm4136_vm12, 1.0, %v15168_v54  ;;  %8377 = vmatmul.msk.f32.gmra.mxu0 %vm15181_vm8, %v15180_v44  ;;  %vm15183_vm2 = vmmov %vm15181_vm8 }
 0x84f   :  { %v4141_v52 = vsel %vm15171_vm10, %v4139_v63, 0.0  ;;  %vm15201_vm8 = vmmov %vm15183_vm2 }
 0x850   :  { %4142 = vadd.xlane.f32.xlu1 %v4141_v52  ;;  %v12062_v52 = vpop.f32.mrf.mxu0 }
 0x862   :  { %v12038_v37 = vpop.xlane.xlu0 %84 }
 0x863   :  { %15176 = vst [vmem:[#allocation68_spill] sm:$0xff] %v12038_v37  ;;  %v87_v6 = vsub.f32 %v12038_v37, %v11969_v45  ;;  %v15210_v37 = vmax.f32 %v11849_v62, 0.0 }
 0x865   :  { %v89_v4 = vand.u32 2147483647, %v87_v6  ;;  %v15182_v6 = vld [vmem:[#allocation46_spill] sm:$0xff] }
 0x866   :  { %8378 = vmatmul.msk.f32.gmra.mxu0 %vm15183_vm2, %v15182_v6 }
 0x867   :  { %vm91_vm6 = vcmp.lt.f32.partialorder %v89_v4, 0.5 }
 0x868   :  { %v12045_v56 = vsel %vm91_vm6, 1.0, %v15168_v54  ;;  %vm15185_vm6 = vmmov %vm15178_vm9 }
 0x869   :  { %15177 = vst [vmem:[#allocation67_spill] sm:$0xff] %v12045_v56  ;;  %v4150_v27 = vsel %vm15171_vm10, %v12045_v56, 0.0  ;;  %v4140_v46 = vmul.f32 %v4138_v57, %v12045_v56  ;;  %vm15186_vm10 = vmmov %vm15185_vm6 }
 0x86a   :  { %4151 = vadd.xlane.f32.xlu2 %v4150_v27 }
 0x86b   :  { %v4144_v9 = vsel %vm15178_vm9, %v4140_v46, 0.0  ;;  %vm15188_vm9 = vmmov %vm15183_vm2 }
 0x86c   :  { %4145 = vadd.xlane.f32.xlu0 %v4144_v9 }
 0x874   :  { %v4149_v1 = vpop.xlane.xlu2 %4148 }
 0x875   :  { %v4153_v41 = vmul.f32 0.8, %v4149_v1 }
 0x877   :  { %v8349_v45 = vadd.f32 -0.0001, %v4153_v41 }
 0x8c3   :  { %v4143_v36 = vpop.xlane.xlu1 %4142 }
 0x8c4   :  { %vm4157_vm11 = vcmp.lt.f32.partialorder %v4143_v36, %v8349_v45  ;;  %v12077_v36 = vpop.f32.mrf.mxu0 }
 0x8c5   :  { %v12053_v53 = vsel %vm4157_vm11, 1.0, %v15168_v54  ;;  %vm15190_vm11 = vmmov %vm15183_vm2 }
 0x8c6   :  { %15179 = vst [vmem:[#allocation71_spill] sm:$0xff] %v12053_v53  ;;  %v4172_v8 = vmul.f32 %v11978_v21, %v12053_v53  ;;  %v4161_v21 = vmul.f32 %v15140_v16, %v12053_v53  ;;  %vm15202_vm2 = vmmov %vm15185_vm6 }
 0x8c8   :  { %4176 = vperm.xlu1 %8640, %v4172_v8   ;;  %v4163_v1 = vsel %vm15185_vm6, %v4161_v21, 0.0  ;;  %v15187_v8 = vld [vmem:[#allocation47_spill] sm:$0xff]  ;;  %v15191_v21 = vld [vmem:[#allocation29_spill] sm:$0xff]  ;;  %vm15205_vm6 = vmmov %vm15201_vm8 }
 0x8c9   :  { %8379 = vmatmul.msk.f32.gmra.mxu0 %vm15188_vm9, %v15187_v8  ;;  %vm15209_vm9 = vmmov %vm15205_vm6 }
 0x8d0   :  { %8658 = vset.pattern.permute.xlu1 %v15174_v28 }
 0x8dd   :  { %v4152_v43 = vpop.xlane.xlu2 %4151 }
 0x8de   :  { %v4154_v63 = vmul.f32 0.8, %v4152_v43 }
 0x8df   :  { %v4146_v57 = vpop.xlane.xlu0 %4145 }
 0x8e0   :  { %v8350_v4 = vadd.f32 -0.0001, %v4154_v63 }
 0x8e2   :  { %vm4158_vm12 = vcmp.lt.f32.partialorder %v4146_v57, %v8350_v4  ;;  %v12082_v4 = vpop.f32.mrf.mxu0 }
 0x8e3   :  { %v12069_v27 = vsel %vm4158_vm12, 1.0, %v15168_v54  ;;  %vm15203_vm12 = vmmov %vm15202_vm2 }
 0x8e4   :  { %15184 = vst [vmem:[#allocation70_spill] sm:$0xff] %v12069_v27  ;;  %v4162_v46 = vmul.f32 %v15156_v40, %v12069_v27  ;;  %v4173_v9 = vmul.f32 %v11986_v33, %v12069_v27  ;;  %v15189_v33 = vld [vmem:[#allocation48_spill] sm:$0xff] }
 0x8e5   :  { %8380 = vmatmul.msk.f32.gmra.mxu0 %vm15190_vm11, %v15189_v33  ;;  %v15198_v33 = vsub.f32 1.0, %v15156_v40  ;;  %vm15221_vm11 = vmmov %vm15205_vm6 }
 0x8e6   :  { %v4164_v41 = vsel %vm15186_vm10, %v4162_v46, 0.0  ;;  %4180 = vperm.xlu2 %8632, %v4173_v9   ;;  %v15192_v46 = vmin.f32 %v15191_v21, 1.0  ;;  %vm15207_vm10 = vmmov %vm15205_vm6 }
 0x8e7   :  { %v4165_v45 = vadd.f32 %v4164_v41, %v4163_v1  ;;  %v15194_v41 = vld [vmem:[#allocation40_spill] sm:$0xff] }
 0x8e8   :  { %v4228_v9 = vmul.f32 %v12053_v53, %v15192_v46  ;;  %v15195_v8 = vmin.f32 %v15194_v41, 1.0 }
 0x8e9   :  { %v4166_v44 = vrot.slane %v4165_v45, 4 }
 0x8ea   :  { %v12104_v21 = vpop.f32.mrf.mxu0 }
 0x8eb   :  { %v4167_v43 = vadd.f32 %v4166_v44, %v4165_v45  ;;  %v4229_v45 = vmul.f32 %v12069_v27, %v15195_v8  ;;  %v15204_v8 = vld [vmem:[#allocation50_spill] sm:$0xff] }
 0x8ed   :  { %v4168_v63 = vrot.slane %v4167_v43, 2 }
 0x8ee   :  { %8659 = vset.pattern.permute.xlu2 %v15148_v50 }
 0x8ef   :  { %v4169_v6 = vadd.f32 %v4168_v63, %v4167_v43  ;;  %v15196_v63 = vsub.f32 1.0, %v15140_v16 }
 0x8f1   :  { %v4170_v57 = vrot.slane %v4169_v6, 1 }
 0x8f2   :  { %v12113_v41 = vpop.f32.mrf.mxu0 }
 0x8f3   :  { %v12089_v1 = vadd.f32 %v4170_v57, %v4169_v6  ;;  %v15200_v6 = vld [vmem:[#allocation49_spill] sm:$0xff] }
 0x8f4   :  { %8381 = vmatmul.msk.f32.gmra.mxu0 %vm15201_vm8, %v15200_v6  ;;  %vm15224_vm8 = vmmov %vm15205_vm6 }
 0x8f5   :  { %15193 = vst [vmem:[#allocation30_spill] sm:$0xff] %v12089_v1  ;;  %v4230_v44 = vmul.f32 %v4228_v9, %v12089_v1  ;;  %v4231_v43 = vmul.f32 %v4229_v45, %v12089_v1 }
 0x8f7   :  { %v12098_v14 = vmul.f32 %v4230_v44, %v15196_v63  ;;  %v12102_v25 = vmul.f32 %v4231_v43, %v15198_v33  ;;  %v15206_v43 = vld [vmem:[#allocation51_spill] sm:$0xff] }
 0x8f9   :  { %15197 = vst [vmem:[#allocation42_spill] sm:$0xff] %v12098_v14  ;;  %v4888_v57 = vsel %vm15202_vm2, %v12102_v25, 0.0  ;;  %v4885_v46 = vsel %vm15203_vm12, %v12098_v14, 0.0  ;;  %v4260_v9 = vperm.slane %v12098_v14, 2  ;;  %v4234_v45 = vperm.slane %v12098_v14, 0 }
 0x8fa   :  { %15199 = vst [vmem:[#allocation53_spill] sm:$0xff] %v12102_v25  ;;  %4889 = vadd.xlane.f32.xlu1 %v4888_v57  ;;  %4886 = vadd.xlane.f32.xlu0 %v4885_v46  ;;  %v12118_v44 = vpop.f32.mrf.mxu0  ;;  %v4273_v63 = vperm.slane %v12098_v14, 3  ;;  %v4247_v33 = vperm.slane %v12098_v14, 1  ;;  %v15208_v57 = vld [vmem:[#allocation52_spill] sm:$0xff]  ;;  %v4286_v46 = vperm.slane %v12098_v14, 4  ;;  %v14868_v10 = vperm.slane %v12102_v25, 1 }
 0x8fb   :  { %4265 = vperm.xlu2 %8659, %v4260_v9   ;;  %v4325_v61 = vperm.slane %v12098_v14, 7  ;;  %v4390_v7 = vperm.slane %v12102_v25, 4  ;;  %v4364_v49 = vperm.slane %v12102_v25, 2  ;;  %vm15227_vm2 = vcmask 523264  }
 0x8fc   :  { %8382 = vmatmul.msk.f32.gmra.mxu0 %vm15205_vm6, %v15204_v8  ;;  %vm15228_vm12 = vmmov %vm15227_vm2 }
 0x8fd   :  { %vm15229_vm6 = vmmov %vm15227_vm2 }
 0x902   :  { %v12124_v6 = vpop.f32.mrf.mxu0 }
 0x903   :  { %4239 = vperm.xlu2 %8659, %v4234_v45  }
 0x904   :  { %8383 = vmatmul.msk.f32.gmra.mxu0 %vm15207_vm10, %v15206_v43  ;;  %v4299_v43 = vperm.slane %v12098_v14, 5  ;;  %vm15231_vm10 = vmmov %vm15227_vm2 }
 0x90a   :  { %v12130_v8 = vpop.f32.mrf.mxu0 }
 0x90b   :  { %4278 = vperm.xlu2 %8659, %v4273_v63  }
 0x90c   :  { %8384 = vmatmul.msk.f32.gmra.mxu0 %vm15209_vm9, %v15208_v57  ;;  %v209_v57 = vld [vmem:[#allocation2 + $0x10] sm:$0xff] }
 0x90d   :  { %4715 = vmatpush.msrb.mxu1 %v209_v57 }
 0x90e   :  { %4252 = vperm.xlu0 %8657, %v4247_v33  }
 0x912   :  { %v12133_v32 = vpop.f32.mrf.mxu0 }
 0x913   :  { %4258 = vperm.xlu1 %8658, %v4247_v33   ;;  %4291 = vperm.xlu2 %8659, %v4286_v46   ;;  %v208_v33 = vld [vmem:[#allocation2 + $0x8] sm:$0xff] }
 0x914   :  { %4716 = vmatpush.msrb.mxu1 %v208_v33 }
 0x916   :  { %8660 = vset.pattern.permute.xlu0 %v15174_v28 }
 0x91a   :  { %v12137_v15 = vpop.f32.mrf.mxu0 }
 0x91b   :  { %4271 = vperm.xlu1 %8658, %v4260_v9   ;;  %4304 = vperm.xlu2 %8659, %v4299_v43   ;;  %v4312_v9 = vperm.slane %v12098_v14, 6 }
 0x91e   :  { %4297 = vperm.xlu0 %8660, %v4286_v46  }
 0x922   :  { %v12140_v46 = vpop.f32.mrf.mxu0 }
 0x923   :  { %4245 = vperm.xlu1 %8658, %v4234_v45   ;;  %8661 = vset.pattern.permute.xlu2 %v15174_v28 }
 0x926   :  { %8662 = vset.pattern.permute.xlu0 %v15148_v50 }
 0x92a   :  { %v12146_v34 = vpop.f32.mrf.mxu0 }
 0x92b   :  { %4284 = vperm.xlu1 %8658, %v4273_v63   ;;  %4310 = vperm.xlu2 %8661, %v4299_v43  }
 0x92e   :  { %4317 = vperm.xlu0 %8662, %v4312_v9  }
 0x933   :  { %4362 = vperm.xlu1 %8658, %v14868_v10   ;;  %4323 = vperm.xlu2 %8661, %v4312_v9  }
 0x936   :  { %8664 = vset.pattern.permute.xlu0 %v15174_v28 }
 0x93a   :  { %v4177_v45 = vpop.permute.xlu1 %4176 }
 0x93b   :  { %8665 = vset.pattern.permute.xlu1 %v15148_v50  ;;  %8663 = vset.pattern.permute.xlu2 %v15148_v50  ;;  %v4182_v63 = vrot.slane %v4177_v45, 1  ;;  %v4183_v43 = vrot.slane %v4177_v45, 2  ;;  %v4184_v57 = vrot.slane %v4177_v45, 3  ;;  %v4185_v33 = vrot.slane %v4177_v45, 4 }
 0x93c   :  { %v4186_v18 = vrot.slane %v4177_v45, 5  ;;  %v4187_v59 = vrot.slane %v4177_v45, 6  ;;  %v4188_v38 = vrot.slane %v4177_v45, 7  ;;  %v4212_v19 = vmul.f32 %v4177_v45, %v15211_v26 }
 0x93d   :  { %v4213_v9 = vmul.f32 %v4182_v63, %v4002_v13  ;;  %v4214_v10 = vmul.f32 %v4183_v43, %v4003_v55  ;;  %v4215_v11 = vmul.f32 %v4184_v57, %v4004_v0  ;;  %v4216_v35 = vmul.f32 %v4185_v33, %v4005_v29  ;;  %v12166_v63 = vpop.f32.mrf.mxu0 }
 0x93e   :  { %4336 = vperm.xlu0 %8664, %v4325_v61   ;;  %v4217_v54 = vmul.f32 %v4186_v18, %v15210_v37  ;;  %v4218_v13 = vmul.f32 %v4187_v59, %v15212_v30  ;;  %v15213_v29 = vmax.f32 %v11863_v39, 0.0 }
 0x93f   :  { %v4669_v20 = vrot.slane %v4213_v9, 7  ;;  %v4671_v55 = vrot.slane %v4214_v10, 6  ;;  %v4673_v43 = vrot.slane %v4215_v11, 5  ;;  %v4675_v57 = vrot.slane %v4216_v35, 4 }
 0x940   :  { %v4181_v22 = vpop.permute.xlu2 %4180  ;;  %v4219_v0 = vmul.f32 %v4188_v38, %v15213_v29  ;;  %v4677_v59 = vrot.slane %v4217_v54, 3  ;;  %v4679_v39 = vrot.slane %v4218_v13, 2  ;;  %v15214_v11 = vmax.f32 %v11879_v17, 0.0 }
 0x941   :  { %v4670_v62 = vsel %vm1699_vm3, %v4669_v20, %v4212_v19  ;;  %v4189_v18 = vrot.slane %v4181_v22, 1  ;;  %v4190_v5 = vrot.slane %v4181_v22, 2  ;;  %v4191_v26 = vrot.slane %v4181_v22, 3 }
 0x942   :  { %v4672_v60 = vsel %vm1702_vm5, %v4671_v55, %v4670_v62  ;;  %v4192_v37 = vrot.slane %v4181_v22, 4  ;;  %v4193_v10 = vrot.slane %v4181_v22, 5  ;;  %v4194_v38 = vrot.slane %v4181_v22, 6 }
 0x943   :  { %4395 = vperm.xlu1 %8665, %v4390_v7   ;;  %4330 = vperm.xlu2 %8663, %v4325_v61   ;;  %v4674_v45 = vsel %vm1705_vm7, %v4673_v43, %v4672_v60  ;;  %v4221_v35 = vmul.f32 %v4189_v18, %v15214_v11  ;;  %v4681_v33 = vrot.slane %v4219_v0, 1  ;;  %v15215_v9 = vmax.f32 %v11893_v58, 0.0 }
 0x944   :  { %v4676_v19 = vsel %vm1708_vm15, %v4675_v57, %v4674_v45  ;;  %v15216_v54 = vmax.f32 %v11890_v42, 0.0  ;;  %v4195_v29 = vrot.slane %v4181_v22, 7  ;;  %v15217_v61 = vmax.f32 %v11887_v2, 0.0 }
 0x945   :  { %v4222_v30 = vmul.f32 %v4190_v5, %v15215_v9  ;;  %v4678_v55 = vsel %vm14902_vm0, %v4677_v59, %v4676_v19  ;;  %v15218_v13 = vmax.f32 %v11896_v12, 0.0  ;;  %v15219_v0 = vmax.f32 %v11900_v48, 0.0  ;;  %v12194_v60 = vpop.f32.mrf.mxu0 }
 0x946   :  { %v4223_v20 = vmul.f32 %v4191_v26, %v15216_v54  ;;  %v4220_v43 = vmul.f32 %v4181_v22, %v15217_v61  ;;  %4375 = vperm.xlu0 %8664, %v4364_v49   ;;  %v4680_v17 = vsel %vm14901_vm1, %v4679_v39, %v4678_v55  ;;  %v4683_v58 = vrot.slane %v4221_v35, 7 }
 0x947   :  { %v4224_v62 = vmul.f32 %v4192_v37, %v15218_v13  ;;  %v4225_v57 = vmul.f32 %v4193_v10, %v15219_v0  ;;  %v4685_v18 = vrot.slane %v4222_v30, 6  ;;  %v4682_v42 = vsel %vm14900_vm4, %v4681_v33, %v4680_v17 }
 0x948   :  { %v15220_v5 = vmax.f32 %v11913_v31, 0.0  ;;  %8351 = vmatmul.msk.f32.vlgmr.msrb.gmra.mxu1 %vm15221_vm11, %v4682_v42  ;;  %v4684_v2 = vsel %vm1699_vm3, %v4683_v58, %v4220_v43  ;;  %v4687_v12 = vrot.slane %v4223_v20, 5  ;;  %v15222_v22 = vmax.f32 %v11929_v3, 0.0  ;;  %vm15233_vm11 = vmmov %vm15227_vm2 }
 0x949   :  { %v4686_v48 = vsel %vm1702_vm5, %v4685_v18, %v4684_v2  ;;  %v4689_v37 = vrot.slane %v4224_v62, 4  ;;  %v4691_v45 = vrot.slane %v4225_v57, 3  ;;  %v15223_v31 = vperm.slane %v12102_v25, 1 }
 0x94a   :  { %v4226_v26 = vmul.f32 %v4194_v38, %v15220_v5  ;;  %v4227_v59 = vmul.f32 %v4195_v29, %v15222_v22  ;;  %v4688_v10 = vsel %vm1705_vm7, %v4687_v12, %v4686_v48  ;;  %v4338_v11 = vperm.slane %v12102_v25, 0 }
 0x94b   :  { %8668 = vset.pattern.permute.xlu1 %v15174_v28  ;;  %4356 = vperm.xlu2 %8663, %v15223_v31   ;;  %v4690_v39 = vsel %vm1708_vm15, %v4689_v37, %v4688_v10  ;;  %v4403_v30 = vperm.slane %v12102_v25, 5  ;;  %v4377_v54 = vperm.slane %v12102_v25, 3  ;;  %v4416_v55 = vperm.slane %v12102_v25, 6 }
 0x94c   :  { %v4693_v38 = vrot.slane %v4226_v26, 2  ;;  %v4692_v35 = vsel %vm14902_vm0, %v4691_v45, %v4690_v39  ;;  %v4695_v19 = vrot.slane %v4227_v59, 1  ;;  %v4429_v0 = vperm.slane %v12102_v25, 7 }
 0x94d   :  { %v12210_v9 = vpop.f32.mrf.mxu0 }
 0x94e   :  { %v4694_v3 = vsel %vm14901_vm1, %v4693_v38, %v4692_v35  ;;  %4349 = vperm.xlu0 %8664, %v4338_v11   ;;  %vm15253_vm1 = vcmask 523264  }
 0x94f   :  { %v4696_v33 = vsel %vm14900_vm4, %v4695_v19, %v4694_v3 }
 0x950   :  { %8352 = vmatmul.msk.f32.gmra.mxu1 %vm15224_vm8, %v4696_v33 }
 0x953   :  { %4414 = vperm.xlu1 %8668, %v4403_v30   ;;  %4369 = vperm.xlu2 %8663, %v4364_v49  }
 0x955   :  { %v12215_v20 = vpop.f32.mrf.mxu0  ;;  %v4266_v29 = vpop.permute.xlu2 %4265 }
 0x956   :  { %4388 = vperm.xlu0 %8664, %v4377_v54   ;;  %v12253_v37 = vmul.f32 %v12104_v21, %v4266_v29 }
 0x958   :  { %v4909_v21 = vsel %vm15227_vm2, %v12253_v37, 0.0 }
 0x95b   :  { %4427 = vperm.xlu1 %8668, %v4416_v55   ;;  %4343 = vperm.xlu2 %8663, %v4338_v11  }
 0x95d   :  { %v12219_v61 = vpop.f32.mrf.mxu0  ;;  %v4240_v43 = vpop.permute.xlu2 %4239 }
 0x95e   :  { %8667 = vset.pattern.permute.xlu0 %v15148_v50  ;;  %v12256_v10 = vmul.f32 %v12058_v23, %v4240_v43 }
 0x960   :  { %v4891_v23 = vsel %vm15228_vm12, %v12256_v10, 0.0  ;;  %vm15236_vm12 = vmmov %vm15229_vm6 }
 0x963   :  { %4382 = vperm.xlu2 %8663, %v4377_v54  }
 0x965   :  { %v12221_v13 = vpop.f32.mrf.mxu0  ;;  %v4279_v49 = vpop.permute.xlu2 %4278 }
 0x966   :  { %4408 = vperm.xlu0 %8667, %v4403_v30   ;;  %v12259_v45 = vmul.f32 %v12118_v44, %v4279_v49 }
 0x968   :  { %15225 = vst [vmem:[#allocation14_spill] sm:$0xff] %v12259_v45  ;;  %v12276_v19 = vsel %vm15229_vm6, %v12259_v45, 0.0 }
 0x96b   :  { %8666 = vset.pattern.permute.xlu2 %v15174_v28 }
 0x96d   :  { %v12225_v62 = vpop.f32.mrf.mxu0  ;;  %v4887_v17 = vpop.xlane.xlu0 %4886 }
 0x96e   :  { %8670 = vset.pattern.permute.xlu0 %v15174_v28  ;;  %v12230_v57 = vmax.f32 %v4887_v17, 1.0  ;;  %v4292_v58 = vpop.permute.xlu2 %4291  ;;  %v4890_v5 = vpop.xlane.xlu1 %4889 }
 0x96f   :  { %v12263_v39 = vmul.f32 %v12130_v8, %v4292_v58 }
 0x970   :  { %v12236_v42 = vrot.slane %v12230_v57, 1  ;;  %v12247_v59 = vrot.slane %v12230_v57, 2  ;;  %v12266_v35 = vrot.slane %v12230_v57, 4  ;;  %vm5074_vm4 = vweird.f32 %v12230_v57 }
 0x971   :  { %15226 = vst [vmem:[#allocation13_spill] sm:$0xff] %v12263_v39  ;;  %v12289_v29 = vsel %vm15231_vm10, %v12263_v39, 0.0  ;;  %vm15238_vm10 = vmmov %vm15229_vm6 }
 0x972   :  { %8939 = vrcp.f32 %v12236_v42  ;;  %v5093_v33 = vand.u32 2147483647, %v12236_v42  ;;  %v5095_v30 = vand.u32 2147483648, %v12236_v42  ;;  %vm5089_vm9 = vweird.f32 %v12236_v42 }
 0x973   :  { %4401 = vperm.xlu2 %8666, %v4390_v7   ;;  %v12240_v7 = vrot.slane %v12230_v57, 5 }
 0x974   :  { %vm12313_vm2 = vcmp.eq.f32.partialorder %v5093_v33, 8.507059e+37 }
 0x975   :  { %v12232_v18 = vpop.f32.mrf.mxu0  ;;  %8941 = vrcp.f32 %v12240_v7  ;;  %v5155_v17 = vand.u32 2147483648, %v12240_v7 }
 0x976   :  { %4440 = vperm.xlu0 %8670, %v4429_v0   ;;  %v4305_v26 = vpop.permute.xlu2 %4304  ;;  %8943 = vrcp.f32 %v12247_v59 }
 0x977   :  { %v12279_v8 = vmul.f32 %v12137_v15, %v4305_v26  ;;  %8945 = vrcp.f32 %v12230_v57  ;;  %v12329_v47 = vor.u32 1.1754944e-38, %v5155_v17 }
 0x978   :  { %v12244_v12 = vpop.eup %8939  ;;  %8947 = vrcp.f32 %v12266_v35 }
 0x979   :  { %v5085_v48 = vmul.f32 %v12244_v12, %v12236_v42  ;;  %15230 = vst [vmem:[#allocation12_spill] sm:$0xff] %v12279_v8  ;;  %v4936_v26 = vsel %vm15233_vm11, %v12279_v8, 0.0  ;;  %vm5090_vm8 = vweird.f32 %v12244_v12 }
 0x97a   :  { %vm12354_vm11 = vmor %vm5089_vm9, %vm5090_vm8 }
 0x97b   :  { %8669 = vset.pattern.permute.xlu2 %v15148_v50  ;;  %v5086_v38 = vsub.f32 1.0, %v5085_v48  ;;  %v12272_v3 = vpop.eup %8941  ;;  %v5096_v48 = vor.u32 1.1754944e-38, %v5095_v30  ;;  %v5108_v30 = vand.u32 2147483647, %v12247_v59  ;;  %vm15243_vm9 = vmmov %vm15229_vm6 }
 0x97c   :  { %v12295_v49 = vpop.eup %8943  ;;  %vm15244_vm8 = vmmov %vm15229_vm6 }
 0x97d   :  { %v12242_v2 = vpop.f32.mrf.mxu0  ;;  %v5087_v15 = vmul.f32 %v12244_v12, %v5086_v38  ;;  %v5100_v53 = vmul.f32 %v12295_v49, %v12247_v59  ;;  %v12334_v27 = vpop.eup %8945  ;;  %vm12424_vm13 = vcmp.eq.f32.partialorder %v5108_v30, 8.507059e+37 }
 0x97e   :  { %v5070_v42 = vmul.f32 %v12334_v27, %v12230_v57 }
 0x97f   :  { %v5088_v33 = vadd.f32 %v12244_v12, %v5087_v15  ;;  %v12343_v15 = vpop.eup %8947 }
 0x980   :  { %v4253_v31 = vpop.permute.xlu0 %4252 }
 0x981   :  { %v12302_v58 = vmul.f32 %v12077_v36, %v4253_v31  ;;  %v12318_v31 = vrot.slane %v12230_v57, 3 }
 0x983   :  { %4421 = vperm.xlu2 %8669, %v4416_v55   ;;  %v12285_v55 = vmax.f32 %v4890_v5, 1.0  ;;  %v4900_v56 = vsel %vm15229_vm6, %v12302_v58, 0.0  ;;  %8949 = vrcp.f32 %v12318_v31  ;;  %vm5119_vm0 = vweird.f32 %v12318_v31 }
 0x985   :  { %v4259_v22 = vpop.permute.xlu1 %4258  ;;  %v4311_v11 = vpop.permute.xlu2 %4310 }
 0x986   :  { %v12283_v54 = vpop.f32.mrf.mxu0  ;;  %v12292_v43 = vmul.f32 %v12082_v4, %v4259_v22  ;;  %v5145_v4 = vmul.f32 %v12272_v3, %v12240_v7 }
 0x988   :  { %15232 = vst [vmem:[#allocation11_spill] sm:$0xff] %v12292_v43  ;;  %v4901_v38 = vsel %vm15236_vm12, %v12292_v43, 0.0  ;;  %v5146_v24 = vsub.f32 1.0, %v5145_v4  ;;  %vm5149_vm12 = vweird.f32 %v12240_v7 }
 0x989   :  { %v4902_v17 = vadd.f32 %v4901_v38, %v4900_v56  ;;  %v5101_v56 = vsub.f32 1.0, %v5100_v53  ;;  %v5130_v53 = vmul.f32 %v12343_v15, %v12266_v35 }
 0x98a   :  { %v5147_v50 = vmul.f32 %v12272_v3, %v5146_v24 }
 0x98b   :  { %4434 = vperm.xlu2 %8669, %v4429_v0   ;;  %v5110_v0 = vand.u32 2147483648, %v12247_v59  ;;  %v4903_v4 = vrot.slane %v4902_v17, 4  ;;  %v5102_v24 = vmul.f32 %v12295_v49, %v5101_v56 }
 0x98c   :  { %v5148_v22 = vadd.f32 %v12272_v3, %v5147_v50 }
 0x98d   :  { %v4272_v44 = vpop.permute.xlu1 %4271  ;;  %v12332_v1 = vor.u32 1.1754944e-38, %v5110_v0  ;;  %v4324_v40 = vpop.permute.xlu2 %4323  ;;  %v4904_v56 = vadd.f32 %v4903_v4, %v4902_v17  ;;  %v5103_v50 = vadd.f32 %v12295_v49, %v5102_v24 }
 0x98e   :  { %v12308_v5 = vmul.f32 %v12113_v41, %v4272_v44  ;;  %v5153_v41 = vand.u32 2147483647, %v12240_v7  ;;  %v12324_v44 = vmul.f32 %v12140_v46, %v4311_v11  ;;  %v12370_v28 = vpop.f32.mrf.mxu0 }
 0x98f   :  { %v4905_v4 = vrot.slane %v4904_v56, 2 }
 0x990   :  { %v4298_v36 = vpop.permute.xlu0 %4297  ;;  %15237 = vst [vmem:[#allocation15_spill] sm:$0xff] %v12324_v44  ;;  %v4910_v46 = vsel %vm15238_vm10, %v12308_v5, 0.0  ;;  %vm5150_vm10 = vweird.f32 %v12272_v3 }
 0x991   :  { %v12341_v11 = vmul.f32 %v12133_v32, %v4298_v36  ;;  %v4937_v32 = vsel %vm15229_vm6, %v12324_v44, 0.0  ;;  %v5140_v36 = vand.u32 2147483648, %v12266_v35  ;;  %v4911_v38 = vadd.f32 %v4910_v46, %v4909_v21  ;;  %vm12420_vm14 = vmor %vm5149_vm12, %vm5150_vm10 }
 0x992   :  { %v5078_v21 = vand.u32 2147483647, %v12230_v57  ;;  %vm5105_vm6 = vweird.f32 %v12295_v49  ;;  %v5152_v7 = vsel %vm12420_vm14, %v12272_v3, %v5148_v22  ;;  %vm5134_vm12 = vweird.f32 %v12266_v35  ;;  %vm15255_vm14 = vmmov %vm15253_vm1 }
 0x993   :  { %15239 = vst [vmem:[#allocation16_spill] sm:$0xff] %v12341_v11  ;;  %v4928_v16 = vsel %vm15244_vm8, %v12341_v11, 0.0  ;;  %vm5135_vm8 = vweird.f32 %v12343_v15 }
 0x994   :  { %vm12459_vm10 = vcmp.eq.f32.partialorder %v5078_v21, 8.507059e+37 }
 0x995   :  { %v4246_v51 = vpop.permute.xlu1 %4245 }
 0x996   :  { %v12347_v25 = vmul.f32 %v12062_v52, %v4246_v51  ;;  %v5080_v51 = vand.u32 2147483648, %v12230_v57  ;;  %v5092_v52 = vsel %vm12354_vm11, %v12244_v12, %v5088_v33  ;;  %v4938_v12 = vadd.f32 %v4937_v32, %v4936_v26 }
 0x997   :  { %v12379_v33 = vrot.slane %v12230_v57, 6  ;;  %v12383_v46 = vsel %vm12313_vm2, %v5096_v48, %v5092_v52  ;;  %vm5104_vm11 = vweird.f32 %v12247_v59  ;;  %v4912_v26 = vrot.slane %v4911_v38, 4 }
 0x998   :  { %15240 = vst [vmem:[#allocation17_spill] sm:$0xff] %v12347_v25  ;;  %v4892_v0 = vsel %vm15243_vm9, %v12347_v25, 0.0  ;;  %v4929_v32 = vadd.f32 %v4928_v16, %v12289_v29  ;;  %v5131_v48 = vsub.f32 1.0, %v5130_v53  ;;  %v5071_v52 = vsub.f32 1.0, %v5070_v42 }
 0x999   :  { %v4893_v14 = vadd.f32 %v4892_v0, %v4891_v23  ;;  %v12389_v23 = vpop.eup %8949  ;;  %v12391_v0 = vor.u32 1.1754944e-38, %v5140_v36  ;;  %v12395_v44 = vor.u32 1.1754944e-38, %v5080_v51  ;;  %v4939_v11 = vrot.slane %v4938_v12, 4 }
 0x99a   :  { %vm5075_vm2 = vweird.f32 %v12334_v27  ;;  %8951 = vrcp.f32 %v12379_v33  ;;  %vm12404_vm9 = vcmp.eq.f32.partialorder %v5153_v41, 8.507059e+37  ;;  %v12410_v29 = vmul.f32 %v12166_v63, %v4324_v40 }
 0x99b   :  { %v4894_v8 = vrot.slane %v4893_v14, 4  ;;  %v5115_v17 = vmul.f32 %v12389_v23, %v12318_v31  ;;  %v4913_v40 = vadd.f32 %v4912_v26, %v4911_v38  ;;  %v4930_v63 = vrot.slane %v4929_v32, 4  ;;  %v12444_v26 = vpop.f32.mrf.mxu0 }
 0x99c   :  { %15248 = vst [vmem:[#allocation19_spill] sm:$0xff] %v12410_v29  ;;  %v5072_v30 = vmul.f32 %v12334_v27, %v5071_v52  ;;  %v12438_v38 = vrot.slane %v12230_v57, 7  ;;  %v4940_v24 = vadd.f32 %v4939_v11, %v4938_v12  ;;  %v4946_v3 = vsel %vm15255_vm14, %v12410_v29, 0.0 }
 0x99d   :  { %v4285_v39 = vpop.permute.xlu1 %4284  ;;  %v12401_v25 = vpop.permute.xlu2 %4330  ;;  %v4895_v36 = vadd.f32 %v4894_v8, %v4893_v14  ;;  %v5132_v14 = vmul.f32 %v12343_v15, %v5131_v48  ;;  %v5116_v22 = vsub.f32 1.0, %v5115_v17  ;;  %v5125_v52 = vand.u32 2147483648, %v12318_v31 }
 0x99e   :  { %v12399_v45 = vmul.f32 %v12124_v6, %v4285_v39  ;;  %v5123_v6 = vand.u32 2147483647, %v12318_v31  ;;  %v4931_v12 = vadd.f32 %v4930_v63, %v4929_v32  ;;  %8953 = vrcp.f32 %v12438_v38 }
 0x99f   :  { %v4896_v17 = vrot.slane %v4895_v36, 2  ;;  %v4941_v32 = vrot.slane %v4940_v24, 2  ;;  %v12471_v21 = vadd.f32 %v12343_v15, %v5132_v14  ;;  %v5073_v63 = vadd.f32 %v12334_v27, %v5072_v30 }
 0x9a0   :  { %15245 = vst [vmem:[#allocation18_spill] sm:$0xff] %v12399_v45  ;;  %v4919_v51 = vsel %vm15253_vm1, %v12399_v45, 0.0  ;;  %v4318_v42 = vpop.permute.xlu0 %4317  ;;  %vm12455_vm1 = vmor %vm5104_vm11, %vm5105_vm6  ;;  %v4906_v45 = vadd.f32 %v4905_v4, %v4904_v56  ;;  %v5117_v43 = vmul.f32 %v12389_v23, %v5116_v22  ;;  %v4932_v56 = vrot.slane %v4931_v12, 2 }
 0x9a1   :  { %v4920_v53 = vadd.f32 %v4919_v51, %v12276_v19  ;;  %v12442_v8 = vmul.f32 %v12146_v34, %v4318_v42  ;;  %v12449_v19 = vpop.eup %8951  ;;  %v4914_v34 = vrot.slane %v4913_v40, 2  ;;  %v5107_v42 = vsel %vm12455_vm1, %v12295_v49, %v5103_v50  ;;  %vm12489_vm11 = vmor %vm5074_vm4, %vm5075_vm2 }
 0x9a2   :  { %v5160_v11 = vmul.f32 %v12449_v19, %v12379_v33  ;;  %v12480_v50 = vsel %vm12404_vm9, %v12329_v47, %v5152_v7  ;;  %v4897_v4 = vadd.f32 %v4896_v17, %v4895_v36  ;;  %v5112_v30 = vsel %vm12424_vm13, %v12332_v1, %v5107_v42  ;;  %vm12502_vm13 = vmor %vm5134_vm12, %vm5135_vm8 }
 0x9a3   :  { %15254 = vst [vmem:[#allocation20_spill] sm:$0xff] %v12442_v8  ;;  %v4921_v39 = vrot.slane %v4920_v53, 4  ;;  %v4945_v51 = vsel %vm15255_vm14, %v12442_v8, 0.0  ;;  %vm5120_vm6 = vweird.f32 %v12389_v23  ;;  %vm12494_vm9 = vcmp.eq.f32.partialorder %v5123_v6, 8.507059e+37  ;;  %v12519_v42 = vpop.f32.mrf.mxu0 }
 0x9a4   :  { %v4947_v29 = vadd.f32 %v4946_v3, %v4945_v51  ;;  %v4907_v36 = vrot.slane %v4906_v45, 1  ;;  %v4942_v7 = vadd.f32 %v4941_v32, %v4940_v24  ;;  %v5077_v57 = vsel %vm12489_vm11, %v12334_v27, %v5073_v63  ;;  %v12509_v41 = vpop.eup %8953  ;;  %vm12536_vm8 = vmor %vm5119_vm0, %vm5120_vm6 }
 0x9a5   :  { %v4922_v59 = vadd.f32 %v4921_v39, %v4920_v53  ;;  %v4915_v53 = vadd.f32 %v4914_v34, %v4913_v40  ;;  %v4357_v3 = vpop.permute.xlu2 %4356  ;;  %v5126_v6 = vor.u32 1.1754944e-38, %v5125_v52  ;;  %v5118_v24 = vadd.f32 %v12389_v23, %v5117_v43  ;;  %v4363_v63 = vpop.permute.xlu1 %4362  ;;  %vm15271_vm0 = vmmov %vm15255_vm14 }
 0x9a6   :  { %v4948_v49 = vrot.slane %v4947_v29, 4  ;;  %v12517_v22 = vrot.slane %v12285_v55, 1  ;;  %v4933_v34 = vadd.f32 %v4932_v56, %v4931_v12  ;;  %v4898_v17 = vrot.slane %v4897_v4, 1  ;;  %vm15272_vm1 = vmmov %vm15271_vm0 }
 0x9a7   :  { %v4923_v8 = vrot.slane %v4922_v59, 2  ;;  %v4916_v39 = vrot.slane %v4915_v53, 1  ;;  %v15266_v27 = vand.u32 2147483647, %v12266_v35  ;;  %v5082_v43 = vsel %vm12459_vm10, %v12395_v44, %v5077_v57  ;;  %vm15273_vm10 = vmmov %vm15271_vm0 }
 0x9a8   :  { %v4949_v40 = vadd.f32 %v4948_v49, %v4947_v29  ;;  %v5137_v29 = vsel %vm12502_vm13, %v12343_v15, %v12471_v21  ;;  %vm5164_vm2 = vweird.f32 %v12379_v33  ;;  %v5168_v15 = vand.u32 2147483647, %v12379_v33  ;;  %vm15274_vm14 = vmmov %vm15271_vm0 }
 0x9a9   :  { %v4924_v16 = vadd.f32 %v4923_v8, %v4922_v59  ;;  %v5161_v8 = vsub.f32 1.0, %v5160_v11  ;;  %vm12523_vm4 = vcmp.eq.f32.partialorder %v15266_v27, 8.507059e+37  ;;  %v4908_v12 = vadd.f32 %v4907_v36, %v4906_v45 }
 0x9aa   :  { %v4950_v59 = vrot.slane %v4949_v40, 2  ;;  %v4943_v32 = vrot.slane %v4942_v7, 1  ;;  %v5170_v21 = vand.u32 2147483648, %v12379_v33  ;;  %v5175_v44 = vmul.f32 %v12509_v41, %v12438_v38 }
 0x9ab   :  { %v4925_v51 = vrot.slane %v4924_v16, 1  ;;  %v5122_v48 = vsel %vm12536_vm8, %v12389_v23, %v5118_v24  ;;  %v12548_v45 = vmul.f32 %v12194_v60, %v12401_v25  ;;  %v5162_v31 = vmul.f32 %v12449_v19, %v5161_v8 }
 0x9ac   :  { %8955 = vrcp.f32 %v12517_v22  ;;  %v4917_v11 = vadd.f32 %v4916_v39, %v4915_v53  ;;  %v4934_v49 = vrot.slane %v4933_v34, 1  ;;  %v4899_v56 = vadd.f32 %v4898_v17, %v4897_v4 }
 0x9ad   :  { %v4926_v14 = vadd.f32 %v4925_v51, %v4924_v16  ;;  %v4951_v1 = vadd.f32 %v4950_v59, %v4949_v40  ;;  %v12553_v57 = vmul.f32 %v12225_v62, %v4363_v63  ;;  %v12556_v27 = vmul.f32 %v12221_v13, %v4357_v3  ;;  %v12564_v24 = vpop.permute.xlu2 %4369  ;;  %v12588_v59 = vpop.f32.mrf.mxu0 }
 0x9ae   :  { %v5098_v25 = vmul.f32 %v12383_v46, %v4908_v12  ;;  %v4944_v60 = vadd.f32 %v4943_v32, %v4942_v7  ;;  %v5127_v53 = vsel %vm12494_vm9, %v5126_v6, %v5122_v48  ;;  %v5176_v4 = vsub.f32 1.0, %v5175_v44 }
 0x9af   :  { %v4954_v16 = vsel %vm15271_vm0, %v12548_v45, 0.0  ;;  %v5163_v62 = vadd.f32 %v12449_v19, %v5162_v31  ;;  %vm5165_vm12 = vweird.f32 %v12449_v19  ;;  %v5113_v13 = vmul.f32 %v5112_v30, %v4917_v11 }
 0x9b0   :  { %v4337_v36 = vpop.permute.xlu0 %4336  ;;  %v5083_v3 = vmul.f32 %v5082_v43, %v4899_v56  ;;  %v5128_v46 = vmul.f32 %v5127_v53, %v4926_v14  ;;  %v4935_v47 = vadd.f32 %v4934_v49, %v4933_v34  ;;  %v4952_v6 = vrot.slane %v4951_v1, 1  ;;  %vm12583_vm11 = vmor %vm5164_vm2, %vm5165_vm12 }
 0x9b1   :  { %v12559_v23 = vmul.f32 %v12210_v9, %v4337_v36  ;;  %v4973_v8 = vsel %vm15273_vm10, %v12553_v57, 0.0  ;;  %v4972_v39 = vsel %vm15274_vm14, %v12556_v27, 0.0  ;;  %v5325_v17 = vrot.slane %v5098_v25, 7 }
 0x9b2   :  { %v12572_v7 = vpop.eup %8955  ;;  %v5142_v51 = vsel %vm12523_vm4, %v12391_v0, %v5137_v29  ;;  %v5177_v34 = vmul.f32 %v12509_v41, %v5176_v4  ;;  %v5158_v12 = vmul.f32 %v12480_v50, %v4944_v60  ;;  %v5167_v32 = vsel %vm12583_vm11, %v12449_v19, %v5163_v62 }
 0x9b3   :  { %v4955_v9 = vsel %vm15272_vm1, %v12559_v23, 0.0  ;;  %vm12594_vm6 = vcmp.eq.f32.partialorder %v5168_v15, 8.507059e+37  ;;  %v5171_v33 = vor.u32 1.1754944e-38, %v5170_v21  ;;  %v5326_v0 = vsel %vm1699_vm3, %v5325_v17, %v5083_v3 }
 0x9b4   :  { %v4956_v40 = vadd.f32 %v4955_v9, %v4954_v16  ;;  %v5329_v29 = vrot.slane %v5128_v46, 5  ;;  %v4974_v35 = vadd.f32 %v4973_v8, %v4972_v39  ;;  %v5327_v48 = vrot.slane %v5113_v13, 6 }
 0x9b5   :  { %v5143_v31 = vmul.f32 %v5142_v51, %v4935_v47  ;;  %v4953_v11 = vadd.f32 %v4952_v6, %v4951_v1  ;;  %v5205_v50 = vmul.f32 %v12572_v7, %v12517_v22  ;;  %v5178_v49 = vadd.f32 %v12509_v41, %v5177_v34  ;;  %v12613_v53 = vpop.permute.xlu2 %4343  ;;  %v12620_v6 = vpop.f32.mrf.mxu0  ;;  %v8804_v34 = vld [vmem:[#allocation2 + $0x2d] ss:$0 sm:$0xff] }
 0x9b6   :  { %v4957_v43 = vrot.slane %v4956_v40, 4  ;;  %vm5180_vm9 = vweird.f32 %v12509_v41  ;;  %v12604_v15 = vrot.slane %v12285_v55, 2  ;;  %v5328_v21 = vsel %vm1702_vm5, %v5327_v48, %v5326_v0 }
 0x9b7   :  { %vm5179_vm13 = vweird.f32 %v12438_v38  ;;  %v5183_v56 = vand.u32 2147483647, %v12438_v38  ;;  %v5185_v14 = vand.u32 2147483648, %v12438_v38  ;;  %v5330_v36 = vsel %vm1705_vm7, %v5329_v29, %v5328_v21 }
 0x9b8   :  { %v4958_v63 = vadd.f32 %v4957_v43, %v4956_v40  ;;  %v4376_v44 = vpop.permute.xlu0 %4375  ;;  %v5172_v1 = vsel %vm12594_vm6, %v5171_v33, %v5167_v32  ;;  %v4975_v25 = vrot.slane %v4974_v35, 4  ;;  %v5331_v4 = vrot.slane %v5143_v31, 4  ;;  %vm5181_vm4 = vmor %vm5179_vm13, %vm5180_vm9 }
 0x9b9   :  { %v5173_v16 = vmul.f32 %v5172_v1, %v4953_v11  ;;  %v5206_v62 = vsub.f32 1.0, %v5205_v50  ;;  %v5182_v9 = vsel %vm5181_vm4, %v12509_v41, %v5178_v49  ;;  %8957 = vrcp.f32 %v12604_v15  ;;  %v4396_v50 = vpop.permute.xlu1 %4395 }
 0x9ba   :  { %v4959_v19 = vrot.slane %v4958_v63, 2  ;;  %v5332_v38 = vsel %vm1708_vm15, %v5331_v4, %v5330_v36  ;;  %v5186_v3 = vor.u32 1.1754944e-38, %v5185_v14  ;;  %v5333_v46 = vrot.slane %v5158_v12, 3  ;;  %v15284_v14 = vld [vmem:[#allocation73_spill] sm:$0xff] }
 0x9bb   :  { %v4976_v40 = vadd.f32 %v4975_v25, %v4974_v35  ;;  %vm5184_vm2 = vcmp.eq.f32.partialorder %v5183_v56, 8.507059e+37  ;;  %v5335_v8 = vrot.slane %v5173_v16, 2  ;;  %v5207_v39 = vmul.f32 %v12572_v7, %v5206_v62 }
 0x9bc   :  { %v4960_v60 = vadd.f32 %v4959_v19, %v4958_v63  ;;  %v5187_v17 = vsel %vm5184_vm2, %v5186_v3, %v5182_v9  ;;  %vm15279_vm8 = vcmask 1045509   ;;  %8959 = vrcp.f32 %v12285_v55 }
 0x9bd   :  { %v5334_v51 = vsel %vm15279_vm8, %v5333_v46, %v5332_v38  ;;  %v4977_v32 = vrot.slane %v4976_v40, 2  ;;  %v12628_v12 = vrot.slane %v12285_v55, 3  ;;  %vm15280_vm0 = vcmask 1046534   ;;  %v4383_v48 = vpop.permute.xlu2 %4382  ;;  %v12669_v62 = vpop.f32.mrf.mxu0 }
 0x9be   :  { %v4961_v13 = vrot.slane %v4960_v60, 1  ;;  %v5336_v33 = vsel %vm15280_vm0, %v5335_v8, %v5334_v51  ;;  %v5208_v0 = vadd.f32 %v12572_v7, %v5207_v39  ;;  %vm5210_vm12 = vweird.f32 %v12572_v7 }
 0x9bf   :  { %v12624_v43 = vpop.eup %8957  ;;  %v5215_v35 = vand.u32 2147483648, %v12517_v22  ;;  %vm15281_vm1 = vcmask 1047559   ;;  %vm5209_vm10 = vweird.f32 %v12517_v22  ;;  %v5213_v11 = vand.u32 2147483647, %v12517_v22 }
 0x9c0   :  { %v4962_v47 = vadd.f32 %v4961_v13, %v4960_v60  ;;  %v4350_v41 = vpop.permute.xlu0 %4349  ;;  %v5220_v49 = vmul.f32 %v12624_v43, %v12604_v15  ;;  %v12644_v19 = vmul.f32 %v12242_v2, %v4376_v44  ;;  %vm12646_vm14 = vmor %vm5209_vm10, %vm5210_vm12  ;;  %v4978_v56 = vadd.f32 %v4977_v32, %v4976_v40  ;;  %v15290_v32 = vld [vmem:[#allocation75_spill] sm:$0xff] }
 0x9c1   :  { %8961 = vrcp.f32 %v12628_v12  ;;  %v15285_v22 = vunpack.i.h.bf16 %v15284_v14  ;;  %v15286_v1 = vunpack.i.l.bf16 %v15284_v14  ;;  %v5212_v2 = vsel %vm12646_vm14, %v12572_v7, %v5208_v0 }
 0x9c2   :  { %v5188_v30 = vmul.f32 %v5187_v17, %v4962_v47  ;;  %v12664_v44 = vmul.f32 %v12232_v18, %v12564_v24  ;;  %v5230_v60 = vand.u32 2147483648, %v12604_v15  ;;  %v12667_v4 = vpop.eup %8959  ;;  %v5216_v16 = vor.u32 1.1754944e-38, %v5215_v35 }
 0x9c3   :  { %vm5214_vm11 = vcmp.eq.f32.partialorder %v5213_v11, 8.507059e+37  ;;  %v5221_v13 = vsub.f32 1.0, %v5220_v49  ;;  %vm15287_vm6 = vcmask 523264   ;;  %v4979_v46 = vrot.slane %v4978_v56, 1 }
 0x9c4   :  { %v5337_v52 = vrot.slane %v5188_v30, 1  ;;  %v4982_v38 = vsel %vm15287_vm6, %v12644_v19, 0.0  ;;  %v5217_v3 = vsel %vm5214_vm11, %v5216_v16, %v5212_v2  ;;  %v5228_v18 = vand.u32 2147483647, %v12604_v15  ;;  %vm15288_vm9 = vmmov %vm15287_vm6 }
 0x9c5   :  { %v4718_v29 = vpop.f32.mrf.mxu1  ;;  %v12677_v24 = vmul.f32 %v12219_v61, %v4350_v41  ;;  %vm5224_vm13 = vweird.f32 %v12604_v15  ;;  %v12683_v47 = vor.u32 1.1754944e-38, %v5230_v60  ;;  %v5198_v8 = vand.u32 2147483647, %v12285_v55  ;;  %v4415_v35 = vpop.permute.xlu1 %4414  ;;  %vm15292_vm2 = vmmov %vm15287_vm6 }
 0x9c6   :  { %v12635_v63 = vsel %vm15281_vm1, %v5337_v52, %v5336_v33  ;;  %v12637_v31 = vadd.f32 %v8804_v34, %v4718_v29  ;;  %v12693_v17 = vmul.f32 %v12215_v20, %v12613_v53  ;;  %v15291_v52 = vunpack.i.l.bf16 %v15290_v32  ;;  %vm15295_vm0 = vmmov %vm15292_vm2 }
 0x9c7   :  { %v5357_v36 = vmul.f32 %v15285_v22, %v12635_v63  ;;  %v5355_v25 = vmul.f32 %v15286_v1, %v12635_v63  ;;  %v12689_v61 = vpop.eup %8961  ;;  %v5222_v0 = vmul.f32 %v12624_v43, %v5221_v13  ;;  %v5200_v29 = vand.u32 2147483648, %v12285_v55  ;;  %vm15296_vm1 = vmmov %vm15295_vm0 }
 0x9c8   :  { %5467 = vrot.lane.b32.xlu1 %v12637_v31, %s9145_s0  ;;  %v4389_v40 = vpop.permute.xlu0 %4388  ;;  %v5359_v33 = vmul.f32 %v15291_v52, %v12635_v63  ;;  %v12706_v49 = vrot.slane %v12285_v55, 4  ;;  %v4980_v20 = vadd.f32 %v4979_v46, %v4978_v56  ;;  %vm5225_vm4 = vweird.f32 %v12624_v43  ;;  %vm15297_vm10 = vmmov %vm15295_vm0 }
 0x9c9   :  { %v5389_v9 = vadd.f32 %v5357_v36, %v12302_v58  ;;  %v5387_v7 = vadd.f32 %v5355_v25, %v12256_v10  ;;  %v4981_v58 = vsel %vm15288_vm9, %v12664_v44, 0.0  ;;  %v5190_v10 = vmul.f32 %v12667_v4, %v12285_v55  ;;  %vm15298_vm14 = vmmov %vm15295_vm0 }
 0x9ca   :  { %v4983_v51 = vadd.f32 %v4982_v38, %v4981_v58  ;;  %v12703_v11 = vmul.f32 %v12370_v28, %v4389_v40  ;;  %v4964_v53 = vsel %vm15292_vm2, %v12677_v24, 0.0  ;;  %vm12716_vm8 = vcmp.eq.f32.partialorder %v5228_v18, 8.507059e+37  ;;  %vm15299_vm11 = vmmov %vm15295_vm0 }
 0x9cb   :  { %5541 = vrot.lane.b32.xlu0 %v5389_v9, %s9145_s0  ;;  %5537 = vrot.lane.b32.xlu2 %v5387_v7, %s9145_s0  ;;  %v12721_v28 = vmul.f32 %v12283_v54, %v4383_v48  ;;  %v5191_v14 = vsub.f32 1.0, %v5190_v10  ;;  %v5235_v56 = vmul.f32 %v12689_v61, %v12628_v12  ;;  %v12726_v22 = vrot.slane %v12285_v55, 5  ;;  %vm12759_vm6 = vmor %vm5224_vm13, %vm5225_vm4 }
 0x9cc   :  { %v4963_v36 = vsel %vm15295_vm0, %v12693_v17, 0.0  ;;  %v4984_v1 = vrot.slane %v4983_v51, 4  ;;  %v5391_v25 = vadd.f32 %v5359_v33, %v12253_v37  ;;  %v5223_v2 = vadd.f32 %v12624_v43, %v5222_v0  ;;  %vm15304_vm4 = vmmov %vm15295_vm0 }
 0x9cd   :  { %v4721_v39 = vpop.f32.mrf.mxu1  ;;  %v4402_v41 = vpop.permute.xlu2 %4401  ;;  %vm5194_vm12 = vweird.f32 %v12285_v55  ;;  %v4965_v54 = vadd.f32 %v4964_v53, %v4963_v36  ;;  %v4991_v48 = vsel %vm15296_vm1, %v12703_v11, 0.0  ;;  %8963 = vrcp.f32 %v12706_v49 }
 0x9ce   :  { %v12695_v30 = vadd.f32 %v8804_v34, %v4721_v39  ;;  %v12712_v34 = vmul.f32 %v12519_v42, %v4402_v41  ;;  %v12729_v42 = vmul.f32 %v12444_v26, %v4396_v50  ;;  %v12739_v60 = vmul.f32 %v5217_v3, %v4980_v20  ;;  %v4844_v50 = vpop.f32.mrf.mxu0  ;;  %v4428_v0 = vpop.permute.xlu1 %4427 }
 0x9cf   :  { %v12741_v26 = vor.u32 1.1754944e-38, %v5200_v29  ;;  %v12747_v37 = vrot.slane %v12285_v55, 6  ;;  %v4990_v9 = vsel %vm15298_vm14, %v12721_v28, 0.0  ;;  %v5192_v13 = vmul.f32 %v12667_v4, %v5191_v14  ;;  %vm15310_vm14 = vmmov %vm15295_vm0 }
 0x9d0   :  { %15289 = vst [vmem:[#allocation21_spill] sm:$0xff] %v12695_v30  ;;  %5469 = vrot.lane.b32.xlu1 %v12695_v30, %s9145_s0  ;;  %v5000_v16 = vsel %vm15297_vm10, %v12712_v34, 0.0  ;;  %v5236_v38 = vsub.f32 1.0, %v5235_v56  ;;  %8965 = vrcp.f32 %v12726_v22  ;;  %v4999_v7 = vsel %vm15299_vm11, %v12729_v42, 0.0 }
 0x9d1   :  { %v4985_v46 = vadd.f32 %v4984_v1, %v4983_v51  ;;  %vm5195_vm9 = vweird.f32 %v12667_v4  ;;  %v4992_v18 = vadd.f32 %v4991_v48, %v4990_v9  ;;  %v5227_v40 = vsel %vm12759_vm6, %v12624_v43, %v5223_v2 }
 0x9d2   :  { %v4966_v58 = vrot.slane %v4965_v54, 4  ;;  %v12768_v10 = vmul.f32 %v12620_v6, %v4415_v35  ;;  %v5001_v39 = vadd.f32 %v5000_v16, %v4999_v7  ;;  %vm12771_vm2 = vcmp.eq.f32.partialorder %v5198_v8, 8.507059e+37 }
 0x9d3   :  { %5545 = vrot.lane.b32.xlu0 %v5391_v25, %s9145_s0  ;;  %vm5239_vm13 = vweird.f32 %v12628_v12  ;;  %v5243_v51 = vand.u32 2147483647, %v12628_v12  ;;  %8967 = vrcp.f32 %v12747_v37  ;;  %v12778_v33 = vpop.eup %8963  ;;  %v5193_v43 = vadd.f32 %v12667_v4, %v5192_v13 }
 0x9d4   :  { %v5237_v6 = vmul.f32 %v12689_v61, %v5236_v38  ;;  %v12786_v8 = vrot.slane %v12285_v55, 7  ;;  %v12791_v35 = vsel %vm12716_vm8, %v12683_v47, %v5227_v40  ;;  %v4986_v20 = vrot.slane %v4985_v46, 2  ;;  %vm12804_vm8 = vmor %vm5194_vm12, %vm5195_vm9 }
 0x9d5   :  { %v5245_v53 = vand.u32 2147483648, %v12628_v12  ;;  %v4993_v14 = vrot.slane %v4992_v18, 4  ;;  %v4967_v36 = vadd.f32 %v4966_v58, %v4965_v54  ;;  %v5009_v1 = vsel %vm15304_vm4, %v12768_v10, 0.0  ;;  %vm15309_vm12 = vmmov %vm15295_vm0 }
 0x9d6   :  { %v12794_v56 = vpop.eup %8965  ;;  %vm5240_vm1 = vweird.f32 %v12689_v61  ;;  %v12809_v21 = vmul.f32 %v4844_v50, %v4428_v0  ;;  %v5250_v2 = vmul.f32 %v12778_v33, %v12706_v49  ;;  %v4847_v48 = vpop.f32.mrf.mxu0  ;;  %v5197_v16 = vsel %vm12804_vm8, %v12667_v4, %v5193_v43 }
 0x9d7   :  { %v5238_v9 = vadd.f32 %v12689_v61, %v5237_v6  ;;  %vm12817_vm10 = vcmp.eq.f32.partialorder %v5243_v51, 8.507059e+37  ;;  %8969 = vrcp.f32 %v12786_v8  ;;  %v4994_v38 = vadd.f32 %v4993_v14, %v4992_v18  ;;  %vm12843_vm11 = vmor %vm5239_vm13, %vm5240_vm1 }
 0x9d8   :  { %v4409_v52 = vpop.permute.xlu0 %4408  ;;  %v5265_v7 = vmul.f32 %v12794_v56, %v12726_v22  ;;  %v4987_v4 = vadd.f32 %v4986_v20, %v4985_v46  ;;  %v4968_v58 = vrot.slane %v4967_v36, 2  ;;  %v5260_v51 = vand.u32 2147483648, %v12706_v49  ;;  %vm15317_vm1 = vmmov %vm15309_vm12 }
 0x9d9   :  { %v12783_v29 = vmul.f32 %v12588_v59, %v4409_v52  ;;  %v5002_v59 = vrot.slane %v5001_v39, 4  ;;  %v12822_v50 = vpop.eup %8967  ;;  %v5018_v43 = vsel %vm15309_vm12, %v12809_v21, 0.0  ;;  %v5251_v6 = vsub.f32 1.0, %v5250_v2 }
 0x9da   :  { %v12837_v14 = vsel %vm12771_vm2, %v12741_v26, %v5197_v16  ;;  %v5246_v46 = vor.u32 1.1754944e-38, %v5245_v53  ;;  %v4995_v15 = vrot.slane %v4994_v38, 2  ;;  %vm5254_vm6 = vweird.f32 %v12706_v49 }
 0x9db   :  { %v5008_v25 = vsel %vm15295_vm0, %v12783_v29, 0.0  ;;  %v5003_v52 = vadd.f32 %v5002_v59, %v5001_v39  ;;  %v5280_v39 = vmul.f32 %v12822_v50, %v12747_v37  ;;  %v5258_v26 = vand.u32 2147483647, %v12706_v49 }
 0x9dc   :  { %v5010_v54 = vadd.f32 %v5009_v1, %v5008_v25  ;;  %v5242_v1 = vsel %vm12843_vm11, %v12689_v61, %v5238_v9  ;;  %v5266_v59 = vsub.f32 1.0, %v5265_v7  ;;  %v4988_v25 = vrot.slane %v4987_v4, 1 }
 0x9dd   :  { %v4422_v13 = vpop.permute.xlu2 %4421  ;;  %v12854_v12 = vpop.eup %8969  ;;  %v5261_v47 = vor.u32 1.1754944e-38, %v5260_v51  ;;  %v5004_v2 = vrot.slane %v5003_v52, 2  ;;  %v5252_v16 = vmul.f32 %v12778_v33, %v5251_v6  ;;  %vm5269_vm9 = vweird.f32 %v12726_v22 }
 0x9de   :  { %v5011_v3 = vrot.slane %v5010_v54, 4  ;;  %v12827_v40 = vmul.f32 %v12669_v62, %v4422_v13  ;;  %v5247_v61 = vsel %vm12817_vm10, %v5246_v46, %v5242_v1  ;;  %v5273_v9 = vand.u32 2147483647, %v12726_v22  ;;  %v4850_v41 = vpop.f32.mrf.mxu0  ;;  %vm15318_vm10 = vmmov %vm15317_vm1 }
 0x9df   :  { %v5267_v62 = vmul.f32 %v12794_v56, %v5266_v59  ;;  %v5275_v51 = vand.u32 2147483648, %v12726_v22  ;;  %vm12865_vm2 = vcmp.eq.f32.partialorder %v5258_v26, 8.507059e+37  ;;  %v5005_v55 = vadd.f32 %v5004_v2, %v5003_v52 }
 0x9e0   :  { %v5012_v0 = vadd.f32 %v5011_v3, %v5010_v54  ;;  %v5017_v18 = vsel %vm15310_vm14, %v12827_v40, 0.0  ;;  %v4969_v54 = vadd.f32 %v4968_v58, %v4967_v36  ;;  %v5281_v3 = vsub.f32 1.0, %v5280_v39 }
 0x9e1   :  { %v5019_v20 = vadd.f32 %v5018_v43, %v5017_v18  ;;  %v4996_v18 = vadd.f32 %v4995_v15, %v4994_v38  ;;  %v5295_v36 = vmul.f32 %v12854_v12, %v12786_v8  ;;  %v4989_v58 = vadd.f32 %v4988_v25, %v4987_v4 }
 0x9e2   :  { %v5013_v13 = vrot.slane %v5012_v0, 2  ;;  %v4970_v39 = vrot.slane %v4969_v54, 1  ;;  %v5253_v38 = vadd.f32 %v12778_v33, %v5252_v16  ;;  %vm5255_vm13 = vweird.f32 %v12778_v33 }
 0x9e3   :  { %v5020_v53 = vrot.slane %v5019_v20, 4  ;;  %v5282_v59 = vmul.f32 %v12822_v50, %v5281_v3  ;;  %vm5284_vm4 = vweird.f32 %v12747_v37  ;;  %v4997_v25 = vrot.slane %v4996_v18, 1  ;;  %vm12882_vm8 = vmor %vm5254_vm6, %vm5255_vm13 }
 0x9e4   :  { %v5268_v52 = vadd.f32 %v12794_v56, %v5267_v62  ;;  %vm5270_vm0 = vweird.f32 %v12794_v56  ;;  %v5233_v2 = vmul.f32 %v12791_v35, %v4989_v58  ;;  %v5257_v3 = vsel %vm12882_vm8, %v12778_v33, %v5253_v38 }
 0x9e5   :  { %v5021_v43 = vadd.f32 %v5020_v53, %v5019_v20  ;;  %v4435_v7 = vpop.permute.xlu2 %4434  ;;  %v5014_v20 = vadd.f32 %v5013_v13, %v5012_v0  ;;  %v5006_v53 = vrot.slane %v5005_v55, 1  ;;  %v4971_v13 = vadd.f32 %v4970_v39, %v4969_v54  ;;  %vm12895_vm12 = vmor %vm5269_vm9, %vm5270_vm0 }
 0x9e6   :  { %v12869_v1 = vmul.f32 %v4847_v48, %v4435_v7  ;;  %v5296_v48 = vsub.f32 1.0, %v5295_v36  ;;  %v5283_v7 = vadd.f32 %v12822_v50, %v5282_v59  ;;  %vm5285_vm14 = vweird.f32 %v12822_v50 }
 0x9e7   :  { %v5022_v46 = vrot.slane %v5021_v43, 2  ;;  %v5290_v62 = vand.u32 2147483648, %v12747_v37  ;;  %v4998_v54 = vadd.f32 %v4997_v25, %v4996_v18  ;;  %v5272_v33 = vsel %vm12895_vm12, %v12794_v56, %v5268_v52  ;;  %vm12912_vm6 = vmor %vm5284_vm4, %vm5285_vm14 }
 0x9e8   :  { %v4441_v15 = vpop.permute.xlu0 %4440  ;;  %v5026_v16 = vsel %vm15317_vm1, %v12869_v1, 0.0  ;;  %v5297_v58 = vmul.f32 %v12854_v12, %v5296_v48  ;;  %v5007_v22 = vadd.f32 %v5006_v53, %v5005_v55  ;;  %vm5274_vm11 = vcmp.eq.f32.partialorder %v5273_v9, 8.507059e+37 }
 0x9e9   :  { %v5023_v4 = vadd.f32 %v5022_v46, %v5021_v43  ;;  %v12875_v26 = vmul.f32 %v4850_v41, %v4441_v15  ;;  %v5015_v43 = vrot.slane %v5014_v20, 1  ;;  %v5276_v39 = vor.u32 1.1754944e-38, %v5275_v51 }
 0x9ea   :  { %v5288_v38 = vand.u32 2147483647, %v12747_v37  ;;  %v5203_v15 = vmul.f32 %v12837_v14, %v4971_v13  ;;  %v5262_v59 = vsel %vm12865_vm2, %v5261_v47, %v5257_v3  ;;  %v5287_v9 = vsel %vm12912_vm6, %v12822_v50, %v5283_v7 }
 0x9eb   :  { %v5027_v41 = vsel %vm15318_vm10, %v12875_v26, 0.0  ;;  %v5024_v36 = vrot.slane %v5023_v4, 1  ;;  %v5016_v0 = vadd.f32 %v5015_v43, %v5014_v20  ;;  %v5277_v25 = vsel %vm5274_vm11, %v5276_v39, %v5272_v33  ;;  %v15327_v39 = vld [vmem:[#allocation74_spill] sm:$0xff] }
 0x9ec   :  { %v5028_v35 = vadd.f32 %v5027_v41, %v5026_v16  ;;  %v5291_v51 = vor.u32 1.1754944e-38, %v5290_v62  ;;  %v5248_v52 = vmul.f32 %v5247_v61, %v4998_v54  ;;  %v5298_v14 = vadd.f32 %v12854_v12, %v5297_v58 }
 0x9ed   :  { %v5025_v55 = vadd.f32 %v5024_v36, %v5023_v4  ;;  %vm5300_vm9 = vweird.f32 %v12854_v12  ;;  %v5263_v6 = vmul.f32 %v5262_v59, %v5007_v22  ;;  %vm5289_vm2 = vcmp.eq.f32.partialorder %v5288_v38, 8.507059e+37  ;;  %v15329_v59 = vld [vmem:[#allocation72_spill] sm:$0xff] }
 0x9ee   :  { %v5029_v46 = vrot.slane %v5028_v35, 4  ;;  %vm5299_vm13 = vweird.f32 %v12786_v8  ;;  %v5305_v37 = vand.u32 2147483648, %v12786_v8  ;;  %v5278_v20 = vmul.f32 %v5277_v25, %v5016_v0 }
 0x9ef   :  { %v5292_v48 = vsel %vm5289_vm2, %v5291_v51, %v5287_v9  ;;  %v5303_v53 = vand.u32 2147483647, %v12786_v8  ;;  %vm5301_vm4 = vmor %vm5299_vm13, %vm5300_vm9  ;;  %v15323_v61 = vrot.slane %v12739_v60, 7  ;;  %v5343_v41 = vrot.slane %v5248_v52, 5  ;;  %v15332_v51 = vld [vmem:[#allocation11_spill] sm:$0xff]  ;;  %v15333_v52 = vld [vmem:[#allocation17_spill] sm:$0xff] }
 0x9f0   :  { %v5030_v56 = vadd.f32 %v5029_v46, %v5028_v35  ;;  %v5293_v50 = vmul.f32 %v5292_v48, %v5025_v55  ;;  %v5302_v13 = vsel %vm5301_vm4, %v12854_v12, %v5298_v14  ;;  %v5341_v43 = vrot.slane %v5233_v2, 6  ;;  %v15337_v48 = vld [vmem:[#allocation80_spill] sm:$0xff] }
 0x9f1   :  { %v5340_v4 = vsel %vm1699_vm3, %v15323_v61, %v5203_v15  ;;  %v5345_v35 = vrot.slane %v5263_v6, 4  ;;  %v5306_v49 = vor.u32 1.1754944e-38, %v5305_v37  ;;  %v5347_v7 = vrot.slane %v5278_v20, 3  ;;  %v15335_v37 = vld [vmem:[#allocation14_spill] sm:$0xff] }
 0x9f2   :  { %v5031_v47 = vrot.slane %v5030_v56, 2  ;;  %vm5304_vm0 = vcmp.eq.f32.partialorder %v5303_v53, 8.507059e+37  ;;  %v5342_v36 = vsel %vm1702_vm5, %v5341_v43, %v5340_v4  ;;  %v5349_v8 = vrot.slane %v5293_v50, 2  ;;  %v15340_v50 = vld [vmem:[#allocation78_spill] sm:$0xff]  ;;  %v15342_v4 = vld [vmem:[#allocation85_spill] sm:$0xff] }
 0x9f3   :  { %v5307_v54 = vsel %vm5304_vm0, %v5306_v49, %v5302_v13  ;;  %v5344_v33 = vsel %vm1705_vm7, %v5343_v41, %v5342_v36  ;;  %vm15324_vm8 = vcmask 1045509   ;;  %vm15325_vm1 = vcmask 1046534   ;;  %v15343_v41 = vld [vmem:[#allocation84_spill] sm:$0xff] }
 0x9f4   :  { %v5032_v16 = vadd.f32 %v5031_v47, %v5030_v56  ;;  %v5346_v60 = vsel %vm1708_vm15, %v5345_v35, %v5344_v33  ;;  %vm15326_vm10 = vcmask 1047559   ;;  %v15328_v38 = vunpack.i.l.bf16 %v15327_v39 }
 0x9f5   :  { %v5348_v46 = vsel %vm15324_vm8, %v5347_v7, %v5346_v60  ;;  %v15330_v0 = vunpack.i.h.bf16 %v15329_v59  ;;  %v15331_v56 = vunpack.i.l.bf16 %v15329_v59  ;;  %v15334_v47 = vunpack.i.h.bf16 %v15290_v32  ;;  %v15346_v32 = vld [vmem:[#allocation82_spill] sm:$0xff] }
 0x9f6   :  { %v5033_v3 = vrot.slane %v5032_v16, 1  ;;  %v5350_v12 = vsel %vm15325_vm1, %v5349_v8, %v5348_v46  ;;  %v15344_v13 = vpack.i.bf16 %v15342_v4, %v15343_v41  ;;  %v5421_v35 = vrot.slane %v12637_v31, 1 }
 0x9f7   :  { %v5361_v6 = vmul.f32 %v15334_v47, %v12635_v63  ;;  %v5435_v7 = vperm.slane %v12637_v31, 0  ;;  %vm15366_vm4 = vcmask 523264  }
 0x9f8   :  { %v5034_v62 = vadd.f32 %v5033_v3, %v5032_v16  ;;  %v15339_v16 = vld [vmem:[#allocation79_spill] sm:$0xff]  ;;  %v5436_v49 = vperm.slane %v5421_v35, 0 }
 0x9f9   :  { %v5393_v20 = vadd.f32 %v5361_v6, %v15335_v37  ;;  %v15341_v61 = vpack.i.bf16 %v15339_v16, %v15340_v50  ;;  %v15345_v3 = vld [vmem:[#allocation83_spill] sm:$0xff]  ;;  %v15355_v6 = vld [vmem:[#allocation20_spill] sm:$0xff]  ;;  %v5422_v16 = vrot.slane %v12637_v31, 2 }
 0x9fa   :  { %v5308_v58 = vmul.f32 %v5307_v54, %v5034_v62  ;;  %v15347_v43 = vpack.i.bf16 %v15345_v3, %v15346_v32 }
 0x9fc   :  { %v5351_v22 = vrot.slane %v5308_v58, 1 }
 0x9fe   :  { %v12934_v2 = vsel %vm15326_vm10, %v5351_v22, %v5350_v12  ;;  %vm15372_vm10 = vmmov %vm15366_vm4 }
 0x9ff   :  { %v5360_v15 = vmul.f32 %v15328_v38, %v12934_v2  ;;  %v5358_v18 = vmul.f32 %v15330_v0, %v12934_v2  ;;  %v5356_v25 = vmul.f32 %v15331_v56, %v12934_v2  ;;  %v15349_v0 = vld [vmem:[#allocation77_spill] sm:$0xff] }
 0xa01   :  { %v5392_v9 = vadd.f32 %v5360_v15, %v12308_v5  ;;  %v5390_v55 = vadd.f32 %v5358_v18, %v15332_v51  ;;  %v5388_v14 = vadd.f32 %v5356_v25, %v15333_v52  ;;  %v15336_v5 = vld [vmem:[#allocation81_spill] sm:$0xff]  ;;  %v15348_v15 = vunpack.i.h.bf16 %v15327_v39  ;;  %v15351_v25 = vld [vmem:[#allocation18_spill] sm:$0xff]  ;;  %v15352_v51 = vld [vmem:[#allocation16_spill] sm:$0xff] }
 0xa02   :  { %v15338_v53 = vpack.i.bf16 %v15336_v5, %v15337_v48  ;;  %v15350_v18 = vunpack.i.l.bf16 %v15349_v0  ;;  %v15353_v52 = vld [vmem:[#allocation57_spill] sm:$0xff] }
 0xa03   :  { %5547 = vrot.lane.b32.xlu0 %v5392_v9, %s9145_s0  ;;  %5543 = vrot.lane.b32.xlu1 %v5390_v55, %s9145_s0  ;;  %v5362_v59 = vmul.f32 %v15348_v15, %v12934_v2 }
 0xa04   :  { %5539 = vrot.lane.b32.xlu2 %v5388_v14, %s9145_s0  ;;  %v5364_v56 = vmul.f32 %v15350_v18, %v12934_v2  ;;  %v15354_v14 = vunpack.i.l.bf16 %v15353_v52 }
 0xa05   :  { %v5394_v9 = vadd.f32 %v5362_v59, %v15351_v25  ;;  %v15359_v59 = vunpack.i.h.bf16 %v15349_v0 }
 0xa06   :  { %v5396_v55 = vadd.f32 %v5364_v56, %v15352_v51  ;;  %v5367_v47 = vmul.f32 %v15354_v14, %v12635_v63 }
 0xa07   :  { %v5366_v18 = vmul.f32 %v15359_v59, %v12934_v2  ;;  %v15367_v59 = vunpack.i.h.bf16 %v15353_v52  ;;  %v15368_v52 = vld [vmem:[#allocation55_spill] sm:$0xff] }
 0xa08   :  { %v5399_v37 = vadd.f32 %v5367_v47, %v15355_v6  ;;  %v5423_v47 = vrot.slane %v12637_v31, 3 }
 0xa0b   :  { %5549 = vrot.lane.b32.xlu0 %v5393_v20, %s9145_s0  ;;  %8677 = vrot.lane.b32.xlu1 %v15338_v53, %s9149_s30 }
 0xa0c   :  { %8672 = vrot.lane.b32.xlu2 %v15341_v61, %s9149_s30  ;;  %v15356_v61 = vld [vmem:[#allocation76_spill] sm:$0xff] }
 0xa0d   :  { %v15357_v4 = vunpack.i.l.bf16 %v15356_v61 }
 0xa0f   :  { %v5363_v41 = vmul.f32 %v15357_v4, %v12635_v63  ;;  %v15362_v4 = vld [vmem:[#allocation12_spill] sm:$0xff] }
 0xa13   :  { %8687 = vrot.lane.b32.xlu1 %v15344_v13, %s9149_s30  ;;  %v5437_v13 = vperm.slane %v5422_v16, 0 }
 0xa14   :  { %8682 = vrot.lane.b32.xlu2 %v15347_v43, %s9149_s30  ;;  %v15358_v43 = vld [vmem:[#allocation13_spill] sm:$0xff] }
 0xa15   :  { %v5395_v35 = vadd.f32 %v5363_v41, %v15358_v43 }
 0xa25   :  { %v5538_v54 = vpop.permute.xlu2 %5537 }
 0xa3a   :  { %v12970_v62 = vpop.permute.xlu1 %5467 }
 0xa3b   :  { %v5475_v36 = vadd.f32 %v12970_v62, %v5436_v49  ;;  %v5473_v8 = vadd.f32 %v12970_v62, %v5435_v7  ;;  %v5477_v32 = vadd.f32 %v12970_v62, %v5437_v13 }
 0xa3d   :  { %v5633_v33 = vadd.f32 %v5538_v54, %v5473_v8  ;;  %v5542_v58 = vpop.permute.xlu0 %5541 }
 0xa3e   :  { %v5635_v60 = vadd.f32 %v5542_v58, %v5475_v36 }
 0xa3f   :  { %vm5665_vm12 = vcmp.ge.f32.partialorder %v5633_v33, 0.0  ;;  %v5697_v46 = vmul.f32 0.2, %v5633_v33 }
 0xa40   :  { %v5699_v22 = vmul.f32 0.2, %v5635_v60  ;;  %vm5667_vm14 = vcmp.ge.f32.partialorder %v5635_v60, 0.0 }
 0xa41   :  { %v5729_v12 = vsel %vm5665_vm12, %v5633_v33, %v5697_v46  ;;  %vm15373_vm12 = vmmov %vm15366_vm4 }
 0xa42   :  { %5793 = vrot.lane.b32.xlu2 %v5729_v12, %s9145_s0  ;;  %v5731_v38 = vsel %vm5667_vm14, %v5635_v60, %v5699_v22  ;;  %v12991_v39 = vpop.permute.xlu1 %5469 }
 0xa43   :  { %5797 = vrot.lane.b32.xlu0 %v5731_v38, %s9145_s0  ;;  %v5474_v20 = vadd.f32 %v12991_v39, %v5435_v7  ;;  %v5478_v60 = vadd.f32 %v12991_v39, %v5437_v13  ;;  %v5476_v46 = vadd.f32 %v12991_v39, %v5436_v49  ;;  %v15361_v49 = vunpack.i.h.bf16 %v15356_v61 }
 0xa45   :  { %v5546_v3 = vpop.permute.xlu0 %5545  ;;  %v5365_v0 = vmul.f32 %v15361_v49, %v12635_v63 }
 0xa46   :  { %v5637_v7 = vadd.f32 %v5546_v3, %v5477_v32 }
 0xa47   :  { %v5397_v41 = vadd.f32 %v5365_v0, %v15362_v4 }
 0xa48   :  { %v5701_v33 = vmul.f32 0.2, %v5637_v7  ;;  %vm5669_vm6 = vcmp.ge.f32.partialorder %v5637_v7, 0.0 }
 0xa4a   :  { %5551 = vrot.lane.b32.xlu2 %v5394_v9, %s9145_s0  ;;  %v5733_v58 = vsel %vm5669_vm6, %v5637_v7, %v5701_v33  ;;  %v15365_v33 = vld [vmem:[#allocation19_spill] sm:$0xff]  ;;  %vm15376_vm6 = vmmov %vm15366_vm4 }
 0xa4b   :  { %5555 = vrot.lane.b32.xlu0 %v5396_v55, %s9145_s0  ;;  %v15360_v55 = vld [vmem:[#allocation15_spill] sm:$0xff] }
 0xa4c   :  { %v5398_v14 = vadd.f32 %v5366_v18, %v15360_v55  ;;  %v5369_v18 = vmul.f32 %v15367_v59, %v12635_v63 }
 0xa53   :  { %5561 = vrot.lane.b32.xlu0 %v5399_v37, %s9145_s0 }
 0xa5e   :  { %v5540_v5 = vpop.permute.xlu2 %5539 }
 0xa5f   :  { %v5634_v48 = vadd.f32 %v5540_v5, %v5474_v20  ;;  %v5438_v20 = vperm.slane %v5423_v47, 0 }
 0xa61   :  { %v5698_v53 = vmul.f32 0.2, %v5634_v48  ;;  %vm5666_vm11 = vcmp.ge.f32.partialorder %v5634_v48, 0.0  ;;  %v5479_v16 = vadd.f32 %v12970_v62, %v5438_v20 }
 0xa63   :  { %v5730_v50 = vsel %vm5666_vm11, %v5634_v48, %v5698_v53 }
 0xa64   :  { %5795 = vrot.lane.b32.xlu1 %v5730_v50, %s9145_s0 }
 0xa66   :  { %v8673_v36 = vpop.permute.xlu2 %8672 }
 0xa67   :  { %v8675_v8 = vunpack.i.h.bf16 %v8673_v36  ;;  %v8674_v54 = vunpack.i.l.bf16 %v8673_v36  ;;  %v15363_v36 = vld [vmem:[#allocation54_spill] sm:$0xff] }
 0xa69   :  { %5961 = vmatpush.msra.mxu1 %v8674_v54 }
 0xa6b   :  { %5962 = vmatpush.msra.mxu1 %v8675_v8  ;;  %v15364_v8 = vunpack.i.l.bf16 %v15363_v36 }
 0xa6c   :  { %5553 = vrot.lane.b32.xlu1 %v5395_v35, %s9145_s0 }
 0xa6d   :  { %v5368_v54 = vmul.f32 %v15364_v8, %v12934_v2 }
 0xa6e   :  { %v8683_v37 = vpop.permute.xlu2 %8682 }
 0xa6f   :  { %v8684_v50 = vunpack.i.l.bf16 %v8683_v37  ;;  %v8685_v3 = vunpack.i.h.bf16 %v8683_v37 }
 0xa74   :  { %5801 = vrot.lane.b32.xlu1 %v5733_v58, %s9145_s0  ;;  %v5400_v58 = vadd.f32 %v5368_v54, %v15365_v33 }
 0xa75   :  { %v5548_v22 = vpop.permute.xlu0 %5547  ;;  %v5544_v12 = vpop.permute.xlu1 %5543 }
 0xa76   :  { %v5638_v38 = vadd.f32 %v5548_v22, %v5478_v60  ;;  %v5636_v15 = vadd.f32 %v5544_v12, %v5476_v46  ;;  %v5480_v46 = vadd.f32 %v12991_v39, %v5438_v20 }
 0xa78   :  { %v5702_v56 = vmul.f32 0.2, %v5638_v38  ;;  %v5700_v25 = vmul.f32 0.2, %v5636_v15  ;;  %vm5670_vm9 = vcmp.ge.f32.partialorder %v5638_v38, 0.0  ;;  %vm5668_vm2 = vcmp.ge.f32.partialorder %v5636_v15, 0.0 }
 0xa7a   :  { %v5734_v9 = vsel %vm5670_vm9, %v5638_v38, %v5702_v56  ;;  %v5732_v51 = vsel %vm5668_vm2, %v5636_v15, %v5700_v25  ;;  %v5401_v56 = vadd.f32 %v5369_v18, %v12548_v45  ;;  %v15369_v45 = vunpack.i.l.bf16 %v15368_v52  ;;  %vm15378_vm9 = vmmov %vm15366_vm4 }
 0xa7b   :  { %5803 = vrot.lane.b32.xlu0 %v5734_v9, %s9145_s0  ;;  %5799 = vrot.lane.b32.xlu2 %v5732_v51, %s9145_s0  ;;  %v5424_v9 = vrot.slane %v12637_v31, 4 }
 0xa7c   :  { %5559 = vrot.lane.b32.xlu1 %v5398_v14, %s9145_s0  ;;  %v5371_v37 = vmul.f32 %v15369_v45, %v12635_v63 }
 0xa7d   :  { %v8678_v6 = vpop.permute.xlu1 %8677  ;;  %v5550_v53 = vpop.permute.xlu0 %5549  ;;  %v5439_v51 = vperm.slane %v5424_v9, 0 }
 0xa7e   :  { %v8680_v5 = vunpack.i.h.bf16 %v8678_v6  ;;  %v8679_v48 = vunpack.i.l.bf16 %v8678_v6  ;;  %v5639_v13 = vadd.f32 %v5550_v53, %v5479_v16  ;;  %v5426_v6 = vrot.slane %v12637_v31, 6 }
 0xa7f   :  { %v5482_v55 = vadd.f32 %v12991_v39, %v5439_v51  ;;  %v5403_v53 = vadd.f32 %v5371_v37, %v12693_v17  ;;  %v5481_v8 = vadd.f32 %v12970_v62, %v5439_v51 }
 0xa80   :  { %5963 = vmatpush.msra.mxu1 %v8679_v48  ;;  %v5703_v32 = vmul.f32 0.2, %v5639_v13  ;;  %vm5671_vm13 = vcmp.ge.f32.partialorder %v5639_v13, 0.0  ;;  %v5441_v20 = vperm.slane %v5426_v6, 0 }
 0xa82   :  { %5964 = vmatpush.msra.mxu1 %v8680_v5  ;;  %v5735_v7 = vsel %vm5671_vm13, %v5639_v13, %v5703_v32  ;;  %v5485_v48 = vadd.f32 %v12970_v62, %v5441_v20  ;;  %vm15381_vm13 = vmmov %vm15366_vm4 }
 0xa83   :  { %5557 = vrot.lane.b32.xlu2 %v5397_v41, %s9145_s0 }
 0xa84   :  { %5965 = vmatpush.msra.mxu1 %v8684_v50 }
 0xa85   :  { %v8688_v61 = vpop.permute.xlu1 %8687 }
 0xa86   :  { %v8690_v43 = vunpack.i.h.bf16 %v8688_v61  ;;  %v8689_v35 = vunpack.i.l.bf16 %v8688_v61  ;;  %5966 = vmatpush.msra.mxu1 %v8685_v3  ;;  %v15370_v3 = vld [vmem:[#allocation56_spill] sm:$0xff] }
 0xa87   :  { %v15371_v61 = vunpack.i.h.bf16 %v15370_v3 }
 0xa88   :  { %5967 = vmatpush.msra.mxu1 %v8689_v35 }
 0xa89   :  { %v5374_v32 = vmul.f32 %v15371_v61, %v12934_v2  ;;  %v5443_v61 = vperm.slane %v12695_v30, 0 }
 0xa8a   :  { %5968 = vmatpush.msra.mxu1 %v8690_v43  ;;  %v5425_v43 = vrot.slane %v12637_v31, 5 }
 0xa8b   :  { %5805 = vrot.lane.b32.xlu2 %v5735_v7, %s9145_s0  ;;  %v5406_v17 = vadd.f32 %v5374_v32, %v12553_v57 }
 0xa8c   :  { %v5440_v35 = vperm.slane %v5425_v43, 0  ;;  %v5489_v43 = vadd.f32 %v12970_v62, %v5443_v61 }
 0xa8e   :  { %v5483_v7 = vadd.f32 %v12970_v62, %v5440_v35 }
 0xa93   :  { %5563 = vrot.lane.b32.xlu2 %v5400_v58, %s9145_s0 }
 0xa9c   :  { %v5794_v60 = vpop.permute.xlu2 %5793 }
 0xa9d   :  { %8385 = vmatmul.msk.f32.vlgmr.msra.gmra.mxu1 %vm15366_vm4, %v5794_v60 }
 0xaa4   :  { %v5552_v22 = vpop.permute.xlu2 %5551 }
 0xaa5   :  { %v5640_v12 = vadd.f32 %v5552_v22, %v5480_v46 }
 0xaa7   :  { %v5704_v38 = vmul.f32 0.2, %v5640_v12  ;;  %vm5672_vm0 = vcmp.ge.f32.partialorder %v5640_v12, 0.0 }
 0xaa9   :  { %v5736_v15 = vsel %vm5672_vm0, %v5640_v12, %v5704_v38  ;;  %vm15382_vm0 = vmmov %vm15376_vm6 }
 0xaaa   :  { %5807 = vrot.lane.b32.xlu1 %v5736_v15, %s9145_s0  ;;  %v15374_v15 = vunpack.i.l.bf16 %v15370_v3 }
 0xaac   :  { %v5372_v59 = vmul.f32 %v15374_v15, %v12934_v2 }
 0xaae   :  { %v5404_v9 = vadd.f32 %v5372_v59, %v12677_v24  ;;  %v5484_v24 = vadd.f32 %v12991_v39, %v5440_v35 }
 0xab2   :  { %5565 = vrot.lane.b32.xlu1 %v5401_v56, %s9145_s0  ;;  %v15375_v56 = vunpack.i.h.bf16 %v15363_v36 }
 0xab5   :  { %v5798_v25 = vpop.permute.xlu0 %5797 }
 0xabd   :  { %v5556_v14 = vpop.permute.xlu0 %5555 }
 0xabe   :  { %v5642_v47 = vadd.f32 %v5556_v14, %v5482_v55  ;;  %v5486_v55 = vadd.f32 %v12991_v39, %v5441_v20  ;;  %v15379_v20 = vld [vmem:[#allocation58_spill] sm:$0xff] }
 0xac0   :  { %v5706_v49 = vmul.f32 0.2, %v5642_v47  ;;  %vm5674_vm8 = vcmp.ge.f32.partialorder %v5642_v47, 0.0 }
 0xac2   :  { %v5738_v0 = vsel %vm5674_vm8, %v5642_v47, %v5706_v49  ;;  %v15377_v49 = vunpack.i.h.bf16 %v15368_v52  ;;  %vm15383_vm8 = vmmov %vm15382_vm0 }
 0xac3   :  { %5811 = vrot.lane.b32.xlu2 %v5738_v0, %s9145_s0 }
 0xac4   :  { %v5373_v0 = vmul.f32 %v15377_v49, %v12635_v63 }
 0xac5   :  { %v5562_v5 = vpop.permute.xlu0 %5561 }
 0xac6   :  { %v5645_v16 = vadd.f32 %v5562_v5, %v5485_v48  ;;  %v15380_v5 = vunpack.i.l.bf16 %v15379_v20 }
 0xac8   :  { %v5709_v50 = vmul.f32 0.2, %v5645_v16  ;;  %vm5677_vm1 = vcmp.ge.f32.partialorder %v5645_v16, 0.0  ;;  %v5375_v52 = vmul.f32 %v15380_v5, %v12635_v63 }
 0xaca   :  { %v5741_v4 = vsel %vm5677_vm1, %v5645_v16, %v5709_v50  ;;  %v5407_v16 = vadd.f32 %v5375_v52, %v12664_v44 }
 0xacb   :  { %5569 = vrot.lane.b32.xlu2 %v5403_v53, %s9145_s0 }
 0xad3   :  { %5817 = vrot.lane.b32.xlu2 %v5741_v4, %s9145_s0  ;;  %v5427_v4 = vrot.slane %v12637_v31, 7 }
 0xad5   :  { %v5800_v41 = vpop.permute.xlu2 %5799 }
 0xad6   :  { %v5796_v13 = vpop.permute.xlu1 %5795 }
 0xad7   :  { %8386 = vmatmul.msk.f32.gmra.mxu1 %vm15372_vm10, %v5796_v13  ;;  %v5442_v13 = vperm.slane %v5427_v4, 0 }
 0xad9   :  { %v5487_v3 = vadd.f32 %v12970_v62, %v5442_v13 }
 0xadb   :  { %5575 = vrot.lane.b32.xlu2 %v5406_v17, %s9145_s0 }
 0xadd   :  { %v5558_v54 = vpop.permute.xlu2 %5557 }
 0xade   :  { %v5554_v33 = vpop.permute.xlu1 %5553  ;;  %v5643_v58 = vadd.f32 %v5558_v54, %v5483_v7 }
 0xadf   :  { %v5641_v60 = vadd.f32 %v5554_v33, %v5481_v8  ;;  %8387 = vmatmul.msk.f32.gmra.mxu1 %vm15373_vm12, %v5798_v25  ;;  %v5370_v25 = vmul.f32 %v15375_v56, %v12934_v2  ;;  %v15387_v56 = vld [vmem:[#allocation59_spill] sm:$0xff] }
 0xae0   :  { %v5707_v46 = vmul.f32 0.2, %v5643_v58  ;;  %vm5675_vm14 = vcmp.ge.f32.partialorder %v5643_v58, 0.0 }
 0xae1   :  { %v5705_v22 = vmul.f32 0.2, %v5641_v60  ;;  %vm5673_vm11 = vcmp.ge.f32.partialorder %v5641_v60, 0.0  ;;  %v5402_v51 = vadd.f32 %v5370_v25, %v12559_v23  ;;  %v5405_v23 = vadd.f32 %v5373_v0, %v12556_v27 }
 0xae2   :  { %v5739_v12 = vsel %vm5675_vm14, %v5643_v58, %v5707_v46  ;;  %v15384_v58 = vld [vmem:[#allocation60_spill] sm:$0xff]  ;;  %v15388_v25 = vunpack.i.l.bf16 %v15387_v56  ;;  %vm15390_vm14 = vmmov %vm15382_vm0 }
 0xae3   :  { %v5737_v38 = vsel %vm5673_vm11, %v5641_v60, %v5705_v22  ;;  %5813 = vrot.lane.b32.xlu1 %v5739_v12, %s9145_s0  ;;  %v15385_v60 = vunpack.i.l.bf16 %v15384_v58  ;;  %v15386_v12 = vunpack.i.h.bf16 %v15384_v58  ;;  %vm15391_vm11 = vmmov %vm15382_vm0 }
 0xae4   :  { %5809 = vrot.lane.b32.xlu0 %v5737_v38, %s9145_s0 }
 0xae5   :  { %v5806_v57 = vpop.permute.xlu2 %5805  ;;  %v5376_v46 = vmul.f32 %v15385_v60, %v12934_v2  ;;  %v5378_v38 = vmul.f32 %v15386_v12, %v12934_v2 }
 0xae6   :  { %v5802_v18 = vpop.permute.xlu1 %5801 }
 0xae7   :  { %8388 = vmatmul.msk.f32.gmra.mxu1 %vm15376_vm6, %v5800_v41  ;;  %v5408_v15 = vadd.f32 %v5376_v46, %v12644_v19  ;;  %v5410_v59 = vadd.f32 %v5378_v38, %v12703_v11  ;;  %v15389_v11 = vunpack.i.h.bf16 %v15387_v56 }
 0xae9   :  { %v5381_v0 = vmul.f32 %v15389_v11, %v12635_v63 }
 0xaeb   :  { %5571 = vrot.lane.b32.xlu1 %v5404_v9, %s9145_s0  ;;  %v5379_v9 = vmul.f32 %v15388_v25, %v12635_v63 }
 0xaec   :  { %5567 = vrot.lane.b32.xlu0 %v5402_v51, %s9145_s0 }
 0xaed   :  { %v5564_v14 = vpop.permute.xlu2 %5563  ;;  %v5804_v48 = vpop.permute.xlu0 %5803 }
 0xaee   :  { %v5646_v47 = vadd.f32 %v5564_v14, %v5486_v55  ;;  %v5560_v36 = vpop.permute.xlu1 %5559 }
 0xaef   :  { %8389 = vmatmul.msk.f32.gmra.mxu1 %vm15378_vm9, %v5802_v18  ;;  %v5644_v37 = vadd.f32 %v5560_v36, %v5484_v24  ;;  %v5413_v36 = vadd.f32 %v5381_v0, %v12783_v29 }
 0xaf0   :  { %v5710_v6 = vmul.f32 0.2, %v5646_v47  ;;  %vm5678_vm2 = vcmp.ge.f32.partialorder %v5646_v47, 0.0 }
 0xaf1   :  { %v5708_v53 = vmul.f32 0.2, %v5644_v37  ;;  %vm5676_vm4 = vcmp.ge.f32.partialorder %v5644_v37, 0.0 }
 0xaf2   :  { %v5742_v45 = vsel %vm5678_vm2, %v5646_v47, %v5710_v6  ;;  %v5411_v47 = vadd.f32 %v5379_v9, %v12729_v42  ;;  %v5490_v42 = vadd.f32 %v12991_v39, %v5443_v61  ;;  %vm15393_vm2 = vmmov %vm15382_vm0 }
 0xaf3   :  { %5819 = vrot.lane.b32.xlu1 %v5742_v45, %s9145_s0  ;;  %v5740_v50 = vsel %vm5676_vm4, %v5644_v37, %v5708_v53 }
 0xaf4   :  { %5573 = vrot.lane.b32.xlu0 %v5405_v23, %s9145_s0  ;;  %v5488_v23 = vadd.f32 %v12991_v39, %v5442_v13 }
 0xaf7   :  { %8390 = vmatmul.msk.f32.gmra.mxu1 %vm15381_vm13, %v5804_v48  ;;  %vm15394_vm13 = vmmov %vm15382_vm0 }
 0xafb   :  { %5577 = vrot.lane.b32.xlu1 %v5407_v16, %s9145_s0 }
 0xafc   :  { %5815 = vrot.lane.b32.xlu0 %v5740_v50, %s9145_s0 }
 0xaff   :  { %8391 = vmatmul.msk.f32.gmra.mxu1 %vm15382_vm0, %v5806_v57  ;;  %v5428_v57 = vrot.slane %v12695_v30, 1 }
 0xb01   :  { %v5444_v18 = vperm.slane %v5428_v57, 0 }
 0xb03   :  { %v5492_v51 = vadd.f32 %v12991_v39, %v5444_v18 }
 0xb1c   :  { %v5808_v27 = vpop.permute.xlu1 %5807 }
 0xb1d   :  { %8392 = vmatmul.msk.f32.gmra.mxu1 %vm15383_vm8, %v5808_v27  ;;  %v5812_v41 = vpop.permute.xlu2 %5811  ;;  %v15392_v27 = vunpack.i.h.bf16 %v15379_v20  ;;  %vm15398_vm8 = vmmov %vm15393_vm2 }
 0xb1f   :  { %v5377_v4 = vmul.f32 %v15392_v27, %v12635_v63  ;;  %v15404_v27 = vld [vmem:[#allocation64_spill] sm:$0xff] }
 0xb21   :  { %v5409_v61 = vadd.f32 %v5377_v4, %v12721_v28  ;;  %v15395_v28 = vld [vmem:[#allocation61_spill] sm:$0xff]  ;;  %v15405_v4 = vunpack.i.h.bf16 %v15404_v27 }
 0xb22   :  { %v15396_v58 = vunpack.i.h.bf16 %v15395_v28  ;;  %v15397_v46 = vunpack.i.l.bf16 %v15395_v28 }
 0xb24   :  { %v5566_v32 = vpop.permute.xlu1 %5565  ;;  %v5382_v60 = vmul.f32 %v15396_v58, %v12934_v2  ;;  %v5380_v12 = vmul.f32 %v15397_v46, %v12934_v2 }
 0xb25   :  { %v5647_v44 = vadd.f32 %v5566_v32, %v5487_v3  ;;  %v5570_v17 = vpop.permute.xlu2 %5569  ;;  %v5429_v3 = vrot.slane %v12695_v30, 2 }
 0xb26   :  { %v5649_v7 = vadd.f32 %v5570_v17, %v5489_v43  ;;  %v5414_v38 = vadd.f32 %v5382_v60, %v12768_v10  ;;  %v5412_v57 = vadd.f32 %v5380_v12, %v12712_v34 }
 0xb27   :  { %v5711_v35 = vmul.f32 0.2, %v5647_v44  ;;  %vm5679_vm1 = vcmp.ge.f32.partialorder %v5647_v44, 0.0  ;;  %v5445_v32 = vperm.slane %v5429_v3, 0 }
 0xb28   :  { %v5713_v8 = vmul.f32 0.2, %v5649_v7  ;;  %vm5681_vm10 = vcmp.ge.f32.partialorder %v5649_v7, 0.0 }
 0xb29   :  { %v5743_v54 = vsel %vm5679_vm1, %v5647_v44, %v5711_v35  ;;  %v5493_v43 = vadd.f32 %v12970_v62, %v5445_v32  ;;  %vm15401_vm1 = vmmov %vm15393_vm2  ;;  %v5494_v34 = vadd.f32 %v12991_v39, %v5445_v32 }
 0xb2a   :  { %5821 = vrot.lane.b32.xlu0 %v5743_v54, %s9145_s0  ;;  %v5745_v33 = vsel %vm5681_vm10, %v5649_v7, %v5713_v8  ;;  %vm15402_vm10 = vmmov %vm15401_vm1 }
 0xb2b   :  { %5825 = vrot.lane.b32.xlu1 %v5745_v33, %s9145_s0 }
 0xb2d   :  { %v13094_v22 = vpop.permute.xlu2 %5817 }
 0xb32   :  { %5579 = vrot.lane.b32.xlu0 %v5408_v15, %s9145_s0  ;;  %v15399_v15 = vld [vmem:[#allocation63_spill] sm:$0xff] }
 0xb33   :  { %5583 = vrot.lane.b32.xlu1 %v5410_v59, %s9145_s0  ;;  %v15400_v59 = vunpack.i.h.bf16 %v15399_v15 }
 0xb35   :  { %v5576_v55 = vpop.permute.xlu2 %5575 }
 0xb36   :  { %v5652_v14 = vadd.f32 %v5576_v55, %v5492_v51 }
 0xb38   :  { %v5716_v49 = vmul.f32 0.2, %v5652_v14  ;;  %vm5684_vm12 = vcmp.ge.f32.partialorder %v5652_v14, 0.0 }
 0xb3a   :  { %5585 = vrot.lane.b32.xlu0 %v5411_v47, %s9145_s0  ;;  %v5748_v19 = vsel %vm5684_vm12, %v5652_v14, %v5716_v49  ;;  %v5431_v47 = vrot.slane %v12695_v30, 4 }
 0xb3b   :  { %5831 = vrot.lane.b32.xlu1 %v5748_v19, %s9145_s0 }
 0xb3c   :  { %v5447_v49 = vperm.slane %v5431_v47, 0 }
 0xb43   :  { %5589 = vrot.lane.b32.xlu1 %v5413_v36, %s9145_s0  ;;  %v5497_v36 = vadd.f32 %v12970_v62, %v5447_v49 }
 0xb55   :  { %v5814_v6 = vpop.permute.xlu1 %5813 }
 0xb56   :  { %v5810_v24 = vpop.permute.xlu0 %5809 }
 0xb57   :  { %8393 = vmatmul.msk.f32.gmra.mxu1 %vm15390_vm14, %v5810_v24 }
 0xb5d   :  { %v5572_v45 = vpop.permute.xlu1 %5571 }
 0xb5e   :  { %v5568_v37 = vpop.permute.xlu0 %5567  ;;  %v5650_v5 = vadd.f32 %v5572_v45, %v5490_v42 }
 0xb5f   :  { %v5648_v52 = vadd.f32 %v5568_v37, %v5488_v23  ;;  %8394 = vmatmul.msk.f32.gmra.mxu1 %vm15391_vm11, %v5812_v41  ;;  %v5491_v41 = vadd.f32 %v12970_v62, %v5444_v18  ;;  %v5385_v18 = vmul.f32 %v15400_v59, %v12635_v63  ;;  %v5430_v23 = vrot.slane %v12695_v30, 3 }
 0xb60   :  { %v5714_v48 = vmul.f32 0.2, %v5650_v5  ;;  %vm5682_vm6 = vcmp.ge.f32.partialorder %v5650_v5, 0.0 }
 0xb61   :  { %v5712_v53 = vmul.f32 0.2, %v5648_v52  ;;  %vm5680_vm9 = vcmp.ge.f32.partialorder %v5648_v52, 0.0  ;;  %v5417_v56 = vadd.f32 %v5385_v18, %v12869_v1  ;;  %v15403_v1 = vunpack.i.l.bf16 %v15399_v15 }
 0xb62   :  { %v5746_v29 = vsel %vm5682_vm6, %v5650_v5, %v5714_v48  ;;  %vm15406_vm6 = vmmov %vm15401_vm1 }
 0xb63   :  { %v5744_v16 = vsel %vm5680_vm9, %v5648_v52, %v5712_v53  ;;  %5827 = vrot.lane.b32.xlu0 %v5746_v29, %s9145_s0  ;;  %v5383_v19 = vmul.f32 %v15403_v1, %v12635_v63  ;;  %v5446_v52 = vperm.slane %v5430_v23, 0 }
 0xb64   :  { %5823 = vrot.lane.b32.xlu2 %v5744_v16, %s9145_s0 }
 0xb65   :  { %v5820_v50 = vpop.permute.xlu1 %5819  ;;  %v5415_v24 = vadd.f32 %v5383_v19, %v12827_v40  ;;  %v5496_v53 = vadd.f32 %v12991_v39, %v5446_v52 }
 0xb66   :  { %v5574_v13 = vpop.permute.xlu0 %5573 }
 0xb67   :  { %8395 = vmatmul.msk.f32.gmra.mxu1 %vm15393_vm2, %v5814_v6  ;;  %v5651_v44 = vadd.f32 %v5574_v13, %v5491_v41  ;;  %v5432_v6 = vrot.slane %v12695_v30, 5  ;;  %v5386_v13 = vmul.f32 %v15405_v4, %v12934_v2  ;;  %vm15409_vm2 = vmmov %vm15401_vm1 }
 0xb69   :  { %v5715_v20 = vmul.f32 0.2, %v5651_v44  ;;  %vm5683_vm4 = vcmp.ge.f32.partialorder %v5651_v44, 0.0  ;;  %v13164_v45 = vperm.slane %v5432_v6, 0 }
 0xb6b   :  { %v5747_v33 = vsel %vm5683_vm4, %v5651_v44, %v5715_v20  ;;  %v5499_v5 = vadd.f32 %v12970_v62, %v13164_v45  ;;  %v5495_v44 = vadd.f32 %v12970_v62, %v5446_v52  ;;  %vm15411_vm4 = vmmov %vm15401_vm1 }
 0xb6c   :  { %5581 = vrot.lane.b32.xlu2 %v5409_v61, %s9145_s0  ;;  %v5418_v61 = vadd.f32 %v5386_v13, %v12875_v26 }
 0xb6d   :  { %v5578_v17 = vpop.permute.xlu1 %5577 }
 0xb6e   :  { %v5816_v35 = vpop.permute.xlu0 %5815  ;;  %v5653_v7 = vadd.f32 %v5578_v17, %v5493_v43  ;;  %v15407_v17 = vld [vmem:[#allocation42_spill] sm:$0xff] }
 0xb6f   :  { %8396 = vmatmul.msk.f32.gmra.mxu1 %vm15394_vm13, %v5816_v35  ;;  %v15408_v35 = vld [vmem:[#allocation27_spill] sm:$0xff] }
 0xb70   :  { %v5717_v8 = vmul.f32 0.2, %v5653_v7  ;;  %vm5685_vm0 = vcmp.ge.f32.partialorder %v5653_v7, 0.0 }
 0xb72   :  { %v5749_v54 = vsel %vm5685_vm0, %v5653_v7, %v5717_v8  ;;  %v13181_v7 = vadd.f32 %v15408_v35, %v15407_v17  ;;  %vm15412_vm0 = vmmov %vm15401_vm1  ;;  %v15420_v17 = vld [vmem:[#allocation53_spill] sm:$0xff] }
 0xb73   :  { %5833 = vrot.lane.b32.xlu0 %v5749_v54, %s9145_s0 }
 0xb74   :  { %5829 = vrot.lane.b32.xlu2 %v5747_v33, %s9145_s0  ;;  %v4444_v26 = vperm.slane %v13181_v7, 0  ;;  %v15410_v33 = vunpack.i.l.bf16 %v15404_v27  ;;  %v4457_v47 = vperm.slane %v13181_v7, 1  ;;  %v4470_v23 = vperm.slane %v13181_v7, 2 }
 0xb75   :  { %v4522_v13 = vperm.slane %v13181_v7, 6 }
 0xb76   :  { %v5384_v28 = vmul.f32 %v15410_v33, %v12934_v2 }
 0xb77   :  { %8397 = vmatmul.msk.f32.gmra.mxu1 %vm15398_vm8, %v13094_v22  ;;  %vm15413_vm8 = vmmov %vm15412_vm0 }
 0xb78   :  { %v5416_v58 = vadd.f32 %v5384_v28, %v12809_v21 }
 0xb7b   :  { %5591 = vrot.lane.b32.xlu0 %v5414_v38, %s9145_s0 }
 0xb7c   :  { %5587 = vrot.lane.b32.xlu2 %v5412_v57, %s9145_s0  ;;  %v5434_v57 = vrot.slane %v12695_v30, 7 }
 0xb7e   :  { %v5450_v15 = vperm.slane %v5434_v57, 0 }
 0xb7f   :  { %8398 = vmatmul.msk.f32.gmra.mxu1 %vm15401_vm1, %v5820_v50  ;;  %vm15414_vm1 = vmmov %vm15412_vm0 }
 0xb80   :  { %v5503_v2 = vadd.f32 %v12970_v62, %v5450_v15  ;;  %v5504_v27 = vadd.f32 %v12991_v39, %v5450_v15 }
 0xb83   :  { %5597 = vrot.lane.b32.xlu0 %v5417_v56, %s9145_s0  ;;  %v5498_v56 = vadd.f32 %v12991_v39, %v5447_v49 }
 0xb9c   :  { %v5822_v25 = vpop.permute.xlu0 %5821 }
 0xb9d   :  { %8399 = vmatmul.msk.f32.gmra.mxu1 %vm15402_vm10, %v5822_v25  ;;  %v5826_v10 = vpop.permute.xlu1 %5825 }
 0xba4   :  { %v5580_v22 = vpop.permute.xlu0 %5579 }
 0xba5   :  { %v5654_v9 = vadd.f32 %v5580_v22, %v5494_v34  ;;  %v5584_v51 = vpop.permute.xlu1 %5583 }
 0xba6   :  { %v5656_v40 = vadd.f32 %v5584_v51, %v5496_v53  ;;  %v4509_v53 = vperm.slane %v13181_v7, 5 }
 0xba7   :  { %vm5686_vm12 = vcmp.ge.f32.partialorder %v5654_v9, 0.0  ;;  %v5718_v55 = vmul.f32 0.2, %v5654_v9 }
 0xba8   :  { %v5720_v41 = vmul.f32 0.2, %v5656_v40  ;;  %vm5688_vm9 = vcmp.ge.f32.partialorder %v5656_v40, 0.0 }
 0xba9   :  { %v5750_v14 = vsel %vm5686_vm12, %v5654_v9, %v5718_v55  ;;  %v5433_v55 = vrot.slane %v12695_v30, 6 }
 0xbaa   :  { %5835 = vrot.lane.b32.xlu2 %v5750_v14, %s9145_s0  ;;  %v5752_v32 = vsel %vm5688_vm9, %v5656_v40, %v5720_v41  ;;  %v5500_v14 = vadd.f32 %v12991_v39, %v13164_v45  ;;  %v15416_v45 = vld [vmem:[#allocation8_spill] sm:$0xff]  ;;  %vm15418_vm9 = vmmov %vm15412_vm0 }
 0xbab   :  { %v5449_v49 = vperm.slane %v5433_v55, 0 }
 0xbac   :  { %v5586_v11 = vpop.permute.xlu0 %5585 }
 0xbad   :  { %v5832_v0 = vpop.permute.xlu1 %5831  ;;  %v5657_v42 = vadd.f32 %v5586_v11, %v5497_v36  ;;  %v5501_v19 = vadd.f32 %v12970_v62, %v5449_v49  ;;  %v4483_v62 = vperm.slane %v13181_v7, 3 }
 0xbaf   :  { %v5721_v37 = vmul.f32 0.2, %v5657_v42  ;;  %vm5689_vm14 = vcmp.ge.f32.partialorder %v5657_v42, 0.0 }
 0xbb1   :  { %v5753_v16 = vsel %vm5689_vm14, %v5657_v42, %v5721_v37  ;;  %vm15415_vm14 = vmmov %vm15412_vm0  ;;  %v15417_v37 = vld [vmem:[#allocation9_spill] sm:$0xff] }
 0xbb2   :  { %5593 = vrot.lane.b32.xlu2 %v5415_v24, %s9145_s0 }
 0xbb5   :  { %v5590_v63 = vpop.permute.xlu1 %5589 }
 0xbb6   :  { %v5659_v48 = vadd.f32 %v5590_v63, %v5499_v5  ;;  %v4496_v5 = vperm.slane %v13181_v7, 4 }
 0xbb8   :  { %v5723_v29 = vmul.f32 0.2, %v5659_v48  ;;  %vm5691_vm11 = vcmp.ge.f32.partialorder %v5659_v48, 0.0 }
 0xbba   :  { %5841 = vrot.lane.b32.xlu2 %v5753_v16, %s9145_s0  ;;  %v5755_v50 = vsel %vm5691_vm11, %v5659_v48, %v5723_v29  ;;  %v5502_v16 = vadd.f32 %v12991_v39, %v5449_v49  ;;  %v4535_v39 = vperm.slane %v13181_v7, 7  ;;  %v15426_v49 = vmov 0  }
 0xbbb   :  { %5845 = vrot.lane.b32.xlu0 %v5755_v50, %s9145_s0 }
 0xbbe   :  { %v5824_v3 = vpop.permute.xlu2 %5823 }
 0xbbf   :  { %8400 = vmatmul.msk.f32.gmra.mxu1 %vm15406_vm6, %v5824_v3 }
 0xbc2   :  { %5599 = vrot.lane.b32.xlu2 %v5418_v61, %s9145_s0 }
 0xbc3   :  { %5839 = vrot.lane.b32.xlu0 %v5752_v32, %s9145_s0 }
 0xbc6   :  { %v5582_v43 = vpop.permute.xlu2 %5581 }
 0xbc7   :  { %v5655_v20 = vadd.f32 %v5582_v43, %v5495_v44  ;;  %8401 = vmatmul.msk.f32.gmra.mxu1 %vm15409_vm2, %v5826_v10  ;;  %vm15419_vm2 = vmmov %vm15412_vm0  ;;  %v5970_v44 = vpop.f32.mrf.mxu1 }
 0xbc9   :  { %v5719_v8 = vmul.f32 0.2, %v5655_v20  ;;  %vm5687_vm13 = vcmp.ge.f32.partialorder %v5655_v20, 0.0 }
 0xbcb   :  { %v5751_v54 = vsel %vm5687_vm13, %v5655_v20, %v5719_v8  ;;  %4455 = vperm.xlu0 %8670, %v4444_v26   ;;  %v15421_v20 = vld [vmem:[#allocation39_spill] sm:$0xff] }
 0xbcc   :  { %5837 = vrot.lane.b32.xlu1 %v5751_v54, %s9145_s0  ;;  %v13232_v8 = vadd.f32 %v15421_v20, %v15420_v17 }
 0xbce   :  { %v5830_v46 = vpop.permute.xlu2 %5829  ;;  %v4600_v54 = vperm.slane %v13232_v8, 4  ;;  %v4574_v33 = vperm.slane %v13232_v8, 2  ;;  %v4587_v7 = vperm.slane %v13232_v8, 3  ;;  %v4613_v55 = vperm.slane %v13232_v8, 5 }
 0xbd4   :  { %5595 = vrot.lane.b32.xlu1 %v5416_v58, %s9145_s0 }
 0xbd5   :  { %v5828_v60 = vpop.permute.xlu0 %5827 }
 0xbd6   :  { %8402 = vmatmul.msk.f32.gmra.mxu1 %vm15411_vm4, %v5828_v60  ;;  %v5588_v18 = vpop.permute.xlu2 %5587  ;;  %v4548_v60 = vperm.slane %v13232_v8, 0 }
 0xbd7   :  { %v5658_v10 = vadd.f32 %v5588_v18, %v5498_v56 }
 0xbd9   :  { %v5722_v22 = vmul.f32 0.2, %v5658_v10  ;;  %vm5690_vm12 = vcmp.ge.f32.partialorder %v5658_v10, 0.0 }
 0xbdb   :  { %v5754_v9 = vsel %vm5690_vm12, %v5658_v10, %v5722_v22  ;;  %vm15423_vm12 = vmmov %vm15412_vm0 }
 0xbde   :  { %8403 = vmatmul.msk.f32.gmra.mxu1 %vm15412_vm0, %v5830_v46  ;;  %v5973_v46 = vpop.f32.mrf.mxu1 }
 0xbe5   :  { %v5834_v12 = vpop.permute.xlu0 %5833 }
 0xbe6   :  { %8404 = vmatmul.msk.f32.gmra.mxu1 %vm15413_vm8, %v5832_v0  ;;  %vm15422_vm8 = vmmov %vm15412_vm0 }
 0xbed   :  { %v5592_v38 = vpop.permute.xlu0 %5591 }
 0xbee   :  { %8405 = vmatmul.msk.f32.gmra.mxu1 %vm15414_vm1, %v5834_v12  ;;  %v5660_v1 = vadd.f32 %v5592_v38, %v5500_v14 }
 0xbf0   :  { %v5724_v36 = vmul.f32 0.2, %v5660_v1  ;;  %vm5692_vm11 = vcmp.ge.f32.partialorder %v5660_v1, 0.0 }
 0xbf2   :  { %v5756_v42 = vsel %vm5692_vm11, %v5660_v1, %v5724_v36  ;;  %v4626_v36 = vperm.slane %v13232_v8, 6 }
 0xbf5   :  { %v5598_v21 = vpop.permute.xlu0 %5597 }
 0xbf6   :  { %v5663_v59 = vadd.f32 %v5598_v21, %v5503_v2  ;;  %v13252_v21 = vpop.f32.mrf.mxu1 }
 0xbf8   :  { %vm5695_vm10 = vcmp.ge.f32.partialorder %v5663_v59, 0.0  ;;  %v5727_v25 = vmul.f32 0.2, %v5663_v59 }
 0xbfa   :  { %v5759_v34 = vsel %vm5695_vm10, %v5663_v59, %v5727_v25 }
 0xbfb   :  { %5853 = vrot.lane.b32.xlu1 %v5759_v34, %s9145_s0  ;;  %v4639_v34 = vperm.slane %v13232_v8, 7 }
 0xc03   :  { %5843 = vrot.lane.b32.xlu1 %v5754_v9, %s9145_s0 }
 0xc04   :  { %v5836_v51 = vpop.permute.xlu2 %5835 }
 0xc05   :  { %8406 = vmatmul.msk.f32.gmra.mxu1 %vm15415_vm14, %v5836_v51  ;;  %vm15424_vm14 = vcmask 15360  }
 0xc06   :  { %vm15425_vm11 = vmmov %vm15424_vm14 }
 0xc0b   :  { %4468 = vperm.xlu1 %8668, %v4457_v47  }
 0xc0c   :  { %v5594_v11 = vpop.permute.xlu2 %5593 }
 0xc0d   :  { %v5661_v0 = vadd.f32 %v5594_v11, %v5501_v19 }
 0xc0f   :  { %v5725_v6 = vmul.f32 0.2, %v5661_v0  ;;  %vm5693_vm6 = vcmp.ge.f32.partialorder %v5661_v0, 0.0 }
 0xc11   :  { %v5757_v24 = vsel %vm5693_vm6, %v5661_v0, %v5725_v6  ;;  %vm15427_vm6 = vmmov %vm15425_vm11 }
 0xc12   :  { %5849 = vrot.lane.b32.xlu2 %v5757_v24, %s9145_s0 }
 0xc13   :  { %5847 = vrot.lane.b32.xlu1 %v5756_v42, %s9145_s0 }
 0xc14   :  { %v5842_v63 = vpop.permute.xlu2 %5841 }
 0xc1a   :  { %4475 = vperm.xlu2 %8669, %v4470_v23  }
 0xc1b   :  { %4481 = vperm.xlu1 %8668, %v4470_v23   ;;  %v13264_v23 = vpop.f32.mrf.mxu1 }
 0xc1c   :  { %v5600_v29 = vpop.permute.xlu2 %5599 }
 0xc1d   :  { %v5664_v3 = vadd.f32 %v5600_v29, %v5504_v27 }
 0xc1f   :  { %v5728_v32 = vmul.f32 0.2, %v5664_v3  ;;  %vm5696_vm4 = vcmp.ge.f32.partialorder %v5664_v3, 0.0 }
 0xc21   :  { %v5760_v43 = vsel %vm5696_vm4, %v5664_v3, %v5728_v32  ;;  %v15430_v3 = vmov 1  }
 0xc22   :  { %4449 = vperm.xlu2 %8669, %v4444_v26   ;;  %v4561_v26 = vperm.slane %v13232_v8, 1 }
 0xc23   :  { %8691 = vset.pattern.permute.xlu1 %v15416_v45 }
 0xc2a   :  { %8692 = vset.pattern.permute.xlu2 %v15417_v37 }
 0xc2b   :  { %4488 = vperm.xlu1 %8691, %v4483_v62  }
 0xc2d   :  { %v13216_v52 = vpop.permute.xlu0 %5845 }
 0xc32   :  { %4494 = vperm.xlu2 %8692, %v4483_v62  }
 0xc33   :  { %4501 = vperm.xlu1 %8691, %v4496_v5  }
 0xc35   :  { %v5840_v40 = vpop.permute.xlu0 %5839 }
 0xc3a   :  { %4507 = vperm.xlu2 %8692, %v4496_v5  }
 0xc3b   :  { %8693 = vset.pattern.permute.xlu1 %v15417_v37 }
 0xc3d   :  { %v4456_v57 = vpop.permute.xlu0 %4455 }
 0xc3e   :  { %v5838_v48 = vpop.permute.xlu1 %5837  ;;  %vm6067_vm1 = vcmp.gt.f32.partialorder %v4456_v57, 0.0 }
 0xc3f   :  { %8407 = vmatmul.msk.f32.gmra.mxu1 %vm15418_vm9, %v5838_v48  ;;  %v6163_v15 = vsel %vm6067_vm1, %v5973_v46, -1e+30  ;;  %vm15428_vm9 = vmmov %vm15427_vm6 }
 0xc40   :  { %v6195_v18 = vsel %vm15424_vm14, %v6163_v15, -inf  ;;  %vm15432_vm14 = vmmov %vm15427_vm6 }
 0xc42   :  { %8694 = vset.pattern.permute.xlu2 %v15416_v45 }
 0xc43   :  { %4520 = vperm.xlu1 %8693, %v4509_v53  }
 0xc46   :  { %v5596_v50 = vpop.permute.xlu1 %5595 }
 0xc47   :  { %v5662_v4 = vadd.f32 %v5596_v50, %v5502_v16  ;;  %8408 = vmatmul.msk.f32.gmra.mxu1 %vm15419_vm2, %v5840_v40  ;;  %v5982_v40 = vpop.f32.mrf.mxu1  ;;  %vm15429_vm2 = vmmov %vm15412_vm0 }
 0xc49   :  { %v5726_v41 = vmul.f32 0.2, %v5662_v4  ;;  %vm5694_vm13 = vcmp.ge.f32.partialorder %v5662_v4, 0.0 }
 0xc4a   :  { %4527 = vperm.xlu2 %8694, %v4522_v13  }
 0xc4b   :  { %v5758_v61 = vsel %vm5694_vm13, %v5662_v4, %v5726_v41  ;;  %4533 = vperm.xlu1 %8693, %v4522_v13   ;;  %vm15431_vm13 = vmmov %vm15412_vm0 }
 0xc4c   :  { %5851 = vrot.lane.b32.xlu0 %v5758_v61, %s9145_s0 }
 0xc4f   :  { %8409 = vmatmul.msk.f32.gmra.mxu1 %vm15412_vm0, %v5842_v63  ;;  %v5985_v41 = vpop.f32.mrf.mxu1 }
 0xc52   :  { %5855 = vrot.lane.b32.xlu2 %v5760_v43, %s9145_s0 }
 0xc53   :  { %8695 = vset.pattern.permute.xlu1 %v15416_v45 }
 0xc54   :  { %4546 = vperm.xlu0 %8670, %v4535_v39  }
 0xc5a   :  { %4540 = vperm.xlu2 %8694, %v4535_v39   ;;  %v5988_v39 = vpop.f32.mrf.mxu1 }
 0xc5b   :  { %4566 = vperm.xlu1 %8695, %v4561_v26  }
 0xc5c   :  { %4611 = vperm.xlu0 %8670, %v4600_v54  }
 0xc62   :  { %8696 = vset.pattern.permute.xlu2 %v15417_v37 }
 0xc63   :  { %4579 = vperm.xlu1 %8695, %v4574_v33  }
 0xc64   :  { %8699 = vset.pattern.permute.xlu0 %v15416_v45 }
 0xc6a   :  { %4572 = vperm.xlu2 %8696, %v4561_v26  }
 0xc6b   :  { %8697 = vset.pattern.permute.xlu1 %v15417_v37 }
 0xc6c   :  { %4462 = vperm.xlu0 %8699, %v4457_v47   ;;  %v13242_v28 = vpop.permute.xlu2 %5849 }
 0xc6d   :  { %v13244_v58 = vpop.permute.xlu1 %5853 }
 0xc72   :  { %4585 = vperm.xlu2 %8696, %v4574_v33  }
 0xc73   :  { %4559 = vperm.xlu1 %8697, %v4548_v60  }
 0xc74   :  { %4514 = vperm.xlu0 %8699, %v4509_v53   ;;  %v13247_v12 = vpop.permute.xlu2 %4475 }
 0xc75   :  { %v5844_v38 = vpop.permute.xlu1 %5843 }
 0xc76   :  { %8410 = vmatmul.msk.f32.gmra.mxu1 %vm15422_vm8, %v5844_v38 }
 0xc7a   :  { %8698 = vset.pattern.permute.xlu2 %v15416_v45 }
 0xc7b   :  { %4598 = vperm.xlu1 %8697, %v4587_v7  }
 0xc7c   :  { %4553 = vperm.xlu0 %8699, %v4548_v60   ;;  %v4450_v2 = vpop.permute.xlu2 %4449 }
 0xc7d   :  { %vm6066_vm10 = vcmp.gt.f32.partialorder %v4450_v2, 0.0  ;;  %v13269_v48 = vpop.permute.xlu1 %4468 }
 0xc7e   :  { %v6162_v59 = vsel %vm6066_vm10, %v5970_v44, -1e+30  ;;  %8411 = vmatmul.msk.f32.gmra.mxu1 %vm15423_vm12, %v13216_v52  ;;  %vm6070_vm12 = vcmp.gt.f32.partialorder %v13247_v12, 0.0 }
 0xc7f   :  { %v6194_v56 = vsel %vm15425_vm11, %v6162_v59, -inf  ;;  %vm15433_vm11 = vmmov %vm15427_vm6 }
 0xc80   :  { %v6196_v25 = vmax.f32 %v6194_v56, %v6195_v18 }
 0xc82   :  { %v6197_v10 = vrot.slane %v6196_v25, 4  ;;  %4592 = vperm.xlu2 %8698, %v4587_v7  }
 0xc83   :  { %8700 = vset.pattern.permute.xlu1 %v15416_v45 }
 0xc84   :  { %v6198_v22 = vmax.f32 %v6196_v25, %v6197_v10  ;;  %4644 = vperm.xlu0 %8699, %v4639_v34   ;;  %v6166_v25 = vsel %vm6070_vm12, %v5982_v40, -1e+30  ;;  %vm15438_vm12 = vmmov %vm15431_vm13 }
 0xc85   :  { %v5848_v27 = vpop.permute.xlu1 %5847 }
 0xc86   :  { %v6199_v9 = vrot.slane %v6198_v22, 2  ;;  %8412 = vmatmul.msk.f32.gmra.mxu1 %vm15429_vm2, %v5848_v27 }
 0xc88   :  { %v6200_v51 = vmax.f32 %v6198_v22, %v6199_v9  ;;  %v6212_v9 = vsel %vm15433_vm11, %v6166_v25, -inf }
 0xc8a   :  { %v6201_v14 = vrot.slane %v6200_v51, 1  ;;  %4605 = vperm.xlu2 %8698, %v4600_v54  }
 0xc8b   :  { %4618 = vperm.xlu1 %8700, %v4613_v55  }
 0xc8c   :  { %v6202_v47 = vmax.f32 %v6200_v51, %v6201_v14  ;;  %8706 = vset.pattern.permute.xlu0 %v15426_v49  ;;  %v13291_v22 = vpop.permute.xlu2 %4494 }
 0xc8e   :  { %v6338_v1 = vsub.f32 %v6162_v59, %v6202_v47  ;;  %v6339_v19 = vsub.f32 %v6163_v15, %v6202_v47  ;;  %8413 = vmatmul.msk.f32.gmra.mxu1 %vm15431_vm13, %v13242_v28  ;;  %v13282_v59 = vpop.permute.xlu1 %4481 }
 0xc8f   :  { %vm6071_vm10 = vcmp.gt.f32.partialorder %v13282_v59, 0.0 }
 0xc90   :  { %v6370_v11 = vmul.f32 1.442695, %v6338_v1  ;;  %v6372_v0 = vmul.f32 1.442695, %v6339_v19  ;;  %v6167_v56 = vsel %vm6071_vm10, %v5985_v41, -1e+30 }
 0xc92   :  { %8971 = vpow2.f32 %v6370_v11  ;;  %8701 = vset.pattern.permute.xlu2 %v15417_v37 }
 0xc93   :  { %8973 = vpow2.f32 %v6372_v0  ;;  %4631 = vperm.xlu1 %8700, %v4626_v36  }
 0xc94   :  { %v13298_v19 = vpop.permute.xlu2 %4507 }
 0xc98   :  { %v8972_v6 = vpop.eup %8971 }
 0xc99   :  { %v8974_v24 = vpop.eup %8973  ;;  %v6434_v42 = vmul.f32 %v8972_v6, %v4450_v2 }
 0xc9a   :  { %v6435_v62 = vmul.f32 %v8974_v24, %v4456_v57  ;;  %4624 = vperm.xlu2 %8701, %v4613_v55   ;;  %v5991_v57 = vpop.f32.mrf.mxu1 }
 0xc9b   :  { %v6466_v5 = vsel %vm15427_vm6, %v6434_v42, 0.0  ;;  %8702 = vset.pattern.permute.xlu1 %v15417_v37 }
 0xc9c   :  { %v6467_v63 = vsel %vm15428_vm9, %v6435_v62, 0.0  ;;  %vm6075_vm9 = vcmp.gt.f32.partialorder %v13298_v19, 0.0 }
 0xc9d   :  { %v6468_v52 = vadd.f32 %v6467_v63, %v6466_v5  ;;  %v13288_v10 = vpop.permute.xlu1 %4488 }
 0xc9e   :  { %vm6072_vm2 = vcmp.gt.f32.partialorder %v13288_v10, 0.0 }
 0xc9f   :  { %v6469_v53 = vrot.slane %v6468_v52, 4  ;;  %v13310_v5 = vsel %vm6072_vm2, %v5988_v39, -1e+30 }
 0xca1   :  { %v6470_v29 = vadd.f32 %v6469_v53, %v6468_v52 }
 0xca2   :  { %4637 = vperm.xlu2 %8701, %v4626_v36   ;;  %v5994_v28 = vpop.f32.mrf.mxu1 }
 0xca3   :  { %v6471_v16 = vrot.slane %v6470_v29, 2  ;;  %4650 = vperm.xlu1 %8702, %v4639_v34   ;;  %v6213_v34 = vsel %vm15432_vm14, %v6167_v56, -inf  ;;  %vm15439_vm14 = vmmov %vm15438_vm12 }
 0xca4   :  { %v6214_v51 = vmax.f32 %v6212_v9, %v6213_v34  ;;  %v13320_v40 = vpop.permute.xlu2 %4527 }
 0xca5   :  { %v6472_v50 = vadd.f32 %v6471_v16, %v6470_v29  ;;  %v13296_v47 = vpop.permute.xlu1 %4501 }
 0xca6   :  { %v6215_v14 = vrot.slane %v6214_v51, 4  ;;  %vm6074_vm6 = vcmp.gt.f32.partialorder %v13296_v47, 0.0 }
 0xca7   :  { %v6473_v4 = vrot.slane %v6472_v50, 1  ;;  %v6170_v36 = vsel %vm6074_vm6, %v5994_v28, -1e+30 }
 0xca8   :  { %v6216_v1 = vmax.f32 %v6214_v51, %v6215_v14 }
 0xca9   :  { %v6474_v13 = vadd.f32 %v6473_v4, %v6472_v50 }
 0xcaa   :  { %8704 = vset.pattern.permute.xlu2 %v15430_v3  ;;  %v5997_v7 = vpop.f32.mrf.mxu1  ;;  %v6217_v0 = vrot.slane %v6216_v1, 2 }
 0xcab   :  { %v6610_v37 = vmax.f32 %v6474_v13, 1e-20  ;;  %8703 = vset.pattern.permute.xlu1 %v15430_v3  ;;  %v13305_v24 = vsel %vm6075_vm9, %v5997_v7, -1e+30 }
 0xcac   :  { %v5856_v39 = vpop.permute.xlu2 %5855 }
 0xcad   :  { %8975 = vrcp.f32 %v6610_v37  ;;  %v6637_v43 = vand.u32 2147483648, %v6610_v37  ;;  %v6635_v8 = vand.u32 2147483647, %v6610_v37  ;;  %vm6631_vm0 = vweird.f32 %v6610_v37 }
 0xcaf   :  { %v6638_v54 = vor.u32 1.1754944e-38, %v6637_v43  ;;  %vm6636_vm1 = vcmp.eq.f32.partialorder %v6635_v8, 8.507059e+37 }
 0xcb2   :  { %v13278_v15 = vpop.f32.mrf.mxu1 }
 0xcb3   :  { %v8976_v61 = vpop.eup %8975 }
 0xcb4   :  { %v6627_v32 = vmul.f32 %v8976_v61, %v6610_v37  ;;  %vm6632_vm4 = vweird.f32 %v8976_v61 }
 0xcb5   :  { %vm6633_vm8 = vmor %vm6631_vm0, %vm6632_vm4  ;;  %vm6073_vm4 = vcmp.gt.f32.partialorder %v13291_v22, 0.0 }
 0xcb6   :  { %v6628_v44 = vsub.f32 1.0, %v6627_v32  ;;  %vm15434_vm0 = vmmov %vm15433_vm11  ;;  %v13316_v53 = vsel %vm6073_vm4, %v5991_v57, -1e+30  ;;  %vm6069_vm11 = vcmp.gt.f32.partialorder %v13269_v48, 0.0 }
 0xcb7   :  { %vm15437_vm10 = vmmov %vm15434_vm0 }
 0xcb8   :  { %v6629_v17 = vmul.f32 %v8976_v61, %v6628_v44  ;;  %v6222_v27 = vsel %vm15437_vm10, %v13316_v53, -inf  ;;  %vm15440_vm9 = vmmov %vm15434_vm0  ;;  %vm6078_vm10 = vcmp.gt.f32.partialorder %v13320_v40, 0.0 }
 0xcb9   :  { %vm15441_vm4 = vmmov %vm15434_vm0 }
 0xcba   :  { %v6630_v26 = vadd.f32 %v8976_v61, %v6629_v17  ;;  %v13280_v2 = vpop.f32.mrf.mxu1 }
 0xcbc   :  { %v6634_v33 = vsel %vm6633_vm8, %v8976_v61, %v6630_v26  ;;  %vm15435_vm8 = vmmov %vm15434_vm0 }
 0xcbd   :  { %v6639_v60 = vsel %vm6636_vm1, %v6638_v54, %v6634_v33  ;;  %v6231_v52 = vsel %vm15435_vm8, %v13305_v24, -inf  ;;  %vm15436_vm1 = vmmov %vm15434_vm0  ;;  %v13331_v54 = vpop.permute.xlu1 %4520 }
 0xcbe   :  { %v6640_v46 = vmul.f32 %v6639_v60, %v6434_v42  ;;  %v6641_v38 = vmul.f32 %v6639_v60, %v6435_v62  ;;  %v5852_v6 = vpop.permute.xlu0 %5851  ;;  %v6230_v42 = vsel %vm15434_vm0, %v6170_v36, -inf  ;;  %v6218_v62 = vmax.f32 %v6216_v1, %v6217_v0  ;;  %vm15442_vm8 = vmmov %vm15436_vm1 }
 0xcbf   :  { %8414 = vmatmul.msk.f32.gmra.mxu1 %vm15431_vm13, %v5852_v6  ;;  %v6232_v29 = vmax.f32 %v6230_v42, %v6231_v52  ;;  %v6221_v16 = vsel %vm15436_vm1, %v13310_v5, -inf }
 0xcc0   :  { %6889 = vperm.xlu0 %8706, %v6641_v38   ;;  %7239 = vperm.xlu2 %8704, %v6641_v38   ;;  %v6219_v50 = vrot.slane %v6218_v62, 1  ;;  %v6223_v4 = vmax.f32 %v6221_v16, %v6222_v27  ;;  %v13355_v16 = vsel %vm6069_vm11, %v13264_v23, -1e+30  ;;  %vm15444_vm11 = vmmov %vm15436_vm1 }
 0xcc1   :  { %7235 = vperm.xlu1 %8703, %v6640_v46   ;;  %v6233_v13 = vrot.slane %v6232_v29, 4 }
 0xcc2   :  { %v13284_v18 = vpop.f32.mrf.mxu1  ;;  %v6220_v37 = vmax.f32 %v6218_v62, %v6219_v50  ;;  %v6224_v41 = vrot.slane %v6223_v4, 4 }
 0xcc3   :  { %v6234_v61 = vmax.f32 %v6232_v29, %v6233_v13  ;;  %v13351_v29 = vpop.permute.xlu2 %4540  ;;  %v6204_v13 = vsel %vm15436_vm1, %v13355_v16, -inf }
 0xcc4   :  { %v6342_v43 = vsub.f32 %v6166_v25, %v6220_v37  ;;  %v6343_v17 = vsub.f32 %v6167_v56, %v6220_v37  ;;  %v6225_v8 = vmax.f32 %v6223_v4, %v6224_v41  ;;  %vm6080_vm0 = vcmp.gt.f32.partialorder %v13351_v29, 0.0 }
 0xcc5   :  { %v6235_v26 = vrot.slane %v6234_v61, 2  ;;  %v13337_v25 = vpop.permute.xlu1 %4533 }
 0xcc6   :  { %v13328_v44 = vpop.permute.xlu0 %4546  ;;  %v6378_v33 = vmul.f32 1.442695, %v6342_v43  ;;  %v6380_v60 = vmul.f32 1.442695, %v6343_v17  ;;  %vm6079_vm13 = vcmp.gt.f32.partialorder %v13337_v25, 0.0 }
 0xcc7   :  { %8415 = vmatmul.msk.f32.gmra.mxu1 %vm15438_vm12, %v13244_v58  ;;  %v6236_v58 = vmax.f32 %v6234_v61, %v6235_v26  ;;  %vm6081_vm2 = vcmp.gt.f32.partialorder %v13328_v44, 0.0  ;;  %vm15443_vm12 = vmmov %vm15436_vm1 }
 0xcc8   :  { %8705 = vset.pattern.permute.xlu2 %v15426_v49  ;;  %8977 = vpow2.f32 %v6378_v33 }
 0xcc9   :  { %6884 = vperm.xlu2 %8705, %v6640_v46   ;;  %v6226_v46 = vrot.slane %v6225_v8, 2  ;;  %8979 = vpow2.f32 %v6380_v60  ;;  %v6237_v7 = vrot.slane %v6236_v58, 1 }
 0xcca   :  { %v13294_v55 = vpop.f32.mrf.mxu1 }
 0xccb   :  { %v6227_v28 = vmax.f32 %v6225_v8, %v6226_v46  ;;  %v6238_v9 = vmax.f32 %v6236_v58, %v6237_v7 }
 0xccd   :  { %v6228_v34 = vrot.slane %v6227_v28, 1  ;;  %v6346_v42 = vsub.f32 %v6170_v36, %v6238_v9  ;;  %v6347_v52 = vsub.f32 %v13305_v24, %v6238_v9  ;;  %v13360_v50 = vpop.permute.xlu1 %4566 }
 0xcce   :  { %v13335_v57 = vpop.permute.xlu0 %4611  ;;  %v8978_v56 = vpop.eup %8977 }
 0xccf   :  { %8416 = vmatmul.msk.f32.gmra.mxu1 %vm15439_vm14, %v5856_v39  ;;  %v8980_v51 = vpop.eup %8979  ;;  %v13342_v1 = vmul.f32 %v8978_v56, %v13247_v12  ;;  %v6229_v6 = vmax.f32 %v6227_v28, %v6228_v34  ;;  %v6388_v23 = vmul.f32 1.442695, %v6347_v52  ;;  %vm6077_vm14 = vcmp.gt.f32.partialorder %v13331_v54, 0.0 }
 0xcd0   :  { %v13348_v62 = vmul.f32 %v8980_v51, %v13282_v59  ;;  %v6386_v59 = vmul.f32 1.442695, %v6346_v42  ;;  %v13403_v28 = vsel %vm6077_vm14, %v13280_v2, -1e+30 }
 0xcd1   :  { %8707 = vset.pattern.permute.xlu2 %v15430_v3  ;;  %v6484_v12 = vsel %vm15440_vm9, %v13342_v1, 0.0  ;;  %v6344_v36 = vsub.f32 %v13310_v5, %v6229_v6  ;;  %v6345_v5 = vsub.f32 %v13316_v53, %v6229_v6  ;;  %v13390_v53 = vsel %vm6078_vm10, %v13284_v18, -1e+30  ;;  %vm15445_vm9 = vmmov %vm15436_vm1 }
 0xcd2   :  { %v13300_v11 = vpop.f32.mrf.mxu1  ;;  %v6485_v27 = vsel %vm15441_vm4, %v13348_v62, 0.0  ;;  %8981 = vpow2.f32 %v6386_v59  ;;  %vm15448_vm4 = vmmov %vm15436_vm1 }
 0xcd3   :  { %v6486_v43 = vadd.f32 %v6485_v27, %v6484_v12  ;;  %v6382_v39 = vmul.f32 1.442695, %v6344_v36  ;;  %v13385_v17 = vsel %vm6080_vm0, %v13300_v11, -1e+30  ;;  %8983 = vpow2.f32 %v6388_v23  ;;  %vm15449_vm0 = vmmov %vm15436_vm1 }
 0xcd4   :  { %v6384_v26 = vmul.f32 1.442695, %v6345_v5  ;;  %v6257_v11 = vsel %vm15445_vm9, %v13385_v17, -inf  ;;  %v6240_v36 = vsel %vm15448_vm4, %v13403_v28, -inf  ;;  %vm15452_vm14 = vmmov %vm15449_vm0 }
 0xcd5   :  { %v6487_v46 = vrot.slane %v6486_v43, 4  ;;  %8985 = vpow2.f32 %v6382_v39  ;;  %v13405_v56 = vpop.permute.xlu1 %4579  ;;  %vm15454_vm9 = vmmov %vm15449_vm0 }
 0xcd6   :  { %8987 = vpow2.f32 %v6384_v26  ;;  %vm15456_vm4 = vmmov %vm15449_vm0 }
 0xcd7   :  { %v6488_v12 = vadd.f32 %v6487_v46, %v6486_v43 }
 0xcd8   :  { %v8982_v51 = vpop.eup %8981 }
 0xcd9   :  { %v8984_v6 = vpop.eup %8983  ;;  %v13415_v59 = vmul.f32 %v8982_v51, %v13296_v47  ;;  %v6489_v26 = vrot.slane %v6488_v12, 2 }
 0xcda   :  { %v13312_v63 = vpop.f32.mrf.mxu1 }
 0xcdb   :  { %v13377_v37 = vsel %vm6081_vm2, %v13312_v63, -1e+30  ;;  %vm15446_vm2 = vmmov %vm15436_vm1  ;;  %v6502_v47 = vsel %vm15449_vm0, %v13415_v59, 0.0 }
 0xcdc   :  { %v6258_v63 = vsel %vm15443_vm12, %v13377_v37, -inf  ;;  %v6248_v18 = vsel %vm15446_vm2, %v13390_v53, -inf  ;;  %vm15451_vm12 = vmmov %vm15449_vm0 }
 0xcdd   :  { %v6259_v58 = vmax.f32 %v6257_v11, %v6258_v63 }
 0xcde   :  { %v13344_v0 = vpop.permute.xlu0 %4462 }
 0xcdf   :  { %vm6068_vm6 = vcmp.gt.f32.partialorder %v13344_v0, 0.0  ;;  %v6260_v2 = vrot.slane %v6259_v58, 4 }
 0xce0   :  { %v13365_v24 = vsel %vm6068_vm6, %v13252_v21, -1e+30  ;;  %v13380_v21 = vsel %vm6079_vm13, %v13294_v55, -1e+30  ;;  %vm15447_vm13 = vmmov %vm15436_vm1 }
 0xce1   :  { %v6203_v4 = vsel %vm15442_vm8, %v13365_v24, -inf  ;;  %v6249_v33 = vsel %vm15444_vm11, %v13380_v21, -inf  ;;  %vm15450_vm8 = vmmov %vm15449_vm0 }
 0xce2   :  { %v13326_v32 = vpop.f32.mrf.mxu1  ;;  %v6205_v41 = vmax.f32 %v6203_v4, %v6204_v13  ;;  %v6250_v7 = vmax.f32 %v6248_v18, %v6249_v33  ;;  %v13418_v13 = vmul.f32 %v8984_v6, %v13298_v19  ;;  %vm15453_vm11 = vmmov %vm15449_vm0 }
 0xce4   :  { %v6206_v55 = vrot.slane %v6205_v41, 4  ;;  %v6251_v27 = vrot.slane %v6250_v7, 4  ;;  %v6503_v19 = vsel %vm15450_vm8, %v13418_v13, 0.0  ;;  %vm15457_vm8 = vmmov %vm15449_vm0 }
 0xce6   :  { %v13382_v61 = vpop.permute.xlu0 %4514  ;;  %v6207_v60 = vmax.f32 %v6205_v41, %v6206_v55  ;;  %v6261_v55 = vmax.f32 %v6259_v58, %v6260_v2  ;;  %v6252_v33 = vmax.f32 %v6250_v7, %v6251_v27 }
 0xce7   :  { %vm6076_vm6 = vcmp.gt.f32.partialorder %v13382_v61, 0.0 }
 0xce8   :  { %v6208_v34 = vrot.slane %v6207_v60, 2  ;;  %v13408_v9 = vsel %vm6076_vm6, %v13278_v15, -1e+30  ;;  %v8986_v15 = vpop.eup %8985  ;;  %v6262_v51 = vrot.slane %v6261_v55, 2  ;;  %vm6084_vm6 = vcmp.gt.f32.partialorder %v13360_v50, 0.0 }
 0xce9   :  { %v6239_v52 = vsel %vm15447_vm13, %v13408_v9, -inf  ;;  %v8988_v43 = vpop.eup %8987  ;;  %vm15455_vm13 = vmmov %vm15449_vm0 }
 0xcea   :  { %v13333_v38 = vpop.f32.mrf.mxu1  ;;  %v6209_v42 = vmax.f32 %v6207_v60, %v6208_v34  ;;  %v6241_v4 = vmax.f32 %v6239_v52, %v6240_v36  ;;  %v13427_v60 = vpop.permute.xlu1 %4559  ;;  %v13434_v34 = vmul.f32 %v8986_v15, %v13288_v10  ;;  %v13437_v58 = vmul.f32 %v8988_v43, %v13291_v22 }
 0xceb   :  { %vm6083_vm10 = vcmp.gt.f32.partialorder %v13427_v60, 0.0 }
 0xcec   :  { %v6210_v23 = vrot.slane %v6209_v42, 1  ;;  %v6242_v39 = vrot.slane %v6241_v4, 4  ;;  %v6493_v10 = vsel %vm15451_vm12, %v13434_v34, 0.0  ;;  %v13448_v22 = vsel %vm6083_vm10, %v13333_v38, -1e+30  ;;  %vm15458_vm12 = vmmov %vm15449_vm0 }
 0xced   :  { %v6494_v27 = vsel %vm15452_vm14, %v13437_v58, 0.0  ;;  %v6267_v38 = vsel %vm15454_vm9, %v13448_v22, -inf  ;;  %vm15459_vm14 = vmmov %vm15449_vm0 }
 0xcee   :  { %v6211_v41 = vmax.f32 %v6209_v42, %v6210_v23  ;;  %v13422_v63 = vpop.permute.xlu0 %4553  ;;  %v6243_v18 = vmax.f32 %v6241_v4, %v6242_v39  ;;  %v6253_v42 = vrot.slane %v6252_v33, 2  ;;  %v13452_v23 = vpop.permute.xlu2 %4572  ;;  %v6263_v4 = vmax.f32 %v6261_v55, %v6262_v51  ;;  %vm15462_vm9 = vmmov %vm15449_vm0 }
 0xcef   :  { %vm6082_vm1 = vcmp.gt.f32.partialorder %v13422_v63, 0.0  ;;  %v6495_v43 = vadd.f32 %v6494_v27, %v6493_v10  ;;  %vm6085_vm2 = vcmp.gt.f32.partialorder %v13452_v23, 0.0 }
 0xcf0   :  { %v6340_v11 = vsub.f32 %v13365_v24, %v6211_v41  ;;  %v6341_v46 = vsub.f32 %v13355_v16, %v6211_v41  ;;  %v6504_v24 = vadd.f32 %v6503_v19, %v6502_v47  ;;  %v13441_v52 = vsel %vm6082_vm1, %v13326_v32, -1e+30 }
 0xcf1   :  { %v6490_v16 = vadd.f32 %v6489_v26, %v6488_v12  ;;  %v6244_v36 = vrot.slane %v6243_v18, 2  ;;  %v6266_v32 = vsel %vm15453_vm11, %v13441_v52, -inf  ;;  %v6254_v15 = vmax.f32 %v6252_v33, %v6253_v42  ;;  %vm15460_vm11 = vmmov %vm15449_vm0 }
 0xcf2   :  { %v13339_v14 = vpop.f32.mrf.mxu1  ;;  %v6374_v7 = vmul.f32 1.442695, %v6340_v11  ;;  %v6376_v6 = vmul.f32 1.442695, %v6341_v46  ;;  %v6505_v12 = vrot.slane %v6504_v24, 4  ;;  %v6268_v47 = vmax.f32 %v6266_v32, %v6267_v38 }
 0xcf3   :  { %v6245_v41 = vmax.f32 %v6243_v18, %v6244_v36  ;;  %v6491_v39 = vrot.slane %v6490_v16, 1  ;;  %v6264_v55 = vrot.slane %v6263_v4, 1  ;;  %v13461_v19 = vsel %vm6084_vm6, %v13339_v14, -1e+30  ;;  %vm15461_vm6 = vmmov %vm15449_vm0 }
 0xcf4   :  { %8989 = vpow2.f32 %v6374_v7  ;;  %v6506_v46 = vadd.f32 %v6505_v12, %v6504_v24  ;;  %v6255_v51 = vrot.slane %v6254_v15, 1  ;;  %v6496_v36 = vrot.slane %v6495_v43, 4 }
 0xcf5   :  { %8991 = vpow2.f32 %v6376_v6  ;;  %v6246_v26 = vrot.slane %v6245_v41, 1  ;;  %v6492_v6 = vadd.f32 %v6491_v39, %v6490_v16  ;;  %v6275_v27 = vsel %vm15455_vm13, %v13461_v19, -inf }
 0xcf6   :  { %v6269_v24 = vrot.slane %v6268_v47, 4  ;;  %v6265_v32 = vmax.f32 %v6263_v4, %v6264_v55  ;;  %v6497_v4 = vadd.f32 %v6496_v36, %v6495_v43  ;;  %vm6086_vm1 = vcmp.gt.f32.partialorder %v13405_v56, 0.0 }
 0xcf7   :  { %v6247_v18 = vmax.f32 %v6245_v41, %v6246_v26  ;;  %v6256_v41 = vmax.f32 %v6254_v15, %v6255_v51 }
 0xcf8   :  { %v6270_v55 = vmax.f32 %v6268_v47, %v6269_v24  ;;  %v6352_v45 = vsub.f32 %v13385_v17, %v6265_v32 }
 0xcf9   :  { %v6348_v12 = vsub.f32 %v13408_v9, %v6247_v18  ;;  %v6349_v16 = vsub.f32 %v13403_v28, %v6247_v18  ;;  %v13485_v9 = vmax.f32 %v6492_v6, 1e-20  ;;  %v6353_v28 = vsub.f32 %v13377_v37, %v6265_v32  ;;  %v13493_v32 = vpop.permute.xlu2 %4585 }
 0xcfa   :  { %v13387_v8 = vpop.f32.mrf.mxu1  ;;  %v8990_v11 = vpop.eup %8989  ;;  %v6350_v51 = vsub.f32 %v13390_v53, %v6256_v41  ;;  %v6398_v43 = vmul.f32 1.442695, %v6352_v45  ;;  %vm6087_vm10 = vcmp.gt.f32.partialorder %v13493_v32, 0.0 }
 0xcfb   :  { %v13464_v33 = vmul.f32 %v8990_v11, %v13344_v0  ;;  %v8992_v7 = vpop.eup %8991  ;;  %v13467_v42 = vsel %vm6085_vm2, %v13387_v8, -1e+30  ;;  %v6507_v8 = vrot.slane %v6506_v46, 2  ;;  %v6390_v11 = vmul.f32 1.442695, %v6348_v12  ;;  %vm15463_vm2 = vmmov %vm15449_vm0 }
 0xcfc   :  { %v13474_v14 = vmul.f32 %v8992_v7, %v13269_v48  ;;  %v6276_v39 = vsel %vm15449_vm0, %v13467_v42, -inf  ;;  %v6392_v7 = vmul.f32 1.442695, %v6349_v16  ;;  %v6351_v12 = vsub.f32 %v13380_v21, %v6256_v41 }
 0xcfd   :  { %v6475_v0 = vsel %vm15456_vm4, %v13464_v33, 0.0  ;;  %v6277_v26 = vmax.f32 %v6275_v27, %v6276_v39  ;;  %8993 = vpow2.f32 %v6390_v11  ;;  %v6508_v15 = vadd.f32 %v6507_v8, %v6506_v46 }
 0xcfe   :  { %v6476_v38 = vsel %vm15457_vm8, %v13474_v14, 0.0  ;;  %8995 = vpow2.f32 %v6392_v7  ;;  %v6498_v27 = vrot.slane %v6497_v4, 2  ;;  %v6400_v17 = vmul.f32 1.442695, %v6353_v28  ;;  %vm15464_vm8 = vmmov %vm15449_vm0 }
 0xcff   :  { %v6477_v48 = vadd.f32 %v6476_v38, %v6475_v0  ;;  %v6278_v18 = vrot.slane %v6277_v26, 4  ;;  %v6271_v0 = vrot.slane %v6270_v55, 2  ;;  %8997 = vrcp.f32 %v13485_v9 }
 0xd00   :  { %v6509_v6 = vrot.slane %v6508_v15, 1  ;;  %v6394_v37 = vmul.f32 1.442695, %v6350_v51  ;;  %v6499_v16 = vadd.f32 %v6498_v27, %v6497_v4  ;;  %v6396_v45 = vmul.f32 1.442695, %v6351_v12 }
 0xd01   :  { %v6478_v35 = vrot.slane %v6477_v48, 4  ;;  %v6279_v46 = vmax.f32 %v6277_v26, %v6278_v18  ;;  %v6272_v21 = vmax.f32 %v6270_v55, %v6271_v0  ;;  %8999 = vpow2.f32 %v6398_v43 }
 0xd02   :  { %v13420_v5 = vpop.f32.mrf.mxu1  ;;  %9001 = vpow2.f32 %v6400_v17  ;;  %v6510_v26 = vadd.f32 %v6509_v6, %v6508_v15  ;;  %v6500_v55 = vrot.slane %v6499_v16, 1  ;;  %vm6663_vm13 = vweird.f32 %v13485_v9 }
 0xd03   :  { %v6479_v20 = vadd.f32 %v6478_v35, %v6477_v48  ;;  %v8994_v24 = vpop.eup %8993  ;;  %9003 = vpow2.f32 %v6394_v37  ;;  %v13508_v48 = vsel %vm6086_vm1, %v13420_v5, -1e+30 }
 0xd04   :  { %v8996_v53 = vpop.eup %8995  ;;  %v13496_v8 = vmul.f32 %v8994_v24, %v13382_v61  ;;  %9005 = vpow2.f32 %v6396_v45  ;;  %v13517_v27 = vmax.f32 %v6510_v26, 1e-20  ;;  %v6284_v5 = vsel %vm15460_vm11, %v13508_v48, -inf }
 0xd05   :  { %v6480_v36 = vrot.slane %v6479_v20, 2  ;;  %v13500_v41 = vmul.f32 %v8996_v53, %v13331_v54  ;;  %v6273_v54 = vrot.slane %v6272_v21, 1  ;;  %v13510_v4 = vpop.eup %8997  ;;  %v6501_v24 = vadd.f32 %v6500_v55, %v6499_v16 }
 0xd06   :  { %v6511_v38 = vsel %vm15458_vm12, %v13496_v8, 0.0  ;;  %v6659_v12 = vmul.f32 %v13510_v4, %v13485_v9  ;;  %vm6664_vm4 = vweird.f32 %v13510_v4 }
 0xd07   :  { %v6481_v35 = vadd.f32 %v6480_v36, %v6479_v20  ;;  %v6280_v20 = vrot.slane %v6279_v46, 2  ;;  %v6512_v61 = vsel %vm15459_vm14, %v13500_v41, 0.0  ;;  %v9000_v18 = vpop.eup %8999  ;;  %v13536_v16 = vmax.f32 %v6501_v24, 1e-20 }
 0xd08   :  { %v6513_v7 = vadd.f32 %v6512_v61, %v6511_v38  ;;  %v9002_v0 = vpop.eup %9001  ;;  %v13530_v45 = vmul.f32 %v9000_v18, %v13351_v29  ;;  %v6660_v38 = vsub.f32 1.0, %v6659_v12  ;;  %v6669_v29 = vand.u32 2147483648, %v13485_v9 }
 0xd09   :  { %v6482_v39 = vrot.slane %v6481_v35, 1  ;;  %v6281_v17 = vmax.f32 %v6279_v46, %v6280_v20  ;;  %v9004_v36 = vpop.eup %9003 }
 0xd0a   :  { %v13443_v2 = vpop.f32.mrf.mxu1  ;;  %v6514_v15 = vrot.slane %v6513_v7, 4  ;;  %v13539_v20 = vmul.f32 %v9004_v36, %v13320_v40  ;;  %v6529_v55 = vsel %vm15462_vm9, %v13530_v45, 0.0  ;;  %vm13587_vm9 = vmor %vm6663_vm13, %vm6664_vm4 }
 0xd0b   :  { %v6483_v11 = vadd.f32 %v6482_v39, %v6481_v35  ;;  %v13513_v28 = vsel %vm6087_vm10, %v13443_v2, -1e+30  ;;  %v6274_v2 = vmax.f32 %v6272_v21, %v6273_v54  ;;  %v9006_v35 = vpop.eup %9005  ;;  %v13533_v39 = vmul.f32 %v9002_v0, %v13328_v44  ;;  %vm15469_vm4 = vmmov %vm15449_vm0 }
 0xd0c   :  { %v6285_v6 = vsel %vm15461_vm6, %v13513_v28, -inf  ;;  %v6515_v37 = vadd.f32 %v6514_v15, %v6513_v7  ;;  %v6282_v26 = vrot.slane %v6281_v17, 1  ;;  %v13545_v44 = vmul.f32 %v9006_v35, %v13337_v25 }
 0xd0d   :  { %v13515_v51 = vmax.f32 %v6483_v11, 1e-20  ;;  %v6286_v53 = vmax.f32 %v6284_v5, %v6285_v6  ;;  %v6354_v21 = vsub.f32 %v13441_v52, %v6274_v2  ;;  %v6355_v61 = vsub.f32 %v13448_v22, %v6274_v2 }
 0xd0e   :  { %v6516_v46 = vrot.slane %v6515_v37, 2  ;;  %v6530_v52 = vsel %vm15463_vm2, %v13533_v39, 0.0  ;;  %v6661_v22 = vmul.f32 %v13510_v4, %v6660_v38  ;;  %v6283_v18 = vmax.f32 %v6281_v17, %v6282_v26  ;;  %v13565_v17 = vpop.permute.xlu1 %4598  ;;  %vm15467_vm2 = vmmov %vm15449_vm0 }
 0xd0f   :  { %9007 = vrcp.f32 %v13515_v51  ;;  %v6287_v54 = vrot.slane %v6286_v53, 4  ;;  %v6402_v5 = vmul.f32 1.442695, %v6354_v21  ;;  %v6520_v12 = vsel %vm15449_vm0, %v13539_v20, 0.0 }
 0xd10   :  { %9009 = vrcp.f32 %v13517_v27  ;;  %v6517_v15 = vadd.f32 %v6516_v46, %v6515_v37  ;;  %v6404_v36 = vmul.f32 1.442695, %v6355_v61  ;;  %v6521_v24 = vsel %vm15464_vm8, %v13545_v44, 0.0  ;;  %v13567_v46 = vpop.permute.xlu2 %4592  ;;  %vm15470_vm8 = vmmov %vm15467_vm2 }
 0xd11   :  { %9011 = vrcp.f32 %v13536_v16  ;;  %v6531_v6 = vadd.f32 %v6530_v52, %v6529_v55  ;;  %v6288_v37 = vmax.f32 %v6286_v53, %v6287_v54  ;;  %v6653_v35 = vand.u32 2147483648, %v13515_v51 }
 0xd12   :  { %v13469_v10 = vpop.f32.mrf.mxu1  ;;  %v6651_v26 = vand.u32 2147483647, %v13515_v51  ;;  %v6518_v21 = vrot.slane %v6517_v15, 1  ;;  %v6356_v61 = vsub.f32 %v13461_v19, %v6283_v18  ;;  %v6357_v7 = vsub.f32 %v13467_v42, %v6283_v18 }
 0xd13   :  { %9013 = vpow2.f32 %v6402_v5  ;;  %vm6647_vm10 = vweird.f32 %v13515_v51  ;;  %vm6089_vm12 = vcmp.gt.f32.partialorder %v13565_v17, 0.0  ;;  %v6662_v54 = vadd.f32 %v13510_v4, %v6661_v22 }
 0xd14   :  { %9015 = vpow2.f32 %v6404_v36  ;;  %v6532_v55 = vrot.slane %v6531_v6, 4  ;;  %vm6088_vm14 = vcmp.gt.f32.partialorder %v13567_v46, 0.0  ;;  %v6654_v52 = vor.u32 1.1754944e-38, %v6653_v35 }
 0xd15   :  { %v9008_v11 = vpop.eup %9007  ;;  %v6289_v30 = vrot.slane %v6288_v37, 2  ;;  %vm6652_vm6 = vcmp.eq.f32.partialorder %v6651_v26, 8.507059e+37  ;;  %v6519_v42 = vadd.f32 %v6518_v21, %v6517_v15  ;;  %v6522_v18 = vadd.f32 %v6521_v24, %v6520_v12 }
 0xd16   :  { %v6643_v40 = vmul.f32 %v9008_v11, %v13515_v51  ;;  %v13557_v0 = vpop.eup %9009  ;;  %vm6648_vm1 = vweird.f32 %v9008_v11  ;;  %v6406_v5 = vmul.f32 1.442695, %v6356_v61  ;;  %v6408_v35 = vmul.f32 1.442695, %v6357_v7 }
 0xd17   :  { %vm6649_vm11 = vmor %vm6647_vm10, %vm6648_vm1  ;;  %v6670_v24 = vor.u32 1.1754944e-38, %v6669_v29  ;;  %v6533_v26 = vadd.f32 %v6532_v55, %v6531_v6  ;;  %v13599_v21 = vsel %vm6088_vm14, %v13469_v10, -1e+30  ;;  %v6290_v7 = vmax.f32 %v6288_v37, %v6289_v30 }
 0xd18   :  { %v6644_v2 = vsub.f32 1.0, %v6643_v40  ;;  %v6691_v40 = vmul.f32 %v13557_v0, %v13517_v27  ;;  %v6523_v29 = vrot.slane %v6522_v18, 4  ;;  %9017 = vpow2.f32 %v6406_v5  ;;  %vm15471_vm1 = vmmov %vm15467_vm2 }
 0xd19   :  { %9019 = vpow2.f32 %v6408_v35  ;;  %v6293_v30 = vsel %vm15469_vm4, %v13599_v21, -inf  ;;  %v6534_v37 = vrot.slane %v6533_v26, 2  ;;  %vm6696_vm0 = vweird.f32 %v13557_v0 }
 0xd1a   :  { %v13490_v47 = vpop.f32.mrf.mxu1  ;;  %v6645_v38 = vmul.f32 %v9008_v11, %v6644_v2  ;;  %v13578_v2 = vpop.eup %9011  ;;  %v6692_v36 = vsub.f32 1.0, %v6691_v40  ;;  %v6524_v5 = vadd.f32 %v6523_v29, %v6522_v18  ;;  %vm6695_vm10 = vweird.f32 %v13517_v27 }
 0xd1b   :  { %v13581_v51 = vsel %vm6089_vm12, %v13490_v47, -1e+30  ;;  %v9014_v12 = vpop.eup %9013  ;;  %v6666_v47 = vsel %vm13587_vm9, %v13510_v4, %v6662_v54  ;;  %v15468_v4 = vand.u32 2147483647, %v13485_v9  ;;  %vm6679_vm12 = vweird.f32 %v13536_v16  ;;  %vm13641_vm14 = vmor %vm6695_vm10, %vm6696_vm0 }
 0xd1c   :  { %v6646_v53 = vadd.f32 %v9008_v11, %v6645_v38  ;;  %v9016_v40 = vpop.eup %9015  ;;  %v6693_v6 = vmul.f32 %v13557_v0, %v6692_v36  ;;  %v13615_v54 = vmul.f32 %v9014_v12, %v13422_v63  ;;  %v6701_v63 = vand.u32 2147483648, %v13517_v27  ;;  %vm15474_vm9 = vmmov %vm15471_vm1 }
 0xd1d   :  { %vm6668_vm13 = vcmp.eq.f32.partialorder %v15468_v4, 8.507059e+37  ;;  %v13618_v55 = vmul.f32 %v9016_v40, %v13427_v60  ;;  %v6535_v60 = vadd.f32 %v6534_v37, %v6533_v26  ;;  %v6525_v40 = vrot.slane %v6524_v5, 2  ;;  %v13660_v37 = vpop.permute.xlu2 %4605  ;;  %vm15477_vm0 = vmmov %vm15471_vm1 }
 0xd1e   :  { %v6650_v19 = vsel %vm6649_vm11, %v9008_v11, %v6646_v53  ;;  %v6294_v53 = vsel %vm15467_vm2, %v13581_v51, -inf  ;;  %v6671_v10 = vsel %vm6668_vm13, %v6670_v24, %v6666_v47  ;;  %v6694_v22 = vadd.f32 %v13557_v0, %v6693_v6  ;;  %v9018_v36 = vpop.eup %9017  ;;  %vm15479_vm10 = vmmov %vm15477_vm0 }
 0xd1f   :  { %v6655_v38 = vsel %vm6652_vm6, %v6654_v52, %v6650_v19  ;;  %v6295_v52 = vmax.f32 %v6293_v30, %v6294_v53  ;;  %v6291_v19 = vrot.slane %v6290_v7, 1  ;;  %v6538_v35 = vsel %vm15470_vm8, %v13615_v54, 0.0  ;;  %vm15478_vm8 = vmmov %vm15477_vm0 }
 0xd20   :  { %v6656_v11 = vmul.f32 %v6655_v38, %v13464_v33  ;;  %v6657_v15 = vmul.f32 %v6655_v38, %v13474_v14  ;;  %v6675_v33 = vmul.f32 %v13578_v2, %v13536_v16  ;;  %v13605_v14 = vmax.f32 %v6519_v42, 1e-20 }
 0xd21   :  { %v13622_v42 = vmul.f32 %v6671_v10, %v13342_v1  ;;  %v6673_v38 = vmul.f32 %v6671_v10, %v13348_v62  ;;  %v6296_v12 = vrot.slane %v6295_v52, 4  ;;  %v9020_v1 = vpop.eup %9019  ;;  %v6699_v62 = vand.u32 2147483647, %v13517_v27 }
 0xd22   :  { %v13523_v43 = vpop.f32.mrf.mxu1  ;;  %7247 = vperm.xlu1 %8703, %v6657_v15   ;;  %6894 = vperm.xlu0 %8706, %v6656_v11   ;;  %v6676_v9 = vsub.f32 1.0, %v6675_v33  ;;  %9021 = vrcp.f32 %v13605_v14  ;;  %v6292_v47 = vmax.f32 %v6290_v7, %v6291_v19  ;;  %v6683_v24 = vand.u32 2147483647, %v13536_v16 }
 0xd23   :  { %7243 = vperm.xlu2 %8707, %v6656_v11   ;;  %v6539_v11 = vsel %vm15471_vm1, %v13618_v55, 0.0  ;;  %v6685_v7 = vand.u32 2147483648, %v13536_v16  ;;  %v6698_v53 = vsel %vm13641_vm14, %v13557_v0, %v6694_v22  ;;  %v13655_v4 = vmul.f32 %v9018_v36, %v13360_v50 }
 0xd24   :  { %v6677_v18 = vmul.f32 %v13578_v2, %v6676_v9  ;;  %v6540_v29 = vadd.f32 %v6539_v11, %v6538_v35  ;;  %v6702_v10 = vor.u32 1.1754944e-38, %v6701_v63  ;;  %v6536_v6 = vrot.slane %v6535_v60, 1 }
 0xd25   :  { %v13658_v30 = vmul.f32 %v9020_v1, %v13452_v23  ;;  %vm6680_vm11 = vweird.f32 %v13578_v2  ;;  %vm6700_vm6 = vcmp.eq.f32.partialorder %v6699_v62, 8.507059e+37  ;;  %v6358_v0 = vsub.f32 %v13508_v48, %v6292_v47 }
 0xd26   :  { %v6678_v9 = vadd.f32 %v13578_v2, %v6677_v18  ;;  %v13665_v19 = vsel %vm6700_vm6, %v6702_v10, %v6698_v53  ;;  %v6526_v50 = vadd.f32 %v6525_v40, %v6524_v5  ;;  %v6359_v22 = vsub.f32 %v13513_v28, %v6292_v47  ;;  %vm13676_vm4 = vmor %vm6679_vm12, %vm6680_vm11 }
 0xd27   :  { %v6547_v23 = vsel %vm15474_vm9, %v13655_v4, 0.0  ;;  %vm6090_vm2 = vcmp.gt.f32.partialorder %v13660_v37, 0.0  ;;  %vm6091_vm13 = vcmp.gt.f32.partialorder %v13335_v57, 0.0  ;;  %v6537_v5 = vadd.f32 %v6536_v6, %v6535_v60 }
 0xd28   :  { %v13648_v27 = vpop.eup %9021  ;;  %v6548_v28 = vsel %vm15477_vm0, %v13658_v30, 0.0  ;;  %v6682_v11 = vsel %vm13676_vm4, %v13578_v2, %v6678_v9  ;;  %v6410_v16 = vmul.f32 1.442695, %v6358_v0  ;;  %v6527_v1 = vrot.slane %v6526_v50, 1 }
 0xd29   :  { %v6707_v63 = vmul.f32 %v13648_v27, %v13605_v14  ;;  %v6412_v18 = vmul.f32 1.442695, %v6359_v22  ;;  %v13691_v62 = vsel %vm6090_vm2, %v13523_v43, -1e+30  ;;  %v6686_v47 = vor.u32 1.1754944e-38, %v6685_v7  ;;  %v13703_v7 = vpop.permute.xlu2 %4624 }
 0xd2a   :  { %v13555_v25 = vpop.f32.mrf.mxu1  ;;  %8708 = vset.pattern.permute.xlu1 %v15426_v49  ;;  %8709 = vset.pattern.permute.xlu0 %v15430_v3  ;;  %vm6684_vm1 = vcmp.eq.f32.partialorder %v6683_v24, 8.507059e+37  ;;  %9023 = vpow2.f32 %v6410_v16  ;;  %v13706_v24 = vpop.permute.xlu1 %4618  ;;  %vm6712_vm12 = vweird.f32 %v13648_v27  ;;  %vm6711_vm14 = vweird.f32 %v13605_v14 }
 0xd2b   :  { %7251 = vperm.xlu2 %8707, %v13622_v42   ;;  %6899 = vperm.xlu1 %8708, %v6657_v15   ;;  %v6297_v15 = vmax.f32 %v6295_v52, %v6296_v12  ;;  %v6541_v52 = vrot.slane %v6540_v29, 4  ;;  %v13683_v35 = vsel %vm6091_vm13, %v13555_v25, -1e+30  ;;  %v6704_v12 = vmul.f32 %v13665_v19, %v13415_v59  ;;  %vm13726_vm11 = vmor %vm6711_vm14, %vm6712_vm12 }
 0xd2c   :  { %7255 = vperm.xlu0 %8709, %v6673_v38   ;;  %v6708_v60 = vsub.f32 1.0, %v6707_v63  ;;  %v6549_v25 = vadd.f32 %v6548_v28, %v6547_v23  ;;  %v6303_v40 = vsel %vm15478_vm8, %v13683_v35, -inf  ;;  %v13697_v59 = vmax.f32 %v6537_v5, 1e-20  ;;  %vm15482_vm13 = vmmov %vm15477_vm0 }
 0xd2d   :  { %v6298_v36 = vrot.slane %v6297_v15, 2  ;;  %v6542_v26 = vadd.f32 %v6541_v52, %v6540_v29  ;;  %v6687_v43 = vsel %vm6684_vm1, %v6686_v47, %v6682_v11  ;;  %v6528_v29 = vadd.f32 %v6527_v1, %v6526_v50  ;;  %vm15483_vm8 = vmmov %vm15477_vm0 }
 0xd2e   :  { %9025 = vpow2.f32 %v6412_v18  ;;  %v6709_v10 = vmul.f32 %v13648_v27, %v6708_v60  ;;  %v13710_v0 = vmul.f32 %v6687_v43, %v13434_v34  ;;  %v6689_v22 = vmul.f32 %v6687_v43, %v13437_v58  ;;  %vm15485_vm12 = vmmov %vm15477_vm0 }
 0xd2f   :  { %v6299_v2 = vmax.f32 %v6297_v15, %v6298_v36  ;;  %v6543_v9 = vrot.slane %v6542_v26, 2  ;;  %9027 = vrcp.f32 %v13697_v59  ;;  %v13713_v63 = vmax.f32 %v6528_v29, 1e-20  ;;  %vm15486_vm14 = vmmov %vm15477_vm0 }
 0xd30   :  { %v6710_v50 = vadd.f32 %v13648_v27, %v6709_v10  ;;  %v9024_v52 = vpop.eup %9023  ;;  %v6717_v5 = vand.u32 2147483648, %v13605_v14  ;;  %v6715_v58 = vand.u32 2147483647, %v13605_v14  ;;  %vm6092_vm9 = vcmp.gt.f32.partialorder %v13706_v24, 0.0 }
 0xd31   :  { %v6300_v15 = vrot.slane %v6299_v2, 1  ;;  %v6544_v28 = vadd.f32 %v6543_v9, %v6542_v26  ;;  %9029 = vrcp.f32 %v13713_v63  ;;  %v13734_v18 = vmul.f32 %v9024_v52, %v13405_v56 }
 0xd32   :  { %v13601_v61 = vpop.f32.mrf.mxu1  ;;  %v6714_v14 = vsel %vm13726_vm11, %v13648_v27, %v6710_v50  ;;  %v6718_v26 = vor.u32 1.1754944e-38, %v6717_v5  ;;  %vm6716_vm6 = vcmp.eq.f32.partialorder %v6715_v58, 8.507059e+37  ;;  %vm6093_vm2 = vcmp.gt.f32.partialorder %v13703_v7, 0.0 }
 0xd33   :  { %8710 = vset.pattern.permute.xlu2 %v15426_v49  ;;  %6909 = vperm.xlu1 %8708, %v6673_v38   ;;  %v6302_v38 = vsel %vm15479_vm10, %v13691_v62, -inf  ;;  %v6301_v36 = vmax.f32 %v6299_v2, %v6300_v15  ;;  %v13742_v2 = vpop.permute.xlu2 %4637  ;;  %v6556_v29 = vsel %vm15482_vm13, %v13734_v18, 0.0  ;;  %vm15484_vm10 = vmmov %vm15477_vm0 }
 0xd34   :  { %6904 = vperm.xlu2 %8710, %v13622_v42   ;;  %7267 = vperm.xlu0 %8709, %v6704_v12   ;;  %v6304_v6 = vmax.f32 %v6302_v38, %v6303_v40  ;;  %v6550_v42 = vrot.slane %v6549_v25, 4  ;;  %v9026_v34 = vpop.eup %9025  ;;  %v6545_v40 = vrot.slane %v6544_v28, 1  ;;  %v6719_v27 = vsel %vm6716_vm6, %v6718_v26, %v6714_v14  ;;  %v13753_v38 = vpop.permute.xlu1 %4631 }
 0xd35   :  { %v13730_v1 = vpop.eup %9027  ;;  %v6361_v43 = vsub.f32 %v13581_v51, %v6301_v36  ;;  %vm6095_vm4 = vcmp.gt.f32.partialorder %v13742_v2, 0.0  ;;  %vm6094_vm1 = vcmp.gt.f32.partialorder %v13753_v38, 0.0  ;;  %vm6743_vm6 = vweird.f32 %v13697_v59 }
 0xd36   :  { %v6305_v23 = vrot.slane %v6304_v6, 4  ;;  %v6551_v48 = vadd.f32 %v6550_v42, %v6549_v25  ;;  %v13740_v25 = vmul.f32 %v9026_v34, %v13493_v32  ;;  %v6739_v56 = vmul.f32 %v13730_v1, %v13697_v59 }
 0xd37   :  { %v13761_v42 = vsel %vm6092_vm9, %v13601_v61, -1e+30  ;;  %v13765_v51 = vpop.eup %9029  ;;  %v6416_v61 = vmul.f32 1.442695, %v6361_v43  ;;  %v6749_v43 = vand.u32 2147483648, %v13697_v59  ;;  %vm6744_vm11 = vweird.f32 %v13730_v1 }
 0xd38   :  { %v6306_v60 = vmax.f32 %v6304_v6, %v6305_v23  ;;  %v6552_v47 = vrot.slane %v6551_v48, 2  ;;  %v6546_v6 = vadd.f32 %v6545_v40, %v6544_v28  ;;  %v6740_v23 = vsub.f32 1.0, %v6739_v56  ;;  %vm13812_vm9 = vmor %vm6743_vm6, %vm6744_vm11 }
 0xd39   :  { %v6311_v28 = vsel %vm15484_vm10, %v13761_v42, -inf  ;;  %v13794_v40 = vmul.f32 %v13665_v19, %v13418_v13  ;;  %v6747_v56 = vand.u32 2147483647, %v13697_v59 }
 0xd3a   :  { %v13645_v33 = vpop.f32.mrf.mxu1  ;;  %v6307_v10 = vrot.slane %v6306_v60, 2  ;;  %v6553_v52 = vadd.f32 %v6552_v47, %v6551_v48  ;;  %v6741_v16 = vmul.f32 %v13730_v1, %v6740_v23 }
 0xd3b   :  { %8711 = vset.pattern.permute.xlu1 %v15430_v3  ;;  %v13751_v32 = vsel %vm6093_vm2, %v13645_v33, -1e+30  ;;  %v6721_v33 = vmul.f32 %v6719_v27, %v13500_v41  ;;  %vm13816_vm2 = vcmp.eq.f32.partialorder %v6747_v56, 8.507059e+37 }
 0xd3c   :  { %8712 = vset.pattern.permute.xlu2 %v15430_v3  ;;  %8716 = vset.pattern.permute.xlu0 %v15426_v49  ;;  %v6312_v50 = vsel %vm15483_vm8, %v13751_v32, -inf  ;;  %v6308_v41 = vmax.f32 %v6306_v60, %v6307_v10  ;;  %v6554_v14 = vrot.slane %v6553_v52, 1 }
 0xd3d   :  { %7263 = vperm.xlu2 %8712, %v6689_v22   ;;  %7259 = vperm.xlu1 %8711, %v13710_v0  }
 0xd3e   :  { %6924 = vperm.xlu0 %8716, %v6704_v12   ;;  %v6360_v12 = vsub.f32 %v13599_v21, %v6301_v36  ;;  %v6557_v21 = vsel %vm15477_vm0, %v13740_v25, 0.0  ;;  %v13784_v36 = vmax.f32 %v6546_v6, 1e-20  ;;  %v6555_v10 = vadd.f32 %v6554_v14, %v6553_v52 }
 0xd3f   :  { %v6558_v48 = vadd.f32 %v6557_v21, %v6556_v29  ;;  %v6742_v29 = vadd.f32 %v13730_v1, %v6741_v16 }
 0xd40   :  { %v6414_v15 = vmul.f32 1.442695, %v6360_v12 }
 0xd41   :  { %v6559_v47 = vrot.slane %v6558_v48, 4 }
 0xd42   :  { %v13699_v53 = vpop.f32.mrf.mxu1  ;;  %9031 = vpow2.f32 %v6414_v15  ;;  %v6720_v15 = vmul.f32 %v6719_v27, %v13496_v8 }
 0xd43   :  { %v13774_v5 = vsel %vm6094_vm1, %v13699_v53, -1e+30  ;;  %v6313_v53 = vmax.f32 %v6311_v28, %v6312_v50  ;;  %9033 = vpow2.f32 %v6416_v61  ;;  %v6560_v19 = vadd.f32 %v6559_v47, %v6558_v48  ;;  %v13805_v61 = vpop.permute.xlu1 %4650  ;;  %vm15491_vm1 = vmmov %vm15483_vm8 }
 0xd44   :  { %9035 = vrcp.f32 %v13784_v36  ;;  %v6733_v28 = vand.u32 2147483648, %v13713_v63  ;;  %v13825_v48 = vmax.f32 %v6555_v10, 1e-20  ;;  %vm6097_vm13 = vcmp.gt.f32.partialorder %v13805_v61, 0.0  ;;  %vm15492_vm10 = vmmov %vm15491_vm1 }
 0xd45   :  { %8714 = vset.pattern.permute.xlu2 %v15426_v49  ;;  %8713 = vset.pattern.permute.xlu1 %v15426_v49  ;;  %v6314_v26 = vrot.slane %v6313_v53, 4 }
 0xd46   :  { %8719 = vset.pattern.permute.xlu0 %v15430_v3  ;;  %6919 = vperm.xlu2 %8714, %v6689_v22   ;;  %v6320_v22 = vsel %vm15486_vm14, %v13774_v5, -inf  ;;  %9037 = vrcp.f32 %v13825_v48  ;;  %vm15493_vm14 = vmmov %vm15491_vm1 }
 0xd47   :  { %6914 = vperm.xlu1 %8713, %v13710_v0   ;;  %7279 = vperm.xlu0 %8719, %v6721_v33   ;;  %v6309_v0 = vrot.slane %v6308_v41, 1  ;;  %v6315_v23 = vmax.f32 %v6313_v53, %v6314_v26  ;;  %v13827_v53 = vpop.permute.xlu0 %4644 }
 0xd48   :  { %v9032_v6 = vpop.eup %9031  ;;  %vm6096_vm0 = vcmp.gt.f32.partialorder %v13827_v53, 0.0 }
 0xd49   :  { %v6310_v50 = vmax.f32 %v6308_v41, %v6309_v0  ;;  %v9034_v13 = vpop.eup %9033  ;;  %v6561_v0 = vrot.slane %v6560_v19, 2 }
 0xd4a   :  { %v6057_v11 = vpop.f32.mrf.mxu1  ;;  %v13820_v41 = vpop.eup %9035  ;;  %v13833_v16 = vmul.f32 %v9034_v13, %v13565_v17 }
 0xd4b   :  { %v13763_v9 = vsel %vm6095_vm4, %v6057_v11, -1e+30  ;;  %v6723_v11 = vmul.f32 %v13765_v51, %v13713_v63  ;;  %v6362_v14 = vsub.f32 %v13691_v62, %v6310_v50  ;;  %v6363_v47 = vsub.f32 %v13683_v35, %v6310_v50 }
 0xd4c   :  { %v6321_v34 = vsel %vm15485_vm12, %v13763_v9, -inf  ;;  %vm6728_vm4 = vweird.f32 %v13765_v51  ;;  %v6755_v17 = vmul.f32 %v13820_v41, %v13784_v36  ;;  %v6566_v56 = vsel %vm15491_vm1, %v13833_v16, 0.0  ;;  %v13878_v27 = vpop.eup %9037 }
 0xd4d   :  { %v6322_v60 = vmax.f32 %v6320_v22, %v6321_v34  ;;  %v6724_v12 = vsub.f32 1.0, %v6723_v11  ;;  %v6750_v34 = vor.u32 1.1754944e-38, %v6749_v43  ;;  %v13830_v22 = vmul.f32 %v9032_v6, %v13567_v46 }
 0xd4e   :  { %8718 = vset.pattern.permute.xlu2 %v15430_v3  ;;  %v6418_v43 = vmul.f32 1.442695, %v6362_v14  ;;  %v6420_v6 = vmul.f32 1.442695, %v6363_v47  ;;  %vm6727_vm12 = vweird.f32 %v13713_v63  ;;  %v6756_v13 = vsub.f32 1.0, %v6755_v17 }
 0xd4f   :  { %v6323_v21 = vrot.slane %v6322_v60, 4  ;;  %8715 = vset.pattern.permute.xlu1 %v15430_v3  ;;  %8721 = vset.pattern.permute.xlu0 %v15426_v49  ;;  %v6725_v52 = vmul.f32 %v13765_v51, %v6724_v12  ;;  %v6565_v12 = vsel %vm15483_vm8, %v13830_v22, 0.0  ;;  %vm13871_vm11 = vmor %vm6727_vm12, %vm6728_vm4 }
 0xd50   :  { %7271 = vperm.xlu1 %8715, %v13794_v40   ;;  %6939 = vperm.xlu0 %8721, %v6721_v33   ;;  %v6746_v33 = vsel %vm13812_vm9, %v13730_v1, %v6742_v29  ;;  %v6316_v1 = vrot.slane %v6315_v23, 2  ;;  %9039 = vpow2.f32 %v6418_v43  ;;  %vm6760_vm9 = vweird.f32 %v13820_v41 }
 0xd51   :  { %7275 = vperm.xlu2 %8718, %v6720_v15   ;;  %v6324_v11 = vmax.f32 %v6322_v60, %v6323_v21  ;;  %v13843_v60 = vsel %vm13816_vm2, %v6750_v34, %v6746_v33  ;;  %v6726_v46 = vadd.f32 %v13765_v51, %v6725_v52  ;;  %v6562_v21 = vadd.f32 %v6561_v0, %v6560_v19 }
 0xd52   :  { %v13782_v58 = vpop.f32.mrf.mxu1  ;;  %v6752_v10 = vmul.f32 %v13843_v60, %v13530_v45  ;;  %v6317_v50 = vmax.f32 %v6315_v23, %v6316_v1  ;;  %v6567_v19 = vadd.f32 %v6566_v56, %v6565_v12  ;;  %9041 = vpow2.f32 %v6420_v6 }
 0xd53   :  { %v6325_v62 = vrot.slane %v6324_v11, 2  ;;  %v13851_v35 = vsel %vm6096_vm0, %v13782_v58, -1e+30  ;;  %v6731_v58 = vand.u32 2147483647, %v13713_v63  ;;  %v6730_v63 = vsel %vm13871_vm11, %v13765_v51, %v6726_v46  ;;  %vm15496_vm0 = vmmov %vm15491_vm1 }
 0xd54   :  { %v6329_v52 = vsel %vm15493_vm14, %v13851_v35, -inf  ;;  %v6318_v33 = vrot.slane %v6317_v50, 1  ;;  %v6757_v34 = vmul.f32 %v13820_v41, %v6756_v13  ;;  %v6568_v0 = vrot.slane %v6567_v19, 4  ;;  %vm15497_vm8 = vmmov %vm15496_vm0 }
 0xd55   :  { %v6326_v23 = vmax.f32 %v6324_v11, %v6325_v62  ;;  %vm6732_vm6 = vcmp.eq.f32.partialorder %v6731_v58, 8.507059e+37  ;;  %v6765_v56 = vand.u32 2147483648, %v13784_v36  ;;  %vm6759_vm2 = vweird.f32 %v13784_v36  ;;  %vm15498_vm11 = vmmov %vm15496_vm0 }
 0xd56   :  { %v6319_v17 = vmax.f32 %v6317_v50, %v6318_v33  ;;  %v9040_v51 = vpop.eup %9039  ;;  %v6758_v62 = vadd.f32 %v13820_v41, %v6757_v34  ;;  %v6569_v43 = vadd.f32 %v6568_v0, %v6567_v19  ;;  %vm6776_vm1 = vweird.f32 %v13878_v27 }
 0xd57   :  { %v6327_v11 = vrot.slane %v6326_v23, 1  ;;  %v13900_v13 = vmul.f32 %v9040_v51, %v13660_v37 }
 0xd58   :  { %8717 = vset.pattern.permute.xlu1 %v15426_v49  ;;  %8726 = vset.pattern.permute.xlu0 %v15430_v3  ;;  %v9042_v12 = vpop.eup %9041  ;;  %v6364_v50 = vsub.f32 %v13761_v42, %v6319_v17  ;;  %v6570_v19 = vrot.slane %v6569_v43, 2 }
 0xd59   :  { %8720 = vset.pattern.permute.xlu2 %v15426_v49  ;;  %6929 = vperm.xlu1 %8717, %v13794_v40   ;;  %v6563_v40 = vrot.slane %v6562_v21, 1  ;;  %v13904_v45 = vmul.f32 %v9042_v12, %v13335_v57  ;;  %v6574_v57 = vsel %vm15496_vm0, %v13900_v13, 0.0 }
 0xd5a   :  { %v6063_v59 = vpop.f32.mrf.mxu1  ;;  %6934 = vperm.xlu2 %8720, %v6720_v15   ;;  %7291 = vperm.xlu0 %8726, %v6752_v10   ;;  %v6771_v15 = vmul.f32 %v13878_v27, %v13825_v48 }
 0xd5b   :  { %v13838_v26 = vsel %vm6097_vm13, %v6063_v59, -1e+30  ;;  %v6734_v59 = vor.u32 1.1754944e-38, %v6733_v28  ;;  %v6564_v1 = vadd.f32 %v6563_v40, %v6562_v21  ;;  %vm6761_vm13 = vmor %vm6759_vm2, %vm6760_vm9 }
 0xd5c   :  { %v6330_v29 = vsel %vm15492_vm10, %v13838_v26, -inf  ;;  %v6772_v21 = vsub.f32 1.0, %v6771_v15  ;;  %v6762_v58 = vsel %vm6761_vm13, %v13820_v41, %v6758_v62  ;;  %v6422_v41 = vmul.f32 1.442695, %v6364_v50  ;;  %vm15500_vm9 = vmmov %vm15496_vm0 }
 0xd5d   :  { %v6331_v8 = vmax.f32 %v6329_v52, %v6330_v29  ;;  %v6735_v14 = vsel %vm6732_vm6, %v6734_v59, %v6730_v63  ;;  %v6328_v29 = vmax.f32 %v6326_v23, %v6327_v11  ;;  %v6365_v52 = vsub.f32 %v13751_v32, %v6319_v17  ;;  %v13931_v17 = vpop.permute.xlu2 %7239  ;;  %vm15499_vm6 = vmmov %vm15496_vm0 }
 0xd5e   :  { %v6736_v46 = vmul.f32 %v6735_v14, %v13539_v20  ;;  %v6737_v28 = vmul.f32 %v6735_v14, %v13545_v44  ;;  %v6763_v20 = vand.u32 2147483647, %v13784_v36  ;;  %v13893_v44 = vmax.f32 %v6564_v1, 1e-20  ;;  %vm15501_vm2 = vmmov %vm15496_vm0 }
 0xd5f   :  { %v6332_v47 = vrot.slane %v6331_v8, 4  ;;  %v6766_v36 = vor.u32 1.1754944e-38, %v6765_v56  ;;  %v6366_v23 = vsub.f32 %v13774_v5, %v6328_v29  ;;  %v6773_v63 = vmul.f32 %v13878_v27, %v6772_v21 }
 0xd60   :  { %vm6764_vm4 = vcmp.eq.f32.partialorder %v6763_v20, 8.507059e+37  ;;  %v6367_v42 = vsub.f32 %v13763_v9, %v6328_v29  ;;  %9043 = vrcp.f32 %v13893_v44  ;;  %v6424_v37 = vmul.f32 1.442695, %v6365_v52 }
 0xd61   :  { %8722 = vset.pattern.permute.xlu1 %v15430_v3  ;;  %v6333_v6 = vmax.f32 %v6331_v8, %v6332_v47  ;;  %v6575_v32 = vsel %vm15497_vm8, %v13904_v45, 0.0  ;;  %v6571_v59 = vadd.f32 %v6570_v19, %v6569_v43  ;;  %v6426_v5 = vmul.f32 1.442695, %v6366_v23 }
 0xd62   :  { %8723 = vset.pattern.permute.xlu2 %v15430_v3  ;;  %8728 = vset.pattern.permute.xlu0 %v15426_v49  ;;  %v6774_v33 = vadd.f32 %v13878_v27, %v6773_v63  ;;  %v6428_v34 = vmul.f32 1.442695, %v6367_v42  ;;  %v6781_v14 = vand.u32 2147483648, %v13825_v48  ;;  %9045 = vpow2.f32 %v6422_v41 }
 0xd63   :  { %7287 = vperm.xlu2 %8723, %v6737_v28   ;;  %7283 = vperm.xlu1 %8722, %v6736_v46   ;;  %v6334_v8 = vrot.slane %v6333_v6, 2  ;;  %v6576_v0 = vadd.f32 %v6575_v32, %v6574_v57  ;;  %vm6775_vm10 = vweird.f32 %v13825_v48  ;;  %v6779_v11 = vand.u32 2147483647, %v13825_v48 }
 0xd64   :  { %6954 = vperm.xlu0 %8728, %v6752_v10   ;;  %v13909_v10 = vsel %vm6764_vm4, %v6766_v36, %v6762_v58  ;;  %9047 = vpow2.f32 %v6424_v37  ;;  %vm6777_vm12 = vmor %vm6775_vm10, %vm6776_vm1  ;;  %v6782_v51 = vor.u32 1.1754944e-38, %v6781_v14  ;;  %v6797_v32 = vand.u32 2147483648, %v13893_v44 }
 0xd65   :  { %v6335_v40 = vmax.f32 %v6333_v6, %v6334_v8  ;;  %v6768_v9 = vmul.f32 %v13909_v10, %v13615_v54  ;;  %v6572_v54 = vrot.slane %v6571_v59, 1  ;;  %9049 = vpow2.f32 %v6426_v5  ;;  %v13957_v8 = vpop.permute.xlu2 %6884  ;;  %vm15502_vm1 = vmmov %vm15501_vm2 }
 0xd66   :  { %v13928_v15 = vpop.eup %9043  ;;  %v6778_v1 = vsel %vm6777_vm12, %v13878_v27, %v6774_v33  ;;  %9051 = vpow2.f32 %v6428_v34  ;;  %vm6780_vm14 = vcmp.eq.f32.partialorder %v6779_v11, 8.507059e+37  ;;  %v6753_v6 = vmul.f32 %v13843_v60, %v13533_v39  ;;  %vm15503_vm10 = vmmov %vm15502_vm1 }
 0xd67   :  { %v6336_v47 = vrot.slane %v6335_v40, 1  ;;  %v6783_v62 = vsel %vm6780_vm14, %v6782_v51, %v6778_v1  ;;  %v6573_v12 = vadd.f32 %v6572_v54, %v6571_v59  ;;  %vm6792_vm13 = vweird.f32 %v13928_v15 }
 0xd68   :  { %v9046_v48 = vpop.eup %9045  ;;  %v6784_v20 = vmul.f32 %v6783_v62, %v13655_v4  ;;  %v6785_v41 = vmul.f32 %v6783_v62, %v13658_v30  ;;  %vm6791_vm4 = vweird.f32 %v13893_v44  ;;  %v6795_v30 = vand.u32 2147483647, %v13893_v44 }
 0xd69   :  { %v6337_v56 = vmax.f32 %v6335_v40, %v6336_v47  ;;  %v13941_v58 = vmax.f32 %v6573_v12, 1e-20  ;;  %v13945_v36 = vmul.f32 %v9046_v48, %v13706_v24  ;;  %vm6793_vm0 = vmor %vm6791_vm4, %vm6792_vm13  ;;  %v6798_v14 = vor.u32 1.1754944e-38, %v6797_v32 }
 0xd6a   :  { %v9048_v43 = vpop.eup %9047  ;;  %vm6796_vm8 = vcmp.eq.f32.partialorder %v6795_v30, 8.507059e+37  ;;  %vm15509_vm13 = vcmask 261120  }
 0xd6b   :  { %8725 = vset.pattern.permute.xlu2 %v15426_v49  ;;  %8724 = vset.pattern.permute.xlu1 %v15426_v49  ;;  %v9050_v29 = vpop.eup %9049  ;;  %v6368_v52 = vsub.f32 %v13851_v35, %v6337_v56  ;;  %v6369_v39 = vsub.f32 %v13838_v26, %v6337_v56  ;;  %v13949_v60 = vmul.f32 %v9048_v43, %v13703_v7  ;;  %9053 = vrcp.f32 %v13941_v58  ;;  %vm15510_vm4 = vmmov %vm15509_vm13 }
 0xd6c   :  { %8730 = vset.pattern.permute.xlu0 %v15430_v3  ;;  %6949 = vperm.xlu2 %8725, %v6737_v28   ;;  %v6577_v28 = vrot.slane %v6576_v0, 4  ;;  %v9052_v21 = vpop.eup %9051  ;;  %v13955_v23 = vmul.f32 %v9050_v29, %v13753_v38  ;;  %v6583_v26 = vsel %vm15498_vm11, %v13945_v36, 0.0  ;;  %v14004_v29 = vpop.permute.xlu1 %7235  ;;  %vm6807_vm14 = vweird.f32 %v13941_v58 }
 0xd6d   :  { %6944 = vperm.xlu1 %8724, %v6736_v46   ;;  %7299 = vperm.xlu0 %8730, %v6768_v9   ;;  %v6787_v46 = vmul.f32 %v13928_v15, %v13893_v44  ;;  %v13952_v4 = vmul.f32 %v9052_v21, %v13742_v2  ;;  %v6430_v24 = vmul.f32 1.442695, %v6368_v52  ;;  %v6432_v63 = vmul.f32 1.442695, %v6369_v39 }
 0xd6e   :  { %v6578_v27 = vadd.f32 %v6577_v28, %v6576_v0  ;;  %v6584_v7 = vsel %vm15499_vm6, %v13949_v60, 0.0  ;;  %v6592_v38 = vsel %vm15501_vm2, %v13955_v23, 0.0  ;;  %v6769_v28 = vmul.f32 %v13909_v10, %v13618_v55 }
 0xd6f   :  { %v6788_v50 = vsub.f32 1.0, %v6787_v46  ;;  %v6593_v2 = vsel %vm15500_vm9, %v13952_v4, 0.0  ;;  %9055 = vpow2.f32 %v6430_v24  ;;  %v6585_v57 = vadd.f32 %v6584_v7, %v6583_v26 }
 0xd70   :  { %v6579_v19 = vrot.slane %v6578_v27, 2  ;;  %9057 = vpow2.f32 %v6432_v63  ;;  %v6594_v59 = vadd.f32 %v6593_v2, %v6592_v38  ;;  %v6813_v52 = vand.u32 2147483648, %v13941_v58 }
 0xd71   :  { %v6789_v35 = vmul.f32 %v13928_v15, %v6788_v50  ;;  %v13976_v5 = vpop.eup %9053  ;;  %v6586_v34 = vrot.slane %v6585_v57, 4  ;;  %v6811_v39 = vand.u32 2147483647, %v13941_v58  ;;  %vm15507_vm9 = vcmask 523520  }
 0xd72   :  { %v6580_v42 = vadd.f32 %v6579_v19, %v6578_v27  ;;  %v6803_v0 = vmul.f32 %v13976_v5, %v13941_v58  ;;  %v6595_v11 = vrot.slane %v6594_v59, 4  ;;  %vm6808_vm12 = vweird.f32 %v13976_v5  ;;  %vm15508_vm2 = vmmov %vm15507_vm9 }
 0xd73   :  { %v6790_v37 = vadd.f32 %v13928_v15, %v6789_v35  ;;  %v6587_v51 = vadd.f32 %v6586_v34, %v6585_v57  ;;  %vm14020_vm11 = vmor %vm6807_vm14, %vm6808_vm12  ;;  %v6814_v2 = vor.u32 1.1754944e-38, %v6813_v52  ;;  %vm6812_vm6 = vcmp.eq.f32.partialorder %v6811_v39, 8.507059e+37 }
 0xd74   :  { %8734 = vset.pattern.permute.xlu2 %v15430_v3  ;;  %v6581_v40 = vrot.slane %v6580_v42, 1  ;;  %v6804_v48 = vsub.f32 1.0, %v6803_v0  ;;  %v6596_v62 = vadd.f32 %v6595_v11, %v6594_v59  ;;  %vm15511_vm12 = vmmov %vm15510_vm4 }
 0xd75   :  { %8727 = vset.pattern.permute.xlu1 %v15430_v3  ;;  %8732 = vset.pattern.permute.xlu0 %v15426_v49  ;;  %v9056_v54 = vpop.eup %9055  ;;  %v6588_v55 = vrot.slane %v6587_v51, 2  ;;  %vm15512_vm14 = vmmov %vm15510_vm4 }
 0xd76   :  { %7295 = vperm.xlu1 %8727, %v6753_v6   ;;  %6964 = vperm.xlu0 %8732, %v6768_v9   ;;  %v6794_v9 = vsel %vm6793_vm0, %v13928_v15, %v6790_v37  ;;  %v6582_v47 = vadd.f32 %v6581_v40, %v6580_v42  ;;  %v9058_v1 = vpop.eup %9057  ;;  %v13990_v46 = vmul.f32 %v9056_v54, %v13827_v53  ;;  %v14002_v53 = vpop.permute.xlu0 %6889  ;;  %v15506_v37 = vld [vmem:[#allocation21_spill] sm:$0xff] }
 0xd77   :  { %7307 = vperm.xlu2 %8734, %v6784_v20   ;;  %v6799_v44 = vsel %vm6796_vm8, %v6798_v14, %v6794_v9  ;;  %v13997_v56 = vmul.f32 %v9058_v1, %v13805_v61  ;;  %v6805_v10 = vmul.f32 %v13976_v5, %v6804_v48  ;;  %v6589_v27 = vadd.f32 %v6588_v55, %v6587_v51 }
 0xd78   :  { %v6801_v15 = vmul.f32 %v6799_v44, %v13740_v25  ;;  %v13994_v12 = vmax.f32 %v6582_v47, 1e-20  ;;  %v6597_v25 = vrot.slane %v6596_v62, 2  ;;  %v6800_v14 = vmul.f32 %v6799_v44, %v13734_v18 }
 0xd79   :  { %v6602_v61 = vsel %vm15503_vm10, %v13997_v56, 0.0  ;;  %v6806_v21 = vadd.f32 %v13976_v5, %v6805_v10  ;;  %v6590_v24 = vrot.slane %v6589_v27, 1 }
 0xd7a   :  { %9059 = vrcp.f32 %v13994_v12  ;;  %vm6823_vm8 = vweird.f32 %v13994_v12  ;;  %v6827_v52 = vand.u32 2147483647, %v13994_v12 }
 0xd7b   :  { %v6810_v63 = vsel %vm14020_vm11, %v13976_v5, %v6806_v21  ;;  %v6591_v30 = vadd.f32 %v6590_v24, %v6589_v27 }
 0xd7c   :  { %v14032_v59 = vsel %vm6812_vm6, %v6814_v2, %v6810_v63  ;;  %vm6828_vm10 = vcmp.eq.f32.partialorder %v6827_v52, 8.507059e+37 }
 0xd7d   :  { %v7244_v33 = vpop.permute.xlu2 %7243  ;;  %v6816_v11 = vmul.f32 %v14032_v59, %v13830_v22  ;;  %v14040_v47 = vmax.f32 %v6591_v30, 1e-20 }
 0xd7e   :  { %8729 = vset.pattern.permute.xlu1 %v15426_v49  ;;  %8735 = vset.pattern.permute.xlu0 %v15430_v3  ;;  %v7364_v58 = vmul.f32 %v7244_v33, %v12637_v31 }
 0xd7f   :  { %8736 = vset.pattern.permute.xlu2 %v15426_v49  ;;  %6959 = vperm.xlu1 %8729, %v6753_v6   ;;  %v6601_v6 = vsel %vm15502_vm1, %v13990_v46, 0.0  ;;  %9061 = vrcp.f32 %v14040_v47 }
 0xd80   :  { %7311 = vperm.xlu0 %8735, %v6785_v41   ;;  %6974 = vperm.xlu2 %8736, %v6784_v20   ;;  %v6598_v20 = vadd.f32 %v6597_v25, %v6596_v62  ;;  %v6603_v50 = vadd.f32 %v6602_v61, %v6601_v6  ;;  %v14018_v19 = vpop.eup %9059  ;;  %v7403_v5 = vsel %vm15507_vm9, %v7364_v58, 0.0  ;;  %vm6839_vm9 = vweird.f32 %v14040_v47 }
 0xd81   :  { %v6819_v32 = vmul.f32 %v14018_v19, %v13994_v12  ;;  %vm6824_vm0 = vweird.f32 %v14018_v19 }
 0xd82   :  { %v6599_v26 = vrot.slane %v6598_v20, 1  ;;  %v6604_v7 = vrot.slane %v6603_v50, 4  ;;  %vm6825_vm1 = vmor %vm6823_vm8, %vm6824_vm0 }
 0xd83   :  { %v6820_v0 = vsub.f32 1.0, %v6819_v32 }
 0xd84   :  { %v6600_v33 = vadd.f32 %v6599_v26, %v6598_v20  ;;  %v6605_v9 = vadd.f32 %v6604_v7, %v6603_v50  ;;  %v6829_v50 = vand.u32 2147483648, %v13994_v12 }
 0xd85   :  { %v14000_v43 = vpop.permute.xlu2 %7251  ;;  %v6821_v44 = vmul.f32 %v14018_v19, %v6820_v0  ;;  %v14064_v35 = vpop.eup %9061 }
 0xd86   :  { %v14043_v1 = vmax.f32 %v6600_v33, 1e-20  ;;  %v6606_v51 = vrot.slane %v6605_v9, 2  ;;  %v6830_v12 = vor.u32 1.1754944e-38, %v6829_v50  ;;  %vm6840_vm11 = vweird.f32 %v14064_v35 }
 0xd87   :  { %8731 = vset.pattern.permute.xlu1 %v15430_v3  ;;  %v6822_v21 = vadd.f32 %v14018_v19, %v6821_v44  ;;  %v6843_v44 = vand.u32 2147483647, %v14040_v47  ;;  %v7366_v50 = vmul.f32 %v14000_v43, %v12637_v31 }
 0xd88   :  { %8737 = vset.pattern.permute.xlu0 %v15426_v49  ;;  %8739 = vset.pattern.permute.xlu2 %v15430_v3  ;;  %9063 = vrcp.f32 %v14043_v1  ;;  %v6607_v10 = vadd.f32 %v6606_v51, %v6605_v9 }
 0xd89   :  { %7303 = vperm.xlu1 %8731, %v6769_v28   ;;  %6979 = vperm.xlu0 %8737, %v6785_v41   ;;  %v6826_v7 = vsel %vm6825_vm1, %v14018_v19, %v6822_v21  ;;  %vm6844_vm0 = vcmp.eq.f32.partialorder %v6843_v44, 8.507059e+37  ;;  %vm15517_vm1 = vcmask 523520  }
 0xd8a   :  { %7319 = vperm.xlu2 %8739, %v6801_v15   ;;  %v6608_v39 = vrot.slane %v6607_v10, 1  ;;  %v6831_v30 = vsel %vm6828_vm10, %v6830_v12, %v6826_v7  ;;  %vm15518_vm10 = vmmov %vm15517_vm1 }
 0xd8b   :  { %v6832_v33 = vmul.f32 %v6831_v30, %v13900_v13  ;;  %v6833_v0 = vmul.f32 %v6831_v30, %v13904_v45 }
 0xd8e   :  { %v6905_v41 = vpop.permute.xlu2 %6904  ;;  %v14068_v58 = vpop.eup %9063 }
 0xd8f   :  { %v7046_v24 = vmul.f32 %v6905_v41, %v12637_v31  ;;  %v6609_v41 = vadd.f32 %v6608_v39, %v6607_v10  ;;  %v6851_v19 = vmul.f32 %v14068_v58, %v14043_v1  ;;  %vm6856_vm6 = vweird.f32 %v14068_v58 }
 0xd90   :  { %v6859_v10 = vand.u32 2147483647, %v14043_v1 }
 0xd91   :  { %8733 = vset.pattern.permute.xlu1 %v15426_v49  ;;  %8743 = vset.pattern.permute.xlu0 %v15430_v3 }
 0xd92   :  { %8741 = vset.pattern.permute.xlu2 %v15426_v49  ;;  %6969 = vperm.xlu1 %8733, %v6769_v28   ;;  %vm6860_vm8 = vcmp.eq.f32.partialorder %v6859_v10, 8.507059e+37 }
 0xd93   :  { %6989 = vperm.xlu2 %8741, %v6801_v15  }
 0xd94   :  { %v7248_v42 = vpop.permute.xlu1 %7247  ;;  %v6895_v38 = vpop.permute.xlu0 %6894 }
 0xd95   :  { %v7365_v57 = vmul.f32 %v7248_v42, %v15506_v37  ;;  %v7044_v48 = vmul.f32 %v6895_v38, %v12637_v31  ;;  %v6835_v38 = vmul.f32 %v14064_v35, %v14040_v47 }
 0xd97   :  { %v7404_v40 = vsel %vm15508_vm2, %v7365_v57, 0.0  ;;  %v14051_v55 = vpop.permute.xlu2 %7263  ;;  %v7083_v6 = vsel %vm15509_vm13, %v7044_v48, 0.0  ;;  %v7092_v57 = vsel %vm15511_vm12, %v7046_v24, 0.0  ;;  %v6836_v9 = vsub.f32 1.0, %v6835_v38  ;;  %vm14112_vm2 = vmor %vm6839_vm9, %vm6840_vm11 }
 0xd98   :  { %v7405_v34 = vadd.f32 %v7404_v40, %v7403_v5  ;;  %vm6855_vm13 = vweird.f32 %v14043_v1  ;;  %vm15520_vm11 = vmmov %vm15517_vm1  ;;  %v7369_v44 = vmul.f32 %v14051_v55, %v15506_v37 }
 0xd99   :  { %v6837_v13 = vmul.f32 %v14064_v35, %v6836_v9 }
 0xd9a   :  { %v7406_v54 = vrot.slane %v7405_v34, 4  ;;  %8738 = vset.pattern.permute.xlu1 %v15430_v3 }
 0xd9b   :  { %8742 = vset.pattern.permute.xlu2 %v15430_v3  ;;  %7315 = vperm.xlu1 %8738, %v6800_v14   ;;  %v6838_v45 = vadd.f32 %v14064_v35, %v6837_v13 }
 0xd9c   :  { %v7407_v28 = vadd.f32 %v7406_v54, %v7405_v34  ;;  %7323 = vperm.xlu2 %8742, %v6816_v11   ;;  %v14084_v34 = vmax.f32 %v6609_v41, 1e-20 }
 0xd9d   :  { %v6900_v18 = vpop.permute.xlu1 %6899 }
 0xd9e   :  { %v7408_v62 = vrot.slane %v7407_v28, 2  ;;  %v7045_v22 = vmul.f32 %v6900_v18, %v15506_v37  ;;  %v14048_v15 = vpop.permute.xlu0 %7255  ;;  %9065 = vrcp.f32 %v14084_v34  ;;  %vm6871_vm9 = vweird.f32 %v14084_v34 }
 0xd9f   :  { %v6875_v55 = vand.u32 2147483647, %v14084_v34 }
 0xda0   :  { %v7409_v25 = vadd.f32 %v7408_v62, %v7407_v28  ;;  %v7084_v61 = vsel %vm15510_vm4, %v7045_v22, 0.0  ;;  %v6920_v5 = vpop.permute.xlu2 %6919  ;;  %v6845_v28 = vand.u32 2147483648, %v14040_v47  ;;  %v6861_v62 = vand.u32 2147483648, %v14043_v1  ;;  %vm14128_vm4 = vmor %vm6855_vm13, %vm6856_vm6 }
 0xda1   :  { %v14056_v27 = vadd.f32 %v7084_v61, %v7083_v6  ;;  %v7367_v6 = vmul.f32 %v14048_v15, %v15506_v37  ;;  %v6842_v47 = vsel %vm14112_vm2, %v14064_v35, %v6838_v45  ;;  %v7049_v1 = vmul.f32 %v6920_v5, %v15506_v37  ;;  %vm15521_vm6 = vmmov %vm15517_vm1 }
 0xda2   :  { %v7410_v20 = vrot.slane %v7409_v25, 1  ;;  %v6862_v35 = vor.u32 1.1754944e-38, %v6861_v62  ;;  %v7412_v38 = vsel %vm15521_vm6, %v7366_v50, 0.0  ;;  %vm15522_vm13 = vmmov %vm15511_vm12  ;;  %vm6876_vm6 = vcmp.eq.f32.partialorder %v6875_v55, 8.507059e+37 }
 0xda3   :  { %8740 = vset.pattern.permute.xlu1 %v15426_v49 }
 0xda4   :  { %8744 = vset.pattern.permute.xlu2 %v15426_v49  ;;  %6984 = vperm.xlu1 %8740, %v6800_v14   ;;  %v7411_v63 = vadd.f32 %v7410_v20, %v7409_v25  ;;  %v6817_v14 = vmul.f32 %v14032_v59, %v13833_v16  ;;  %v14105_v18 = vpop.eup %9065  ;;  %v7362_v25 = vmul.f32 %v14004_v29, %v12637_v31  ;;  %v6846_v29 = vor.u32 1.1754944e-38, %v6845_v28 }
 0xda5   :  { %6994 = vperm.xlu2 %8744, %v6816_v11   ;;  %v6910_v26 = vpop.permute.xlu1 %6909  ;;  %v6852_v11 = vsub.f32 1.0, %v6851_v19  ;;  %v6867_v21 = vmul.f32 %v14105_v18, %v14084_v34  ;;  %v7363_v20 = vmul.f32 %v13931_v17, %v15506_v37  ;;  %vm6872_vm2 = vweird.f32 %v14105_v18 }
 0xda6   :  { %v7047_v2 = vmul.f32 %v6910_v26, %v15506_v37  ;;  %v14072_v42 = vpop.permute.xlu0 %7267  ;;  %7556 = vrot.lane.b32.xlu0 %v7411_v63, %s9147_s26  ;;  %v6847_v63 = vsel %vm6844_vm0, %v6846_v29, %v6842_v47  ;;  %v7394_v26 = vsel %vm15517_vm1, %v7362_v25, 0.0  ;;  %vm15524_vm0 = vmmov %vm15517_vm1 }
 0xda7   :  { %v6853_v16 = vmul.f32 %v14068_v58, %v6852_v11  ;;  %v6868_v12 = vsub.f32 1.0, %v6867_v21  ;;  %v7395_v43 = vsel %vm15520_vm11, %v7363_v20, 0.0  ;;  %vm15531_vm11 = vmmov %vm15524_vm0 }
 0xda8   :  { %v7093_v32 = vsel %vm15512_vm14, %v7047_v2, 0.0  ;;  %v7102_v2 = vsel %vm15511_vm12, %v7049_v1, 0.0  ;;  %vm15519_vm14 = vmmov %vm15511_vm12  ;;  %v7396_v30 = vadd.f32 %v7395_v43, %v7394_v26 }
 0xda9   :  { %v14081_v40 = vadd.f32 %v7093_v32, %v7092_v57  ;;  %v6854_v48 = vadd.f32 %v14068_v58, %v6853_v16  ;;  %v6849_v32 = vmul.f32 %v6847_v63, %v13949_v60  ;;  %v6869_v9 = vmul.f32 %v14105_v18, %v6868_v12 }
 0xdab   :  { %v14098_v59 = vpop.permute.xlu2 %7275  ;;  %v6858_v15 = vsel %vm14128_vm4, %v14068_v58, %v6854_v48  ;;  %v7413_v58 = vsel %vm15518_vm10, %v7367_v6, 0.0  ;;  %v6870_v62 = vadd.f32 %v14105_v18, %v6869_v9  ;;  %vm15523_vm4 = vmmov %vm15517_vm1  ;;  %v6877_v6 = vand.u32 2147483648, %v14084_v34 }
 0xdac   :  { %8746 = vset.pattern.permute.xlu1 %v15430_v3  ;;  %v14145_v7 = vsel %vm6860_vm8, %v6862_v35, %v6858_v15  ;;  %v7414_v19 = vadd.f32 %v7413_v58, %v7412_v38  ;;  %vm15525_vm8 = vmmov %vm15511_vm12 }
 0xdad   :  { %8747 = vset.pattern.permute.xlu2 %v15430_v3  ;;  %7331 = vperm.xlu1 %8746, %v6832_v33   ;;  %v6864_v5 = vmul.f32 %v14145_v7, %v13955_v23  ;;  %v7370_v23 = vmul.f32 %v14072_v42, %v12637_v31  ;;  %vm15526_vm1 = vmmov %vm15524_vm0 }
 0xdae   :  { %7335 = vperm.xlu2 %8747, %v6833_v0   ;;  %7327 = vperm.xlu0 %8743, %v6817_v14   ;;  %v7415_v11 = vrot.slane %v7414_v19, 4  ;;  %vm15527_vm10 = vmmov %vm15524_vm0 }
 0xdaf   :  { %v14091_v54 = vpop.permute.xlu1 %7259  ;;  %v7430_v10 = vsel %vm15526_vm1, %v7370_v23, 0.0  ;;  %vm15528_vm12 = vmmov %vm15524_vm0 }
 0xdb0   :  { %v14095_v51 = vpop.permute.xlu0 %6924  ;;  %v7368_v45 = vmul.f32 %v14091_v54, %v12637_v31  ;;  %v7416_v47 = vadd.f32 %v7415_v11, %v7414_v19 }
 0xdb2   :  { %v7421_v1 = vsel %vm15528_vm12, %v7368_v45, 0.0  ;;  %v7417_v34 = vrot.slane %v7416_v47, 2 }
 0xdb4   :  { %v6935_v41 = vpop.permute.xlu2 %6934 }
 0xdb5   :  { %8748 = vset.pattern.permute.xlu1 %v15426_v49 }
 0xdb6   :  { %8749 = vset.pattern.permute.xlu2 %v15426_v49  ;;  %7004 = vperm.xlu1 %8748, %v6832_v33   ;;  %v6848_v33 = vmul.f32 %v6847_v63, %v13945_v36  ;;  %v7372_v36 = vmul.f32 %v14098_v59, %v12637_v31  ;;  %v6878_v63 = vor.u32 1.1754944e-38, %v6877_v6 }
 0xdb7   :  { %7009 = vperm.xlu2 %8749, %v6833_v0   ;;  %8745 = vset.pattern.permute.xlu0 %v15426_v49  ;;  %v7397_v0 = vrot.slane %v7396_v30, 4 }
 0xdb8   :  { %6999 = vperm.xlu0 %8745, %v6817_v14   ;;  %v7052_v14 = vmul.f32 %v6935_v41, %v12637_v31  ;;  %v7439_v61 = vsel %vm15527_vm10, %v7372_v36, 0.0  ;;  %vm15538_vm10 = vmmov %vm15526_vm1 }
 0xdb9   :  { %v6915_v52 = vpop.permute.xlu1 %6914  ;;  %v7280_v39 = vpop.permute.xlu0 %7279  ;;  %v7398_v21 = vadd.f32 %v7397_v0, %v7396_v30  ;;  %v7418_v30 = vadd.f32 %v7417_v34, %v7416_v47  ;;  %v6865_v0 = vmul.f32 %v14145_v7, %v13952_v4 }
 0xdba   :  { %v7048_v24 = vmul.f32 %v6915_v52, %v12637_v31  ;;  %v7373_v60 = vmul.f32 %v7280_v39, %v15506_v37  ;;  %v7119_v42 = vsel %vm15522_vm13, %v7052_v14, 0.0  ;;  %v7422_v52 = vsel %vm15531_vm11, %v7369_v44, 0.0  ;;  %vm15534_vm13 = vmmov %vm15524_vm0 }
 0xdbb   :  { %v7423_v35 = vadd.f32 %v7422_v52, %v7421_v1  ;;  %v7419_v23 = vrot.slane %v7418_v30, 1  ;;  %vm15541_vm11 = vmmov %vm15526_vm1 }
 0xdbc   :  { %v7101_v17 = vsel %vm15519_vm14, %v7048_v24, 0.0  ;;  %v7440_v59 = vsel %vm15523_vm4, %v7373_v60, 0.0  ;;  %vm14193_vm14 = vmor %vm6871_vm9, %vm6872_vm2  ;;  %v7050_v24 = vmul.f32 %v14095_v51, %v12637_v31 }
 0xdbd   :  { %v14151_v57 = vadd.f32 %v7102_v2, %v7101_v17  ;;  %v7288_v29 = vpop.permute.xlu2 %7287  ;;  %v7441_v20 = vadd.f32 %v7440_v59, %v7439_v61  ;;  %v6874_v39 = vsel %vm14193_vm14, %v14105_v18, %v6870_v62  ;;  %v7399_v2 = vrot.slane %v7398_v21, 2  ;;  %vm15532_vm9 = vmmov %vm15525_vm8 }
 0xdbe   :  { %8751 = vset.pattern.permute.xlu1 %v15430_v3  ;;  %v6879_v38 = vsel %vm6876_vm6, %v6878_v63, %v6874_v39  ;;  %v7424_v41 = vrot.slane %v7423_v35, 4  ;;  %v7110_v18 = vsel %vm15532_vm9, %v7050_v24, 0.0  ;;  %vm15533_vm2 = vmmov %vm15525_vm8  ;;  %v7420_v62 = vadd.f32 %v7419_v23, %v7418_v30  ;;  %v9079_v30 = vld [vmem:[#allocation2 + $0x2e] ss:$0 sm:$0xff] }
 0xdbf   :  { %8754 = vset.pattern.permute.xlu2 %v15430_v3  ;;  %7343 = vperm.xlu1 %8751, %v6849_v32   ;;  %v7442_v17 = vrot.slane %v7441_v20, 4  ;;  %v6881_v14 = vmul.f32 %v6879_v38, %v13997_v56  ;;  %vm15535_vm4 = vmmov %vm15524_vm0 }
 0xdc0   :  { %7347 = vperm.xlu2 %8754, %v6864_v5   ;;  %8750 = vset.pattern.permute.xlu0 %v15430_v3  ;;  %v7425_v11 = vadd.f32 %v7424_v41, %v7423_v35  ;;  %vm15542_vm6 = vmmov %vm15526_vm1 }
 0xdc1   :  { %7339 = vperm.xlu0 %8750, %v6848_v33   ;;  %v7443_v9 = vadd.f32 %v7442_v17, %v7441_v20 }
 0xdc2   :  { %v7272_v13 = vpop.permute.xlu1 %7271  ;;  %v6940_v16 = vpop.permute.xlu0 %6939  ;;  %v7426_v45 = vrot.slane %v7425_v11, 2 }
 0xdc3   :  { %v7371_v28 = vmul.f32 %v7272_v13, %v15506_v37  ;;  %v7053_v48 = vmul.f32 %v6940_v16, %v15506_v37  ;;  %v7444_v13 = vrot.slane %v7443_v9, 2  ;;  %v7375_v16 = vmul.f32 %v7288_v29, %v15506_v37 }
 0xdc5   :  { %v7431_v22 = vsel %vm15524_vm0, %v7371_v28, 0.0  ;;  %v7120_v54 = vsel %vm15525_vm8, %v7053_v48, 0.0  ;;  %v7449_v4 = vsel %vm15534_vm13, %v7375_v16, 0.0  ;;  %vm15536_vm0 = vmmov %vm15533_vm2 }
 0xdc6   :  { %v14181_v25 = vadd.f32 %v7120_v54, %v7119_v42  ;;  %v7432_v15 = vadd.f32 %v7431_v22, %v7430_v10  ;;  %v6950_v60 = vpop.permute.xlu2 %6949  ;;  %v7445_v42 = vadd.f32 %v7444_v13, %v7443_v9  ;;  %v7427_v22 = vadd.f32 %v7426_v45, %v7425_v11  ;;  %vm15537_vm8 = vmmov %vm15536_vm0 }
 0xdc7   :  { %8753 = vset.pattern.permute.xlu1 %v15426_v49  ;;  %v7055_v61 = vmul.f32 %v6950_v60, %v15506_v37  ;;  %vm15539_vm12 = vmmov %vm15536_vm0 }
 0xdc8   :  { %8756 = vset.pattern.permute.xlu2 %v15426_v49  ;;  %7019 = vperm.xlu1 %8753, %v6849_v32   ;;  %v7433_v26 = vrot.slane %v7432_v15, 4  ;;  %v7446_v6 = vrot.slane %v7445_v42, 1  ;;  %v7428_v1 = vrot.slane %v7427_v22, 1  ;;  %vm15540_vm14 = vmmov %vm15536_vm0 }
 0xdc9   :  { %7024 = vperm.xlu2 %8756, %v6864_v5   ;;  %8752 = vset.pattern.permute.xlu0 %v15426_v49  ;;  %v14212_v5 = vmul.f32 %v6879_v38, %v13990_v46  ;;  %v7129_v35 = vsel %vm15536_vm0, %v7055_v61, 0.0  ;;  %vm15543_vm9 = vmmov %vm15536_vm0 }
 0xdca   :  { %7014 = vperm.xlu0 %8752, %v6848_v33   ;;  %v7434_v51 = vadd.f32 %v7433_v26, %v7432_v15  ;;  %v7400_v33 = vadd.f32 %v7399_v2, %v7398_v21  ;;  %v7447_v52 = vadd.f32 %v7446_v6, %v7445_v42  ;;  %v7429_v24 = vadd.f32 %v7428_v1, %v7427_v22  ;;  %vm15545_vm13 = vmmov %vm15526_vm1 }
 0xdcb   :  { %v6930_v58 = vpop.permute.xlu1 %6929 }
 0xdcc   :  { %v7051_v12 = vmul.f32 %v6930_v58, %v15506_v37  ;;  %v14205_v43 = vpop.permute.xlu0 %7291  ;;  %v7435_v46 = vrot.slane %v7434_v51, 2  ;;  %v7401_v36 = vrot.slane %v7400_v33, 1 }
 0xdcd   :  { %v7376_v2 = vmul.f32 %v14205_v43, %v12637_v31 }
 0xdce   :  { %v7111_v32 = vsel %vm15533_vm2, %v7051_v12, 0.0  ;;  %v7436_v44 = vadd.f32 %v7435_v46, %v7434_v51  ;;  %v9080_v51 = vld [vmem:[#allocation2 + $0x80] sm:$0xff]  ;;  %vm15544_vm2 = vmmov %vm15526_vm1 }
 0xdcf   :  { %v14209_v19 = vadd.f32 %v7111_v32, %v7110_v18  ;;  %v7457_v41 = vsel %vm15526_vm1, %v7376_v2, 0.0 }
 0xdd0   :  { %8758 = vset.pattern.permute.xlu1 %v15430_v3  ;;  %v7437_v55 = vrot.slane %v7436_v44, 1 }
 0xdd1   :  { %8759 = vset.pattern.permute.xlu2 %v15430_v3  ;;  %7355 = vperm.xlu1 %8758, %v14212_v5   ;;  %v7308_v54 = vpop.permute.xlu2 %7307 }
 0xdd2   :  { %7359 = vperm.xlu2 %8759, %v6881_v14   ;;  %8755 = vset.pattern.permute.xlu0 %v15430_v3  ;;  %v7402_v3 = vadd.f32 %v7401_v36, %v7400_v33  ;;  %v7438_v20 = vadd.f32 %v7437_v55, %v7436_v44  ;;  %v9081_v33 = vld [vmem:[#allocation2 + $0x88] sm:$0xff]  ;;  %v7380_v46 = vmul.f32 %v7308_v54, %v12637_v31 }
 0xdd3   :  { %7351 = vperm.xlu0 %8755, %v6865_v0   ;;  %v8760_v9 = vpack.i.bf16 %v9080_v51, %v9081_v33 }
 0xdd5   :  { %v7284_v56 = vpop.permute.xlu1 %7283 }
 0xdd6   :  { %v7374_v28 = vmul.f32 %v7284_v56, %v12637_v31  ;;  %v6955_v48 = vpop.permute.xlu0 %6954 }
 0xdd8   :  { %v7448_v7 = vsel %vm15535_vm4, %v7374_v28, 0.0  ;;  %vm15546_vm4 = vmmov %vm15536_vm0 }
 0xdd9   :  { %v7450_v59 = vadd.f32 %v7449_v4, %v7448_v7  ;;  %7558 = vrot.lane.b32.xlu1 %v7420_v62, %s9147_s26 }
 0xdda   :  { %7554 = vrot.lane.b32.xlu2 %v7402_v3, %s9147_s26  ;;  %8765 = vset.pattern.permute.xlu1 %v15426_v49  ;;  %v6975_v26 = vpop.permute.xlu2 %6974 }
 0xddb   :  { %v7451_v10 = vrot.slane %v7450_v59, 4  ;;  %8757 = vset.pattern.permute.xlu0 %v15426_v49  ;;  %8766 = vset.pattern.permute.xlu2 %v15426_v49 }
 0xddc   :  { %7029 = vperm.xlu0 %8757, %v6865_v0   ;;  %v7056_v0 = vmul.f32 %v6955_v48, %v12637_v31  ;;  %v7475_v48 = vsel %vm15541_vm11, %v7380_v46, 0.0  ;;  %vm15551_vm11 = vmmov %vm15526_vm1 }
 0xddd   :  { %v7452_v47 = vadd.f32 %v7451_v10, %v7450_v59  ;;  %v7060_v59 = vmul.f32 %v6975_v26, %v12637_v31 }
 0xdde   :  { %v7137_v56 = vsel %vm15539_vm12, %v7056_v0, 0.0  ;;  %vm15549_vm12 = vmmov %vm15536_vm0 }
 0xddf   :  { %v7453_v29 = vrot.slane %v7452_v47, 2  ;;  %v6945_v15 = vpop.permute.xlu1 %6944  ;;  %v7300_v21 = vpop.permute.xlu0 %7299 }
 0xde0   :  { %v7054_v50 = vmul.f32 %v6945_v15, %v12637_v31  ;;  %v7378_v54 = vmul.f32 %v7300_v21, %v12637_v31 }
 0xde1   :  { %v7454_v39 = vadd.f32 %v7453_v29, %v7452_v47  ;;  %7562 = vrot.lane.b32.xlu1 %v7438_v20, %s9147_s26  ;;  %v7155_v29 = vsel %vm15543_vm9, %v7060_v59, 0.0  ;;  %vm15553_vm9 = vmmov %vm15526_vm1 }
 0xde2   :  { %v7128_v49 = vsel %vm15537_vm8, %v7054_v50, 0.0  ;;  %7564 = vrot.lane.b32.xlu2 %v7447_v52, %s9147_s26  ;;  %v7466_v15 = vsel %vm15544_vm2, %v7378_v54, 0.0  ;;  %vm15547_vm8 = vmmov %vm15536_vm0 }
 0xde3   :  { %v14236_v63 = vadd.f32 %v7129_v35, %v7128_v49  ;;  %v7455_v34 = vrot.slane %v7454_v39, 1  ;;  %vm15554_vm2 = vmmov %vm15526_vm1 }
 0xde4   :  { %7560 = vrot.lane.b32.xlu0 %v7429_v24, %s9147_s26  ;;  %v7320_v43 = vpop.permute.xlu2 %7319  ;;  %v7086_v24 = vrot.slane %v14056_v27, 4 }
 0xde5   :  { %v7456_v58 = vadd.f32 %v7455_v34, %v7454_v39 }
 0xde8   :  { %v7296_v17 = vpop.permute.xlu1 %7295  ;;  %v6965_v12 = vpop.permute.xlu0 %6964 }
 0xde9   :  { %v7377_v38 = vmul.f32 %v7296_v17, %v15506_v37  ;;  %7566 = vrot.lane.b32.xlu1 %v7456_v58, %s9147_s26  ;;  %v7058_v34 = vmul.f32 %v6965_v12, %v12637_v31 }
 0xdea   :  { %7039 = vperm.xlu2 %8766, %v6881_v14  }
 0xdeb   :  { %v7458_v18 = vsel %vm15538_vm10, %v7377_v38, 0.0  ;;  %vm15548_vm10 = vmmov %vm15526_vm1 }
 0xdec   :  { %v7459_v32 = vadd.f32 %v7458_v18, %v7457_v41  ;;  %7635 = vrot.lane.b32.xlu0 %v9079_v30, %s9147_s26  ;;  %v7087_v41 = vadd.f32 %v7086_v24, %v14056_v27  ;;  %v7146_v18 = vsel %vm15536_vm0, %v7058_v34, 0.0 }
 0xded   :  { %v6990_v22 = vpop.permute.xlu2 %6989 }
 0xdee   :  { %v7460_v60 = vrot.slane %v7459_v32, 4  ;;  %v7088_v12 = vrot.slane %v7087_v41, 2 }
 0xdf0   :  { %v7461_v11 = vadd.f32 %v7460_v60, %v7459_v32  ;;  %v7383_v60 = vmul.f32 %v7320_v43, %v15506_v37 }
 0xdf1   :  { %8761 = vrot.lane.b32.xlu1 %v8760_v9, %s9150_s8  ;;  %v6960_v14 = vpop.permute.xlu1 %6959 }
 0xdf2   :  { %v7462_v23 = vrot.slane %v7461_v11, 2  ;;  %v7057_v13 = vmul.f32 %v6960_v14, %v15506_v37  ;;  %v7312_v16 = vpop.permute.xlu0 %7311  ;;  %v7089_v14 = vadd.f32 %v7088_v12, %v7087_v41  ;;  %v7485_v27 = vsel %vm15526_vm1, %v7383_v60, 0.0 }
 0xdf3   :  { %v7381_v36 = vmul.f32 %v7312_v16, %v15506_v37 }
 0xdf4   :  { %v7463_v45 = vadd.f32 %v7462_v23, %v7461_v11  ;;  %v7138_v28 = vsel %vm15540_vm14, %v7057_v13, 0.0  ;;  %vm15550_vm14 = vmmov %vm15536_vm0 }
 0xdf5   :  { %v14254_v44 = vadd.f32 %v7138_v28, %v7137_v56  ;;  %v7476_v62 = vsel %vm15542_vm6, %v7381_v36, 0.0  ;;  %v7090_v36 = vrot.slane %v7089_v14, 1  ;;  %v7063_v56 = vmul.f32 %v6990_v22, %v15506_v37  ;;  %vm15552_vm6 = vmmov %vm15526_vm1 }
 0xdf6   :  { %v7477_v42 = vadd.f32 %v7476_v62, %v7475_v48  ;;  %v7464_v4 = vrot.slane %v7463_v45, 1  ;;  %v7324_v26 = vpop.permute.xlu2 %7323 }
 0xdf8   :  { %v7478_v7 = vrot.slane %v7477_v42, 4  ;;  %v7465_v3 = vadd.f32 %v7464_v4, %v7463_v45 }
 0xdf9   :  { %7034 = vperm.xlu1 %8765, %v14212_v5  }
 0xdfa   :  { %v7479_v10 = vadd.f32 %v7478_v7, %v7477_v42  ;;  %7568 = vrot.lane.b32.xlu2 %v7465_v3, %s9147_s26  ;;  %v7091_v42 = vadd.f32 %v7090_v36, %v7089_v14  ;;  %v7165_v7 = vsel %vm15549_vm12, %v7063_v56, 0.0  ;;  %vm15559_vm12 = vmmov %vm15536_vm0 }
 0xdfb   :  { %v7304_v55 = vpop.permute.xlu1 %7303  ;;  %v6980_v6 = vpop.permute.xlu0 %6979 }
 0xdfc   :  { %v7480_v47 = vrot.slane %v7479_v10, 2  ;;  %v7379_v61 = vmul.f32 %v7304_v55, %v15506_v37  ;;  %v7061_v1 = vmul.f32 %v6980_v6, %v15506_v37 }
 0xdfe   :  { %v7481_v20 = vadd.f32 %v7480_v47, %v7479_v10  ;;  %v7467_v50 = vsel %vm15545_vm13, %v7379_v61, 0.0  ;;  %v7156_v5 = vsel %vm15546_vm4, %v7061_v1, 0.0  ;;  %v7384_v47 = vmul.f32 %v7324_v26, %v12637_v31  ;;  %vm15555_vm13 = vmmov %vm15536_vm0 }
 0xdff   :  { %v7468_v21 = vadd.f32 %v7467_v50, %v7466_v15  ;;  %v14267_v52 = vadd.f32 %v7156_v5, %v7155_v29  ;;  %v6995_v0 = vpop.permute.xlu2 %6994  ;;  %vm15556_vm4 = vmmov %vm15536_vm0 }
 0xe00   :  { %v7482_v39 = vrot.slane %v7481_v20, 1 }
 0xe01   :  { %v7469_v35 = vrot.slane %v7468_v21, 4 }
 0xe02   :  { %v7483_v49 = vadd.f32 %v7482_v39, %v7481_v20 }
 0xe03   :  { %v7470_v58 = vadd.f32 %v7469_v35, %v7468_v21  ;;  %v7493_v21 = vsel %vm15553_vm9, %v7384_v47, 0.0  ;;  %vm15563_vm9 = vmmov %vm15526_vm1 }
 0xe04   :  { %v6970_v2 = vpop.permute.xlu1 %6969  ;;  %7572 = vrot.lane.b32.xlu0 %v7483_v49, %s9147_s26 }
 0xe05   :  { %v7471_v17 = vrot.slane %v7470_v58, 2  ;;  %v7059_v38 = vmul.f32 %v6970_v2, %v15506_v37 }
 0xe07   :  { %v7472_v32 = vadd.f32 %v7471_v17, %v7470_v58  ;;  %v7147_v30 = vsel %vm15547_vm8, %v7059_v38, 0.0  ;;  %v7064_v38 = vmul.f32 %v6995_v0, %v12637_v31  ;;  %vm15557_vm8 = vmmov %vm15536_vm0 }
 0xe08   :  { %v14276_v51 = vadd.f32 %v7147_v30, %v7146_v18  ;;  %v7336_v48 = vpop.permute.xlu2 %7335 }
 0xe09   :  { %v7473_v33 = vrot.slane %v7472_v32, 1  ;;  %v7387_v22 = vmul.f32 %v7336_v48, %v15506_v37 }
 0xe0b   :  { %v7474_v9 = vadd.f32 %v7473_v33, %v7472_v32  ;;  %v7503_v50 = vsel %vm15551_vm11, %v7387_v22, 0.0  ;;  %vm15561_vm11 = vmmov %vm15526_vm1 }
 0xe0d   :  { %v7316_v11 = vpop.permute.xlu1 %7315  ;;  %7570 = vrot.lane.b32.xlu2 %v7474_v9, %s9147_s26 }
 0xe0e   :  { %v7382_v46 = vmul.f32 %v7316_v11, %v12637_v31 }
 0xe10   :  { %v7484_v23 = vsel %vm15548_vm10, %v7382_v46, 0.0  ;;  %vm15558_vm10 = vmmov %vm15526_vm1 }
 0xe11   :  { %v7486_v13 = vadd.f32 %v7485_v27, %v7484_v23  ;;  %v7010_v15 = vpop.permute.xlu2 %7009  ;;  %v7173_v27 = vsel %vm15536_vm0, %v7064_v38, 0.0 }
 0xe12   :  { %v7067_v26 = vmul.f32 %v7010_v15, %v15506_v37 }
 0xe13   :  { %v7487_v16 = vrot.slane %v7486_v13, 4 }
 0xe14   :  { %v7183_v33 = vsel %vm15555_vm13, %v7067_v26, 0.0  ;;  %vm15568_vm13 = vcmask 130048  }
 0xe15   :  { %v7488_v45 = vadd.f32 %v7487_v16, %v7486_v13 }
 0xe16   :  { %v6985_v28 = vpop.permute.xlu1 %6984 }
 0xe17   :  { %v7489_v43 = vrot.slane %v7488_v45, 2  ;;  %v7062_v62 = vmul.f32 %v6985_v28, %v12637_v31 }
 0xe18   :  { %v7557_v4 = vpop.permute.xlu0 %7556 }
 0xe19   :  { %v7490_v3 = vadd.f32 %v7489_v43, %v7488_v45  ;;  %v7164_v59 = vsel %vm15550_vm14, %v7062_v62, 0.0  ;;  %v14287_v54 = vadd.f32 %v7557_v4, %v7091_v42  ;;  %vm15560_vm14 = vmmov %vm15536_vm0 }
 0xe1a   :  { %v14289_v10 = vadd.f32 %v7165_v7, %v7164_v59  ;;  %v7348_v9 = vpop.permute.xlu2 %7347 }
 0xe1b   :  { %v7491_v55 = vrot.slane %v7490_v3, 1 }
 0xe1d   :  { %v7492_v6 = vadd.f32 %v7491_v55, %v7490_v3 }
 0xe1f   :  { %v7332_v61 = vpop.permute.xlu1 %7331  ;;  %7574 = vrot.lane.b32.xlu1 %v7492_v6, %s9147_s26 }
 0xe20   :  { %v7386_v1 = vmul.f32 %v7332_v61, %v12637_v31  ;;  %v7328_v29 = vpop.permute.xlu0 %7327 }
 0xe21   :  { %v7385_v20 = vmul.f32 %v7328_v29, %v15506_v37 }
 0xe22   :  { %v7502_v5 = vsel %vm15552_vm6, %v7386_v1, 0.0  ;;  %vm15562_vm6 = vmmov %vm15526_vm1 }
 0xe23   :  { %v7504_v39 = vadd.f32 %v7503_v50, %v7502_v5  ;;  %v7494_v35 = vsel %vm15554_vm2, %v7385_v20, 0.0  ;;  %v14316_v62 = vpop.permute.xlu2 %7024  ;;  %vm15564_vm2 = vmmov %vm15526_vm1 }
 0xe24   :  { %v7495_v49 = vadd.f32 %v7494_v35, %v7493_v21 }
 0xe25   :  { %v7505_v24 = vrot.slane %v7504_v39, 4 }
 0xe26   :  { %v7496_v34 = vrot.slane %v7495_v49, 4 }
 0xe27   :  { %v7506_v58 = vadd.f32 %v7505_v24, %v7504_v39 }
 0xe28   :  { %v7497_v2 = vadd.f32 %v7496_v34, %v7495_v49  ;;  %v7005_v17 = vpop.permute.xlu1 %7004  ;;  %v7390_v49 = vmul.f32 %v7348_v9, %v12637_v31 }
 0xe29   :  { %v7507_v41 = vrot.slane %v7506_v58, 2  ;;  %v7066_v18 = vmul.f32 %v7005_v17, %v12637_v31 }
 0xe2a   :  { %v7498_v32 = vrot.slane %v7497_v2, 2  ;;  %v7000_v30 = vpop.permute.xlu0 %6999  ;;  %v7520_v38 = vsel %vm15563_vm9, %v7390_v49, 0.0  ;;  %v7122_v49 = vrot.slane %v14181_v25, 4  ;;  %vm15577_vm9 = vmmov %vm15536_vm0 }
 0xe2b   :  { %v7508_v12 = vadd.f32 %v7507_v41, %v7506_v58  ;;  %v7182_v60 = vsel %vm15556_vm4, %v7066_v18, 0.0  ;;  %v7065_v11 = vmul.f32 %v7000_v30, %v15506_v37  ;;  %v14335_v30 = vld [vmem:[#allocation2 + $0x70] sm:$0xff]  ;;  %vm15569_vm4 = vmmov %vm15536_vm0 }
 0xe2c   :  { %v7499_v46 = vadd.f32 %v7498_v32, %v7497_v2  ;;  %v14306_v14 = vadd.f32 %v7183_v33, %v7182_v60  ;;  %v7360_v1 = vpop.permute.xlu2 %7359  ;;  %v14337_v33 = vld [vmem:[#allocation2 + $0x78] sm:$0xff] }
 0xe2d   :  { %v7174_v0 = vsel %vm15557_vm8, %v7065_v11, 0.0  ;;  %v7509_v23 = vrot.slane %v7508_v12, 1  ;;  %v7393_v21 = vmul.f32 %v7360_v1, %v15506_v37  ;;  %v14341_v9 = vpack.i.bf16 %v14335_v30, %v14337_v33  ;;  %vm15570_vm8 = vmmov %vm15536_vm0 }
 0xe2e   :  { %v14310_v13 = vadd.f32 %v7174_v0, %v7173_v27  ;;  %v7500_v16 = vrot.slane %v7499_v46, 1 }
 0xe2f   :  { %v7510_v36 = vadd.f32 %v7509_v23, %v7508_v12  ;;  %v7530_v26 = vsel %vm15561_vm11, %v7393_v21, 0.0  ;;  %vm15575_vm11 = vcmask 1046534  }
 0xe30   :  { %v7501_v56 = vadd.f32 %v7500_v16, %v7499_v46 }
 0xe31   :  { %v7344_v45 = vpop.permute.xlu1 %7343  ;;  %7578 = vrot.lane.b32.xlu2 %v7510_v36, %s9147_s26 }
 0xe32   :  { %v7389_v28 = vmul.f32 %v7344_v45, %v15506_v37  ;;  %7576 = vrot.lane.b32.xlu0 %v7501_v56, %s9147_s26 }
 0xe33   :  { %v7340_v48 = vpop.permute.xlu0 %7339 }
 0xe34   :  { %v7388_v43 = vmul.f32 %v7340_v48, %v12637_v31  ;;  %v7512_v42 = vsel %vm15526_vm1, %v7389_v28, 0.0  ;;  %v15565_v48 = vld [vmem:[#allocation67_spill] sm:$0xff]  ;;  %vm15571_vm1 = vmmov %vm15536_vm0 }
 0xe36   :  { %v7511_v4 = vsel %vm15558_vm10, %v7388_v43, 0.0  ;;  %v15566_v43 = vld [vmem:[#allocation70_spill] sm:$0xff]  ;;  %vm15572_vm10 = vmmov %vm15536_vm0 }
 0xe37   :  { %v7513_v7 = vadd.f32 %v7512_v42, %v7511_v4  ;;  %v7671_v42 = vmul.f32 %v15566_v43, %v15565_v48  ;;  %v15567_v4 = vld [vmem:[#allocation30_spill] sm:$0xff]  ;;  %v7158_v43 = vrot.slane %v14267_v52, 4 }
 0xe39   :  { %v7514_v3 = vrot.slane %v7513_v7, 4 }
 0xe3a   :  { %v7020_v59 = vpop.permute.xlu1 %7019 }
 0xe3b   :  { %v7515_v55 = vadd.f32 %v7514_v3, %v7513_v7  ;;  %v7069_v6 = vmul.f32 %v7020_v59, %v15506_v37  ;;  %v14350_v7 = vmul.f32 %v7671_v42, %v15567_v4 }
 0xe3c   :  { %v7015_v22 = vpop.permute.xlu0 %7014 }
 0xe3d   :  { %v7516_v47 = vrot.slane %v7515_v55, 2  ;;  %v7068_v61 = vmul.f32 %v7015_v22, %v12637_v31  ;;  %v7192_v15 = vsel %vm15559_vm12, %v7069_v6, 0.0  ;;  %v7801_v3 = vsel %vm15568_vm13, %v14350_v7, 0.0  ;;  %vm15573_vm12 = vmmov %vm15536_vm0 }
 0xe3e   :  { %v7043_v6 = vmul.f32 %v14002_v53, %v15506_v37  ;;  %v7042_v22 = vmul.f32 %v13957_v8, %v12637_v31  ;;  %v7104_v53 = vrot.slane %v14151_v57, 4  ;;  %v7113_v8 = vrot.slane %v14209_v19, 4  ;;  %vm15579_vm13 = vmmov %vm15575_vm11 }
 0xe3f   :  { %v7517_v29 = vadd.f32 %v7516_v47, %v7515_v55  ;;  %v7191_v20 = vsel %vm15560_vm14, %v7068_v61, 0.0  ;;  %vm15574_vm14 = vcmask 1045509  }
 0xe40   :  { %v14324_v50 = vadd.f32 %v7192_v15, %v7191_v20  ;;  %v7075_v47 = vsel %vm15569_vm4, %v7043_v6, 0.0  ;;  %v7074_v61 = vsel %vm15536_vm0, %v7042_v22, 0.0  ;;  %v7555_v15 = vpop.permute.xlu2 %7554  ;;  %v7095_v20 = vrot.slane %v14081_v40, 4 }
 0xe41   :  { %v7518_v5 = vrot.slane %v7517_v29, 1 }
 0xe43   :  { %v7356_v39 = vpop.permute.xlu1 %7355  ;;  %v7519_v35 = vadd.f32 %v7518_v5, %v7517_v29  ;;  %v7076_v29 = vadd.f32 %v7075_v47, %v7074_v61 }
 0xe44   :  { %v7392_v24 = vmul.f32 %v7356_v39, %v12637_v31 }
 0xe45   :  { %7580 = vrot.lane.b32.xlu0 %v7519_v35, %s9147_s26  ;;  %v7352_v34 = vpop.permute.xlu0 %7351  ;;  %v7077_v39 = vrot.slane %v7076_v29, 4  ;;  %v7096_v35 = vadd.f32 %v7095_v20, %v14081_v40  ;;  %v7140_v40 = vrot.slane %v14254_v44, 4  ;;  %v7167_v20 = vrot.slane %v14289_v10, 4 }
 0xe46   :  { %v7529_v58 = vsel %vm15562_vm6, %v7392_v24, 0.0  ;;  %v7391_v2 = vmul.f32 %v7352_v34, %v15506_v37  ;;  %v7131_v24 = vrot.slane %v14236_v63, 4  ;;  %vm15576_vm6 = vcmask 1047559  }
 0xe47   :  { %v7531_v17 = vadd.f32 %v7530_v26, %v7529_v58  ;;  %v7078_v34 = vadd.f32 %v7077_v39, %v7076_v29  ;;  %v7105_v26 = vadd.f32 %v7104_v53, %v14151_v57  ;;  %v7123_v58 = vadd.f32 %v7122_v49, %v14181_v25  ;;  %vm15580_vm4 = vmmov %vm15576_vm6 }
 0xe48   :  { %v7521_v41 = vsel %vm15564_vm2, %v7391_v2, 0.0  ;;  %v7114_v2 = vadd.f32 %v7113_v8, %v14209_v19  ;;  %v7141_v57 = vadd.f32 %v7140_v40, %v14254_v44  ;;  %v7619_v53 = vmul.f32 0.5, %v14287_v54  ;;  %vm15578_vm2 = vmmov %vm15574_vm14 }
 0xe49   :  { %v7532_v18 = vrot.slane %v7531_v17, 4  ;;  %v7522_v32 = vadd.f32 %v7521_v41, %v7520_v38  ;;  %v14376_v41 = vpop.permute.xlu2 %7564 }
 0xe4b   :  { %v7533_v12 = vadd.f32 %v7532_v18, %v7531_v17  ;;  %v7523_v60 = vrot.slane %v7522_v32, 4  ;;  %v7559_v28 = vpop.permute.xlu1 %7558  ;;  %v7097_v17 = vrot.slane %v7096_v35, 2  ;;  %v7132_v18 = vadd.f32 %v7131_v24, %v14236_v63 }
 0xe4c   :  { %v7149_v24 = vrot.slane %v14276_v51, 4 }
 0xe4d   :  { %v7534_v11 = vrot.slane %v7533_v12, 2  ;;  %v7524_v46 = vadd.f32 %v7523_v60, %v7522_v32  ;;  %8768 = vrot.lane.b32.xlu0 %v14341_v9, %s9150_s8  ;;  %v7079_v32 = vrot.slane %v7078_v34, 2  ;;  %v7124_v60 = vrot.slane %v7123_v58, 2 }
 0xe4e   :  { %v14364_v1 = vpop.permute.xlu0 %7029  ;;  %v7133_v25 = vrot.slane %v7132_v18, 2 }
 0xe4f   :  { %v7535_v27 = vadd.f32 %v7534_v11, %v7533_v12  ;;  %v7525_v0 = vrot.slane %v7524_v46, 2  ;;  %v7098_v11 = vadd.f32 %v7097_v17, %v7096_v35  ;;  %v7125_v19 = vadd.f32 %v7124_v60, %v7123_v58 }
 0xe50   :  { %v7159_v35 = vadd.f32 %v7158_v43, %v14267_v52  ;;  %v7194_v60 = vrot.slane %v14324_v50, 4 }
 0xe51   :  { %v7526_v23 = vadd.f32 %v7525_v0, %v7524_v46  ;;  %v7536_v16 = vrot.slane %v7535_v27, 1  ;;  %v7115_v46 = vrot.slane %v7114_v2, 2  ;;  %v7080_v0 = vadd.f32 %v7079_v32, %v7078_v34 }
 0xe52   :  { %v7126_v6 = vrot.slane %v7125_v19, 1 }
 0xe53   :  { %v7537_v36 = vadd.f32 %v7536_v16, %v7535_v27  ;;  %v7527_v56 = vrot.slane %v7526_v23, 1  ;;  %v14354_v59 = vpop.permute.xlu1 %7562  ;;  %v7106_v27 = vrot.slane %v7105_v26, 2  ;;  %v7116_v16 = vadd.f32 %v7115_v46, %v7114_v2 }
 0xe54   :  { %v7081_v42 = vrot.slane %v7080_v0, 1  ;;  %v7127_v34 = vadd.f32 %v7126_v6, %v7125_v19 }
 0xe55   :  { %7584 = vrot.lane.b32.xlu2 %v7537_v36, %s9147_s26  ;;  %v7528_v45 = vadd.f32 %v7527_v56, %v7526_v23  ;;  %v7099_v23 = vrot.slane %v7098_v11, 1  ;;  %v7107_v36 = vadd.f32 %v7106_v27, %v7105_v26  ;;  %v7142_v56 = vrot.slane %v7141_v57, 2 }
 0xe56   :  { %v7561_v38 = vpop.permute.xlu0 %7560  ;;  %v7117_v47 = vrot.slane %v7116_v16, 1  ;;  %v7082_v49 = vadd.f32 %v7081_v42, %v7080_v0  ;;  %v7160_v27 = vrot.slane %v7159_v35, 2 }
 0xe57   :  { %7582 = vrot.lane.b32.xlu1 %v7528_v45, %s9147_s26  ;;  %v7134_v45 = vadd.f32 %v7133_v25, %v7132_v18  ;;  %v7100_v22 = vadd.f32 %v7099_v23, %v7098_v11  ;;  %v7108_v44 = vrot.slane %v7107_v36, 1  ;;  %v7143_v61 = vadd.f32 %v7142_v56, %v7141_v57 }
 0xe58   :  { %v7118_v26 = vadd.f32 %v7117_v47, %v7116_v16  ;;  %v7602_v2 = vadd.f32 %v7555_v15, %v7082_v49  ;;  %v7150_v57 = vadd.f32 %v7149_v24, %v14276_v51  ;;  %v7071_v25 = vmul.f32 %v14364_v1, %v15506_v37 }
 0xe59   :  { %v7135_v39 = vrot.slane %v7134_v45, 1  ;;  %v7109_v58 = vadd.f32 %v7108_v44, %v7107_v36  ;;  %v7144_v17 = vrot.slane %v7143_v61, 1  ;;  %v7070_v36 = vmul.f32 %v14316_v62, %v12637_v31 }
 0xe5a   :  { %v7618_v19 = vmul.f32 0.5, %v7602_v2  ;;  %v7161_v1 = vadd.f32 %v7160_v27, %v7159_v35  ;;  %v7201_v43 = vsel %vm15572_vm10, %v7071_v25, 0.0  ;;  %v7151_v42 = vrot.slane %v7150_v57, 2 }
 0xe5b   :  { %v14356_v55 = vpop.permute.xlu1 %7566  ;;  %v7136_v32 = vadd.f32 %v7135_v39, %v7134_v45  ;;  %v7605_v15 = vadd.f32 %v7561_v38, %v7109_v58  ;;  %v7145_v23 = vadd.f32 %v7144_v17, %v7143_v61  ;;  %v7606_v38 = vadd.f32 %v14354_v59, %v7118_v26 }
 0xe5c   :  { %v7195_v45 = vadd.f32 %v7194_v60, %v14324_v50  ;;  %v7200_v59 = vsel %vm15573_vm12, %v7070_v36, 0.0  ;;  %v7152_v58 = vadd.f32 %v7151_v42, %v7150_v57 }
 0xe5d   :  { %v7622_v47 = vmul.f32 0.5, %v7606_v38 }
 0xe5e   :  { %v14380_v48 = vpop.permute.xlu0 %7635  ;;  %v7196_v39 = vrot.slane %v7195_v45, 2  ;;  %v7153_v57 = vrot.slane %v7152_v58, 1 }
 0xe5f   :  { %v14392_v18 = vadd.f32 %v14380_v48, %v7619_v53  ;;  %v14428_v53 = vadd.f32 %v14380_v48, %v7622_v47 }
 0xe61   :  { %v7655_v16 = vmax.f32 %v14392_v18, 0.0  ;;  %v7658_v60 = vmax.f32 %v14428_v53, 0.0 }
 0xe63   :  { %v8762_v5 = vpop.permute.xlu1 %8761  ;;  %v7690_v50 = vrot.slane %v7655_v16, 7  ;;  %v7696_v42 = vrot.slane %v7658_v60, 4 }
 0xe64   :  { %v8763_v21 = vunpack.i.l.bf16 %v8762_v5  ;;  %v8764_v12 = vunpack.i.h.bf16 %v8762_v5  ;;  %v7176_v5 = vrot.slane %v14310_v13, 4 }
 0xe66   :  { %7746 = vmatpush.msrb.mxu3 %v8763_v21  ;;  %v7604_v21 = vadd.f32 %v7559_v28, %v7100_v22  ;;  %v7168_v28 = vadd.f32 %v7167_v20, %v14289_v10  ;;  %v7177_v52 = vadd.f32 %v7176_v5, %v14310_v13  ;;  %v7185_v13 = vrot.slane %v14306_v14, 4 }
 0xe67   :  { %v7202_v20 = vadd.f32 %v7201_v43, %v7200_v59 }
 0xe68   :  { %7747 = vmatpush.msrb.mxu3 %v8764_v12  ;;  %v7620_v54 = vmul.f32 0.5, %v7604_v21  ;;  %v7169_v56 = vrot.slane %v7168_v28, 2  ;;  %v7178_v51 = vrot.slane %v7177_v52, 2  ;;  %v7186_v22 = vadd.f32 %v7185_v13, %v14306_v14 }
 0xe69   :  { %v7162_v21 = vrot.slane %v7161_v1, 1 }
 0xe6a   :  { %v14404_v10 = vadd.f32 %v14380_v48, %v7620_v54  ;;  %v7170_v44 = vadd.f32 %v7169_v56, %v7168_v28  ;;  %v7179_v61 = vadd.f32 %v7178_v51, %v7177_v52  ;;  %v7187_v24 = vrot.slane %v7186_v22, 2 }
 0xe6b   :  { %v7035_v63 = vpop.permute.xlu1 %7034  ;;  %v7197_v28 = vadd.f32 %v7196_v39, %v7195_v45 }
 0xe6c   :  { %v7072_v29 = vmul.f32 %v7035_v63, %v12637_v31  ;;  %v14413_v63 = vadd.f32 %v14380_v48, %v7618_v19  ;;  %v7656_v6 = vmax.f32 %v14404_v10, 0.0  ;;  %v7607_v31 = vadd.f32 %v14376_v41, %v7127_v34 }
 0xe6d   :  { %v7608_v41 = vadd.f32 %v14356_v55, %v7136_v32  ;;  %v7171_v2 = vrot.slane %v7170_v44, 1  ;;  %v7180_v17 = vrot.slane %v7179_v61, 1  ;;  %v7188_v27 = vadd.f32 %v7187_v24, %v7186_v22 }
 0xe6e   :  { %v7209_v40 = vsel %vm15570_vm8, %v7072_v29, 0.0  ;;  %v7654_v14 = vmax.f32 %v14413_v63, 0.0  ;;  %v7692_v49 = vrot.slane %v7656_v6, 6  ;;  %v7198_v43 = vrot.slane %v7197_v28, 1 }
 0xe6f   :  { %v7624_v54 = vmul.f32 0.5, %v7608_v41  ;;  %v7181_v19 = vadd.f32 %v7180_v17, %v7179_v61  ;;  %vm15583_vm8 = vcmask 130048  }
 0xe70   :  { %v7691_v26 = vsel %vm1699_vm3, %v7690_v50, %v7654_v14  ;;  %v7199_v39 = vadd.f32 %v7198_v43, %v7197_v28 }
 0xe76   :  { %v14396_v12 = vpop.permute.xlu0 %7572 }
 0xe77   :  { %7802 = vadd.xlane.f32.xlu0 %v7801_v3  ;;  %v7040_v3 = vpop.permute.xlu2 %7039 }
 0xe78   :  { %v7073_v8 = vmul.f32 %v7040_v3, %v15506_v37  ;;  %v7621_v37 = vmul.f32 0.5, %v7605_v15  ;;  %v7163_v15 = vadd.f32 %v7162_v21, %v7161_v1 }
 0xe7a   :  { %v7210_v11 = vsel %vm15571_vm1, %v7073_v8, 0.0  ;;  %v14420_v62 = vadd.f32 %v14380_v48, %v7621_v37  ;;  %v7623_v8 = vmul.f32 0.5, %v7607_v31  ;;  %v7611_v37 = vadd.f32 %v14396_v12, %v7163_v15  ;;  %vm15586_vm1 = vmmov %vm15583_vm8 }
 0xe7b   :  { %v7211_v0 = vadd.f32 %v7210_v11, %v7209_v40  ;;  %v7203_v40 = vrot.slane %v7202_v20, 4  ;;  %v7693_v11 = vsel %vm1702_vm5, %v7692_v49, %v7691_v26  ;;  %v7154_v12 = vadd.f32 %v7153_v57, %v7152_v58  ;;  %vm15587_vm10 = vmmov %vm15586_vm1 }
 0xe7c   :  { %v7657_v34 = vmax.f32 %v14420_v62, 0.0  ;;  %v14437_v52 = vadd.f32 %v14380_v48, %v7623_v8 }
 0xe7d   :  { %v7212_v3 = vrot.slane %v7211_v0, 4  ;;  %v7204_v36 = vadd.f32 %v7203_v40, %v7202_v20  ;;  %v7627_v20 = vmul.f32 0.5, %v7611_v37 }
 0xe7e   :  { %v7694_v25 = vrot.slane %v7657_v34, 5  ;;  %v7659_v51 = vmax.f32 %v14437_v52, 0.0 }
 0xe7f   :  { %v7569_v46 = vpop.permute.xlu2 %7568  ;;  %v7213_v35 = vadd.f32 %v7212_v3, %v7211_v0  ;;  %v7172_v0 = vadd.f32 %v7171_v2, %v7170_v44  ;;  %v7189_v3 = vrot.slane %v7188_v27, 1  ;;  %v7205_v61 = vrot.slane %v7204_v36, 2 }
 0xe80   :  { %v7609_v55 = vadd.f32 %v7569_v46, %v7145_v23  ;;  %v14444_v23 = vadd.f32 %v14380_v48, %v7624_v54  ;;  %v7695_v45 = vsel %vm1705_vm7, %v7694_v25, %v7693_v11  ;;  %v7698_v44 = vrot.slane %v7659_v51, 3 }
 0xe81   :  { %v7214_v32 = vrot.slane %v7213_v35, 2  ;;  %v7697_v47 = vsel %vm1708_vm15, %v7696_v42, %v7695_v45  ;;  %v7190_v41 = vadd.f32 %v7189_v3, %v7188_v27  ;;  %v7206_v58 = vadd.f32 %v7205_v61, %v7204_v36 }
 0xe82   :  { %v7625_v38 = vmul.f32 0.5, %v7609_v55  ;;  %v7660_v59 = vmax.f32 %v14444_v23, 0.0  ;;  %v7699_v8 = vsel %vm15574_vm14, %v7698_v44, %v7697_v47 }
 0xe83   :  { %v7215_v1 = vadd.f32 %v7214_v32, %v7213_v35  ;;  %v14463_v32 = vadd.f32 %v14380_v48, %v7627_v20  ;;  %v7207_v36 = vrot.slane %v7206_v58, 1 }
 0xe84   :  { %v14452_v31 = vadd.f32 %v14380_v48, %v7625_v38  ;;  %v7700_v17 = vrot.slane %v7660_v59, 2 }
 0xe85   :  { %v7216_v21 = vrot.slane %v7215_v1, 1  ;;  %v7663_v38 = vmax.f32 %v14463_v32, 0.0  ;;  %v7208_v3 = vadd.f32 %v7207_v36, %v7206_v58 }
 0xe86   :  { %v7661_v49 = vmax.f32 %v14452_v31, 0.0  ;;  %v7701_v11 = vsel %vm15575_vm11, %v7700_v17, %v7699_v8 }
 0xe87   :  { %v7571_v5 = vpop.permute.xlu2 %7570  ;;  %v7217_v28 = vadd.f32 %v7216_v21, %v7215_v1 }
 0xe88   :  { %v7610_v24 = vadd.f32 %v7571_v5, %v7154_v12  ;;  %v7702_v27 = vrot.slane %v7661_v49, 1 }
 0xe8a   :  { %v7626_v25 = vmul.f32 0.5, %v7610_v24 }
 0xe8c   :  { %v14479_v45 = vadd.f32 %v14380_v48, %v7626_v25 }
 0xe8e   :  { %v7662_v61 = vmax.f32 %v14479_v45, 0.0 }
 0xe8f   :  { %v7579_v56 = vpop.permute.xlu2 %7578 }
 0xe90   :  { %v7614_v40 = vadd.f32 %v7579_v56, %v7190_v41 }
 0xe91   :  { %v7575_v13 = vpop.permute.xlu1 %7574 }
 0xe92   :  { %v7612_v22 = vadd.f32 %v7575_v13, %v7172_v0 }
 0xe94   :  { %v7628_v35 = vmul.f32 0.5, %v7612_v22  ;;  %v7704_v22 = vrot.slane %v7663_v38, 7 }
 0xe96   :  { %v14467_v15 = vadd.f32 %v14380_v48, %v7628_v35  ;;  %v7705_v35 = vsel %vm1699_vm3, %v7704_v22, %v7662_v61  ;;  %v15584_v22 = vld [vmem:[#allocation39_spill] sm:$0xff] }
 0xe98   :  { %v7664_v56 = vmax.f32 %v14467_v15, 0.0 }
 0xe9a   :  { %v7706_v47 = vrot.slane %v7664_v56, 6 }
 0xe9c   :  { %v7707_v8 = vsel %vm1702_vm5, %v7706_v47, %v7705_v35 }
 0xea4   :  { %v7577_v29 = vpop.permute.xlu0 %7576 }
 0xea5   :  { %v7613_v50 = vadd.f32 %v7577_v29, %v7181_v19  ;;  %v7630_v19 = vmul.f32 0.5, %v7614_v40 }
 0xea7   :  { %v7629_v29 = vmul.f32 0.5, %v7613_v50  ;;  %v14486_v42 = vadd.f32 %v14380_v48, %v7630_v19  ;;  %v15582_v19 = vld [vmem:[#allocation71_spill] sm:$0xff] }
 0xea9   :  { %v14472_v57 = vadd.f32 %v14380_v48, %v7629_v29 }
 0xeab   :  { %v7665_v37 = vmax.f32 %v14472_v57, 0.0 }
 0xead   :  { %v7708_v12 = vrot.slane %v7665_v37, 5 }
 0xeaf   :  { %v7585_v55 = vpop.permute.xlu2 %7584  ;;  %v7709_v29 = vsel %vm1705_vm7, %v7708_v12, %v7707_v8 }
 0xeb0   :  { %v7617_v0 = vadd.f32 %v7585_v55, %v7217_v28 }
 0xeb2   :  { %v7633_v1 = vmul.f32 0.5, %v7617_v0 }
 0xeb4   :  { %v14496_v20 = vadd.f32 %v14380_v48, %v7633_v1 }
 0xeb7   :  { %v7581_v46 = vpop.permute.xlu0 %7580 }
 0xeb8   :  { %v7615_v26 = vadd.f32 %v7581_v46, %v7199_v39  ;;  %v7703_v46 = vsel %vm15576_vm6, %v7702_v27, %v7701_v11  ;;  %v7666_v39 = vmax.f32 %v14486_v42, 0.0 }
 0xeba   :  { %v7631_v13 = vmul.f32 0.5, %v7615_v26  ;;  %v7669_v26 = vmax.f32 %v14496_v20, 0.0  ;;  %v7710_v17 = vrot.slane %v7666_v39, 4 }
 0xebc   :  { %v14483_v43 = vadd.f32 %v14380_v48, %v7631_v13  ;;  %v15581_v13 = vld [vmem:[#allocation62_spill] sm:$0xff] }
 0xebe   :  { %v7667_v21 = vmax.f32 %v14483_v43, 0.0 }
 0xebf   :  { %v8769_v2 = vpop.permute.xlu0 %8768 }
 0xec0   :  { %v8770_v54 = vunpack.i.l.bf16 %v8769_v2  ;;  %v8771_v5 = vunpack.i.h.bf16 %v8769_v2  ;;  %v7712_v2 = vrot.slane %v7667_v21, 3 }
 0xec2   :  { %7748 = vmatpush.msrb.mxu3 %v8770_v54  ;;  %v7711_v54 = vsel %vm1708_vm15, %v7710_v17, %v7709_v29 }
 0xec3   :  { %v7713_v58 = vsel %vm15578_vm2, %v7712_v2, %v7711_v54 }
 0xec4   :  { %7749 = vmatpush.msrb.mxu3 %v8771_v5 }
 0xec5   :  { %8417 = vmatmul.msk.f32.vlgmr.msrb.gmra.mxu3 %vm15577_vm9, %v7703_v46  ;;  %v7670_v46 = vmul.f32 %v15582_v19, %v15581_v13 }
 0xec7   :  { %v7672_v36 = vmul.f32 %v7670_v46, %v15567_v4 }
 0xec9   :  { %v7583_v50 = vpop.permute.xlu1 %7582  ;;  %v7798_v1 = vsel %vm15583_vm8, %v7672_v36, 0.0 }
 0xeca   :  { %v7616_v44 = vadd.f32 %v7583_v50, %v7208_v3 }
 0xecc   :  { %v7632_v41 = vmul.f32 0.5, %v7616_v44  ;;  %v15585_v44 = vld [vmem:[#allocation27_spill] sm:$0xff] }
 0xece   :  { %v14505_v24 = vadd.f32 %v14380_v48, %v7632_v41  ;;  %v7716_v48 = vrot.slane %v7669_v26, 1 }
 0xed0   :  { %v7668_v40 = vmax.f32 %v14505_v24, 0.0 }
 0xed2   :  { %v7714_v55 = vrot.slane %v7668_v40, 2 }
 0xed4   :  { %v7715_v28 = vsel %vm15579_vm13, %v7714_v55, %v7713_v58  ;;  %v15590_v58 = vld [vmem:[#allocation69_spill] sm:$0xff] }
 0xed5   :  { %v7717_v11 = vsel %vm15580_vm4, %v7716_v48, %v7715_v28  ;;  %v15588_v48 = vld [vmem:[#allocation66_spill] sm:$0xff]  ;;  %vm15591_vm4 = vcmp.gt.f32.partialorder %v15590_v58, 0.5  ;;  %v15592_v28 = vmov 0.0  }
 0xed6   :  { %8418 = vmatmul.msk.f32.gmra.mxu3 %vm15536_vm0, %v7717_v11  ;;  %vm15589_vm6 = vcmp.gt.f32.partialorder %v15588_v48, 0.5 }
 0xf48   :  { %v7751_v5 = vpop.f32.mrf.mxu3 }
 0xf49   :  { %9067 = vtanh.f32 %v7751_v5 }
 0xf4f   :  { %v9068_v27 = vpop.eup %9067 }
 0xf50   :  { %7761 = vperm.xlu1 %8765, %v9068_v27  }
 0xf59   :  { %v7754_v25 = vpop.f32.mrf.mxu3 }
 0xf5a   :  { %9069 = vtanh.f32 %v7754_v25 }
 0xf60   :  { %v9070_v0 = vpop.eup %9069 }
 0xf61   :  { %7766 = vperm.xlu2 %8766, %v9070_v0  }
 0xf7a   :  { %7799 = vadd.xlane.f32.xlu1 %v7798_v1  ;;  %v7803_v1 = vpop.xlane.xlu0 %7802 }
 0xfbb   :  { %v7767_v3 = vpop.permute.xlu2 %7766 }
 0xfbc   :  { %v7770_v50 = vmul.f32 %v15584_v22, %v7767_v3 }
 0xfbe   :  { %v7772_v41 = vsel %vm15586_vm1, %v7770_v50, 0.0 }
 0xfc2   :  { %v7762_v47 = vpop.permute.xlu1 %7761 }
 0xfc3   :  { %v7769_v12 = vmul.f32 %v15585_v44, %v7762_v47 }
 0xfc5   :  { %v7771_v35 = vsel %vm15587_vm10, %v7769_v12, 0.0  ;;  %vm15593_vm10 = vmmov %vm15586_vm1 }
 0xfc6   :  { %v7773_v8 = vadd.f32 %v7772_v41, %v7771_v35 }
 0xfc8   :  { %v7774_v29 = vrot.slane %v7773_v8, 4 }
 0xfca   :  { %v7775_v2 = vadd.f32 %v7774_v29, %v7773_v8 }
 0xfcc   :  { %v7776_v17 = vrot.slane %v7775_v2, 2 }
 0xfce   :  { %v7777_v55 = vadd.f32 %v7776_v17, %v7775_v2 }
 0xfd0   :  { %v7778_v54 = vrot.slane %v7777_v55, 1 }
 0xfd2   :  { %v7779_v4 = vadd.f32 %v7778_v54, %v7777_v55 }
 0xfd4   :  { %vm7780_vm12 = vcmp.gt.f32.partialorder %v7779_v4, %v7762_v47  ;;  %vm7782_vm14 = vcmp.eq.f32.partialorder %v7779_v4, %v7762_v47  ;;  %vm7783_vm11 = vcmp.eq.f32.partialorder %v7779_v4, %v7767_v3  ;;  %vm7781_vm2 = vcmp.gt.f32.partialorder %v7779_v4, %v7767_v3 }
 0xfd5   :  { %vm7784_vm9 = vmand %vm7782_vm14, %vm15589_vm6  ;;  %v7805_v47 = vmul.f32 0.8, %v7803_v1 }
 0xfd6   :  { %vm7786_vm13 = vmor %vm7780_vm12, %vm7784_vm9 }
 0xfd7   :  { %vm7785_vm0 = vmand %vm7783_vm11, %vm15591_vm4  ;;  %v7788_v11 = vsel %vm7786_vm13, 1.0, %v15592_v28  ;;  %v8420_v35 = vadd.f32 -0.0001, %v7805_v47  ;;  %vm15597_vm13 = vcmask 1045509   ;;  %vm15598_vm4 = vcmask 1046534  }
 0xfd8   :  { %vm7787_vm8 = vmor %vm7781_vm2, %vm7785_vm0  ;;  %v7790_v5 = vmul.f32 %v7788_v11, %v7672_v36  ;;  %vm7884_vm2 = vcmask 123904   ;;  %vm15599_vm0 = vcmask 1047559  }
 0xfd9   :  { %v7789_v25 = vsel %vm7787_vm8, 1.0, %v15592_v28  ;;  %vm15594_vm11 = vmmov %vm15586_vm1 }
 0xfda   :  { %v7791_v13 = vmul.f32 %v7789_v25, %v14350_v7  ;;  %v7792_v19 = vsel %vm15586_vm1, %v7790_v5, 0.0  ;;  %vm15595_vm6 = vmmov %vm15586_vm1  ;;  %v15596_v25 = vld [vmem:[#allocation8_spill] sm:$0xff] }
 0xfdb   :  { %7793 = vadd.xlane.f32.xlu0 %v7792_v19 }
 0xfdc   :  { %v7795_v46 = vsel %vm15593_vm10, %v7791_v13, 0.0 }
 0xfdd   :  { %7796 = vadd.xlane.f32.xlu2 %v7795_v46 }
 0xfed   :  { %v7800_v3 = vpop.xlane.xlu1 %7799 }
 0xfee   :  { %v7804_v50 = vmul.f32 0.8, %v7800_v3 }
 0xff0   :  { %v8419_v12 = vadd.f32 -0.0001, %v7804_v50 }
0x104e   :  { %v7794_v41 = vpop.xlane.xlu0 %7793 }
0x104f   :  { %vm7808_vm12 = vcmp.lt.f32.partialorder %v7794_v41, %v8419_v12 }
0x1050   :  { %v7797_v8 = vpop.xlane.xlu2 %7796  ;;  %v14541_v36 = vsel %vm7808_vm12, 1.0, %v15592_v28 }
0x1051   :  { %vm7809_vm14 = vcmp.lt.f32.partialorder %v7797_v8, %v8420_v35  ;;  %v7812_v7 = vmul.f32 %v15585_v44, %v14541_v36  ;;  %v7823_v29 = vmul.f32 %v9068_v27, %v14541_v36  ;;  %v8805_v27 = vld [vmem:[%s14688_s4] ss:$0 sm:$0xff]  ;;  %s9151_s4 = smov 32  }
0x1052   :  { %v14547_v2 = vsel %vm7809_vm14, 1.0, %v15592_v28  ;;  %vm7880_vm9 = vcmp.eq.s32.totalorder %v15596_v25, %v8805_v27  ;;  %vm15608_vm14 = vmmov %vm15597_vm13 }
0x1053   :  { %v7813_v17 = vmul.f32 %v15584_v22, %v14547_v2  ;;  %v7824_v55 = vmul.f32 %v9070_v0, %v14547_v2  ;;  %7827 = vperm.xlu1 %8765, %v7823_v29   ;;  %v7814_v54 = vsel %vm15594_vm11, %v7812_v7, 0.0  ;;  %v8421_v0 = vsel %vm7880_vm9, 1.0, %v15592_v28  ;;  %vm15610_vm11 = vmmov %vm15599_vm0 }
0x1055   :  { %v7815_v4 = vsel %vm15595_vm6, %v7813_v17, 0.0  ;;  %7831 = vperm.xlu2 %8766, %v7824_v55  }
0x1056   :  { %v7816_v48 = vadd.f32 %v7815_v4, %v7814_v54 }
0x1058   :  { %v7817_v58 = vrot.slane %v7816_v48, 4 }
0x105a   :  { %v7818_v11 = vadd.f32 %v7817_v58, %v7816_v48 }
0x105c   :  { %v7819_v44 = vrot.slane %v7818_v11, 2 }
0x105d   :  { %8778 = vrot.lane.b32.xlu2 %v14341_v9, %s9147_s26 }
0x105e   :  { %v7820_v5 = vadd.f32 %v7819_v44, %v7818_v11  ;;  %v15601_v11 = vld [vmem:[#allocation65_spill] sm:$0xff] }
0x105f   :  { %v8423_v27 = vadd.f32 -1.0, %v15601_v11 }
0x1060   :  { %v7821_v22 = vrot.slane %v7820_v5, 1 }
0x1062   :  { %v7822_v13 = vadd.f32 %v7821_v22, %v7820_v5  ;;  %v7973_v5 = vand.u32 2147483647, %v15601_v11 }
0x1064   :  { %v14559_v19 = vmul.f32 %v8421_v0, %v7822_v13  ;;  %v8004_v0 = vand.u32 2147483647, %v8423_v27  ;;  %vm14598_vm1 = vcmp.lt.f32.partialorder %v7973_v5, 0.5 }
0x1065   :  { %8788 = vrot.lane.b32.xlu2 %v14341_v9, %s9145_s0 }
0x1066   :  { %v7885_v46 = vsel %vm7884_vm2, %v14559_v19, 0.0  ;;  %vm14610_vm12 = vcmp.lt.f32.partialorder %v8004_v0, 0.5 }
0x1067   :  { %7886 = vadd.xlane.f32.xlu0 %v7885_v46  ;;  %v8008_v23 = vsel %vm14610_vm12, 1.0, %v15592_v28 }
0x106d   :  { %8798 = vrot.lane.b32.xlu2 %v14341_v9, %s9151_s4  ;;  %v55_v9 = vld [vmem:[%s14689_s5] sm:$0x3]  ;;  %s9154_s5 = smov [#allocation5]  }
0x106e   :  { %s8216_s14 = sshll.u32 %s9154_s5, 4  ;;  %s8217_s14 = int_to_ptr.vmem [resolvable:$true] %s8216_s14 }
0x10af   :  { %v7832_v1 = vpop.permute.xlu2 %7831 }
0x10b0   :  { %v7840_v3 = vrot.slane %v7832_v1, 1  ;;  %v7841_v50 = vrot.slane %v7832_v1, 2  ;;  %v7842_v47 = vrot.slane %v7832_v1, 3  ;;  %v7843_v12 = vrot.slane %v7832_v1, 4 }
0x10b1   :  { %v7844_v41 = vrot.slane %v7832_v1, 5  ;;  %v7845_v35 = vrot.slane %v7832_v1, 6  ;;  %v7846_v7 = vrot.slane %v7832_v1, 7  ;;  %v7871_v54 = vmul.f32 %v7832_v1, %v7662_v61  ;;  %v14593_v1 = vld [vmem:[#allocation2 + $0x80] sm:$0xff] }
0x10b2   :  { %v7872_v8 = vmul.f32 %v7840_v3, %v7663_v38  ;;  %v7873_v29 = vmul.f32 %v7841_v50, %v7664_v56  ;;  %v7874_v17 = vmul.f32 %v7842_v47, %v7665_v37  ;;  %v7875_v55 = vmul.f32 %v7843_v12, %v7666_v39  ;;  %v9085_v3 = vld [vmem:[#allocation2 + $0x88] sm:$0xff] }
0x10b3   :  { %v7876_v4 = vmul.f32 %v7844_v41, %v7667_v21  ;;  %v7877_v32 = vmul.f32 %v7845_v35, %v7668_v40  ;;  %v7878_v15 = vmul.f32 %v7846_v7, %v7669_v26  ;;  %v15600_v26 = vld [vmem:[#allocation68_spill] sm:$0xff]  ;;  %v14596_v50 = vpack.i.bf16 %v14593_v1, %v9085_v3 }
0x10b4   :  { %v7919_v48 = vrot.slane %v7872_v8, 7  ;;  %v7921_v58 = vrot.slane %v7873_v29, 6  ;;  %v7923_v38 = vrot.slane %v7874_v17, 5  ;;  %v7925_v37 = vrot.slane %v7875_v55, 4 }
0x10b5   :  { %v7927_v42 = vrot.slane %v7876_v4, 3  ;;  %v7929_v61 = vrot.slane %v7877_v32, 2  ;;  %v7931_v39 = vrot.slane %v7878_v15, 1  ;;  %v8424_v40 = vadd.f32 -1.0, %v15600_v26  ;;  %8773 = vrot.lane.b32.xlu0 %v14596_v50, %s9147_s26  ;;  %8783 = vrot.lane.b32.xlu1 %v14596_v50, %s9145_s0 }
0x10b6   :  { %v7920_v57 = vsel %vm1699_vm3, %v7919_v48, %v7871_v54  ;;  %v7974_v44 = vand.u32 2147483647, %v15600_v26 }
0x10b7   :  { %v7922_v56 = vsel %vm1702_vm5, %v7921_v58, %v7920_v57  ;;  %v8005_v22 = vand.u32 2147483647, %v8424_v40  ;;  %v7977_v57 = vsel %vm14598_vm1, 1.0, %v15592_v28  ;;  %vm8029_vm1 = vcmp.eq.s32.totalorder %v15596_v25, 1 }
0x10b8   :  { %v7924_v45 = vsel %vm1705_vm7, %v7923_v38, %v7922_v56  ;;  %vm14589_vm8 = vcmp.lt.f32.partialorder %v7974_v44, 0.5  ;;  %v7979_v31 = vmul.f32 %v7977_v57, %v14541_v36 }
0x10b9   :  { %v7926_v43 = vsel %vm1708_vm15, %v7925_v37, %v7924_v45  ;;  %vm8007_vm10 = vcmp.lt.f32.partialorder %v8005_v22, 0.5  ;;  %v7978_v58 = vsel %vm14589_vm8, 1.0, %v15592_v28  ;;  %v14644_v37 = vld [vmem:[#allocation2 + $0x2e] ss:$0 sm:$0xff]  ;;  %vm7998_vm8 = vcmp.eq.s32.totalorder %v15596_v25, 0 }
0x10ba   :  { %v7928_v21 = vsel %vm15597_vm13, %v7927_v42, %v7926_v43  ;;  %v8009_v62 = vsel %vm8007_vm10, 1.0, %v15592_v28  ;;  %vm7981_vm6 = vcmp.gt.f32.partialorder %v7979_v31, 0.0 }
0x10bb   :  { %v7930_v24 = vsel %vm15598_vm4, %v7929_v61, %v7928_v21  ;;  %v8011_v53 = vmul.f32 %v8009_v62, %v14547_v2 }
0x10bc   :  { %v7932_v20 = vsel %vm15599_vm0, %v7931_v39, %v7930_v24  ;;  %vm15615_vm0 = vcmask 130048  }
0x10bd   :  { %7952 = vmatpush.msra.mxu2 %v7932_v20  ;;  %8091 = vrot.lane.b32.xlu0 %v14644_v37, %s9145_s0 }
0x10be   :  { %8793 = vrot.lane.b32.xlu1 %v14596_v50, %s9151_s4 }
0x10c5   :  { %v7828_v46 = vpop.permute.xlu1 %7827  ;;  %8108 = vrot.lane.b32.xlu0 %v14644_v37, %s9151_s4 }
0x10c6   :  { %v7833_v47 = vrot.slane %v7828_v46, 1  ;;  %v7834_v12 = vrot.slane %v7828_v46, 2  ;;  %v7835_v41 = vrot.slane %v7828_v46, 3  ;;  %v7836_v35 = vrot.slane %v7828_v46, 4  ;;  %8176 = vrot.lane.b32.xlu1 %v55_v9, %s9152_s12 }
0x10c7   :  { %v7837_v7 = vrot.slane %v7828_v46, 5  ;;  %v7838_v29 = vrot.slane %v7828_v46, 6  ;;  %v7839_v17 = vrot.slane %v7828_v46, 7  ;;  %v7863_v18 = vmul.f32 %v7828_v46, %v7654_v14 }
0x10c8   :  { %v7864_v55 = vmul.f32 %v7833_v47, %v7655_v16  ;;  %v7865_v54 = vmul.f32 %v7834_v12, %v7656_v6  ;;  %v7866_v4 = vmul.f32 %v7835_v41, %v7657_v34  ;;  %v7867_v32 = vmul.f32 %v7836_v35, %v7658_v60 }
0x10c9   :  { %v7868_v10 = vmul.f32 %v7837_v7, %v7659_v51  ;;  %v7980_v34 = vmul.f32 %v7978_v58, %v14547_v2  ;;  %v7869_v15 = vmul.f32 %v7838_v29, %v7660_v59  ;;  %v7870_v63 = vmul.f32 %v7839_v17, %v7661_v49 }
0x10ca   :  { %v7905_v16 = vrot.slane %v7864_v55, 7  ;;  %v7907_v6 = vrot.slane %v7865_v54, 6  ;;  %v7909_v52 = vrot.slane %v7866_v4, 5  ;;  %v7911_v51 = vrot.slane %v7867_v32, 4  ;;  %v8779_v4 = vpop.permute.xlu2 %8778 }
0x10cb   :  { %v7913_v2 = vrot.slane %v7868_v10, 3  ;;  %v8010_v49 = vmul.f32 %v8008_v23, %v14541_v36  ;;  %v7915_v56 = vrot.slane %v7869_v15, 2  ;;  %v7917_v42 = vrot.slane %v7870_v63, 1 }
0x10cc   :  { %v7906_v14 = vsel %vm1699_vm3, %v7905_v16, %v7863_v18  ;;  %vm7982_vm3 = vcmp.gt.f32.partialorder %v7980_v34, 0.0  ;;  %v7999_v35 = vsel %vm7998_vm8, 1.0, %v15592_v28  ;;  %v8780_v25 = vunpack.i.l.bf16 %v8779_v4 }
0x10cd   :  { %v7908_v60 = vsel %vm1702_vm5, %v7907_v6, %v7906_v14  ;;  %vm8013_vm5 = vcmp.gt.f32.partialorder %v8011_v53, 0.0  ;;  %v7988_v43 = vsel %vm7982_vm3, %v7932_v20, -1e+30  ;;  %vm8012_vm9 = vcmp.gt.f32.partialorder %v8010_v49, 0.0 }
0x10ce   :  { %v7910_v59 = vsel %vm1705_vm7, %v7909_v52, %v7908_v60  ;;  %v8019_v61 = vsel %vm8013_vm5, %v7932_v20, -1e+30  ;;  %vm15609_vm7 = vmmov %vm15598_vm4 }
0x10cf   :  { %v7912_v38 = vsel %vm1708_vm15, %v7911_v51, %v7910_v59  ;;  %vm15611_vm15 = vcmask 261120  }
0x10d0   :  { %v7914_v45 = vsel %vm15608_vm14, %v7913_v2, %v7912_v38  ;;  %v7990_v26 = vsel %vm15611_vm15, %v7988_v43, -inf  ;;  %vm15612_vm2 = vmmov %vm15611_vm15 }
0x10d1   :  { %v7916_v21 = vsel %vm15609_vm7, %v7915_v56, %v7914_v45  ;;  %v8021_v40 = vsel %vm15612_vm2, %v8019_v61, -inf  ;;  %vm15613_vm13 = vmmov %vm15612_vm2 }
0x10d2   :  { %v7918_v39 = vsel %vm15610_vm11, %v7917_v42, %v7916_v21  ;;  %vm15614_vm4 = vmmov %vm15612_vm2  ;;  %v8789_v23 = vpop.permute.xlu2 %8788 }
0x10d3   :  { %7953 = vmatpush.msra.mxu2 %v7918_v39  ;;  %v7987_v36 = vsel %vm7981_vm6, %v7918_v39, -1e+30  ;;  %v8018_v24 = vsel %vm8012_vm9, %v7918_v39, -1e+30  ;;  %vm15616_vm10 = vmmov %vm15612_vm2  ;;  %v8791_v59 = vunpack.i.h.bf16 %v8789_v23  ;;  %v8790_v2 = vunpack.i.l.bf16 %v8789_v23 }
0x10d4   :  { %v7989_v11 = vsel %vm15613_vm13, %v7987_v36, -inf  ;;  %v8020_v27 = vsel %vm15614_vm4, %v8018_v24, -inf  ;;  %8422 = vmatmul.msk.f32.vlgmr.msra.gmra.mxu2 %vm15615_vm0, %v14559_v19  ;;  %vm15617_vm7 = vmmov %vm15612_vm2  ;;  %vm8185_vm9 = vcmask 25600  }
0x10d5   :  { %v7991_v20 = vmax.f32 %v7989_v11, %v7990_v26  ;;  %v8022_v44 = vmax.f32 %v8020_v27, %v8021_v40  ;;  %8083 = vmatpush.msrb.mxu2 %v9085_v3  ;;  %vm15618_vm11 = vmmov %vm15612_vm2  ;;  %v8806_v11 = vld [vmem:[#allocation2 + $0x2f] ss:$0 sm:$0xff] }
0x10d6   :  { %vm15619_vm6 = vmmov %vm15612_vm2 }
0x10d7   :  { %v7992_v5 = vrot.slane %v7991_v20, 4  ;;  %v8023_v22 = vrot.slane %v8022_v44, 4  ;;  %8084 = vmatpush.msrb.mxu2 %v14593_v1  ;;  %v8030_v1 = vsel %vm8029_vm1, 1.0, %v15592_v28  ;;  %v8781_v28 = vunpack.i.h.bf16 %v8779_v4 }
0x10d9   :  { %v7993_v0 = vmax.f32 %v7991_v20, %v7992_v5  ;;  %v8024_v13 = vmax.f32 %v8022_v44, %v8023_v22  ;;  %8085 = vmatpush.msrb.mxu2 %v14337_v33 }
0x10da   :  { %v8799_v43 = vpop.permute.xlu2 %8798 }
0x10db   :  { %v7994_v46 = vrot.slane %v7993_v0, 2  ;;  %v8025_v47 = vrot.slane %v8024_v13, 2  ;;  %8086 = vmatpush.msrb.mxu2 %v14335_v30  ;;  %v7887_v30 = vpop.xlane.xlu0 %7886  ;;  %v8800_v39 = vunpack.i.l.bf16 %v8799_v43  ;;  %v8801_v36 = vunpack.i.h.bf16 %v8799_v43 }
0x10dc   :  { %v7888_v55 = vmax.f32 %v7887_v30, 1.0 }
0x10dd   :  { %v7995_v12 = vmax.f32 %v7993_v0, %v7994_v46  ;;  %v8026_v41 = vmax.f32 %v8024_v13, %v8025_v47 }
0x10de   :  { %9071 = vrcp.f32 %v7888_v55  ;;  %v7969_v62 = vand.u32 2147483648, %v7888_v55  ;;  %vm7963_vm3 = vweird.f32 %v7888_v55  ;;  %v7967_v34 = vand.u32 2147483647, %v7888_v55 }
0x10df   :  { %v7996_v19 = vrot.slane %v7995_v12, 1  ;;  %v8027_v3 = vrot.slane %v8026_v41, 1 }
0x10e0   :  { %v7970_v53 = vor.u32 1.1754944e-38, %v7969_v62  ;;  %vm7968_vm14 = vcmp.eq.f32.partialorder %v7967_v34, 8.507059e+37 }
0x10e1   :  { %v7997_v8 = vmax.f32 %v7995_v12, %v7996_v19  ;;  %v8028_v7 = vmax.f32 %v8026_v41, %v8027_v3 }
0x10e3   :  { %v8000_v29 = vmul.f32 %v7999_v35, %v7997_v8  ;;  %v8031_v33 = vmul.f32 %v8030_v1, %v8028_v7 }
0x10e4   :  { %v9072_v32 = vpop.eup %9071 }
0x10e5   :  { %v8032_v17 = vadd.f32 %v8031_v33, %v8000_v29  ;;  %v7959_v18 = vmul.f32 %v9072_v32, %v7888_v55  ;;  %vm7964_vm12 = vweird.f32 %v9072_v32 }
0x10e6   :  { %vm7965_vm5 = vmor %vm7963_vm3, %vm7964_vm12 }
0x10e7   :  { %8426 = vmatmul.msk.f32.vlgmr.msrb.gmra.mxu2 %vm15616_vm10, %v8032_v17  ;;  %v7960_v10 = vsub.f32 1.0, %v7959_v18 }
0x10e9   :  { %v7961_v16 = vmul.f32 %v9072_v32, %v7960_v10 }
0x10eb   :  { %v7962_v6 = vadd.f32 %v9072_v32, %v7961_v16 }
0x10ed   :  { %v7966_v15 = vsel %vm7965_vm5, %v9072_v32, %v7962_v6 }
0x10ee   :  { %v7971_v14 = vsel %vm7968_vm14, %v7970_v53, %v7966_v15 }
0x1127   :  { %v8774_v54 = vpop.permute.xlu0 %8773  ;;  %v8784_v60 = vpop.permute.xlu1 %8783 }
0x1128   :  { %v8776_v48 = vunpack.i.h.bf16 %v8774_v54  ;;  %v8775_v58 = vunpack.i.l.bf16 %v8774_v54  ;;  %v8786_v51 = vunpack.i.h.bf16 %v8784_v60  ;;  %v8785_v57 = vunpack.i.l.bf16 %v8784_v60 }
0x112a   :  { %8060 = vmatpush.msra.mxu3 %v8775_v58 }
0x112c   :  { %8061 = vmatpush.msra.mxu3 %v8776_v48 }
0x112e   :  { %8062 = vmatpush.msra.mxu3 %v8780_v25 }
0x112f   :  { %v8092_v38 = vpop.permute.xlu0 %8091 }
0x1130   :  { %8063 = vmatpush.msra.mxu3 %v8781_v28  ;;  %v8794_v42 = vpop.permute.xlu1 %8793 }
0x1131   :  { %v8796_v61 = vunpack.i.h.bf16 %v8794_v42  ;;  %v8795_v21 = vunpack.i.l.bf16 %v8794_v42 }
0x1132   :  { %8126 = vmatpush.msrb.mxu3 %v8785_v57 }
0x1133   :  { %8163 = vmatpush.msra.mxu2 %v8795_v21 }
0x1134   :  { %8127 = vmatpush.msrb.mxu3 %v8786_v51 }
0x1135   :  { %8164 = vmatpush.msra.mxu2 %v8796_v61 }
0x1136   :  { %8128 = vmatpush.msrb.mxu3 %v8790_v2 }
0x1137   :  { %8165 = vmatpush.msra.mxu2 %v8800_v39  ;;  %v8109_v50 = vpop.permute.xlu0 %8108 }
0x1138   :  { %8129 = vmatpush.msrb.mxu3 %v8791_v59  ;;  %v8177_v0 = vpop.permute.xlu1 %8176 }
0x1139   :  { %8166 = vmatpush.msra.mxu2 %v8801_v36 }
0x1157   :  { %v7955_v63 = vpop.f32.mrf.mxu2 }
0x1158   :  { %v7972_v52 = vmul.f32 %v7971_v14, %v7955_v63 }
0x115a   :  { %8425 = vmatmul.msk.f32.vlgmr.msra.gmra.mxu3 %vm15617_vm7, %v7972_v52 }
0x116a   :  { %v8088_v31 = vpop.f32.mrf.mxu2 }
0x11dd   :  { %v8065_v49 = vpop.f32.mrf.mxu3 }
0x11de   :  { %v8089_v56 = vadd.f32 %v8088_v31, %v8065_v49 }
0x11e0   :  { %v8094_v45 = vadd.f32 %v8092_v38, %v8089_v56 }
0x11e2   :  { %v8095_v37 = vmax.f32 %v8094_v45, 0.0 }
0x11e4   :  { %8427 = vmatmul.msk.f32.vlgmr.msrb.gmra.mxu3 %vm15618_vm11, %v8095_v37 }
0x1267   :  { %v8131_v24 = vpop.f32.mrf.mxu3 }
0x1268   :  { %v8132_v26 = vadd.f32 %v8131_v24, %v8109_v50 }
0x126a   :  { %v8134_v40 = vmax.f32 %v8132_v26, 0.0 }
0x126c   :  { %8428 = vmatmul.msk.f32.vlgmr.msra.gmra.mxu2 %vm15619_vm6, %v8134_v40 }
0x12ef   :  { %v8168_v27 = vpop.f32.mrf.mxu2 }
0x12f0   :  { %v8169_v20 = vadd.f32 %v8806_v11, %v8168_v27 }
0x12f2   :  { %v8171_v44 = vmax.f32 %v8169_v20, -20.0 }
0x12f4   :  { %v8172_v5 = vmin.f32 %v8171_v44, 2.0 }
0x12f6   :  { %v8173_v22 = vmul.f32 1.442695, %v8172_v5 }
0x12f8   :  { %9073 = vpow2.f32 %v8173_v22 }
0x12fe   :  { %v9074_v13 = vpop.eup %9073 }
0x12ff   :  { %v8179_v46 = vmul.f32 %v9074_v13, %v8177_v0 }
0x1301   :  { %8181 = vrot.lane.b32.xlu0 %v8179_v46, %s9153_s13 }
0x1373   :  { %v8182_v47 = vpop.permute.xlu0 %8181 }
0x1374   :  { %v8184_v12 = vadd.f32 %v8182_v47, %v8169_v20 }
0x1376   :  { %v8186_v41 = vsel %vm8185_vm9, %v8184_v12, -inf }
0x1377   :  { %8187 = vmax.xlane.f32.xlu2 %v8186_v41 }
0x13ea   :  { %v8188_v19 = vpop.xlane.xlu2 %8187 }
0x13eb   :  { %v8189_v3 = vsub.f32 %v8184_v12, %v8188_v19 }
0x13ed   :  { %v8190_v35 = vmul.f32 1.442695, %v8189_v3 }
0x13ef   :  { %9075 = vpow2.f32 %v8190_v35 }
0x13f5   :  { %v9076_v1 = vpop.eup %9075 }
0x13f6   :  { %v8192_v8 = vsel %vm8185_vm9, %v9076_v1, 0.0 }
0x13f7   :  { %8193 = vadd.xlane.f32.xlu1 %v8192_v8 }
0x146a   :  { %v8194_v7 = vpop.xlane.xlu1 %8193 }
0x146b   :  { %9077 = vrcp.f32 %v8194_v7  ;;  %v8206_v30 = vand.u32 2147483648, %v8194_v7  ;;  %v8204_v54 = vand.u32 2147483647, %v8194_v7  ;;  %vm8200_vm2 = vweird.f32 %v8194_v7 }
0x146d   :  { %v8207_v48 = vor.u32 1.1754944e-38, %v8206_v30  ;;  %vm8205_vm4 = vcmp.eq.f32.partialorder %v8204_v54, 8.507059e+37 }
0x1471   :  { %v9078_v29 = vpop.eup %9077 }
0x1472   :  { %v8196_v33 = vmul.f32 %v9078_v29, %v8194_v7  ;;  %vm8201_vm15 = vweird.f32 %v9078_v29 }
0x1473   :  { %vm8202_vm13 = vmor %vm8200_vm2, %vm8201_vm15 }
0x1474   :  { %v8197_v17 = vsub.f32 1.0, %v8196_v33 }
0x1476   :  { %v8198_v55 = vmul.f32 %v9078_v29, %v8197_v17 }
0x1478   :  { %v8199_v4 = vadd.f32 %v9078_v29, %v8198_v55 }
0x147a   :  { %v8203_v58 = vsel %vm8202_vm13, %v9078_v29, %v8199_v4 }
0x147b   :  { %v8208_v25 = vsel %vm8205_vm4, %v8207_v48, %v8203_v58 }
0x147c   :  { %v8209_v28 = vmul.f32 %v9076_v1, %v8208_v25 }
0x147e   :  { %8210 = vst.msk [vmem:[#allocation5] sm:$0x3] %vm8185_vm9, %v8209_v28 }
0x147f   :  { %8221 = dma.vmem_to_hbm [thread:$0]  %s8217_s14, 32, %s8219_s17, [#allocation4]  }
0x1480   :  { %9137 = dma.done.wait [#allocation4], 32  }
0x1481   :  { %9138 = vsyncadd [#allocation4], 4294967264 }
0x1482   :  { %8226 = vsyncpa [#allocation3], 1 }
0x1483   :  { %8227 = vsyncpa [#allocation4], 1 }

</bundles_post_ra>
